<compile_context>
chip_gen: v5e
topology: v5e:2x2
jax: 0.10.0
libtpu: 0.0.40
codegen_flags: <defaults>
</compile_context>

<pallas_src>
import math
from functools import partial

import jax
import jax.numpy as jnp
from jax import lax
from jax.experimental import pallas as pl
from jax.experimental.pallas import tpu as pltpu


# ----------------------------- in-kernel helpers -----------------------------

def _layer_norm(x, w, b, eps=1e-5):
    # x: (R, C) f32, w/b: (1, C).  PyTorch F.layer_norm (biased variance).
    mu = jnp.mean(x, axis=-1, keepdims=True)
    xc = x - mu
    var = jnp.mean(xc * xc, axis=-1, keepdims=True)
    return xc * lax.rsqrt(var + eps) * w + b


def _linear(x_f32, w_bf16, b_f32):
    # y = x @ w.T + b ; bf16 operands into the MXU, f32 accumulation.
    y = lax.dot_general(x_f32.astype(jnp.bfloat16), w_bf16,
                        (((1,), (1,)), ((), ())),
                        preferred_element_type=jnp.float32)
    return y + b_f32


def _gelu_exact(x):
    # PyTorch nn.GELU default: 0.5 * x * (1 + erf(x / sqrt(2)))
    return 0.5 * x * (1.0 + lax.erf(x * (1.0 / math.sqrt(2.0))))


# ------------------------------- block kernel --------------------------------

def _resblock_kernel(x_ref,
                     ln1_w_ref, ln1_b_ref,
                     w_q_ref, b_q_ref, w_k_ref, b_k_ref, w_v_ref, b_v_ref,
                     w_out_ref, b_out_ref,
                     ln2_w_ref, ln2_b_ref,
                     w_fc_ref, b_fc_ref,
                     w_proj_ref, b_proj_ref,
                     o_ref,
                     k_scr, v_scr,
                     *, num_heads: int, head_dim: int,
                     block_q: int, block_k: int):
    H, d = num_heads, head_dim
    C = H * d
    L = x_ref.shape[0]
    scale = d ** -0.5
    q_tile = pl.program_id(1)

    # ---- K/V for the whole sequence: computed once per batch element ----
    @pl.when(q_tile == 0)
    def _():
        h_full = _layer_norm(x_ref[...].astype(jnp.float32),
                             ln1_w_ref[...], ln1_b_ref[...])          # (L, C)
        k = _linear(h_full, w_k_ref[...], b_k_ref[...])               # (L, C)
        k_scr[...] = jnp.transpose(k.reshape(L, H, d),
                                   (1, 0, 2)).astype(jnp.bfloat16)    # (H, L, d)
        v = _linear(h_full, w_v_ref[...], b_v_ref[...])               # (L, C)
        v_scr[...] = jnp.transpose(v.reshape(L, H, d),
                                   (1, 0, 2)).astype(jnp.bfloat16)    # (H, L, d)

    # ---- query tile: attention branch x + out_proj(MHA(ln_1(x))) ----
    q_start = pl.multiple_of(q_tile * block_q, block_q)
    x_q = x_ref[pl.ds(q_start, block_q), :].astype(jnp.float32)       # (TQ, C)
    h_q = _layer_norm(x_q, ln1_w_ref[...], ln1_b_ref[...])            # (TQ, C)
    q = _linear(h_q, w_q_ref[...], b_q_ref[...]) * scale              # (TQ, C)
    q3 = jnp.transpose(q.reshape(block_q, H, d),
                       (1, 0, 2)).astype(jnp.bfloat16)                # (H, TQ, d)

    nk = L // block_k

    def kv_step(kb, carry):
        m, l, acc = carry
        if isinstance(kb, int):
            k_start = kb * block_k
        else:
            k_start = pl.multiple_of(kb * block_k, block_k)
        k_blk = k_scr[:, pl.ds(k_start, block_k), :]                  # (H, TK, d)
        v_blk = v_scr[:, pl.ds(k_start, block_k), :]                  # (H, TK, d)
        s = jnp.einsum('hqd,hkd->hqk', q3, k_blk,
                       preferred_element_type=jnp.float32)            # (H,TQ,TK) f32
        m_new = jnp.maximum(m, jnp.max(s, axis=-1, keepdims=True))
        alpha = jnp.exp(m - m_new)
        p = jnp.exp(s - m_new)
        l = alpha * l + jnp.sum(p, axis=-1, keepdims=True)
        acc = alpha * acc + jnp.einsum('hqk,hkd->hqd',
                                       p.astype(jnp.bfloat16), v_blk,
                                       preferred_element_type=jnp.float32)
        return m_new, l, acc

    m0 = jnp.full((H, block_q, 1), -jnp.inf, jnp.float32)
    l0 = jnp.zeros((H, block_q, 1), jnp.float32)
    acc0 = jnp.zeros((H, block_q, d), jnp.float32)
    if nk <= 8:
        carry = (m0, l0, acc0)
        for kb in range(nk):          # static unroll (LLO scheduler visibility)
            carry = kv_step(kb, carry)
        _, l, acc = carry
    else:
        _, l, acc = lax.fori_loop(0, nk, kv_step, (m0, l0, acc0))

    attn = acc * pl.reciprocal(l, approx=True)                        # (H, TQ, d)
    attn = jnp.transpose(attn, (1, 0, 2)).reshape(block_q, C)         # (TQ, C)
    attn = _linear(attn, w_out_ref[...], b_out_ref[...])              # out_proj
    x_q = x_q + attn

    # ---- MLP branch: x + c_proj(GELU(c_fc(ln_2(x)))) ----
    h2 = _layer_norm(x_q, ln2_w_ref[...], ln2_b_ref[...])
    fc = _gelu_exact(_linear(h2, w_fc_ref[...], b_fc_ref[...]))       # (TQ, M)
    x_q = x_q + _linear(fc, w_proj_ref[...], b_proj_ref[...])         # (TQ, C)

    o_ref[...] = x_q.astype(o_ref.dtype)


# ------------------------------ python wrapper --------------------------------

def _tpu_vmem_capacity():
    try:
        return int(pltpu.get_tpu_info().vmem_capacity_bytes)
    except Exception:
        return 64 * 1024 * 1024   # conservative fallback (safe on all gens)


def _vmem_limit_bytes():
    # Leave headroom for Mosaic internal scratch + double-buffered act slabs:
    # ~52 MiB on v7x (64 MiB/TC), ~105 MiB on v5e/v6e (128 MiB).
    return max(32 * 1024 * 1024, int(_tpu_vmem_capacity() * 0.82))


def _tile_targets():
    cap = _tpu_vmem_capacity()
    if cap <= 80 * 1024 * 1024:    # v7x-class (64 MiB per TC)
        return 128, 256            # (block_q target, block_k target)
    return 512, 512                # v5e / v6e (128 MiB)


def _pick_tile(L, target):
    """Largest tile <= target dividing L, preferring MXU-friendly multiples."""
    if L <= target:
        return L
    hi = min(target, L)
    for align in (256, 128, 8, 1):
        best = 0
        t = align
        while t <= hi:
            if L % t == 0:
                best = t
            t += align
        if best:
            return best
    return L


def custom_resblock(x, params, *, num_heads, block_q=None, block_k=None,
                    single_buffer_weights=True):
    """One CustomResidualAttentionBlock.  x: (N, L, C) float32."""
    N, L, C = x.shape
    head_dim = C // num_heads
    M = params["w_fc"].shape[0]
    bq_t, bk_t = _tile_targets()
    if block_q is None:
        block_q = _pick_tile(L, bq_t)
    if block_k is None:
        block_k = _pick_tile(L, bk_t)
    assert L % block_q == 0 and L % block_k == 0, (L, block_q, block_k)
    nq = L // block_q

    # Split in_proj into q / k / v so K and V can be projected (once) and
    # stored to VMEM scratch independently, and q per query tile.
    w_in, b_in = params["w_in"], params["b_in"]
    w_q, w_k, w_v = w_in[:C], w_in[C:2 * C], w_in[2 * C:]
    b_q, b_k, b_v = b_in[:, :C], b_in[:, C:2 * C], b_in[:, 2 * C:]

    param_arrays = [params["ln1_w"], params["ln1_b"],
                    w_q, b_q, w_k, b_k, w_v, b_v,
                    params["w_out"], params["b_out"],
                    params["ln2_w"], params["ln2_b"],
                    params["w_fc"], params["b_fc"],
                    params["w_proj"], params["b_proj"]]

    def _param_spec(shape):
        nd = len(shape)
        idx = lambda n, q, _nd=nd: (0,) * _nd
        if single_buffer_weights and hasattr(pl, "Buffered"):
            try:
                # Constant index_map => nothing to prefetch; single-buffer the
                # resident weights (halves weight VMEM vs default buffering).
                return pl.BlockSpec(shape, idx, pipeline_mode=pl.Buffered(1))
            except TypeError:
                pass
        return pl.BlockSpec(shape, idx)

    in_specs = [pl.BlockSpec((None, L, C), lambda n, q: (n, 0, 0))]   # x (full L)
    in_specs += [_param_spec(p.shape) for p in param_arrays]

    kernel = partial(_resblock_kernel, num_heads=num_heads, head_dim=head_dim,
                     block_q=block_q, block_k=block_k)

    # Advisory cost estimate (helps XLA schedule the per-layer custom calls).
    flops = N * (4 * L * C * C                     # K,V projections (once)
                 + L * (4 * C * C                  # q proj + out proj
                        + 4 * L * C                # scores + p@v
                        + 4 * C * M))              # MLP
    transcendentals = N * (num_heads * L * L + L * M)
    bytes_accessed = int(2 * x.size * x.dtype.itemsize
                         + sum(int(p.size) * p.dtype.itemsize
                               for p in param_arrays))

    out = pl.pallas_call(
        kernel,
        out_shape=jax.ShapeDtypeStruct((N, L, C), x.dtype),
        grid_spec=pltpu.PrefetchScalarGridSpec(
            num_scalar_prefetch=0,
            grid=(N, nq),
            in_specs=in_specs,
            out_specs=pl.BlockSpec((None, block_q, C), lambda n, q: (n, q, 0)),
            scratch_shapes=[pltpu.VMEM((num_heads, L, head_dim), jnp.bfloat16),
                            pltpu.VMEM((num_heads, L, head_dim), jnp.bfloat16)]),
        compiler_params=pltpu.CompilerParams(
            # q axis MUST be 'arbitrary': the K/V scratch written at q==0 is
            # reused by later q tiles of the same batch element.
            dimension_semantics=("parallel", "arbitrary"),
            vmem_limit_bytes=_vmem_limit_bytes()),
        cost_estimate=pl.CostEstimate(flops=int(flops),
                                      transcendentals=int(transcendentals),
                                      bytes_accessed=bytes_accessed),
    )(x, *param_arrays)
    return out


def custom_transformer(x, layer_params, *, num_heads, block_q=None,
                       block_k=None, single_buffer_weights=True):
    """CustomTransformer.forward (batch_first=True, attn_mask=None)."""
    # TODO(synk): attn_mask support (forward default is None) not implemented.
    # TODO(synk): cross-layer weight prefetch (P10) could hide per-layer weight
    # DMA behind the previous layer's matmuls; not implemented here.
    for params in layer_params:
        x = custom_resblock(x, params, num_heads=num_heads, block_q=block_q,
                            block_k=block_k,
                            single_buffer_weights=single_buffer_weights)
    return x


# ------------------------------ parameter init --------------------------------

def init_params(key, width, layers, heads, mlp_ratio=4.0):
    C = width
    M = int(C * mlp_ratio)
    head_dim = C // heads
    scale = head_dim ** -0.5
    params = []
    for l in range(layers):
        ks = jax.random.split(jax.random.fold_in(key, l), 6)
        p = dict(
            ln1_w=jnp.ones((1, C), jnp.float32),
            ln1_b=jnp.zeros((1, C), jnp.float32),
            # Attention.in_proj_weight = randn(3C, C) * head_dim**-0.5  (bf16)
            w_in=(jax.random.normal(ks[0], (3 * C, C), jnp.float32) * scale
                  ).astype(jnp.bfloat16),
            b_in=jnp.zeros((1, 3 * C), jnp.float32),
            # out_proj: nn.Linear(C, C)
            w_out=jax.random.uniform(ks[1], (C, C), jnp.float32,
                                     -1 / math.sqrt(C), 1 / math.sqrt(C)
                                     ).astype(jnp.bfloat16),
            b_out=jax.random.uniform(ks[2], (1, C), jnp.float32,
                                     -1 / math.sqrt(C), 1 / math.sqrt(C)),
            ln2_w=jnp.ones((1, C), jnp.float32),
            ln2_b=jnp.zeros((1, C), jnp.float32),
            # mlp.c_fc: Linear(C, M);  mlp.c_proj: Linear(M, C)
            w_fc=jax.random.uniform(ks[3], (M, C), jnp.float32,
                                    -1 / math.sqrt(C), 1 / math.sqrt(C)
                                    ).astype(jnp.bfloat16),
            b_fc=jnp.zeros((1, M), jnp.float32),
            w_proj=jax.random.uniform(ks[4], (C, M), jnp.float32,
                                      -1 / math.sqrt(M), 1 / math.sqrt(M)
                                      ).astype(jnp.bfloat16),
            b_proj=jnp.zeros((1, C), jnp.float32),
        )
        params.append(p)
    return params


# --------------------------- pure-JAX reference check --------------------------

def _ref_block(x, p, num_heads):
    N, L, C = x.shape
    hd = C // num_heads

    def ln(v, w, b):
        mu = v.mean(-1, keepdims=True)
        var = ((v - mu) ** 2).mean(-1, keepdims=True)
        return (v - mu) / jnp.sqrt(var + 1e-5) * w[0] + b[0]

    w_in = p["w_in"].astype(jnp.float32)
    w_out = p["w_out"].astype(jnp.float32)
    w_fc = p["w_fc"].astype(jnp.float32)
    w_proj = p["w_proj"].astype(jnp.float32)

    h = ln(x, p["ln1_w"], p["ln1_b"])
    qkv = h @ w_in.T + p["b_in"][0]
    q, k, v = jnp.split(qkv, 3, axis=-1)
    q = q.reshape(N, L, num_heads, hd).transpose(0, 2, 1, 3)
    k = k.reshape(N, L, num_heads, hd).transpose(0, 2, 1, 3)
    v = v.reshape(N, L, num_heads, hd).transpose(0, 2, 1, 3)
    s = jnp.einsum("nhqd,nhkd->nhqk", q, k) * (hd ** -0.5)
    a = jax.nn.softmax(s, axis=-1)
    o = jnp.einsum("nhqk,nhkd->nhqd", a, v).transpose(0, 2, 1, 3).reshape(N, L, C)
    x = x + (o @ w_out.T + p["b_out"][0])
    h2 = ln(x, p["ln2_w"], p["ln2_b"])
    fc = jax.nn.gelu(h2 @ w_fc.T + p["b_fc"][0], approximate=False)
    x = x + (fc @ w_proj.T + p["b_proj"][0])
    return x


# ------------------------------------ main -------------------------------------

if __name__ == "__main__":
    # Small shapes: batch=2, seq=16, width=64, heads=4, layers=2, mlp=256.
    # block_q=8 / block_k=8 exercise both the q-tiling path (grid=(2,2)) and
    # the KV-tiled online-softmax loop (nk=2).
    N, L, width, heads, layers = 2, 16, 64, 4, 2

    key = jax.random.PRNGKey(0)
    x = jax.random.normal(jax.random.fold_in(key, 123), (N, L, width), jnp.float32)
    layer_params = init_params(key, width, layers, heads)

    def run(single_buffer_weights):
        fwd = jax.jit(partial(custom_transformer, num_heads=heads,
                              block_q=8, block_k=8,
                              single_buffer_weights=single_buffer_weights))
        return jax.block_until_ready(fwd(x, layer_params))

    try:
        out = run(True)
    except Exception:
        # Compatibility fallback: some jax builds may reject
        # pipeline_mode=pl.Buffered(1); retry with default weight buffering.
        out = run(False)

    # Correctness check against a pure-JAX f32 reference of the same math
    # (tolerance accounts for bf16 matmul operands + approx reciprocal).
    ref = x
    for p in layer_params:
        ref = _ref_block(ref, p, heads)
    rel_err = float(jnp.max(jnp.abs(out - ref)) / (jnp.max(jnp.abs(ref)) + 1e-6))
    assert rel_err < 5e-2, f"relative error too large: {rel_err}"

    print("KERNEL_OK")
</pallas_src>

<mosaic_0001>
module attributes {stable_mosaic.version = 11 : i64} {
  func.func @_resblock_kernel(%arg0: i32, %arg1: i32, %arg2: memref<1x16x64xf32, #tpu.memory_space<vmem>>, %arg3: memref<1x64xf32, #tpu.memory_space<vmem>>, %arg4: memref<1x64xf32, #tpu.memory_space<vmem>>, %arg5: memref<64x64xbf16, #tpu.memory_space<vmem>>, %arg6: memref<1x64xf32, #tpu.memory_space<vmem>>, %arg7: memref<64x64xbf16, #tpu.memory_space<vmem>>, %arg8: memref<1x64xf32, #tpu.memory_space<vmem>>, %arg9: memref<64x64xbf16, #tpu.memory_space<vmem>>, %arg10: memref<1x64xf32, #tpu.memory_space<vmem>>, %arg11: memref<64x64xbf16, #tpu.memory_space<vmem>>, %arg12: memref<1x64xf32, #tpu.memory_space<vmem>>, %arg13: memref<1x64xf32, #tpu.memory_space<vmem>>, %arg14: memref<1x64xf32, #tpu.memory_space<vmem>>, %arg15: memref<256x64xbf16, #tpu.memory_space<vmem>>, %arg16: memref<1x256xf32, #tpu.memory_space<vmem>>, %arg17: memref<64x256xbf16, #tpu.memory_space<vmem>>, %arg18: memref<1x64xf32, #tpu.memory_space<vmem>>, %arg19: memref<1x8x64xf32, #tpu.memory_space<vmem>>, %arg20: memref<4x16x16xbf16, #tpu.memory_space<vmem>>, %arg21: memref<4x16x16xbf16, #tpu.memory_space<vmem>>) attributes {dimension_semantics = [#tpu.dimension_semantics<parallel>, #tpu.dimension_semantics<arbitrary>], iteration_bounds = array<i64: 2, 2>, scalar_prefetch = 0 : i64, scratch_operands = 2 : i64, tpu.core_type = #tpu.core_type<tc>, window_params = [{transform_indices = @transform_0, window_bounds = array<i64: 1, 16, 64>}, {pipeline_mode = #tpu.pipeline_mode<synchronous>, transform_indices = @transform_1, window_bounds = array<i64: 1, 64>}, {pipeline_mode = #tpu.pipeline_mode<synchronous>, transform_indices = @transform_2, window_bounds = array<i64: 1, 64>}, {pipeline_mode = #tpu.pipeline_mode<synchronous>, transform_indices = @transform_3, window_bounds = array<i64: 64, 64>}, {pipeline_mode = #tpu.pipeline_mode<synchronous>, transform_indices = @transform_4, window_bounds = array<i64: 1, 64>}, {pipeline_mode = #tpu.pipeline_mode<synchronous>, transform_indices = @transform_5, window_bounds = array<i64: 64, 64>}, {pipeline_mode = #tpu.pipeline_mode<synchronous>, transform_indices = @transform_6, window_bounds = array<i64: 1, 64>}, {pipeline_mode = #tpu.pipeline_mode<synchronous>, transform_indices = @transform_7, window_bounds = array<i64: 64, 64>}, {pipeline_mode = #tpu.pipeline_mode<synchronous>, transform_indices = @transform_8, window_bounds = array<i64: 1, 64>}, {pipeline_mode = #tpu.pipeline_mode<synchronous>, transform_indices = @transform_9, window_bounds = array<i64: 64, 64>}, {pipeline_mode = #tpu.pipeline_mode<synchronous>, transform_indices = @transform_10, window_bounds = array<i64: 1, 64>}, {pipeline_mode = #tpu.pipeline_mode<synchronous>, transform_indices = @transform_11, window_bounds = array<i64: 1, 64>}, {pipeline_mode = #tpu.pipeline_mode<synchronous>, transform_indices = @transform_12, window_bounds = array<i64: 1, 64>}, {pipeline_mode = #tpu.pipeline_mode<synchronous>, transform_indices = @transform_13, window_bounds = array<i64: 256, 64>}, {pipeline_mode = #tpu.pipeline_mode<synchronous>, transform_indices = @transform_14, window_bounds = array<i64: 1, 256>}, {pipeline_mode = #tpu.pipeline_mode<synchronous>, transform_indices = @transform_15, window_bounds = array<i64: 64, 256>}, {pipeline_mode = #tpu.pipeline_mode<synchronous>, transform_indices = @transform_16, window_bounds = array<i64: 1, 64>}, {transform_indices = @transform_17, window_bounds = array<i64: 1, 8, 64>}]} {
    %c0_i32 = arith.constant 0 : i32
    %0 = arith.cmpi eq, %arg1, %c0_i32 : i32
    %1 = arith.extui %0 : i1 to i32
    %c0_i32_0 = arith.constant 0 : i32
    %2 = arith.cmpi ne, %1, %c0_i32_0 : i32
    scf.if %2 {
      %c0_68 = arith.constant 0 : index
      %c0_69 = arith.constant 0 : index
      %c0_70 = arith.constant 0 : index
      %142 = vector.load %arg2[%c0_68, %c0_69, %c0_70] : memref<1x16x64xf32, #tpu.memory_space<vmem>>, vector<1x16x64xf32>
      %143 = vector.shape_cast %142 : vector<1x16x64xf32> to vector<16x64xf32>
      %c0_71 = arith.constant 0 : index
      %c0_72 = arith.constant 0 : index
      %144 = vector.load %arg3[%c0_71, %c0_72] : memref<1x64xf32, #tpu.memory_space<vmem>>, vector<1x64xf32>
      %c0_73 = arith.constant 0 : index
      %c0_74 = arith.constant 0 : index
      %145 = vector.load %arg4[%c0_73, %c0_74] : memref<1x64xf32, #tpu.memory_space<vmem>>, vector<1x64xf32>
      %cst_75 = arith.constant dense<0.000000e+00> : vector<16xf32>
      %146 = vector.multi_reduction <add>, %143, %cst_75 [1] : vector<16x64xf32> to vector<16xf32>
      %147 = vector.shape_cast %146 : vector<16xf32> to vector<16x1xf32>
      %cst_76 = arith.constant 6.400000e+01 : f32
      %148 = vector.broadcast %cst_76 : f32 to vector<16x1xf32>
      %149 = arith.divf %147, %148 : vector<16x1xf32>
      %150 = vector.broadcast %149 : vector<16x1xf32> to vector<16x64xf32>
      %151 = arith.subf %143, %150 : vector<16x64xf32>
      %152 = arith.mulf %151, %151 : vector<16x64xf32>
      %cst_77 = arith.constant dense<0.000000e+00> : vector<16xf32>
      %153 = vector.multi_reduction <add>, %152, %cst_77 [1] : vector<16x64xf32> to vector<16xf32>
      %154 = vector.shape_cast %153 : vector<16xf32> to vector<16x1xf32>
      %cst_78 = arith.constant 6.400000e+01 : f32
      %155 = vector.broadcast %cst_78 : f32 to vector<16x1xf32>
      %156 = arith.divf %154, %155 : vector<16x1xf32>
      %cst_79 = arith.constant 9.99999974E-6 : f32
      %157 = vector.broadcast %cst_79 : f32 to vector<16x1xf32>
      %158 = arith.addf %156, %157 : vector<16x1xf32>
      %159 = math.rsqrt %158 : vector<16x1xf32>
      %160 = vector.broadcast %159 : vector<16x1xf32> to vector<16x64xf32>
      %161 = arith.mulf %151, %160 : vector<16x64xf32>
      %162 = vector.broadcast %144 : vector<1x64xf32> to vector<16x64xf32>
      %163 = arith.mulf %161, %162 : vector<16x64xf32>
      %164 = vector.broadcast %145 : vector<1x64xf32> to vector<16x64xf32>
      %165 = arith.addf %163, %164 : vector<16x64xf32>
      %c0_80 = arith.constant 0 : index
      %c0_81 = arith.constant 0 : index
      %166 = vector.load %arg7[%c0_80, %c0_81] : memref<64x64xbf16, #tpu.memory_space<vmem>>, vector<64x64xbf16>
      %c0_82 = arith.constant 0 : index
      %c0_83 = arith.constant 0 : index
      %167 = vector.load %arg8[%c0_82, %c0_83] : memref<1x64xf32, #tpu.memory_space<vmem>>, vector<1x64xf32>
      %168 = arith.truncf %165 : vector<16x64xf32> to vector<16x64xbf16>
      %cst_84 = arith.constant dense<0.000000e+00> : vector<16x64xf32>
      %169 = tpu.matmul %168, %166, %cst_84 {dimension_numbers = #tpu.dot_dimension_numbers<[1], [1], [0], [0], [0, 0, 1, 0], [], []>} : vector<16x64xbf16>, vector<64x64xbf16>, vector<16x64xf32> -> vector<16x64xf32>
      %170 = vector.broadcast %167 : vector<1x64xf32> to vector<16x64xf32>
      %171 = arith.addf %169, %170 : vector<16x64xf32>
      %172 = vector.shape_cast %171 : vector<16x64xf32> to vector<16x4x16xf32>
      %173 = tpu.transpose %172, [1, 0, 2] : vector<16x4x16xf32> -> vector<4x16x16xf32>
      %174 = arith.truncf %173 : vector<4x16x16xf32> to vector<4x16x16xbf16>
      %c0_85 = arith.constant 0 : index
      %c0_86 = arith.constant 0 : index
      %c0_87 = arith.constant 0 : index
      %175 = vector.load %arg20[%c0_85, %c0_86, %c0_87] : memref<4x16x16xbf16, #tpu.memory_space<vmem>>, vector<4x16x16xbf16>
      tpu.vector_store %arg20[%c0_85, %c0_86, %c0_87], %174 {strides = array<i32>} : memref<4x16x16xbf16, #tpu.memory_space<vmem>>, vector<4x16x16xbf16>,
      %c0_88 = arith.constant 0 : index
      %c0_89 = arith.constant 0 : index
      %176 = vector.load %arg9[%c0_88, %c0_89] : memref<64x64xbf16, #tpu.memory_space<vmem>>, vector<64x64xbf16>
      %c0_90 = arith.constant 0 : index
      %c0_91 = arith.constant 0 : index
      %177 = vector.load %arg10[%c0_90, %c0_91] : memref<1x64xf32, #tpu.memory_space<vmem>>, vector<1x64xf32>
      %178 = arith.truncf %165 : vector<16x64xf32> to vector<16x64xbf16>
      %cst_92 = arith.constant dense<0.000000e+00> : vector<16x64xf32>
      %179 = tpu.matmul %178, %176, %cst_92 {dimension_numbers = #tpu.dot_dimension_numbers<[1], [1], [0], [0], [0, 0, 1, 0], [], []>} : vector<16x64xbf16>, vector<64x64xbf16>, vector<16x64xf32> -> vector<16x64xf32>
      %180 = vector.broadcast %177 : vector<1x64xf32> to vector<16x64xf32>
      %181 = arith.addf %179, %180 : vector<16x64xf32>
      %182 = vector.shape_cast %181 : vector<16x64xf32> to vector<16x4x16xf32>
      %183 = tpu.transpose %182, [1, 0, 2] : vector<16x4x16xf32> -> vector<4x16x16xf32>
      %184 = arith.truncf %183 : vector<4x16x16xf32> to vector<4x16x16xbf16>
      %c0_93 = arith.constant 0 : index
      %c0_94 = arith.constant 0 : index
      %c0_95 = arith.constant 0 : index
      %185 = vector.load %arg21[%c0_93, %c0_94, %c0_95] : memref<4x16x16xbf16, #tpu.memory_space<vmem>>, vector<4x16x16xbf16>
      tpu.vector_store %arg21[%c0_93, %c0_94, %c0_95], %184 {strides = array<i32>} : memref<4x16x16xbf16, #tpu.memory_space<vmem>>, vector<4x16x16xbf16>,
    } else {
    }
    %c8_i32 = arith.constant 8 : i32
    %3 = arith.muli %arg1, %c8_i32 : i32
    %4 = tpu.assume_multiple %3, 8 : i32
    %c0 = arith.constant 0 : index
    %5 = arith.index_cast %4 : i32 to index
    %c0_1 = arith.constant 0 : index
    %6 = vector.load %arg2[%c0, %5, %c0_1] : memref<1x16x64xf32, #tpu.memory_space<vmem>>, vector<1x8x64xf32>
    %7 = vector.shape_cast %6 : vector<1x8x64xf32> to vector<8x64xf32>
    %c0_2 = arith.constant 0 : index
    %c0_3 = arith.constant 0 : index
    %8 = vector.load %arg3[%c0_2, %c0_3] : memref<1x64xf32, #tpu.memory_space<vmem>>, vector<1x64xf32>
    %c0_4 = arith.constant 0 : index
    %c0_5 = arith.constant 0 : index
    %9 = vector.load %arg4[%c0_4, %c0_5] : memref<1x64xf32, #tpu.memory_space<vmem>>, vector<1x64xf32>
    %cst = arith.constant dense<0.000000e+00> : vector<8xf32>
    %10 = vector.multi_reduction <add>, %7, %cst [1] : vector<8x64xf32> to vector<8xf32>
    %11 = vector.shape_cast %10 : vector<8xf32> to vector<8x1xf32>
    %cst_6 = arith.constant 6.400000e+01 : f32
    %12 = vector.broadcast %cst_6 : f32 to vector<8x1xf32>
    %13 = arith.divf %11, %12 : vector<8x1xf32>
    %14 = vector.broadcast %13 : vector<8x1xf32> to vector<8x64xf32>
    %15 = arith.subf %7, %14 : vector<8x64xf32>
    %16 = arith.mulf %15, %15 : vector<8x64xf32>
    %cst_7 = arith.constant dense<0.000000e+00> : vector<8xf32>
    %17 = vector.multi_reduction <add>, %16, %cst_7 [1] : vector<8x64xf32> to vector<8xf32>
    %18 = vector.shape_cast %17 : vector<8xf32> to vector<8x1xf32>
    %cst_8 = arith.constant 6.400000e+01 : f32
    %19 = vector.broadcast %cst_8 : f32 to vector<8x1xf32>
    %20 = arith.divf %18, %19 : vector<8x1xf32>
    %cst_9 = arith.constant 9.99999974E-6 : f32
    %21 = vector.broadcast %cst_9 : f32 to vector<8x1xf32>
    %22 = arith.addf %20, %21 : vector<8x1xf32>
    %23 = math.rsqrt %22 : vector<8x1xf32>
    %24 = vector.broadcast %23 : vector<8x1xf32> to vector<8x64xf32>
    %25 = arith.mulf %15, %24 : vector<8x64xf32>
    %26 = vector.broadcast %8 : vector<1x64xf32> to vector<8x64xf32>
    %27 = arith.mulf %25, %26 : vector<8x64xf32>
    %28 = vector.broadcast %9 : vector<1x64xf32> to vector<8x64xf32>
    %29 = arith.addf %27, %28 : vector<8x64xf32>
    %c0_10 = arith.constant 0 : index
    %c0_11 = arith.constant 0 : index
    %30 = vector.load %arg5[%c0_10, %c0_11] : memref<64x64xbf16, #tpu.memory_space<vmem>>, vector<64x64xbf16>
    %c0_12 = arith.constant 0 : index
    %c0_13 = arith.constant 0 : index
    %31 = vector.load %arg6[%c0_12, %c0_13] : memref<1x64xf32, #tpu.memory_space<vmem>>, vector<1x64xf32>
    %32 = arith.truncf %29 : vector<8x64xf32> to vector<8x64xbf16>
    %cst_14 = arith.constant dense<0.000000e+00> : vector<8x64xf32>
    %33 = tpu.matmul %32, %30, %cst_14 {dimension_numbers = #tpu.dot_dimension_numbers<[1], [1], [0], [0], [0, 0, 1, 0], [], []>} : vector<8x64xbf16>, vector<64x64xbf16>, vector<8x64xf32> -> vector<8x64xf32>
    %34 = vector.broadcast %31 : vector<1x64xf32> to vector<8x64xf32>
    %35 = arith.addf %33, %34 : vector<8x64xf32>
    %cst_15 = arith.constant 2.500000e-01 : f32
    %36 = vector.broadcast %cst_15 : f32 to vector<8x64xf32>
    %37 = arith.mulf %35, %36 : vector<8x64xf32>
    %38 = vector.shape_cast %37 : vector<8x64xf32> to vector<8x4x16xf32>
    %39 = tpu.transpose %38, [1, 0, 2] : vector<8x4x16xf32> -> vector<4x8x16xf32>
    %40 = arith.truncf %39 : vector<4x8x16xf32> to vector<4x8x16xbf16>
    %cst_16 = arith.constant 0xFF800000 : f32
    %41 = vector.broadcast %cst_16 : f32 to vector<4x8x1xf32>
    %cst_17 = arith.constant 0.000000e+00 : f32
    %42 = vector.broadcast %cst_17 : f32 to vector<4x8x1xf32>
    %cst_18 = arith.constant 0.000000e+00 : f32
    %43 = vector.broadcast %cst_18 : f32 to vector<4x8x16xf32>
    %c0_19 = arith.constant 0 : index
    %c0_20 = arith.constant 0 : index
    %c0_21 = arith.constant 0 : index
    %44 = vector.load %arg20[%c0_19, %c0_20, %c0_21] : memref<4x16x16xbf16, #tpu.memory_space<vmem>>, vector<4x8x16xbf16>
    %c0_22 = arith.constant 0 : index
    %c0_23 = arith.constant 0 : index
    %c0_24 = arith.constant 0 : index
    %45 = vector.load %arg21[%c0_22, %c0_23, %c0_24] : memref<4x16x16xbf16, #tpu.memory_space<vmem>>, vector<4x8x16xbf16>
    "tpu.trace_start"() <{level = 10 : i32, message = "hqd,hkd->hqk"}> : () -> ()
    %cst_25 = arith.constant dense<0.000000e+00> : vector<4x8x8xf32>
    %46 = tpu.matmul %40, %44, %cst_25 {dimension_numbers = #tpu.dot_dimension_numbers<[2], [2], [1], [1], [0, 0, 0, 1, 1, 1], [0], [0]>} : vector<4x8x16xbf16>, vector<4x8x16xbf16>, vector<4x8x8xf32> -> vector<4x8x8xf32>
    "tpu.trace_stop"() : () -> ()
    %cst_26 = arith.constant dense<0xFF800000> : vector<4x8xf32>
    %47 = vector.multi_reduction <maximumf>, %46, %cst_26 [2] : vector<4x8x8xf32> to vector<4x8xf32>
    %48 = vector.shape_cast %47 : vector<4x8xf32> to vector<4x8x1xf32>
    %49 = arith.maximumf %41, %48 : vector<4x8x1xf32>
    %50 = arith.subf %41, %49 : vector<4x8x1xf32>
    %51 = math.exp %50 : vector<4x8x1xf32>
    %52 = vector.broadcast %49 : vector<4x8x1xf32> to vector<4x8x8xf32>
    %53 = arith.subf %46, %52 : vector<4x8x8xf32>
    %54 = math.exp %53 : vector<4x8x8xf32>
    %55 = arith.mulf %51, %42 : vector<4x8x1xf32>
    %cst_27 = arith.constant dense<0.000000e+00> : vector<4x8xf32>
    %56 = vector.multi_reduction <add>, %54, %cst_27 [2] : vector<4x8x8xf32> to vector<4x8xf32>
    %57 = vector.shape_cast %56 : vector<4x8xf32> to vector<4x8x1xf32>
    %58 = arith.addf %55, %57 : vector<4x8x1xf32>
    %59 = vector.broadcast %51 : vector<4x8x1xf32> to vector<4x8x16xf32>
    %60 = arith.mulf %59, %43 : vector<4x8x16xf32>
    %61 = arith.truncf %54 : vector<4x8x8xf32> to vector<4x8x8xbf16>
    "tpu.trace_start"() <{level = 10 : i32, message = "hqk,hkd->hqd"}> : () -> ()
    %cst_28 = arith.constant dense<0.000000e+00> : vector<4x8x16xf32>
    %62 = tpu.matmul %61, %45, %cst_28 {dimension_numbers = #tpu.dot_dimension_numbers<[2], [1], [1], [2], [0, 0, 0, 1, 1, 2], [0], [0]>} : vector<4x8x8xbf16>, vector<4x8x16xbf16>, vector<4x8x16xf32> -> vector<4x8x16xf32>
    "tpu.trace_stop"() : () -> ()
    %63 = arith.addf %60, %62 : vector<4x8x16xf32>
    %c0_29 = arith.constant 0 : index
    %c8 = arith.constant 8 : index
    %c0_30 = arith.constant 0 : index
    %64 = vector.load %arg20[%c0_29, %c8, %c0_30] : memref<4x16x16xbf16, #tpu.memory_space<vmem>>, vector<4x8x16xbf16>
    %c0_31 = arith.constant 0 : index
    %c8_32 = arith.constant 8 : index
    %c0_33 = arith.constant 0 : index
    %65 = vector.load %arg21[%c0_31, %c8_32, %c0_33] : memref<4x16x16xbf16, #tpu.memory_space<vmem>>, vector<4x8x16xbf16>
    "tpu.trace_start"() <{level = 10 : i32, message = "hqd,hkd->hqk"}> : () -> ()
    %cst_34 = arith.constant dense<0.000000e+00> : vector<4x8x8xf32>
    %66 = tpu.matmul %40, %64, %cst_34 {dimension_numbers = #tpu.dot_dimension_numbers<[2], [2], [1], [1], [0, 0, 0, 1, 1, 1], [0], [0]>} : vector<4x8x16xbf16>, vector<4x8x16xbf16>, vector<4x8x8xf32> -> vector<4x8x8xf32>
    "tpu.trace_stop"() : () -> ()
    %cst_35 = arith.constant dense<0xFF800000> : vector<4x8xf32>
    %67 = vector.multi_reduction <maximumf>, %66, %cst_35 [2] : vector<4x8x8xf32> to vector<4x8xf32>
    %68 = vector.shape_cast %67 : vector<4x8xf32> to vector<4x8x1xf32>
    %69 = arith.maximumf %49, %68 : vector<4x8x1xf32>
    %70 = arith.subf %49, %69 : vector<4x8x1xf32>
    %71 = math.exp %70 : vector<4x8x1xf32>
    %72 = vector.broadcast %69 : vector<4x8x1xf32> to vector<4x8x8xf32>
    %73 = arith.subf %66, %72 : vector<4x8x8xf32>
    %74 = math.exp %73 : vector<4x8x8xf32>
    %75 = arith.mulf %71, %58 : vector<4x8x1xf32>
    %cst_36 = arith.constant dense<0.000000e+00> : vector<4x8xf32>
    %76 = vector.multi_reduction <add>, %74, %cst_36 [2] : vector<4x8x8xf32> to vector<4x8xf32>
    %77 = vector.shape_cast %76 : vector<4x8xf32> to vector<4x8x1xf32>
    %78 = arith.addf %75, %77 : vector<4x8x1xf32>
    %79 = vector.broadcast %71 : vector<4x8x1xf32> to vector<4x8x16xf32>
    %80 = arith.mulf %79, %63 : vector<4x8x16xf32>
    %81 = arith.truncf %74 : vector<4x8x8xf32> to vector<4x8x8xbf16>
    "tpu.trace_start"() <{level = 10 : i32, message = "hqk,hkd->hqd"}> : () -> ()
    %cst_37 = arith.constant dense<0.000000e+00> : vector<4x8x16xf32>
    %82 = tpu.matmul %81, %65, %cst_37 {dimension_numbers = #tpu.dot_dimension_numbers<[2], [1], [1], [2], [0, 0, 0, 1, 1, 2], [0], [0]>} : vector<4x8x8xbf16>, vector<4x8x16xbf16>, vector<4x8x16xf32> -> vector<4x8x16xf32>
    "tpu.trace_stop"() : () -> ()
    %83 = arith.addf %80, %82 : vector<4x8x16xf32>
    %84 = tpu.reciprocal %78 {approx = true} : vector<4x8x1xf32> -> vector<4x8x1xf32>
    %85 = vector.broadcast %84 : vector<4x8x1xf32> to vector<4x8x16xf32>
    %86 = arith.mulf %83, %85 : vector<4x8x16xf32>
    %87 = tpu.transpose %86, [1, 0, 2] : vector<4x8x16xf32> -> vector<8x4x16xf32>
    %88 = vector.shape_cast %87 : vector<8x4x16xf32> to vector<8x64xf32>
    %c0_38 = arith.constant 0 : index
    %c0_39 = arith.constant 0 : index
    %89 = vector.load %arg11[%c0_38, %c0_39] : memref<64x64xbf16, #tpu.memory_space<vmem>>, vector<64x64xbf16>
    %c0_40 = arith.constant 0 : index
    %c0_41 = arith.constant 0 : index
    %90 = vector.load %arg12[%c0_40, %c0_41] : memref<1x64xf32, #tpu.memory_space<vmem>>, vector<1x64xf32>
    %91 = arith.truncf %88 : vector<8x64xf32> to vector<8x64xbf16>
    %cst_42 = arith.constant dense<0.000000e+00> : vector<8x64xf32>
    %92 = tpu.matmul %91, %89, %cst_42 {dimension_numbers = #tpu.dot_dimension_numbers<[1], [1], [0], [0], [0, 0, 1, 0], [], []>} : vector<8x64xbf16>, vector<64x64xbf16>, vector<8x64xf32> -> vector<8x64xf32>
    %93 = vector.broadcast %90 : vector<1x64xf32> to vector<8x64xf32>
    %94 = arith.addf %92, %93 : vector<8x64xf32>
    %95 = arith.addf %7, %94 : vector<8x64xf32>
    %c0_43 = arith.constant 0 : index
    %c0_44 = arith.constant 0 : index
    %96 = vector.load %arg13[%c0_43, %c0_44] : memref<1x64xf32, #tpu.memory_space<vmem>>, vector<1x64xf32>
    %c0_45 = arith.constant 0 : index
    %c0_46 = arith.constant 0 : index
    %97 = vector.load %arg14[%c0_45, %c0_46] : memref<1x64xf32, #tpu.memory_space<vmem>>, vector<1x64xf32>
    %cst_47 = arith.constant dense<0.000000e+00> : vector<8xf32>
    %98 = vector.multi_reduction <add>, %95, %cst_47 [1] : vector<8x64xf32> to vector<8xf32>
    %99 = vector.shape_cast %98 : vector<8xf32> to vector<8x1xf32>
    %cst_48 = arith.constant 6.400000e+01 : f32
    %100 = vector.broadcast %cst_48 : f32 to vector<8x1xf32>
    %101 = arith.divf %99, %100 : vector<8x1xf32>
    %102 = vector.broadcast %101 : vector<8x1xf32> to vector<8x64xf32>
    %103 = arith.subf %95, %102 : vector<8x64xf32>
    %104 = arith.mulf %103, %103 : vector<8x64xf32>
    %cst_49 = arith.constant dense<0.000000e+00> : vector<8xf32>
    %105 = vector.multi_reduction <add>, %104, %cst_49 [1] : vector<8x64xf32> to vector<8xf32>
    %106 = vector.shape_cast %105 : vector<8xf32> to vector<8x1xf32>
    %cst_50 = arith.constant 6.400000e+01 : f32
    %107 = vector.broadcast %cst_50 : f32 to vector<8x1xf32>
    %108 = arith.divf %106, %107 : vector<8x1xf32>
    %cst_51 = arith.constant 9.99999974E-6 : f32
    %109 = vector.broadcast %cst_51 : f32 to vector<8x1xf32>
    %110 = arith.addf %108, %109 : vector<8x1xf32>
    %111 = math.rsqrt %110 : vector<8x1xf32>
    %112 = vector.broadcast %111 : vector<8x1xf32> to vector<8x64xf32>
    %113 = arith.mulf %103, %112 : vector<8x64xf32>
    %114 = vector.broadcast %96 : vector<1x64xf32> to vector<8x64xf32>
    %115 = arith.mulf %113, %114 : vector<8x64xf32>
    %116 = vector.broadcast %97 : vector<1x64xf32> to vector<8x64xf32>
    %117 = arith.addf %115, %116 : vector<8x64xf32>
    %c0_52 = arith.constant 0 : index
    %c0_53 = arith.constant 0 : index
    %118 = vector.load %arg15[%c0_52, %c0_53] : memref<256x64xbf16, #tpu.memory_space<vmem>>, vector<256x64xbf16>
    %c0_54 = arith.constant 0 : index
    %c0_55 = arith.constant 0 : index
    %119 = vector.load %arg16[%c0_54, %c0_55] : memref<1x256xf32, #tpu.memory_space<vmem>>, vector<1x256xf32>
    %120 = arith.truncf %117 : vector<8x64xf32> to vector<8x64xbf16>
    %cst_56 = arith.constant dense<0.000000e+00> : vector<8x256xf32>
    %121 = tpu.matmul %120, %118, %cst_56 {dimension_numbers = #tpu.dot_dimension_numbers<[1], [1], [0], [0], [0, 0, 1, 0], [], []>} : vector<8x64xbf16>, vector<256x64xbf16>, vector<8x256xf32> -> vector<8x256xf32>
    %122 = vector.broadcast %119 : vector<1x256xf32> to vector<8x256xf32>
    %123 = arith.addf %121, %122 : vector<8x256xf32>
    %cst_57 = arith.constant 5.000000e-01 : f32
    %124 = vector.broadcast %cst_57 : f32 to vector<8x256xf32>
    %125 = arith.mulf %124, %123 : vector<8x256xf32>
    %cst_58 = arith.constant 0.707106769 : f32
    %126 = vector.broadcast %cst_58 : f32 to vector<8x256xf32>
    %127 = arith.mulf %123, %126 : vector<8x256xf32>
    %128 = math.erf %127 : vector<8x256xf32>
    %cst_59 = arith.constant 1.000000e+00 : f32
    %129 = vector.broadcast %cst_59 : f32 to vector<8x256xf32>
    %130 = arith.addf %129, %128 : vector<8x256xf32>
    %131 = arith.mulf %125, %130 : vector<8x256xf32>
    %c0_60 = arith.constant 0 : index
    %c0_61 = arith.constant 0 : index
    %132 = vector.load %arg17[%c0_60, %c0_61] : memref<64x256xbf16, #tpu.memory_space<vmem>>, vector<64x256xbf16>
    %c0_62 = arith.constant 0 : index
    %c0_63 = arith.constant 0 : index
    %133 = vector.load %arg18[%c0_62, %c0_63] : memref<1x64xf32, #tpu.memory_space<vmem>>, vector<1x64xf32>
    %134 = arith.truncf %131 : vector<8x256xf32> to vector<8x256xbf16>
    %cst_64 = arith.constant dense<0.000000e+00> : vector<8x64xf32>
    %135 = tpu.matmul %134, %132, %cst_64 {dimension_numbers = #tpu.dot_dimension_numbers<[1], [1], [0], [0], [0, 0, 1, 0], [], []>} : vector<8x256xbf16>, vector<64x256xbf16>, vector<8x64xf32> -> vector<8x64xf32>
    %136 = vector.broadcast %133 : vector<1x64xf32> to vector<8x64xf32>
    %137 = arith.addf %135, %136 : vector<8x64xf32>
    %138 = arith.addf %95, %137 : vector<8x64xf32>
    %c0_65 = arith.constant 0 : index
    %c0_66 = arith.constant 0 : index
    %c0_67 = arith.constant 0 : index
    %139 = vector.load %arg19[%c0_65, %c0_66, %c0_67] : memref<1x8x64xf32, #tpu.memory_space<vmem>>, vector<1x8x64xf32>
    %140 = vector.shape_cast %139 : vector<1x8x64xf32> to vector<8x64xf32>
    %141 = vector.shape_cast %138 : vector<8x64xf32> to vector<1x8x64xf32>
    tpu.vector_store %arg19[%c0_65, %c0_66, %c0_67], %141 {strides = array<i32>} : memref<1x8x64xf32, #tpu.memory_space<vmem>>, vector<1x8x64xf32>,
    return
  }
  func.func @transform_0(%arg0: i32, %arg1: i32) -> (i32, i32, i32) {
    %c0_i32 = arith.constant 0 : i32
    %c0_i32_0 = arith.constant 0 : i32
    %c0_i32_1 = arith.constant 0 : i32
    return %arg0, %c0_i32, %c0_i32_0 : i32, i32, i32
  }
  func.func @transform_1(%arg0: i32, %arg1: i32) -> (i32, i32) {
    %c0_i32 = arith.constant 0 : i32
    %c0_i32_0 = arith.constant 0 : i32
    %c0_i32_1 = arith.constant 0 : i32
    return %c0_i32, %c0_i32_0 : i32, i32
  }
  func.func @transform_2(%arg0: i32, %arg1: i32) -> (i32, i32) {
    %c0_i32 = arith.constant 0 : i32
    %c0_i32_0 = arith.constant 0 : i32
    %c0_i32_1 = arith.constant 0 : i32
    return %c0_i32, %c0_i32_0 : i32, i32
  }
  func.func @transform_3(%arg0: i32, %arg1: i32) -> (i32, i32) {
    %c0_i32 = arith.constant 0 : i32
    %c0_i32_0 = arith.constant 0 : i32
    %c0_i32_1 = arith.constant 0 : i32
    return %c0_i32, %c0_i32_0 : i32, i32
  }
  func.func @transform_4(%arg0: i32, %arg1: i32) -> (i32, i32) {
    %c0_i32 = arith.constant 0 : i32
    %c0_i32_0 = arith.constant 0 : i32
    %c0_i32_1 = arith.constant 0 : i32
    return %c0_i32, %c0_i32_0 : i32, i32
  }
  func.func @transform_5(%arg0: i32, %arg1: i32) -> (i32, i32) {
    %c0_i32 = arith.constant 0 : i32
    %c0_i32_0 = arith.constant 0 : i32
    %c0_i32_1 = arith.constant 0 : i32
    return %c0_i32, %c0_i32_0 : i32, i32
  }
  func.func @transform_6(%arg0: i32, %arg1: i32) -> (i32, i32) {
    %c0_i32 = arith.constant 0 : i32
    %c0_i32_0 = arith.constant 0 : i32
    %c0_i32_1 = arith.constant 0 : i32
    return %c0_i32, %c0_i32_0 : i32, i32
  }
  func.func @transform_7(%arg0: i32, %arg1: i32) -> (i32, i32) {
    %c0_i32 = arith.constant 0 : i32
    %c0_i32_0 = arith.constant 0 : i32
    %c0_i32_1 = arith.constant 0 : i32
    return %c0_i32, %c0_i32_0 : i32, i32
  }
  func.func @transform_8(%arg0: i32, %arg1: i32) -> (i32, i32) {
    %c0_i32 = arith.constant 0 : i32
    %c0_i32_0 = arith.constant 0 : i32
    %c0_i32_1 = arith.constant 0 : i32
    return %c0_i32, %c0_i32_0 : i32, i32
  }
  func.func @transform_9(%arg0: i32, %arg1: i32) -> (i32, i32) {
    %c0_i32 = arith.constant 0 : i32
    %c0_i32_0 = arith.constant 0 : i32
    %c0_i32_1 = arith.constant 0 : i32
    return %c0_i32, %c0_i32_0 : i32, i32
  }
  func.func @transform_10(%arg0: i32, %arg1: i32) -> (i32, i32) {
    %c0_i32 = arith.constant 0 : i32
    %c0_i32_0 = arith.constant 0 : i32
    %c0_i32_1 = arith.constant 0 : i32
    return %c0_i32, %c0_i32_0 : i32, i32
  }
  func.func @transform_11(%arg0: i32, %arg1: i32) -> (i32, i32) {
    %c0_i32 = arith.constant 0 : i32
    %c0_i32_0 = arith.constant 0 : i32
    %c0_i32_1 = arith.constant 0 : i32
    return %c0_i32, %c0_i32_0 : i32, i32
  }
  func.func @transform_12(%arg0: i32, %arg1: i32) -> (i32, i32) {
    %c0_i32 = arith.constant 0 : i32
    %c0_i32_0 = arith.constant 0 : i32
    %c0_i32_1 = arith.constant 0 : i32
    return %c0_i32, %c0_i32_0 : i32, i32
  }
  func.func @transform_13(%arg0: i32, %arg1: i32) -> (i32, i32) {
    %c0_i32 = arith.constant 0 : i32
    %c0_i32_0 = arith.constant 0 : i32
    %c0_i32_1 = arith.constant 0 : i32
    return %c0_i32, %c0_i32_0 : i32, i32
  }
  func.func @transform_14(%arg0: i32, %arg1: i32) -> (i32, i32) {
    %c0_i32 = arith.constant 0 : i32
    %c0_i32_0 = arith.constant 0 : i32
    %c0_i32_1 = arith.constant 0 : i32
    return %c0_i32, %c0_i32_0 : i32, i32
  }
  func.func @transform_15(%arg0: i32, %arg1: i32) -> (i32, i32) {
    %c0_i32 = arith.constant 0 : i32
    %c0_i32_0 = arith.constant 0 : i32
    %c0_i32_1 = arith.constant 0 : i32
    return %c0_i32, %c0_i32_0 : i32, i32
  }
  func.func @transform_16(%arg0: i32, %arg1: i32) -> (i32, i32) {
    %c0_i32 = arith.constant 0 : i32
    %c0_i32_0 = arith.constant 0 : i32
    %c0_i32_1 = arith.constant 0 : i32
    return %c0_i32, %c0_i32_0 : i32, i32
  }
  func.func @transform_17(%arg0: i32, %arg1: i32) -> (i32, i32, i32) {
    %c0_i32 = arith.constant 0 : i32
    %c0_i32_0 = arith.constant 0 : i32
    return %arg0, %arg1, %c0_i32 : i32, i32, i32
  }
}

module attributes {stable_mosaic.version = 11 : i64} {
  func.func @_resblock_kernel(%arg0: i32, %arg1: i32, %arg2: memref<1x16x64xf32, #tpu.memory_space<vmem>>, %arg3: memref<1x64xf32, #tpu.memory_space<vmem>>, %arg4: memref<1x64xf32, #tpu.memory_space<vmem>>, %arg5: memref<64x64xbf16, #tpu.memory_space<vmem>>, %arg6: memref<1x64xf32, #tpu.memory_space<vmem>>, %arg7: memref<64x64xbf16, #tpu.memory_space<vmem>>, %arg8: memref<1x64xf32, #tpu.memory_space<vmem>>, %arg9: memref<64x64xbf16, #tpu.memory_space<vmem>>, %arg10: memref<1x64xf32, #tpu.memory_space<vmem>>, %arg11: memref<64x64xbf16, #tpu.memory_space<vmem>>, %arg12: memref<1x64xf32, #tpu.memory_space<vmem>>, %arg13: memref<1x64xf32, #tpu.memory_space<vmem>>, %arg14: memref<1x64xf32, #tpu.memory_space<vmem>>, %arg15: memref<256x64xbf16, #tpu.memory_space<vmem>>, %arg16: memref<1x256xf32, #tpu.memory_space<vmem>>, %arg17: memref<64x256xbf16, #tpu.memory_space<vmem>>, %arg18: memref<1x64xf32, #tpu.memory_space<vmem>>, %arg19: memref<1x8x64xf32, #tpu.memory_space<vmem>>, %arg20: memref<4x16x16xbf16, #tpu.memory_space<vmem>>, %arg21: memref<4x16x16xbf16, #tpu.memory_space<vmem>>) attributes {dimension_semantics = [#tpu.dimension_semantics<parallel>, #tpu.dimension_semantics<arbitrary>], iteration_bounds = array<i64: 2, 2>, scalar_prefetch = 0 : i64, scratch_operands = 2 : i64, tpu.core_type = #tpu.core_type<tc>, window_params = [{transform_indices = @transform_0, window_bounds = array<i64: 1, 16, 64>}, {pipeline_mode = #tpu.pipeline_mode<synchronous>, transform_indices = @transform_1, window_bounds = array<i64: 1, 64>}, {pipeline_mode = #tpu.pipeline_mode<synchronous>, transform_indices = @transform_2, window_bounds = array<i64: 1, 64>}, {pipeline_mode = #tpu.pipeline_mode<synchronous>, transform_indices = @transform_3, window_bounds = array<i64: 64, 64>}, {pipeline_mode = #tpu.pipeline_mode<synchronous>, transform_indices = @transform_4, window_bounds = array<i64: 1, 64>}, {pipeline_mode = #tpu.pipeline_mode<synchronous>, transform_indices = @transform_5, window_bounds = array<i64: 64, 64>}, {pipeline_mode = #tpu.pipeline_mode<synchronous>, transform_indices = @transform_6, window_bounds = array<i64: 1, 64>}, {pipeline_mode = #tpu.pipeline_mode<synchronous>, transform_indices = @transform_7, window_bounds = array<i64: 64, 64>}, {pipeline_mode = #tpu.pipeline_mode<synchronous>, transform_indices = @transform_8, window_bounds = array<i64: 1, 64>}, {pipeline_mode = #tpu.pipeline_mode<synchronous>, transform_indices = @transform_9, window_bounds = array<i64: 64, 64>}, {pipeline_mode = #tpu.pipeline_mode<synchronous>, transform_indices = @transform_10, window_bounds = array<i64: 1, 64>}, {pipeline_mode = #tpu.pipeline_mode<synchronous>, transform_indices = @transform_11, window_bounds = array<i64: 1, 64>}, {pipeline_mode = #tpu.pipeline_mode<synchronous>, transform_indices = @transform_12, window_bounds = array<i64: 1, 64>}, {pipeline_mode = #tpu.pipeline_mode<synchronous>, transform_indices = @transform_13, window_bounds = array<i64: 256, 64>}, {pipeline_mode = #tpu.pipeline_mode<synchronous>, transform_indices = @transform_14, window_bounds = array<i64: 1, 256>}, {pipeline_mode = #tpu.pipeline_mode<synchronous>, transform_indices = @transform_15, window_bounds = array<i64: 64, 256>}, {pipeline_mode = #tpu.pipeline_mode<synchronous>, transform_indices = @transform_16, window_bounds = array<i64: 1, 64>}, {transform_indices = @transform_17, window_bounds = array<i64: 1, 8, 64>}]} {
    %c0_i32 = arith.constant 0 : i32
    %0 = arith.cmpi eq, %arg1, %c0_i32 : i32
    %1 = arith.extui %0 : i1 to i32
    %c0_i32_0 = arith.constant 0 : i32
    %2 = arith.cmpi ne, %1, %c0_i32_0 : i32
    scf.if %2 {
      %c0_68 = arith.constant 0 : index
      %c0_69 = arith.constant 0 : index
      %c0_70 = arith.constant 0 : index
      %142 = vector.load %arg2[%c0_68, %c0_69, %c0_70] : memref<1x16x64xf32, #tpu.memory_space<vmem>>, vector<1x16x64xf32>
      %143 = vector.shape_cast %142 : vector<1x16x64xf32> to vector<16x64xf32>
      %c0_71 = arith.constant 0 : index
      %c0_72 = arith.constant 0 : index
      %144 = vector.load %arg3[%c0_71, %c0_72] : memref<1x64xf32, #tpu.memory_space<vmem>>, vector<1x64xf32>
      %c0_73 = arith.constant 0 : index
      %c0_74 = arith.constant 0 : index
      %145 = vector.load %arg4[%c0_73, %c0_74] : memref<1x64xf32, #tpu.memory_space<vmem>>, vector<1x64xf32>
      %cst_75 = arith.constant dense<0.000000e+00> : vector<16xf32>
      %146 = vector.multi_reduction <add>, %143, %cst_75 [1] : vector<16x64xf32> to vector<16xf32>
      %147 = vector.shape_cast %146 : vector<16xf32> to vector<16x1xf32>
      %cst_76 = arith.constant 6.400000e+01 : f32
      %148 = vector.broadcast %cst_76 : f32 to vector<16x1xf32>
      %149 = arith.divf %147, %148 : vector<16x1xf32>
      %150 = vector.broadcast %149 : vector<16x1xf32> to vector<16x64xf32>
      %151 = arith.subf %143, %150 : vector<16x64xf32>
      %152 = arith.mulf %151, %151 : vector<16x64xf32>
      %cst_77 = arith.constant dense<0.000000e+00> : vector<16xf32>
      %153 = vector.multi_reduction <add>, %152, %cst_77 [1] : vector<16x64xf32> to vector<16xf32>
      %154 = vector.shape_cast %153 : vector<16xf32> to vector<16x1xf32>
      %cst_78 = arith.constant 6.400000e+01 : f32
      %155 = vector.broadcast %cst_78 : f32 to vector<16x1xf32>
      %156 = arith.divf %154, %155 : vector<16x1xf32>
      %cst_79 = arith.constant 9.99999974E-6 : f32
      %157 = vector.broadcast %cst_79 : f32 to vector<16x1xf32>
      %158 = arith.addf %156, %157 : vector<16x1xf32>
      %159 = math.rsqrt %158 : vector<16x1xf32>
      %160 = vector.broadcast %159 : vector<16x1xf32> to vector<16x64xf32>
      %161 = arith.mulf %151, %160 : vector<16x64xf32>
      %162 = vector.broadcast %144 : vector<1x64xf32> to vector<16x64xf32>
      %163 = arith.mulf %161, %162 : vector<16x64xf32>
      %164 = vector.broadcast %145 : vector<1x64xf32> to vector<16x64xf32>
      %165 = arith.addf %163, %164 : vector<16x64xf32>
      %c0_80 = arith.constant 0 : index
      %c0_81 = arith.constant 0 : index
      %166 = vector.load %arg7[%c0_80, %c0_81] : memref<64x64xbf16, #tpu.memory_space<vmem>>, vector<64x64xbf16>
      %c0_82 = arith.constant 0 : index
      %c0_83 = arith.constant 0 : index
      %167 = vector.load %arg8[%c0_82, %c0_83] : memref<1x64xf32, #tpu.memory_space<vmem>>, vector<1x64xf32>
      %168 = arith.truncf %165 : vector<16x64xf32> to vector<16x64xbf16>
      %cst_84 = arith.constant dense<0.000000e+00> : vector<16x64xf32>
      %169 = tpu.matmul %168, %166, %cst_84 {dimension_numbers = #tpu.dot_dimension_numbers<[1], [1], [0], [0], [0, 0, 1, 0], [], []>} : vector<16x64xbf16>, vector<64x64xbf16>, vector<16x64xf32> -> vector<16x64xf32>
      %170 = vector.broadcast %167 : vector<1x64xf32> to vector<16x64xf32>
      %171 = arith.addf %169, %170 : vector<16x64xf32>
      %172 = vector.shape_cast %171 : vector<16x64xf32> to vector<16x4x16xf32>
      %173 = tpu.transpose %172, [1, 0, 2] : vector<16x4x16xf32> -> vector<4x16x16xf32>
      %174 = arith.truncf %173 : vector<4x16x16xf32> to vector<4x16x16xbf16>
      %c0_85 = arith.constant 0 : index
      %c0_86 = arith.constant 0 : index
      %c0_87 = arith.constant 0 : index
      %175 = vector.load %arg20[%c0_85, %c0_86, %c0_87] : memref<4x16x16xbf16, #tpu.memory_space<vmem>>, vector<4x16x16xbf16>
      tpu.vector_store %arg20[%c0_85, %c0_86, %c0_87], %174 {strides = array<i32>} : memref<4x16x16xbf16, #tpu.memory_space<vmem>>, vector<4x16x16xbf16>,
      %c0_88 = arith.constant 0 : index
      %c0_89 = arith.constant 0 : index
      %176 = vector.load %arg9[%c0_88, %c0_89] : memref<64x64xbf16, #tpu.memory_space<vmem>>, vector<64x64xbf16>
      %c0_90 = arith.constant 0 : index
      %c0_91 = arith.constant 0 : index
      %177 = vector.load %arg10[%c0_90, %c0_91] : memref<1x64xf32, #tpu.memory_space<vmem>>, vector<1x64xf32>
      %178 = arith.truncf %165 : vector<16x64xf32> to vector<16x64xbf16>
      %cst_92 = arith.constant dense<0.000000e+00> : vector<16x64xf32>
      %179 = tpu.matmul %178, %176, %cst_92 {dimension_numbers = #tpu.dot_dimension_numbers<[1], [1], [0], [0], [0, 0, 1, 0], [], []>} : vector<16x64xbf16>, vector<64x64xbf16>, vector<16x64xf32> -> vector<16x64xf32>
      %180 = vector.broadcast %177 : vector<1x64xf32> to vector<16x64xf32>
      %181 = arith.addf %179, %180 : vector<16x64xf32>
      %182 = vector.shape_cast %181 : vector<16x64xf32> to vector<16x4x16xf32>
      %183 = tpu.transpose %182, [1, 0, 2] : vector<16x4x16xf32> -> vector<4x16x16xf32>
      %184 = arith.truncf %183 : vector<4x16x16xf32> to vector<4x16x16xbf16>
      %c0_93 = arith.constant 0 : index
      %c0_94 = arith.constant 0 : index
      %c0_95 = arith.constant 0 : index
      %185 = vector.load %arg21[%c0_93, %c0_94, %c0_95] : memref<4x16x16xbf16, #tpu.memory_space<vmem>>, vector<4x16x16xbf16>
      tpu.vector_store %arg21[%c0_93, %c0_94, %c0_95], %184 {strides = array<i32>} : memref<4x16x16xbf16, #tpu.memory_space<vmem>>, vector<4x16x16xbf16>,
    } else {
    }
    %c8_i32 = arith.constant 8 : i32
    %3 = arith.muli %arg1, %c8_i32 : i32
    %4 = tpu.assume_multiple %3, 8 : i32
    %c0 = arith.constant 0 : index
    %5 = arith.index_cast %4 : i32 to index
    %c0_1 = arith.constant 0 : index
    %6 = vector.load %arg2[%c0, %5, %c0_1] : memref<1x16x64xf32, #tpu.memory_space<vmem>>, vector<1x8x64xf32>
    %7 = vector.shape_cast %6 : vector<1x8x64xf32> to vector<8x64xf32>
    %c0_2 = arith.constant 0 : index
    %c0_3 = arith.constant 0 : index
    %8 = vector.load %arg3[%c0_2, %c0_3] : memref<1x64xf32, #tpu.memory_space<vmem>>, vector<1x64xf32>
    %c0_4 = arith.constant 0 : index
    %c0_5 = arith.constant 0 : index
    %9 = vector.load %arg4[%c0_4, %c0_5] : memref<1x64xf32, #tpu.memory_space<vmem>>, vector<1x64xf32>
    %cst = arith.constant dense<0.000000e+00> : vector<8xf32>
    %10 = vector.multi_reduction <add>, %7, %cst [1] : vector<8x64xf32> to vector<8xf32>
    %11 = vector.shape_cast %10 : vector<8xf32> to vector<8x1xf32>
    %cst_6 = arith.constant 6.400000e+01 : f32
    %12 = vector.broadcast %cst_6 : f32 to vector<8x1xf32>
    %13 = arith.divf %11, %12 : vector<8x1xf32>
    %14 = vector.broadcast %13 : vector<8x1xf32> to vector<8x64xf32>
    %15 = arith.subf %7, %14 : vector<8x64xf32>
    %16 = arith.mulf %15, %15 : vector<8x64xf32>
    %cst_7 = arith.constant dense<0.000000e+00> : vector<8xf32>
    %17 = vector.multi_reduction <add>, %16, %cst_7 [1] : vector<8x64xf32> to vector<8xf32>
    %18 = vector.shape_cast %17 : vector<8xf32> to vector<8x1xf32>
    %cst_8 = arith.constant 6.400000e+01 : f32
    %19 = vector.broadcast %cst_8 : f32 to vector<8x1xf32>
    %20 = arith.divf %18, %19 : vector<8x1xf32>
    %cst_9 = arith.constant 9.99999974E-6 : f32
    %21 = vector.broadcast %cst_9 : f32 to vector<8x1xf32>
    %22 = arith.addf %20, %21 : vector<8x1xf32>
    %23 = math.rsqrt %22 : vector<8x1xf32>
    %24 = vector.broadcast %23 : vector<8x1xf32> to vector<8x64xf32>
    %25 = arith.mulf %15, %24 : vector<8x64xf32>
    %26 = vector.broadcast %8 : vector<1x64xf32> to vector<8x64xf32>
    %27 = arith.mulf %25, %26 : vector<8x64xf32>
    %28 = vector.broadcast %9 : vector<1x64xf32> to vector<8x64xf32>
    %29 = arith.addf %27, %28 : vector<8x64xf32>
    %c0_10 = arith.constant 0 : index
    %c0_11 = arith.constant 0 : index
    %30 = vector.load %arg5[%c0_10, %c0_11] : memref<64x64xbf16, #tpu.memory_space<vmem>>, vector<64x64xbf16>
    %c0_12 = arith.constant 0 : index
    %c0_13 = arith.constant 0 : index
    %31 = vector.load %arg6[%c0_12, %c0_13] : memref<1x64xf32, #tpu.memory_space<vmem>>, vector<1x64xf32>
    %32 = arith.truncf %29 : vector<8x64xf32> to vector<8x64xbf16>
    %cst_14 = arith.constant dense<0.000000e+00> : vector<8x64xf32>
    %33 = tpu.matmul %32, %30, %cst_14 {dimension_numbers = #tpu.dot_dimension_numbers<[1], [1], [0], [0], [0, 0, 1, 0], [], []>} : vector<8x64xbf16>, vector<64x64xbf16>, vector<8x64xf32> -> vector<8x64xf32>
    %34 = vector.broadcast %31 : vector<1x64xf32> to vector<8x64xf32>
    %35 = arith.addf %33, %34 : vector<8x64xf32>
    %cst_15 = arith.constant 2.500000e-01 : f32
    %36 = vector.broadcast %cst_15 : f32 to vector<8x64xf32>
    %37 = arith.mulf %35, %36 : vector<8x64xf32>
    %38 = vector.shape_cast %37 : vector<8x64xf32> to vector<8x4x16xf32>
    %39 = tpu.transpose %38, [1, 0, 2] : vector<8x4x16xf32> -> vector<4x8x16xf32>
    %40 = arith.truncf %39 : vector<4x8x16xf32> to vector<4x8x16xbf16>
    %cst_16 = arith.constant 0xFF800000 : f32
    %41 = vector.broadcast %cst_16 : f32 to vector<4x8x1xf32>
    %cst_17 = arith.constant 0.000000e+00 : f32
    %42 = vector.broadcast %cst_17 : f32 to vector<4x8x1xf32>
    %cst_18 = arith.constant 0.000000e+00 : f32
    %43 = vector.broadcast %cst_18 : f32 to vector<4x8x16xf32>
    %c0_19 = arith.constant 0 : index
    %c0_20 = arith.constant 0 : index
    %c0_21 = arith.constant 0 : index
    %44 = vector.load %arg20[%c0_19, %c0_20, %c0_21] : memref<4x16x16xbf16, #tpu.memory_space<vmem>>, vector<4x8x16xbf16>
    %c0_22 = arith.constant 0 : index
    %c0_23 = arith.constant 0 : index
    %c0_24 = arith.constant 0 : index
    %45 = vector.load %arg21[%c0_22, %c0_23, %c0_24] : memref<4x16x16xbf16, #tpu.memory_space<vmem>>, vector<4x8x16xbf16>
    "tpu.trace_start"() <{level = 10 : i32, message = "hqd,hkd->hqk"}> : () -> ()
    %cst_25 = arith.constant dense<0.000000e+00> : vector<4x8x8xf32>
    %46 = tpu.matmul %40, %44, %cst_25 {dimension_numbers = #tpu.dot_dimension_numbers<[2], [2], [1], [1], [0, 0, 0, 1, 1, 1], [0], [0]>} : vector<4x8x16xbf16>, vector<4x8x16xbf16>, vector<4x8x8xf32> -> vector<4x8x8xf32>
    "tpu.trace_stop"() : () -> ()
    %cst_26 = arith.constant dense<0xFF800000> : vector<4x8xf32>
    %47 = vector.multi_reduction <maximumf>, %46, %cst_26 [2] : vector<4x8x8xf32> to vector<4x8xf32>
    %48 = vector.shape_cast %47 : vector<4x8xf32> to vector<4x8x1xf32>
    %49 = arith.maximumf %41, %48 : vector<4x8x1xf32>
    %50 = arith.subf %41, %49 : vector<4x8x1xf32>
    %51 = math.exp %50 : vector<4x8x1xf32>
    %52 = vector.broadcast %49 : vector<4x8x1xf32> to vector<4x8x8xf32>
    %53 = arith.subf %46, %52 : vector<4x8x8xf32>
    %54 = math.exp %53 : vector<4x8x8xf32>
    %55 = arith.mulf %51, %42 : vector<4x8x1xf32>
    %cst_27 = arith.constant dense<0.000000e+00> : vector<4x8xf32>
    %56 = vector.multi_reduction <add>, %54, %cst_27 [2] : vector<4x8x8xf32> to vector<4x8xf32>
    %57 = vector.shape_cast %56 : vector<4x8xf32> to vector<4x8x1xf32>
    %58 = arith.addf %55, %57 : vector<4x8x1xf32>
    %59 = vector.broadcast %51 : vector<4x8x1xf32> to vector<4x8x16xf32>
    %60 = arith.mulf %59, %43 : vector<4x8x16xf32>
    %61 = arith.truncf %54 : vector<4x8x8xf32> to vector<4x8x8xbf16>
    "tpu.trace_start"() <{level = 10 : i32, message = "hqk,hkd->hqd"}> : () -> ()
    %cst_28 = arith.constant dense<0.000000e+00> : vector<4x8x16xf32>
    %62 = tpu.matmul %61, %45, %cst_28 {dimension_numbers = #tpu.dot_dimension_numbers<[2], [1], [1], [2], [0, 0, 0, 1, 1, 2], [0], [0]>} : vector<4x8x8xbf16>, vector<4x8x16xbf16>, vector<4x8x16xf32> -> vector<4x8x16xf32>
    "tpu.trace_stop"() : () -> ()
    %63 = arith.addf %60, %62 : vector<4x8x16xf32>
    %c0_29 = arith.constant 0 : index
    %c8 = arith.constant 8 : index
    %c0_30 = arith.constant 0 : index
    %64 = vector.load %arg20[%c0_29, %c8, %c0_30] : memref<4x16x16xbf16, #tpu.memory_space<vmem>>, vector<4x8x16xbf16>
    %c0_31 = arith.constant 0 : index
    %c8_32 = arith.constant 8 : index
    %c0_33 = arith.constant 0 : index
    %65 = vector.load %arg21[%c0_31, %c8_32, %c0_33] : memref<4x16x16xbf16, #tpu.memory_space<vmem>>, vector<4x8x16xbf16>
    "tpu.trace_start"() <{level = 10 : i32, message = "hqd,hkd->hqk"}> : () -> ()
    %cst_34 = arith.constant dense<0.000000e+00> : vector<4x8x8xf32>
    %66 = tpu.matmul %40, %64, %cst_34 {dimension_numbers = #tpu.dot_dimension_numbers<[2], [2], [1], [1], [0, 0, 0, 1, 1, 1], [0], [0]>} : vector<4x8x16xbf16>, vector<4x8x16xbf16>, vector<4x8x8xf32> -> vector<4x8x8xf32>
    "tpu.trace_stop"() : () -> ()
    %cst_35 = arith.constant dense<0xFF800000> : vector<4x8xf32>
    %67 = vector.multi_reduction <maximumf>, %66, %cst_35 [2] : vector<4x8x8xf32> to vector<4x8xf32>
    %68 = vector.shape_cast %67 : vector<4x8xf32> to vector<4x8x1xf32>
    %69 = arith.maximumf %49, %68 : vector<4x8x1xf32>
    %70 = arith.subf %49, %69 : vector<4x8x1xf32>
    %71 = math.exp %70 : vector<4x8x1xf32>
    %72 = vector.broadcast %69 : vector<4x8x1xf32> to vector<4x8x8xf32>
    %73 = arith.subf %66, %72 : vector<4x8x8xf32>
    %74 = math.exp %73 : vector<4x8x8xf32>
    %75 = arith.mulf %71, %58 : vector<4x8x1xf32>
    %cst_36 = arith.constant dense<0.000000e+00> : vector<4x8xf32>
    %76 = vector.multi_reduction <add>, %74, %cst_36 [2] : vector<4x8x8xf32> to vector<4x8xf32>
    %77 = vector.shape_cast %76 : vector<4x8xf32> to vector<4x8x1xf32>
    %78 = arith.addf %75, %77 : vector<4x8x1xf32>
    %79 = vector.broadcast %71 : vector<4x8x1xf32> to vector<4x8x16xf32>
    %80 = arith.mulf %79, %63 : vector<4x8x16xf32>
    %81 = arith.truncf %74 : vector<4x8x8xf32> to vector<4x8x8xbf16>
    "tpu.trace_start"() <{level = 10 : i32, message = "hqk,hkd->hqd"}> : () -> ()
    %cst_37 = arith.constant dense<0.000000e+00> : vector<4x8x16xf32>
    %82 = tpu.matmul %81, %65, %cst_37 {dimension_numbers = #tpu.dot_dimension_numbers<[2], [1], [1], [2], [0, 0, 0, 1, 1, 2], [0], [0]>} : vector<4x8x8xbf16>, vector<4x8x16xbf16>, vector<4x8x16xf32> -> vector<4x8x16xf32>
    "tpu.trace_stop"() : () -> ()
    %83 = arith.addf %80, %82 : vector<4x8x16xf32>
    %84 = tpu.reciprocal %78 {approx = true} : vector<4x8x1xf32> -> vector<4x8x1xf32>
    %85 = vector.broadcast %84 : vector<4x8x1xf32> to vector<4x8x16xf32>
    %86 = arith.mulf %83, %85 : vector<4x8x16xf32>
    %87 = tpu.transpose %86, [1, 0, 2] : vector<4x8x16xf32> -> vector<8x4x16xf32>
    %88 = vector.shape_cast %87 : vector<8x4x16xf32> to vector<8x64xf32>
    %c0_38 = arith.constant 0 : index
    %c0_39 = arith.constant 0 : index
    %89 = vector.load %arg11[%c0_38, %c0_39] : memref<64x64xbf16, #tpu.memory_space<vmem>>, vector<64x64xbf16>
    %c0_40 = arith.constant 0 : index
    %c0_41 = arith.constant 0 : index
    %90 = vector.load %arg12[%c0_40, %c0_41] : memref<1x64xf32, #tpu.memory_space<vmem>>, vector<1x64xf32>
    %91 = arith.truncf %88 : vector<8x64xf32> to vector<8x64xbf16>
    %cst_42 = arith.constant dense<0.000000e+00> : vector<8x64xf32>
    %92 = tpu.matmul %91, %89, %cst_42 {dimension_numbers = #tpu.dot_dimension_numbers<[1], [1], [0], [0], [0, 0, 1, 0], [], []>} : vector<8x64xbf16>, vector<64x64xbf16>, vector<8x64xf32> -> vector<8x64xf32>
    %93 = vector.broadcast %90 : vector<1x64xf32> to vector<8x64xf32>
    %94 = arith.addf %92, %93 : vector<8x64xf32>
    %95 = arith.addf %7, %94 : vector<8x64xf32>
    %c0_43 = arith.constant 0 : index
    %c0_44 = arith.constant 0 : index
    %96 = vector.load %arg13[%c0_43, %c0_44] : memref<1x64xf32, #tpu.memory_space<vmem>>, vector<1x64xf32>
    %c0_45 = arith.constant 0 : index
    %c0_46 = arith.constant 0 : index
    %97 = vector.load %arg14[%c0_45, %c0_46] : memref<1x64xf32, #tpu.memory_space<vmem>>, vector<1x64xf32>
    %cst_47 = arith.constant dense<0.000000e+00> : vector<8xf32>
    %98 = vector.multi_reduction <add>, %95, %cst_47 [1] : vector<8x64xf32> to vector<8xf32>
    %99 = vector.shape_cast %98 : vector<8xf32> to vector<8x1xf32>
    %cst_48 = arith.constant 6.400000e+01 : f32
    %100 = vector.broadcast %cst_48 : f32 to vector<8x1xf32>
    %101 = arith.divf %99, %100 : vector<8x1xf32>
    %102 = vector.broadcast %101 : vector<8x1xf32> to vector<8x64xf32>
    %103 = arith.subf %95, %102 : vector<8x64xf32>
    %104 = arith.mulf %103, %103 : vector<8x64xf32>
    %cst_49 = arith.constant dense<0.000000e+00> : vector<8xf32>
    %105 = vector.multi_reduction <add>, %104, %cst_49 [1] : vector<8x64xf32> to vector<8xf32>
    %106 = vector.shape_cast %105 : vector<8xf32> to vector<8x1xf32>
    %cst_50 = arith.constant 6.400000e+01 : f32
    %107 = vector.broadcast %cst_50 : f32 to vector<8x1xf32>
    %108 = arith.divf %106, %107 : vector<8x1xf32>
    %cst_51 = arith.constant 9.99999974E-6 : f32
    %109 = vector.broadcast %cst_51 : f32 to vector<8x1xf32>
    %110 = arith.addf %108, %109 : vector<8x1xf32>
    %111 = math.rsqrt %110 : vector<8x1xf32>
    %112 = vector.broadcast %111 : vector<8x1xf32> to vector<8x64xf32>
    %113 = arith.mulf %103, %112 : vector<8x64xf32>
    %114 = vector.broadcast %96 : vector<1x64xf32> to vector<8x64xf32>
    %115 = arith.mulf %113, %114 : vector<8x64xf32>
    %116 = vector.broadcast %97 : vector<1x64xf32> to vector<8x64xf32>
    %117 = arith.addf %115, %116 : vector<8x64xf32>
    %c0_52 = arith.constant 0 : index
    %c0_53 = arith.constant 0 : index
    %118 = vector.load %arg15[%c0_52, %c0_53] : memref<256x64xbf16, #tpu.memory_space<vmem>>, vector<256x64xbf16>
    %c0_54 = arith.constant 0 : index
    %c0_55 = arith.constant 0 : index
    %119 = vector.load %arg16[%c0_54, %c0_55] : memref<1x256xf32, #tpu.memory_space<vmem>>, vector<1x256xf32>
    %120 = arith.truncf %117 : vector<8x64xf32> to vector<8x64xbf16>
    %cst_56 = arith.constant dense<0.000000e+00> : vector<8x256xf32>
    %121 = tpu.matmul %120, %118, %cst_56 {dimension_numbers = #tpu.dot_dimension_numbers<[1], [1], [0], [0], [0, 0, 1, 0], [], []>} : vector<8x64xbf16>, vector<256x64xbf16>, vector<8x256xf32> -> vector<8x256xf32>
    %122 = vector.broadcast %119 : vector<1x256xf32> to vector<8x256xf32>
    %123 = arith.addf %121, %122 : vector<8x256xf32>
    %cst_57 = arith.constant 5.000000e-01 : f32
    %124 = vector.broadcast %cst_57 : f32 to vector<8x256xf32>
    %125 = arith.mulf %124, %123 : vector<8x256xf32>
    %cst_58 = arith.constant 0.707106769 : f32
    %126 = vector.broadcast %cst_58 : f32 to vector<8x256xf32>
    %127 = arith.mulf %123, %126 : vector<8x256xf32>
    %128 = math.erf %127 : vector<8x256xf32>
    %cst_59 = arith.constant 1.000000e+00 : f32
    %129 = vector.broadcast %cst_59 : f32 to vector<8x256xf32>
    %130 = arith.addf %129, %128 : vector<8x256xf32>
    %131 = arith.mulf %125, %130 : vector<8x256xf32>
    %c0_60 = arith.constant 0 : index
    %c0_61 = arith.constant 0 : index
    %132 = vector.load %arg17[%c0_60, %c0_61] : memref<64x256xbf16, #tpu.memory_space<vmem>>, vector<64x256xbf16>
    %c0_62 = arith.constant 0 : index
    %c0_63 = arith.constant 0 : index
    %133 = vector.load %arg18[%c0_62, %c0_63] : memref<1x64xf32, #tpu.memory_space<vmem>>, vector<1x64xf32>
    %134 = arith.truncf %131 : vector<8x256xf32> to vector<8x256xbf16>
    %cst_64 = arith.constant dense<0.000000e+00> : vector<8x64xf32>
    %135 = tpu.matmul %134, %132, %cst_64 {dimension_numbers = #tpu.dot_dimension_numbers<[1], [1], [0], [0], [0, 0, 1, 0], [], []>} : vector<8x256xbf16>, vector<64x256xbf16>, vector<8x64xf32> -> vector<8x64xf32>
    %136 = vector.broadcast %133 : vector<1x64xf32> to vector<8x64xf32>
    %137 = arith.addf %135, %136 : vector<8x64xf32>
    %138 = arith.addf %95, %137 : vector<8x64xf32>
    %c0_65 = arith.constant 0 : index
    %c0_66 = arith.constant 0 : index
    %c0_67 = arith.constant 0 : index
    %139 = vector.load %arg19[%c0_65, %c0_66, %c0_67] : memref<1x8x64xf32, #tpu.memory_space<vmem>>, vector<1x8x64xf32>
    %140 = vector.shape_cast %139 : vector<1x8x64xf32> to vector<8x64xf32>
    %141 = vector.shape_cast %138 : vector<8x64xf32> to vector<1x8x64xf32>
    tpu.vector_store %arg19[%c0_65, %c0_66, %c0_67], %141 {strides = array<i32>} : memref<1x8x64xf32, #tpu.memory_space<vmem>>, vector<1x8x64xf32>,
    return
  }
  func.func @transform_0(%arg0: i32, %arg1: i32) -> (i32, i32, i32) {
    %c0_i32 = arith.constant 0 : i32
    %c0_i32_0 = arith.constant 0 : i32
    %c0_i32_1 = arith.constant 0 : i32
    return %arg0, %c0_i32, %c0_i32_0 : i32, i32, i32
  }
  func.func @transform_1(%arg0: i32, %arg1: i32) -> (i32, i32) {
    %c0_i32 = arith.constant 0 : i32
    %c0_i32_0 = arith.constant 0 : i32
    %c0_i32_1 = arith.constant 0 : i32
    return %c0_i32, %c0_i32_0 : i32, i32
  }
  func.func @transform_2(%arg0: i32, %arg1: i32) -> (i32, i32) {
    %c0_i32 = arith.constant 0 : i32
    %c0_i32_0 = arith.constant 0 : i32
    %c0_i32_1 = arith.constant 0 : i32
    return %c0_i32, %c0_i32_0 : i32, i32
  }
  func.func @transform_3(%arg0: i32, %arg1: i32) -> (i32, i32) {
    %c0_i32 = arith.constant 0 : i32
    %c0_i32_0 = arith.constant 0 : i32
    %c0_i32_1 = arith.constant 0 : i32
    return %c0_i32, %c0_i32_0 : i32, i32
  }
  func.func @transform_4(%arg0: i32, %arg1: i32) -> (i32, i32) {
    %c0_i32 = arith.constant 0 : i32
    %c0_i32_0 = arith.constant 0 : i32
    %c0_i32_1 = arith.constant 0 : i32
    return %c0_i32, %c0_i32_0 : i32, i32
  }
  func.func @transform_5(%arg0: i32, %arg1: i32) -> (i32, i32) {
    %c0_i32 = arith.constant 0 : i32
    %c0_i32_0 = arith.constant 0 : i32
    %c0_i32_1 = arith.constant 0 : i32
    return %c0_i32, %c0_i32_0 : i32, i32
  }
  func.func @transform_6(%arg0: i32, %arg1: i32) -> (i32, i32) {
    %c0_i32 = arith.constant 0 : i32
    %c0_i32_0 = arith.constant 0 : i32
    %c0_i32_1 = arith.constant 0 : i32
    return %c0_i32, %c0_i32_0 : i32, i32
  }
  func.func @transform_7(%arg0: i32, %arg1: i32) -> (i32, i32) {
    %c0_i32 = arith.constant 0 : i32
    %c0_i32_0 = arith.constant 0 : i32
    %c0_i32_1 = arith.constant 0 : i32
    return %c0_i32, %c0_i32_0 : i32, i32
  }
  func.func @transform_8(%arg0: i32, %arg1: i32) -> (i32, i32) {
    %c0_i32 = arith.constant 0 : i32
    %c0_i32_0 = arith.constant 0 : i32
    %c0_i32_1 = arith.constant 0 : i32
    return %c0_i32, %c0_i32_0 : i32, i32
  }
  func.func @transform_9(%arg0: i32, %arg1: i32) -> (i32, i32) {
    %c0_i32 = arith.constant 0 : i32
    %c0_i32_0 = arith.constant 0 : i32
    %c0_i32_1 = arith.constant 0 : i32
    return %c0_i32, %c0_i32_0 : i32, i32
  }
  func.func @transform_10(%arg0: i32, %arg1: i32) -> (i32, i32) {
    %c0_i32 = arith.constant 0 : i32
    %c0_i32_0 = arith.constant 0 : i32
    %c0_i32_1 = arith.constant 0 : i32
    return %c0_i32, %c0_i32_0 : i32, i32
  }
  func.func @transform_11(%arg0: i32, %arg1: i32) -> (i32, i32) {
    %c0_i32 = arith.constant 0 : i32
    %c0_i32_0 = arith.constant 0 : i32
    %c0_i32_1 = arith.constant 0 : i32
    return %c0_i32, %c0_i32_0 : i32, i32
  }
  func.func @transform_12(%arg0: i32, %arg1: i32) -> (i32, i32) {
    %c0_i32 = arith.constant 0 : i32
    %c0_i32_0 = arith.constant 0 : i32
    %c0_i32_1 = arith.constant 0 : i32
    return %c0_i32, %c0_i32_0 : i32, i32
  }
  func.func @transform_13(%arg0: i32, %arg1: i32) -> (i32, i32) {
    %c0_i32 = arith.constant 0 : i32
    %c0_i32_0 = arith.constant 0 : i32
    %c0_i32_1 = arith.constant 0 : i32
    return %c0_i32, %c0_i32_0 : i32, i32
  }
  func.func @transform_14(%arg0: i32, %arg1: i32) -> (i32, i32) {
    %c0_i32 = arith.constant 0 : i32
    %c0_i32_0 = arith.constant 0 : i32
    %c0_i32_1 = arith.constant 0 : i32
    return %c0_i32, %c0_i32_0 : i32, i32
  }
  func.func @transform_15(%arg0: i32, %arg1: i32) -> (i32, i32) {
    %c0_i32 = arith.constant 0 : i32
    %c0_i32_0 = arith.constant 0 : i32
    %c0_i32_1 = arith.constant 0 : i32
    return %c0_i32, %c0_i32_0 : i32, i32
  }
  func.func @transform_16(%arg0: i32, %arg1: i32) -> (i32, i32) {
    %c0_i32 = arith.constant 0 : i32
    %c0_i32_0 = arith.constant 0 : i32
    %c0_i32_1 = arith.constant 0 : i32
    return %c0_i32, %c0_i32_0 : i32, i32
  }
  func.func @transform_17(%arg0: i32, %arg1: i32) -> (i32, i32, i32) {
    %c0_i32 = arith.constant 0 : i32
    %c0_i32_0 = arith.constant 0 : i32
    return %arg0, %arg1, %c0_i32 : i32, i32, i32
  }
}

module attributes {stable_mosaic.version = 11 : i64} {
  func.func @_resblock_kernel(%arg0: i32, %arg1: i32, %arg2: memref<1x16x64xf32, #tpu.memory_space<vmem>>, %arg3: memref<1x64xf32, #tpu.memory_space<vmem>>, %arg4: memref<1x64xf32, #tpu.memory_space<vmem>>, %arg5: memref<64x64xbf16, #tpu.memory_space<vmem>>, %arg6: memref<1x64xf32, #tpu.memory_space<vmem>>, %arg7: memref<64x64xbf16, #tpu.memory_space<vmem>>, %arg8: memref<1x64xf32, #tpu.memory_space<vmem>>, %arg9: memref<64x64xbf16, #tpu.memory_space<vmem>>, %arg10: memref<1x64xf32, #tpu.memory_space<vmem>>, %arg11: memref<64x64xbf16, #tpu.memory_space<vmem>>, %arg12: memref<1x64xf32, #tpu.memory_space<vmem>>, %arg13: memref<1x64xf32, #tpu.memory_space<vmem>>, %arg14: memref<1x64xf32, #tpu.memory_space<vmem>>, %arg15: memref<256x64xbf16, #tpu.memory_space<vmem>>, %arg16: memref<1x256xf32, #tpu.memory_space<vmem>>, %arg17: memref<64x256xbf16, #tpu.memory_space<vmem>>, %arg18: memref<1x64xf32, #tpu.memory_space<vmem>>, %arg19: memref<1x8x64xf32, #tpu.memory_space<vmem>>, %arg20: memref<4x16x16xbf16, #tpu.memory_space<vmem>>, %arg21: memref<4x16x16xbf16, #tpu.memory_space<vmem>>) attributes {dimension_semantics = [#tpu.dimension_semantics<parallel>, #tpu.dimension_semantics<arbitrary>], iteration_bounds = array<i64: 2, 2>, scalar_prefetch = 0 : i64, scratch_operands = 2 : i64, tpu.core_type = #tpu.core_type<tc>, window_params = [{transform_indices = @transform_0, window_bounds = array<i64: 1, 16, 64>}, {pipeline_mode = #tpu.pipeline_mode<synchronous>, transform_indices = @transform_1, window_bounds = array<i64: 1, 64>}, {pipeline_mode = #tpu.pipeline_mode<synchronous>, transform_indices = @transform_2, window_bounds = array<i64: 1, 64>}, {pipeline_mode = #tpu.pipeline_mode<synchronous>, transform_indices = @transform_3, window_bounds = array<i64: 64, 64>}, {pipeline_mode = #tpu.pipeline_mode<synchronous>, transform_indices = @transform_4, window_bounds = array<i64: 1, 64>}, {pipeline_mode = #tpu.pipeline_mode<synchronous>, transform_indices = @transform_5, window_bounds = array<i64: 64, 64>}, {pipeline_mode = #tpu.pipeline_mode<synchronous>, transform_indices = @transform_6, window_bounds = array<i64: 1, 64>}, {pipeline_mode = #tpu.pipeline_mode<synchronous>, transform_indices = @transform_7, window_bounds = array<i64: 64, 64>}, {pipeline_mode = #tpu.pipeline_mode<synchronous>, transform_indices = @transform_8, window_bounds = array<i64: 1, 64>}, {pipeline_mode = #tpu.pipeline_mode<synchronous>, transform_indices = @transform_9, window_bounds = array<i64: 64, 64>}, {pipeline_mode = #tpu.pipeline_mode<synchronous>, transform_indices = @transform_10, window_bounds = array<i64: 1, 64>}, {pipeline_mode = #tpu.pipeline_mode<synchronous>, transform_indices = @transform_11, window_bounds = array<i64: 1, 64>}, {pipeline_mode = #tpu.pipeline_mode<synchronous>, transform_indices = @transform_12, window_bounds = array<i64: 1, 64>}, {pipeline_mode = #tpu.pipeline_mode<synchronous>, transform_indices = @transform_13, window_bounds = array<i64: 256, 64>}, {pipeline_mode = #tpu.pipeline_mode<synchronous>, transform_indices = @transform_14, window_bounds = array<i64: 1, 256>}, {pipeline_mode = #tpu.pipeline_mode<synchronous>, transform_indices = @transform_15, window_bounds = array<i64: 64, 256>}, {pipeline_mode = #tpu.pipeline_mode<synchronous>, transform_indices = @transform_16, window_bounds = array<i64: 1, 64>}, {transform_indices = @transform_17, window_bounds = array<i64: 1, 8, 64>}]} {
    %c0_i32 = arith.constant 0 : i32
    %0 = arith.cmpi eq, %arg1, %c0_i32 : i32
    %1 = arith.extui %0 : i1 to i32
    %c0_i32_0 = arith.constant 0 : i32
    %2 = arith.cmpi ne, %1, %c0_i32_0 : i32
    scf.if %2 {
      %c0_68 = arith.constant 0 : index
      %c0_69 = arith.constant 0 : index
      %c0_70 = arith.constant 0 : index
      %142 = vector.load %arg2[%c0_68, %c0_69, %c0_70] : memref<1x16x64xf32, #tpu.memory_space<vmem>>, vector<1x16x64xf32>
      %143 = vector.shape_cast %142 : vector<1x16x64xf32> to vector<16x64xf32>
      %c0_71 = arith.constant 0 : index
      %c0_72 = arith.constant 0 : index
      %144 = vector.load %arg3[%c0_71, %c0_72] : memref<1x64xf32, #tpu.memory_space<vmem>>, vector<1x64xf32>
      %c0_73 = arith.constant 0 : index
      %c0_74 = arith.constant 0 : index
      %145 = vector.load %arg4[%c0_73, %c0_74] : memref<1x64xf32, #tpu.memory_space<vmem>>, vector<1x64xf32>
      %cst_75 = arith.constant dense<0.000000e+00> : vector<16xf32>
      %146 = vector.multi_reduction <add>, %143, %cst_75 [1] : vector<16x64xf32> to vector<16xf32>
      %147 = vector.shape_cast %146 : vector<16xf32> to vector<16x1xf32>
      %cst_76 = arith.constant 6.400000e+01 : f32
      %148 = vector.broadcast %cst_76 : f32 to vector<16x1xf32>
      %149 = arith.divf %147, %148 : vector<16x1xf32>
      %150 = vector.broadcast %149 : vector<16x1xf32> to vector<16x64xf32>
      %151 = arith.subf %143, %150 : vector<16x64xf32>
      %152 = arith.mulf %151, %151 : vector<16x64xf32>
      %cst_77 = arith.constant dense<0.000000e+00> : vector<16xf32>
      %153 = vector.multi_reduction <add>, %152, %cst_77 [1] : vector<16x64xf32> to vector<16xf32>
      %154 = vector.shape_cast %153 : vector<16xf32> to vector<16x1xf32>
      %cst_78 = arith.constant 6.400000e+01 : f32
      %155 = vector.broadcast %cst_78 : f32 to vector<16x1xf32>
      %156 = arith.divf %154, %155 : vector<16x1xf32>
      %cst_79 = arith.constant 9.99999974E-6 : f32
      %157 = vector.broadcast %cst_79 : f32 to vector<16x1xf32>
      %158 = arith.addf %156, %157 : vector<16x1xf32>
      %159 = math.rsqrt %158 : vector<16x1xf32>
      %160 = vector.broadcast %159 : vector<16x1xf32> to vector<16x64xf32>
      %161 = arith.mulf %151, %160 : vector<16x64xf32>
      %162 = vector.broadcast %144 : vector<1x64xf32> to vector<16x64xf32>
      %163 = arith.mulf %161, %162 : vector<16x64xf32>
      %164 = vector.broadcast %145 : vector<1x64xf32> to vector<16x64xf32>
      %165 = arith.addf %163, %164 : vector<16x64xf32>
      %c0_80 = arith.constant 0 : index
      %c0_81 = arith.constant 0 : index
      %166 = vector.load %arg7[%c0_80, %c0_81] : memref<64x64xbf16, #tpu.memory_space<vmem>>, vector<64x64xbf16>
      %c0_82 = arith.constant 0 : index
      %c0_83 = arith.constant 0 : index
      %167 = vector.load %arg8[%c0_82, %c0_83] : memref<1x64xf32, #tpu.memory_space<vmem>>, vector<1x64xf32>
      %168 = arith.truncf %165 : vector<16x64xf32> to vector<16x64xbf16>
      %cst_84 = arith.constant dense<0.000000e+00> : vector<16x64xf32>
      %169 = tpu.matmul %168, %166, %cst_84 {dimension_numbers = #tpu.dot_dimension_numbers<[1], [1], [0], [0], [0, 0, 1, 0], [], []>} : vector<16x64xbf16>, vector<64x64xbf16>, vector<16x64xf32> -> vector<16x64xf32>
      %170 = vector.broadcast %167 : vector<1x64xf32> to vector<16x64xf32>
      %171 = arith.addf %169, %170 : vector<16x64xf32>
      %172 = vector.shape_cast %171 : vector<16x64xf32> to vector<16x4x16xf32>
      %173 = tpu.transpose %172, [1, 0, 2] : vector<16x4x16xf32> -> vector<4x16x16xf32>
      %174 = arith.truncf %173 : vector<4x16x16xf32> to vector<4x16x16xbf16>
      %c0_85 = arith.constant 0 : index
      %c0_86 = arith.constant 0 : index
      %c0_87 = arith.constant 0 : index
      %175 = vector.load %arg20[%c0_85, %c0_86, %c0_87] : memref<4x16x16xbf16, #tpu.memory_space<vmem>>, vector<4x16x16xbf16>
      tpu.vector_store %arg20[%c0_85, %c0_86, %c0_87], %174 {strides = array<i32>} : memref<4x16x16xbf16, #tpu.memory_space<vmem>>, vector<4x16x16xbf16>,
      %c0_88 = arith.constant 0 : index
      %c0_89 = arith.constant 0 : index
      %176 = vector.load %arg9[%c0_88, %c0_89] : memref<64x64xbf16, #tpu.memory_space<vmem>>, vector<64x64xbf16>
      %c0_90 = arith.constant 0 : index
      %c0_91 = arith.constant 0 : index
      %177 = vector.load %arg10[%c0_90, %c0_91] : memref<1x64xf32, #tpu.memory_space<vmem>>, vector<1x64xf32>
      %178 = arith.truncf %165 : vector<16x64xf32> to vector<16x64xbf16>
      %cst_92 = arith.constant dense<0.000000e+00> : vector<16x64xf32>
      %179 = tpu.matmul %178, %176, %cst_92 {dimension_numbers = #tpu.dot_dimension_numbers<[1], [1], [0], [0], [0, 0, 1, 0], [], []>} : vector<16x64xbf16>, vector<64x64xbf16>, vector<16x64xf32> -> vector<16x64xf32>
      %180 = vector.broadcast %177 : vector<1x64xf32> to vector<16x64xf32>
      %181 = arith.addf %179, %180 : vector<16x64xf32>
      %182 = vector.shape_cast %181 : vector<16x64xf32> to vector<16x4x16xf32>
      %183 = tpu.transpose %182, [1, 0, 2] : vector<16x4x16xf32> -> vector<4x16x16xf32>
      %184 = arith.truncf %183 : vector<4x16x16xf32> to vector<4x16x16xbf16>
      %c0_93 = arith.constant 0 : index
      %c0_94 = arith.constant 0 : index
      %c0_95 = arith.constant 0 : index
      %185 = vector.load %arg21[%c0_93, %c0_94, %c0_95] : memref<4x16x16xbf16, #tpu.memory_space<vmem>>, vector<4x16x16xbf16>
      tpu.vector_store %arg21[%c0_93, %c0_94, %c0_95], %184 {strides = array<i32>} : memref<4x16x16xbf16, #tpu.memory_space<vmem>>, vector<4x16x16xbf16>,
    } else {
    }
    %c8_i32 = arith.constant 8 : i32
    %3 = arith.muli %arg1, %c8_i32 : i32
    %4 = tpu.assume_multiple %3, 8 : i32
    %c0 = arith.constant 0 : index
    %5 = arith.index_cast %4 : i32 to index
    %c0_1 = arith.constant 0 : index
    %6 = vector.load %arg2[%c0, %5, %c0_1] : memref<1x16x64xf32, #tpu.memory_space<vmem>>, vector<1x8x64xf32>
    %7 = vector.shape_cast %6 : vector<1x8x64xf32> to vector<8x64xf32>
    %c0_2 = arith.constant 0 : index
    %c0_3 = arith.constant 0 : index
    %8 = vector.load %arg3[%c0_2, %c0_3] : memref<1x64xf32, #tpu.memory_space<vmem>>, vector<1x64xf32>
    %c0_4 = arith.constant 0 : index
    %c0_5 = arith.constant 0 : index
    %9 = vector.load %arg4[%c0_4, %c0_5] : memref<1x64xf32, #tpu.memory_space<vmem>>, vector<1x64xf32>
    %cst = arith.constant dense<0.000000e+00> : vector<8xf32>
    %10 = vector.multi_reduction <add>, %7, %cst [1] : vector<8x64xf32> to vector<8xf32>
    %11 = vector.shape_cast %10 : vector<8xf32> to vector<8x1xf32>
    %cst_6 = arith.constant 6.400000e+01 : f32
    %12 = vector.broadcast %cst_6 : f32 to vector<8x1xf32>
    %13 = arith.divf %11, %12 : vector<8x1xf32>
    %14 = vector.broadcast %13 : vector<8x1xf32> to vector<8x64xf32>
    %15 = arith.subf %7, %14 : vector<8x64xf32>
    %16 = arith.mulf %15, %15 : vector<8x64xf32>
    %cst_7 = arith.constant dense<0.000000e+00> : vector<8xf32>
    %17 = vector.multi_reduction <add>, %16, %cst_7 [1] : vector<8x64xf32> to vector<8xf32>
    %18 = vector.shape_cast %17 : vector<8xf32> to vector<8x1xf32>
    %cst_8 = arith.constant 6.400000e+01 : f32
    %19 = vector.broadcast %cst_8 : f32 to vector<8x1xf32>
    %20 = arith.divf %18, %19 : vector<8x1xf32>
    %cst_9 = arith.constant 9.99999974E-6 : f32
    %21 = vector.broadcast %cst_9 : f32 to vector<8x1xf32>
    %22 = arith.addf %20, %21 : vector<8x1xf32>
    %23 = math.rsqrt %22 : vector<8x1xf32>
    %24 = vector.broadcast %23 : vector<8x1xf32> to vector<8x64xf32>
    %25 = arith.mulf %15, %24 : vector<8x64xf32>
    %26 = vector.broadcast %8 : vector<1x64xf32> to vector<8x64xf32>
    %27 = arith.mulf %25, %26 : vector<8x64xf32>
    %28 = vector.broadcast %9 : vector<1x64xf32> to vector<8x64xf32>
    %29 = arith.addf %27, %28 : vector<8x64xf32>
    %c0_10 = arith.constant 0 : index
    %c0_11 = arith.constant 0 : index
    %30 = vector.load %arg5[%c0_10, %c0_11] : memref<64x64xbf16, #tpu.memory_space<vmem>>, vector<64x64xbf16>
    %c0_12 = arith.constant 0 : index
    %c0_13 = arith.constant 0 : index
    %31 = vector.load %arg6[%c0_12, %c0_13] : memref<1x64xf32, #tpu.memory_space<vmem>>, vector<1x64xf32>
    %32 = arith.truncf %29 : vector<8x64xf32> to vector<8x64xbf16>
    %cst_14 = arith.constant dense<0.000000e+00> : vector<8x64xf32>
    %33 = tpu.matmul %32, %30, %cst_14 {dimension_numbers = #tpu.dot_dimension_numbers<[1], [1], [0], [0], [0, 0, 1, 0], [], []>} : vector<8x64xbf16>, vector<64x64xbf16>, vector<8x64xf32> -> vector<8x64xf32>
    %34 = vector.broadcast %31 : vector<1x64xf32> to vector<8x64xf32>
    %35 = arith.addf %33, %34 : vector<8x64xf32>
    %cst_15 = arith.constant 2.500000e-01 : f32
    %36 = vector.broadcast %cst_15 : f32 to vector<8x64xf32>
    %37 = arith.mulf %35, %36 : vector<8x64xf32>
    %38 = vector.shape_cast %37 : vector<8x64xf32> to vector<8x4x16xf32>
    %39 = tpu.transpose %38, [1, 0, 2] : vector<8x4x16xf32> -> vector<4x8x16xf32>
    %40 = arith.truncf %39 : vector<4x8x16xf32> to vector<4x8x16xbf16>
    %cst_16 = arith.constant 0xFF800000 : f32
    %41 = vector.broadcast %cst_16 : f32 to vector<4x8x1xf32>
    %cst_17 = arith.constant 0.000000e+00 : f32
    %42 = vector.broadcast %cst_17 : f32 to vector<4x8x1xf32>
    %cst_18 = arith.constant 0.000000e+00 : f32
    %43 = vector.broadcast %cst_18 : f32 to vector<4x8x16xf32>
    %c0_19 = arith.constant 0 : index
    %c0_20 = arith.constant 0 : index
    %c0_21 = arith.constant 0 : index
    %44 = vector.load %arg20[%c0_19, %c0_20, %c0_21] : memref<4x16x16xbf16, #tpu.memory_space<vmem>>, vector<4x8x16xbf16>
    %c0_22 = arith.constant 0 : index
    %c0_23 = arith.constant 0 : index
    %c0_24 = arith.constant 0 : index
    %45 = vector.load %arg21[%c0_22, %c0_23, %c0_24] : memref<4x16x16xbf16, #tpu.memory_space<vmem>>, vector<4x8x16xbf16>
    "tpu.trace_start"() <{level = 10 : i32, message = "hqd,hkd->hqk"}> : () -> ()
    %cst_25 = arith.constant dense<0.000000e+00> : vector<4x8x8xf32>
    %46 = tpu.matmul %40, %44, %cst_25 {dimension_numbers = #tpu.dot_dimension_numbers<[2], [2], [1], [1], [0, 0, 0, 1, 1, 1], [0], [0]>} : vector<4x8x16xbf16>, vector<4x8x16xbf16>, vector<4x8x8xf32> -> vector<4x8x8xf32>
    "tpu.trace_stop"() : () -> ()
    %cst_26 = arith.constant dense<0xFF800000> : vector<4x8xf32>
    %47 = vector.multi_reduction <maximumf>, %46, %cst_26 [2] : vector<4x8x8xf32> to vector<4x8xf32>
    %48 = vector.shape_cast %47 : vector<4x8xf32> to vector<4x8x1xf32>
    %49 = arith.maximumf %41, %48 : vector<4x8x1xf32>
    %50 = arith.subf %41, %49 : vector<4x8x1xf32>
    %51 = math.exp %50 : vector<4x8x1xf32>
    %52 = vector.broadcast %49 : vector<4x8x1xf32> to vector<4x8x8xf32>
    %53 = arith.subf %46, %52 : vector<4x8x8xf32>
    %54 = math.exp %53 : vector<4x8x8xf32>
    %55 = arith.mulf %51, %42 : vector<4x8x1xf32>
    %cst_27 = arith.constant dense<0.000000e+00> : vector<4x8xf32>
    %56 = vector.multi_reduction <add>, %54, %cst_27 [2] : vector<4x8x8xf32> to vector<4x8xf32>
    %57 = vector.shape_cast %56 : vector<4x8xf32> to vector<4x8x1xf32>
    %58 = arith.addf %55, %57 : vector<4x8x1xf32>
    %59 = vector.broadcast %51 : vector<4x8x1xf32> to vector<4x8x16xf32>
    %60 = arith.mulf %59, %43 : vector<4x8x16xf32>
    %61 = arith.truncf %54 : vector<4x8x8xf32> to vector<4x8x8xbf16>
    "tpu.trace_start"() <{level = 10 : i32, message = "hqk,hkd->hqd"}> : () -> ()
    %cst_28 = arith.constant dense<0.000000e+00> : vector<4x8x16xf32>
    %62 = tpu.matmul %61, %45, %cst_28 {dimension_numbers = #tpu.dot_dimension_numbers<[2], [1], [1], [2], [0, 0, 0, 1, 1, 2], [0], [0]>} : vector<4x8x8xbf16>, vector<4x8x16xbf16>, vector<4x8x16xf32> -> vector<4x8x16xf32>
    "tpu.trace_stop"() : () -> ()
    %63 = arith.addf %60, %62 : vector<4x8x16xf32>
    %c0_29 = arith.constant 0 : index
    %c8 = arith.constant 8 : index
    %c0_30 = arith.constant 0 : index
    %64 = vector.load %arg20[%c0_29, %c8, %c0_30] : memref<4x16x16xbf16, #tpu.memory_space<vmem>>, vector<4x8x16xbf16>
    %c0_31 = arith.constant 0 : index
    %c8_32 = arith.constant 8 : index
    %c0_33 = arith.constant 0 : index
    %65 = vector.load %arg21[%c0_31, %c8_32, %c0_33] : memref<4x16x16xbf16, #tpu.memory_space<vmem>>, vector<4x8x16xbf16>
    "tpu.trace_start"() <{level = 10 : i32, message = "hqd,hkd->hqk"}> : () -> ()
    %cst_34 = arith.constant dense<0.000000e+00> : vector<4x8x8xf32>
    %66 = tpu.matmul %40, %64, %cst_34 {dimension_numbers = #tpu.dot_dimension_numbers<[2], [2], [1], [1], [0, 0, 0, 1, 1, 1], [0], [0]>} : vector<4x8x16xbf16>, vector<4x8x16xbf16>, vector<4x8x8xf32> -> vector<4x8x8xf32>
    "tpu.trace_stop"() : () -> ()
    %cst_35 = arith.constant dense<0xFF800000> : vector<4x8xf32>
    %67 = vector.multi_reduction <maximumf>, %66, %cst_35 [2] : vector<4x8x8xf32> to vector<4x8xf32>
    %68 = vector.shape_cast %67 : vector<4x8xf32> to vector<4x8x1xf32>
    %69 = arith.maximumf %49, %68 : vector<4x8x1xf32>
    %70 = arith.subf %49, %69 : vector<4x8x1xf32>
    %71 = math.exp %70 : vector<4x8x1xf32>
    %72 = vector.broadcast %69 : vector<4x8x1xf32> to vector<4x8x8xf32>
    %73 = arith.subf %66, %72 : vector<4x8x8xf32>
    %74 = math.exp %73 : vector<4x8x8xf32>
    %75 = arith.mulf %71, %58 : vector<4x8x1xf32>
    %cst_36 = arith.constant dense<0.000000e+00> : vector<4x8xf32>
    %76 = vector.multi_reduction <add>, %74, %cst_36 [2] : vector<4x8x8xf32> to vector<4x8xf32>
    %77 = vector.shape_cast %76 : vector<4x8xf32> to vector<4x8x1xf32>
    %78 = arith.addf %75, %77 : vector<4x8x1xf32>
    %79 = vector.broadcast %71 : vector<4x8x1xf32> to vector<4x8x16xf32>
    %80 = arith.mulf %79, %63 : vector<4x8x16xf32>
    %81 = arith.truncf %74 : vector<4x8x8xf32> to vector<4x8x8xbf16>
    "tpu.trace_start"() <{level = 10 : i32, message = "hqk,hkd->hqd"}> : () -> ()
    %cst_37 = arith.constant dense<0.000000e+00> : vector<4x8x16xf32>
    %82 = tpu.matmul %81, %65, %cst_37 {dimension_numbers = #tpu.dot_dimension_numbers<[2], [1], [1], [2], [0, 0, 0, 1, 1, 2], [0], [0]>} : vector<4x8x8xbf16>, vector<4x8x16xbf16>, vector<4x8x16xf32> -> vector<4x8x16xf32>
    "tpu.trace_stop"() : () -> ()
    %83 = arith.addf %80, %82 : vector<4x8x16xf32>
    %84 = tpu.reciprocal %78 {approx = true} : vector<4x8x1xf32> -> vector<4x8x1xf32>
    %85 = vector.broadcast %84 : vector<4x8x1xf32> to vector<4x8x16xf32>
    %86 = arith.mulf %83, %85 : vector<4x8x16xf32>
    %87 = tpu.transpose %86, [1, 0, 2] : vector<4x8x16xf32> -> vector<8x4x16xf32>
    %88 = vector.shape_cast %87 : vector<8x4x16xf32> to vector<8x64xf32>
    %c0_38 = arith.constant 0 : index
    %c0_39 = arith.constant 0 : index
    %89 = vector.load %arg11[%c0_38, %c0_39] : memref<64x64xbf16, #tpu.memory_space<vmem>>, vector<64x64xbf16>
    %c0_40 = arith.constant 0 : index
    %c0_41 = arith.constant 0 : index
    %90 = vector.load %arg12[%c0_40, %c0_41] : memref<1x64xf32, #tpu.memory_space<vmem>>, vector<1x64xf32>
    %91 = arith.truncf %88 : vector<8x64xf32> to vector<8x64xbf16>
    %cst_42 = arith.constant dense<0.000000e+00> : vector<8x64xf32>
    %92 = tpu.matmul %91, %89, %cst_42 {dimension_numbers = #tpu.dot_dimension_numbers<[1], [1], [0], [0], [0, 0, 1, 0], [], []>} : vector<8x64xbf16>, vector<64x64xbf16>, vector<8x64xf32> -> vector<8x64xf32>
    %93 = vector.broadcast %90 : vector<1x64xf32> to vector<8x64xf32>
    %94 = arith.addf %92, %93 : vector<8x64xf32>
    %95 = arith.addf %7, %94 : vector<8x64xf32>
    %c0_43 = arith.constant 0 : index
    %c0_44 = arith.constant 0 : index
    %96 = vector.load %arg13[%c0_43, %c0_44] : memref<1x64xf32, #tpu.memory_space<vmem>>, vector<1x64xf32>
    %c0_45 = arith.constant 0 : index
    %c0_46 = arith.constant 0 : index
    %97 = vector.load %arg14[%c0_45, %c0_46] : memref<1x64xf32, #tpu.memory_space<vmem>>, vector<1x64xf32>
    %cst_47 = arith.constant dense<0.000000e+00> : vector<8xf32>
    %98 = vector.multi_reduction <add>, %95, %cst_47 [1] : vector<8x64xf32> to vector<8xf32>
    %99 = vector.shape_cast %98 : vector<8xf32> to vector<8x1xf32>
    %cst_48 = arith.constant 6.400000e+01 : f32
    %100 = vector.broadcast %cst_48 : f32 to vector<8x1xf32>
    %101 = arith.divf %99, %100 : vector<8x1xf32>
    %102 = vector.broadcast %101 : vector<8x1xf32> to vector<8x64xf32>
    %103 = arith.subf %95, %102 : vector<8x64xf32>
    %104 = arith.mulf %103, %103 : vector<8x64xf32>
    %cst_49 = arith.constant dense<0.000000e+00> : vector<8xf32>
    %105 = vector.multi_reduction <add>, %104, %cst_49 [1] : vector<8x64xf32> to vector<8xf32>
    %106 = vector.shape_cast %105 : vector<8xf32> to vector<8x1xf32>
    %cst_50 = arith.constant 6.400000e+01 : f32
    %107 = vector.broadcast %cst_50 : f32 to vector<8x1xf32>
    %108 = arith.divf %106, %107 : vector<8x1xf32>
    %cst_51 = arith.constant 9.99999974E-6 : f32
    %109 = vector.broadcast %cst_51 : f32 to vector<8x1xf32>
    %110 = arith.addf %108, %109 : vector<8x1xf32>
    %111 = math.rsqrt %110 : vector<8x1xf32>
    %112 = vector.broadcast %111 : vector<8x1xf32> to vector<8x64xf32>
    %113 = arith.mulf %103, %112 : vector<8x64xf32>
    %114 = vector.broadcast %96 : vector<1x64xf32> to vector<8x64xf32>
    %115 = arith.mulf %113, %114 : vector<8x64xf32>
    %116 = vector.broadcast %97 : vector<1x64xf32> to vector<8x64xf32>
    %117 = arith.addf %115, %116 : vector<8x64xf32>
    %c0_52 = arith.constant 0 : index
    %c0_53 = arith.constant 0 : index
    %118 = vector.load %arg15[%c0_52, %c0_53] : memref<256x64xbf16, #tpu.memory_space<vmem>>, vector<256x64xbf16>
    %c0_54 = arith.constant 0 : index
    %c0_55 = arith.constant 0 : index
    %119 = vector.load %arg16[%c0_54, %c0_55] : memref<1x256xf32, #tpu.memory_space<vmem>>, vector<1x256xf32>
    %120 = arith.truncf %117 : vector<8x64xf32> to vector<8x64xbf16>
    %cst_56 = arith.constant dense<0.000000e+00> : vector<8x256xf32>
    %121 = tpu.matmul %120, %118, %cst_56 {dimension_numbers = #tpu.dot_dimension_numbers<[1], [1], [0], [0], [0, 0, 1, 0], [], []>} : vector<8x64xbf16>, vector<256x64xbf16>, vector<8x256xf32> -> vector<8x256xf32>
    %122 = vector.broadcast %119 : vector<1x256xf32> to vector<8x256xf32>
    %123 = arith.addf %121, %122 : vector<8x256xf32>
    %cst_57 = arith.constant 5.000000e-01 : f32
    %124 = vector.broadcast %cst_57 : f32 to vector<8x256xf32>
    %125 = arith.mulf %124, %123 : vector<8x256xf32>
    %cst_58 = arith.constant 0.707106769 : f32
    %126 = vector.broadcast %cst_58 : f32 to vector<8x256xf32>
    %127 = arith.mulf %123, %126 : vector<8x256xf32>
    %128 = math.erf %127 : vector<8x256xf32>
    %cst_59 = arith.constant 1.000000e+00 : f32
    %129 = vector.broadcast %cst_59 : f32 to vector<8x256xf32>
    %130 = arith.addf %129, %128 : vector<8x256xf32>
    %131 = arith.mulf %125, %130 : vector<8x256xf32>
    %c0_60 = arith.constant 0 : index
    %c0_61 = arith.constant 0 : index
    %132 = vector.load %arg17[%c0_60, %c0_61] : memref<64x256xbf16, #tpu.memory_space<vmem>>, vector<64x256xbf16>
    %c0_62 = arith.constant 0 : index
    %c0_63 = arith.constant 0 : index
    %133 = vector.load %arg18[%c0_62, %c0_63] : memref<1x64xf32, #tpu.memory_space<vmem>>, vector<1x64xf32>
    %134 = arith.truncf %131 : vector<8x256xf32> to vector<8x256xbf16>
    %cst_64 = arith.constant dense<0.000000e+00> : vector<8x64xf32>
    %135 = tpu.matmul %134, %132, %cst_64 {dimension_numbers = #tpu.dot_dimension_numbers<[1], [1], [0], [0], [0, 0, 1, 0], [], []>} : vector<8x256xbf16>, vector<64x256xbf16>, vector<8x64xf32> -> vector<8x64xf32>
    %136 = vector.broadcast %133 : vector<1x64xf32> to vector<8x64xf32>
    %137 = arith.addf %135, %136 : vector<8x64xf32>
    %138 = arith.addf %95, %137 : vector<8x64xf32>
    %c0_65 = arith.constant 0 : index
    %c0_66 = arith.constant 0 : index
    %c0_67 = arith.constant 0 : index
    %139 = vector.load %arg19[%c0_65, %c0_66, %c0_67] : memref<1x8x64xf32, #tpu.memory_space<vmem>>, vector<1x8x64xf32>
    %140 = vector.shape_cast %139 : vector<1x8x64xf32> to vector<8x64xf32>
    %141 = vector.shape_cast %138 : vector<8x64xf32> to vector<1x8x64xf32>
    tpu.vector_store %arg19[%c0_65, %c0_66, %c0_67], %141 {strides = array<i32>} : memref<1x8x64xf32, #tpu.memory_space<vmem>>, vector<1x8x64xf32>,
    return
  }
  func.func @transform_0(%arg0: i32, %arg1: i32) -> (i32, i32, i32) {
    %c0_i32 = arith.constant 0 : i32
    %c0_i32_0 = arith.constant 0 : i32
    %c0_i32_1 = arith.constant 0 : i32
    return %arg0, %c0_i32, %c0_i32_0 : i32, i32, i32
  }
  func.func @transform_1(%arg0: i32, %arg1: i32) -> (i32, i32) {
    %c0_i32 = arith.constant 0 : i32
    %c0_i32_0 = arith.constant 0 : i32
    %c0_i32_1 = arith.constant 0 : i32
    return %c0_i32, %c0_i32_0 : i32, i32
  }
  func.func @transform_2(%arg0: i32, %arg1: i32) -> (i32, i32) {
    %c0_i32 = arith.constant 0 : i32
    %c0_i32_0 = arith.constant 0 : i32
    %c0_i32_1 = arith.constant 0 : i32
    return %c0_i32, %c0_i32_0 : i32, i32
  }
  func.func @transform_3(%arg0: i32, %arg1: i32) -> (i32, i32) {
    %c0_i32 = arith.constant 0 : i32
    %c0_i32_0 = arith.constant 0 : i32
    %c0_i32_1 = arith.constant 0 : i32
    return %c0_i32, %c0_i32_0 : i32, i32
  }
  func.func @transform_4(%arg0: i32, %arg1: i32) -> (i32, i32) {
    %c0_i32 = arith.constant 0 : i32
    %c0_i32_0 = arith.constant 0 : i32
    %c0_i32_1 = arith.constant 0 : i32
    return %c0_i32, %c0_i32_0 : i32, i32
  }
  func.func @transform_5(%arg0: i32, %arg1: i32) -> (i32, i32) {
    %c0_i32 = arith.constant 0 : i32
    %c0_i32_0 = arith.constant 0 : i32
    %c0_i32_1 = arith.constant 0 : i32
    return %c0_i32, %c0_i32_0 : i32, i32
  }
  func.func @transform_6(%arg0: i32, %arg1: i32) -> (i32, i32) {
    %c0_i32 = arith.constant 0 : i32
    %c0_i32_0 = arith.constant 0 : i32
    %c0_i32_1 = arith.constant 0 : i32
    return %c0_i32, %c0_i32_0 : i32, i32
  }
  func.func @transform_7(%arg0: i32, %arg1: i32) -> (i32, i32) {
    %c0_i32 = arith.constant 0 : i32
    %c0_i32_0 = arith.constant 0 : i32
    %c0_i32_1 = arith.constant 0 : i32
    return %c0_i32, %c0_i32_0 : i32, i32
  }
  func.func @transform_8(%arg0: i32, %arg1: i32) -> (i32, i32) {
    %c0_i32 = arith.constant 0 : i32
    %c0_i32_0 = arith.constant 0 : i32
    %c0_i32_1 = arith.constant 0 : i32
    return %c0_i32, %c0_i32_0 : i32, i32
  }
  func.func @transform_9(%arg0: i32, %arg1: i32) -> (i32, i32) {
    %c0_i32 = arith.constant 0 : i32
    %c0_i32_0 = arith.constant 0 : i32
    %c0_i32_1 = arith.constant 0 : i32
    return %c0_i32, %c0_i32_0 : i32, i32
  }
  func.func @transform_10(%arg0: i32, %arg1: i32) -> (i32, i32) {
    %c0_i32 = arith.constant 0 : i32
    %c0_i32_0 = arith.constant 0 : i32
    %c0_i32_1 = arith.constant 0 : i32
    return %c0_i32, %c0_i32_0 : i32, i32
  }
  func.func @transform_11(%arg0: i32, %arg1: i32) -> (i32, i32) {
    %c0_i32 = arith.constant 0 : i32
    %c0_i32_0 = arith.constant 0 : i32
    %c0_i32_1 = arith.constant 0 : i32
    return %c0_i32, %c0_i32_0 : i32, i32
  }
  func.func @transform_12(%arg0: i32, %arg1: i32) -> (i32, i32) {
    %c0_i32 = arith.constant 0 : i32
    %c0_i32_0 = arith.constant 0 : i32
    %c0_i32_1 = arith.constant 0 : i32
    return %c0_i32, %c0_i32_0 : i32, i32
  }
  func.func @transform_13(%arg0: i32, %arg1: i32) -> (i32, i32) {
    %c0_i32 = arith.constant 0 : i32
    %c0_i32_0 = arith.constant 0 : i32
    %c0_i32_1 = arith.constant 0 : i32
    return %c0_i32, %c0_i32_0 : i32, i32
  }
  func.func @transform_14(%arg0: i32, %arg1: i32) -> (i32, i32) {
    %c0_i32 = arith.constant 0 : i32
    %c0_i32_0 = arith.constant 0 : i32
    %c0_i32_1 = arith.constant 0 : i32
    return %c0_i32, %c0_i32_0 : i32, i32
  }
  func.func @transform_15(%arg0: i32, %arg1: i32) -> (i32, i32) {
    %c0_i32 = arith.constant 0 : i32
    %c0_i32_0 = arith.constant 0 : i32
    %c0_i32_1 = arith.constant 0 : i32
    return %c0_i32, %c0_i32_0 : i32, i32
  }
  func.func @transform_16(%arg0: i32, %arg1: i32) -> (i32, i32) {
    %c0_i32 = arith.constant 0 : i32
    %c0_i32_0 = arith.constant 0 : i32
    %c0_i32_1 = arith.constant 0 : i32
    return %c0_i32, %c0_i32_0 : i32, i32
  }
  func.func @transform_17(%arg0: i32, %arg1: i32) -> (i32, i32, i32) {
    %c0_i32 = arith.constant 0 : i32
    %c0_i32_0 = arith.constant 0 : i32
    return %arg0, %arg1, %c0_i32 : i32, i32, i32
  }
}

module attributes {stable_mosaic.version = 11 : i64} {
  func.func @_resblock_kernel(%arg0: i32, %arg1: i32, %arg2: memref<1x16x64xf32, #tpu.memory_space<vmem>>, %arg3: memref<1x64xf32, #tpu.memory_space<vmem>>, %arg4: memref<1x64xf32, #tpu.memory_space<vmem>>, %arg5: memref<64x64xbf16, #tpu.memory_space<vmem>>, %arg6: memref<1x64xf32, #tpu.memory_space<vmem>>, %arg7: memref<64x64xbf16, #tpu.memory_space<vmem>>, %arg8: memref<1x64xf32, #tpu.memory_space<vmem>>, %arg9: memref<64x64xbf16, #tpu.memory_space<vmem>>, %arg10: memref<1x64xf32, #tpu.memory_space<vmem>>, %arg11: memref<64x64xbf16, #tpu.memory_space<vmem>>, %arg12: memref<1x64xf32, #tpu.memory_space<vmem>>, %arg13: memref<1x64xf32, #tpu.memory_space<vmem>>, %arg14: memref<1x64xf32, #tpu.memory_space<vmem>>, %arg15: memref<256x64xbf16, #tpu.memory_space<vmem>>, %arg16: memref<1x256xf32, #tpu.memory_space<vmem>>, %arg17: memref<64x256xbf16, #tpu.memory_space<vmem>>, %arg18: memref<1x64xf32, #tpu.memory_space<vmem>>, %arg19: memref<1x8x64xf32, #tpu.memory_space<vmem>>, %arg20: memref<4x16x16xbf16, #tpu.memory_space<vmem>>, %arg21: memref<4x16x16xbf16, #tpu.memory_space<vmem>>) attributes {dimension_semantics = [#tpu.dimension_semantics<parallel>, #tpu.dimension_semantics<arbitrary>], iteration_bounds = array<i64: 2, 2>, scalar_prefetch = 0 : i64, scratch_operands = 2 : i64, tpu.core_type = #tpu.core_type<tc>, window_params = [{transform_indices = @transform_0, window_bounds = array<i64: 1, 16, 64>}, {pipeline_mode = #tpu.pipeline_mode<synchronous>, transform_indices = @transform_1, window_bounds = array<i64: 1, 64>}, {pipeline_mode = #tpu.pipeline_mode<synchronous>, transform_indices = @transform_2, window_bounds = array<i64: 1, 64>}, {pipeline_mode = #tpu.pipeline_mode<synchronous>, transform_indices = @transform_3, window_bounds = array<i64: 64, 64>}, {pipeline_mode = #tpu.pipeline_mode<synchronous>, transform_indices = @transform_4, window_bounds = array<i64: 1, 64>}, {pipeline_mode = #tpu.pipeline_mode<synchronous>, transform_indices = @transform_5, window_bounds = array<i64: 64, 64>}, {pipeline_mode = #tpu.pipeline_mode<synchronous>, transform_indices = @transform_6, window_bounds = array<i64: 1, 64>}, {pipeline_mode = #tpu.pipeline_mode<synchronous>, transform_indices = @transform_7, window_bounds = array<i64: 64, 64>}, {pipeline_mode = #tpu.pipeline_mode<synchronous>, transform_indices = @transform_8, window_bounds = array<i64: 1, 64>}, {pipeline_mode = #tpu.pipeline_mode<synchronous>, transform_indices = @transform_9, window_bounds = array<i64: 64, 64>}, {pipeline_mode = #tpu.pipeline_mode<synchronous>, transform_indices = @transform_10, window_bounds = array<i64: 1, 64>}, {pipeline_mode = #tpu.pipeline_mode<synchronous>, transform_indices = @transform_11, window_bounds = array<i64: 1, 64>}, {pipeline_mode = #tpu.pipeline_mode<synchronous>, transform_indices = @transform_12, window_bounds = array<i64: 1, 64>}, {pipeline_mode = #tpu.pipeline_mode<synchronous>, transform_indices = @transform_13, window_bounds = array<i64: 256, 64>}, {pipeline_mode = #tpu.pipeline_mode<synchronous>, transform_indices = @transform_14, window_bounds = array<i64: 1, 256>}, {pipeline_mode = #tpu.pipeline_mode<synchronous>, transform_indices = @transform_15, window_bounds = array<i64: 64, 256>}, {pipeline_mode = #tpu.pipeline_mode<synchronous>, transform_indices = @transform_16, window_bounds = array<i64: 1, 64>}, {transform_indices = @transform_17, window_bounds = array<i64: 1, 8, 64>}]} {
    %c0_i32 = arith.constant 0 : i32
    %0 = arith.cmpi eq, %arg1, %c0_i32 : i32
    %1 = arith.extui %0 : i1 to i32
    %c0_i32_0 = arith.constant 0 : i32
    %2 = arith.cmpi ne, %1, %c0_i32_0 : i32
    scf.if %2 {
      %c0_68 = arith.constant 0 : index
      %c0_69 = arith.constant 0 : index
      %c0_70 = arith.constant 0 : index
      %142 = vector.load %arg2[%c0_68, %c0_69, %c0_70] : memref<1x16x64xf32, #tpu.memory_space<vmem>>, vector<1x16x64xf32>
      %143 = vector.shape_cast %142 : vector<1x16x64xf32> to vector<16x64xf32>
      %c0_71 = arith.constant 0 : index
      %c0_72 = arith.constant 0 : index
      %144 = vector.load %arg3[%c0_71, %c0_72] : memref<1x64xf32, #tpu.memory_space<vmem>>, vector<1x64xf32>
      %c0_73 = arith.constant 0 : index
      %c0_74 = arith.constant 0 : index
      %145 = vector.load %arg4[%c0_73, %c0_74] : memref<1x64xf32, #tpu.memory_space<vmem>>, vector<1x64xf32>
      %cst_75 = arith.constant dense<0.000000e+00> : vector<16xf32>
      %146 = vector.multi_reduction <add>, %143, %cst_75 [1] : vector<16x64xf32> to vector<16xf32>
      %147 = vector.shape_cast %146 : vector<16xf32> to vector<16x1xf32>
      %cst_76 = arith.constant 6.400000e+01 : f32
      %148 = vector.broadcast %cst_76 : f32 to vector<16x1xf32>
      %149 = arith.divf %147, %148 : vector<16x1xf32>
      %150 = vector.broadcast %149 : vector<16x1xf32> to vector<16x64xf32>
      %151 = arith.subf %143, %150 : vector<16x64xf32>
      %152 = arith.mulf %151, %151 : vector<16x64xf32>
      %cst_77 = arith.constant dense<0.000000e+00> : vector<16xf32>
      %153 = vector.multi_reduction <add>, %152, %cst_77 [1] : vector<16x64xf32> to vector<16xf32>
      %154 = vector.shape_cast %153 : vector<16xf32> to vector<16x1xf32>
      %cst_78 = arith.constant 6.400000e+01 : f32
      %155 = vector.broadcast %cst_78 : f32 to vector<16x1xf32>
      %156 = arith.divf %154, %155 : vector<16x1xf32>
      %cst_79 = arith.constant 9.99999974E-6 : f32
      %157 = vector.broadcast %cst_79 : f32 to vector<16x1xf32>
      %158 = arith.addf %156, %157 : vector<16x1xf32>
      %159 = math.rsqrt %158 : vector<16x1xf32>
      %160 = vector.broadcast %159 : vector<16x1xf32> to vector<16x64xf32>
      %161 = arith.mulf %151, %160 : vector<16x64xf32>
      %162 = vector.broadcast %144 : vector<1x64xf32> to vector<16x64xf32>
      %163 = arith.mulf %161, %162 : vector<16x64xf32>
      %164 = vector.broadcast %145 : vector<1x64xf32> to vector<16x64xf32>
      %165 = arith.addf %163, %164 : vector<16x64xf32>
      %c0_80 = arith.constant 0 : index
      %c0_81 = arith.constant 0 : index
      %166 = vector.load %arg7[%c0_80, %c0_81] : memref<64x64xbf16, #tpu.memory_space<vmem>>, vector<64x64xbf16>
      %c0_82 = arith.constant 0 : index
      %c0_83 = arith.constant 0 : index
      %167 = vector.load %arg8[%c0_82, %c0_83] : memref<1x64xf32, #tpu.memory_space<vmem>>, vector<1x64xf32>
      %168 = arith.truncf %165 : vector<16x64xf32> to vector<16x64xbf16>
      %cst_84 = arith.constant dense<0.000000e+00> : vector<16x64xf32>
      %169 = tpu.matmul %168, %166, %cst_84 {dimension_numbers = #tpu.dot_dimension_numbers<[1], [1], [0], [0], [0, 0, 1, 0], [], []>} : vector<16x64xbf16>, vector<64x64xbf16>, vector<16x64xf32> -> vector<16x64xf32>
      %170 = vector.broadcast %167 : vector<1x64xf32> to vector<16x64xf32>
      %171 = arith.addf %169, %170 : vector<16x64xf32>
      %172 = vector.shape_cast %171 : vector<16x64xf32> to vector<16x4x16xf32>
      %173 = tpu.transpose %172, [1, 0, 2] : vector<16x4x16xf32> -> vector<4x16x16xf32>
      %174 = arith.truncf %173 : vector<4x16x16xf32> to vector<4x16x16xbf16>
      %c0_85 = arith.constant 0 : index
      %c0_86 = arith.constant 0 : index
      %c0_87 = arith.constant 0 : index
      %175 = vector.load %arg20[%c0_85, %c0_86, %c0_87] : memref<4x16x16xbf16, #tpu.memory_space<vmem>>, vector<4x16x16xbf16>
      tpu.vector_store %arg20[%c0_85, %c0_86, %c0_87], %174 {strides = array<i32>} : memref<4x16x16xbf16, #tpu.memory_space<vmem>>, vector<4x16x16xbf16>,
      %c0_88 = arith.constant 0 : index
      %c0_89 = arith.constant 0 : index
      %176 = vector.load %arg9[%c0_88, %c0_89] : memref<64x64xbf16, #tpu.memory_space<vmem>>, vector<64x64xbf16>
      %c0_90 = arith.constant 0 : index
      %c0_91 = arith.constant 0 : index
      %177 = vector.load %arg10[%c0_90, %c0_91] : memref<1x64xf32, #tpu.memory_space<vmem>>, vector<1x64xf32>
      %178 = arith.truncf %165 : vector<16x64xf32> to vector<16x64xbf16>
      %cst_92 = arith.constant dense<0.000000e+00> : vector<16x64xf32>
      %179 = tpu.matmul %178, %176, %cst_92 {dimension_numbers = #tpu.dot_dimension_numbers<[1], [1], [0], [0], [0, 0, 1, 0], [], []>} : vector<16x64xbf16>, vector<64x64xbf16>, vector<16x64xf32> -> vector<16x64xf32>
      %180 = vector.broadcast %177 : vector<1x64xf32> to vector<16x64xf32>
      %181 = arith.addf %179, %180 : vector<16x64xf32>
      %182 = vector.shape_cast %181 : vector<16x64xf32> to vector<16x4x16xf32>
      %183 = tpu.transpose %182, [1, 0, 2] : vector<16x4x16xf32> -> vector<4x16x16xf32>
      %184 = arith.truncf %183 : vector<4x16x16xf32> to vector<4x16x16xbf16>
      %c0_93 = arith.constant 0 : index
      %c0_94 = arith.constant 0 : index
      %c0_95 = arith.constant 0 : index
      %185 = vector.load %arg21[%c0_93, %c0_94, %c0_95] : memref<4x16x16xbf16, #tpu.memory_space<vmem>>, vector<4x16x16xbf16>
      tpu.vector_store %arg21[%c0_93, %c0_94, %c0_95], %184 {strides = array<i32>} : memref<4x16x16xbf16, #tpu.memory_space<vmem>>, vector<4x16x16xbf16>,
    } else {
    }
    %c8_i32 = arith.constant 8 : i32
    %3 = arith.muli %arg1, %c8_i32 : i32
    %4 = tpu.assume_multiple %3, 8 : i32
    %c0 = arith.constant 0 : index
    %5 = arith.index_cast %4 : i32 to index
    %c0_1 = arith.constant 0 : index
    %6 = vector.load %arg2[%c0, %5, %c0_1] : memref<1x16x64xf32, #tpu.memory_space<vmem>>, vector<1x8x64xf32>
    %7 = vector.shape_cast %6 : vector<1x8x64xf32> to vector<8x64xf32>
    %c0_2 = arith.constant 0 : index
    %c0_3 = arith.constant 0 : index
    %8 = vector.load %arg3[%c0_2, %c0_3] : memref<1x64xf32, #tpu.memory_space<vmem>>, vector<1x64xf32>
    %c0_4 = arith.constant 0 : index
    %c0_5 = arith.constant 0 : index
    %9 = vector.load %arg4[%c0_4, %c0_5] : memref<1x64xf32, #tpu.memory_space<vmem>>, vector<1x64xf32>
    %cst = arith.constant dense<0.000000e+00> : vector<8xf32>
    %10 = vector.multi_reduction <add>, %7, %cst [1] : vector<8x64xf32> to vector<8xf32>
    %11 = vector.shape_cast %10 : vector<8xf32> to vector<8x1xf32>
    %cst_6 = arith.constant 6.400000e+01 : f32
    %12 = vector.broadcast %cst_6 : f32 to vector<8x1xf32>
    %13 = arith.divf %11, %12 : vector<8x1xf32>
    %14 = vector.broadcast %13 : vector<8x1xf32> to vector<8x64xf32>
    %15 = arith.subf %7, %14 : vector<8x64xf32>
    %16 = arith.mulf %15, %15 : vector<8x64xf32>
    %cst_7 = arith.constant dense<0.000000e+00> : vector<8xf32>
    %17 = vector.multi_reduction <add>, %16, %cst_7 [1] : vector<8x64xf32> to vector<8xf32>
    %18 = vector.shape_cast %17 : vector<8xf32> to vector<8x1xf32>
    %cst_8 = arith.constant 6.400000e+01 : f32
    %19 = vector.broadcast %cst_8 : f32 to vector<8x1xf32>
    %20 = arith.divf %18, %19 : vector<8x1xf32>
    %cst_9 = arith.constant 9.99999974E-6 : f32
    %21 = vector.broadcast %cst_9 : f32 to vector<8x1xf32>
    %22 = arith.addf %20, %21 : vector<8x1xf32>
    %23 = math.rsqrt %22 : vector<8x1xf32>
    %24 = vector.broadcast %23 : vector<8x1xf32> to vector<8x64xf32>
    %25 = arith.mulf %15, %24 : vector<8x64xf32>
    %26 = vector.broadcast %8 : vector<1x64xf32> to vector<8x64xf32>
    %27 = arith.mulf %25, %26 : vector<8x64xf32>
    %28 = vector.broadcast %9 : vector<1x64xf32> to vector<8x64xf32>
    %29 = arith.addf %27, %28 : vector<8x64xf32>
    %c0_10 = arith.constant 0 : index
    %c0_11 = arith.constant 0 : index
    %30 = vector.load %arg5[%c0_10, %c0_11] : memref<64x64xbf16, #tpu.memory_space<vmem>>, vector<64x64xbf16>
    %c0_12 = arith.constant 0 : index
    %c0_13 = arith.constant 0 : index
    %31 = vector.load %arg6[%c0_12, %c0_13] : memref<1x64xf32, #tpu.memory_space<vmem>>, vector<1x64xf32>
    %32 = arith.truncf %29 : vector<8x64xf32> to vector<8x64xbf16>
    %cst_14 = arith.constant dense<0.000000e+00> : vector<8x64xf32>
    %33 = tpu.matmul %32, %30, %cst_14 {dimension_numbers = #tpu.dot_dimension_numbers<[1], [1], [0], [0], [0, 0, 1, 0], [], []>} : vector<8x64xbf16>, vector<64x64xbf16>, vector<8x64xf32> -> vector<8x64xf32>
    %34 = vector.broadcast %31 : vector<1x64xf32> to vector<8x64xf32>
    %35 = arith.addf %33, %34 : vector<8x64xf32>
    %cst_15 = arith.constant 2.500000e-01 : f32
    %36 = vector.broadcast %cst_15 : f32 to vector<8x64xf32>
    %37 = arith.mulf %35, %36 : vector<8x64xf32>
    %38 = vector.shape_cast %37 : vector<8x64xf32> to vector<8x4x16xf32>
    %39 = tpu.transpose %38, [1, 0, 2] : vector<8x4x16xf32> -> vector<4x8x16xf32>
    %40 = arith.truncf %39 : vector<4x8x16xf32> to vector<4x8x16xbf16>
    %cst_16 = arith.constant 0xFF800000 : f32
    %41 = vector.broadcast %cst_16 : f32 to vector<4x8x1xf32>
    %cst_17 = arith.constant 0.000000e+00 : f32
    %42 = vector.broadcast %cst_17 : f32 to vector<4x8x1xf32>
    %cst_18 = arith.constant 0.000000e+00 : f32
    %43 = vector.broadcast %cst_18 : f32 to vector<4x8x16xf32>
    %c0_19 = arith.constant 0 : index
    %c0_20 = arith.constant 0 : index
    %c0_21 = arith.constant 0 : index
    %44 = vector.load %arg20[%c0_19, %c0_20, %c0_21] : memref<4x16x16xbf16, #tpu.memory_space<vmem>>, vector<4x8x16xbf16>
    %c0_22 = arith.constant 0 : index
    %c0_23 = arith.constant 0 : index
    %c0_24 = arith.constant 0 : index
    %45 = vector.load %arg21[%c0_22, %c0_23, %c0_24] : memref<4x16x16xbf16, #tpu.memory_space<vmem>>, vector<4x8x16xbf16>
    "tpu.trace_start"() <{level = 10 : i32, message = "hqd,hkd->hqk"}> : () -> ()
    %cst_25 = arith.constant dense<0.000000e+00> : vector<4x8x8xf32>
    %46 = tpu.matmul %40, %44, %cst_25 {dimension_numbers = #tpu.dot_dimension_numbers<[2], [2], [1], [1], [0, 0, 0, 1, 1, 1], [0], [0]>} : vector<4x8x16xbf16>, vector<4x8x16xbf16>, vector<4x8x8xf32> -> vector<4x8x8xf32>
    "tpu.trace_stop"() : () -> ()
    %cst_26 = arith.constant dense<0xFF800000> : vector<4x8xf32>
    %47 = vector.multi_reduction <maximumf>, %46, %cst_26 [2] : vector<4x8x8xf32> to vector<4x8xf32>
    %48 = vector.shape_cast %47 : vector<4x8xf32> to vector<4x8x1xf32>
    %49 = arith.maximumf %41, %48 : vector<4x8x1xf32>
    %50 = arith.subf %41, %49 : vector<4x8x1xf32>
    %51 = math.exp %50 : vector<4x8x1xf32>
    %52 = vector.broadcast %49 : vector<4x8x1xf32> to vector<4x8x8xf32>
    %53 = arith.subf %46, %52 : vector<4x8x8xf32>
    %54 = math.exp %53 : vector<4x8x8xf32>
    %55 = arith.mulf %51, %42 : vector<4x8x1xf32>
    %cst_27 = arith.constant dense<0.000000e+00> : vector<4x8xf32>
    %56 = vector.multi_reduction <add>, %54, %cst_27 [2] : vector<4x8x8xf32> to vector<4x8xf32>
    %57 = vector.shape_cast %56 : vector<4x8xf32> to vector<4x8x1xf32>
    %58 = arith.addf %55, %57 : vector<4x8x1xf32>
    %59 = vector.broadcast %51 : vector<4x8x1xf32> to vector<4x8x16xf32>
    %60 = arith.mulf %59, %43 : vector<4x8x16xf32>
    %61 = arith.truncf %54 : vector<4x8x8xf32> to vector<4x8x8xbf16>
    "tpu.trace_start"() <{level = 10 : i32, message = "hqk,hkd->hqd"}> : () -> ()
    %cst_28 = arith.constant dense<0.000000e+00> : vector<4x8x16xf32>
    %62 = tpu.matmul %61, %45, %cst_28 {dimension_numbers = #tpu.dot_dimension_numbers<[2], [1], [1], [2], [0, 0, 0, 1, 1, 2], [0], [0]>} : vector<4x8x8xbf16>, vector<4x8x16xbf16>, vector<4x8x16xf32> -> vector<4x8x16xf32>
    "tpu.trace_stop"() : () -> ()
    %63 = arith.addf %60, %62 : vector<4x8x16xf32>
    %c0_29 = arith.constant 0 : index
    %c8 = arith.constant 8 : index
    %c0_30 = arith.constant 0 : index
    %64 = vector.load %arg20[%c0_29, %c8, %c0_30] : memref<4x16x16xbf16, #tpu.memory_space<vmem>>, vector<4x8x16xbf16>
    %c0_31 = arith.constant 0 : index
    %c8_32 = arith.constant 8 : index
    %c0_33 = arith.constant 0 : index
    %65 = vector.load %arg21[%c0_31, %c8_32, %c0_33] : memref<4x16x16xbf16, #tpu.memory_space<vmem>>, vector<4x8x16xbf16>
    "tpu.trace_start"() <{level = 10 : i32, message = "hqd,hkd->hqk"}> : () -> ()
    %cst_34 = arith.constant dense<0.000000e+00> : vector<4x8x8xf32>
    %66 = tpu.matmul %40, %64, %cst_34 {dimension_numbers = #tpu.dot_dimension_numbers<[2], [2], [1], [1], [0, 0, 0, 1, 1, 1], [0], [0]>} : vector<4x8x16xbf16>, vector<4x8x16xbf16>, vector<4x8x8xf32> -> vector<4x8x8xf32>
    "tpu.trace_stop"() : () -> ()
    %cst_35 = arith.constant dense<0xFF800000> : vector<4x8xf32>
    %67 = vector.multi_reduction <maximumf>, %66, %cst_35 [2] : vector<4x8x8xf32> to vector<4x8xf32>
    %68 = vector.shape_cast %67 : vector<4x8xf32> to vector<4x8x1xf32>
    %69 = arith.maximumf %49, %68 : vector<4x8x1xf32>
    %70 = arith.subf %49, %69 : vector<4x8x1xf32>
    %71 = math.exp %70 : vector<4x8x1xf32>
    %72 = vector.broadcast %69 : vector<4x8x1xf32> to vector<4x8x8xf32>
    %73 = arith.subf %66, %72 : vector<4x8x8xf32>
    %74 = math.exp %73 : vector<4x8x8xf32>
    %75 = arith.mulf %71, %58 : vector<4x8x1xf32>
    %cst_36 = arith.constant dense<0.000000e+00> : vector<4x8xf32>
    %76 = vector.multi_reduction <add>, %74, %cst_36 [2] : vector<4x8x8xf32> to vector<4x8xf32>
    %77 = vector.shape_cast %76 : vector<4x8xf32> to vector<4x8x1xf32>
    %78 = arith.addf %75, %77 : vector<4x8x1xf32>
    %79 = vector.broadcast %71 : vector<4x8x1xf32> to vector<4x8x16xf32>
    %80 = arith.mulf %79, %63 : vector<4x8x16xf32>
    %81 = arith.truncf %74 : vector<4x8x8xf32> to vector<4x8x8xbf16>
    "tpu.trace_start"() <{level = 10 : i32, message = "hqk,hkd->hqd"}> : () -> ()
    %cst_37 = arith.constant dense<0.000000e+00> : vector<4x8x16xf32>
    %82 = tpu.matmul %81, %65, %cst_37 {dimension_numbers = #tpu.dot_dimension_numbers<[2], [1], [1], [2], [0, 0, 0, 1, 1, 2], [0], [0]>} : vector<4x8x8xbf16>, vector<4x8x16xbf16>, vector<4x8x16xf32> -> vector<4x8x16xf32>
    "tpu.trace_stop"() : () -> ()
    %83 = arith.addf %80, %82 : vector<4x8x16xf32>
    %84 = tpu.reciprocal %78 {approx = true} : vector<4x8x1xf32> -> vector<4x8x1xf32>
    %85 = vector.broadcast %84 : vector<4x8x1xf32> to vector<4x8x16xf32>
    %86 = arith.mulf %83, %85 : vector<4x8x16xf32>
    %87 = tpu.transpose %86, [1, 0, 2] : vector<4x8x16xf32> -> vector<8x4x16xf32>
    %88 = vector.shape_cast %87 : vector<8x4x16xf32> to vector<8x64xf32>
    %c0_38 = arith.constant 0 : index
    %c0_39 = arith.constant 0 : index
    %89 = vector.load %arg11[%c0_38, %c0_39] : memref<64x64xbf16, #tpu.memory_space<vmem>>, vector<64x64xbf16>
    %c0_40 = arith.constant 0 : index
    %c0_41 = arith.constant 0 : index
    %90 = vector.load %arg12[%c0_40, %c0_41] : memref<1x64xf32, #tpu.memory_space<vmem>>, vector<1x64xf32>
    %91 = arith.truncf %88 : vector<8x64xf32> to vector<8x64xbf16>
    %cst_42 = arith.constant dense<0.000000e+00> : vector<8x64xf32>
    %92 = tpu.matmul %91, %89, %cst_42 {dimension_numbers = #tpu.dot_dimension_numbers<[1], [1], [0], [0], [0, 0, 1, 0], [], []>} : vector<8x64xbf16>, vector<64x64xbf16>, vector<8x64xf32> -> vector<8x64xf32>
    %93 = vector.broadcast %90 : vector<1x64xf32> to vector<8x64xf32>
    %94 = arith.addf %92, %93 : vector<8x64xf32>
    %95 = arith.addf %7, %94 : vector<8x64xf32>
    %c0_43 = arith.constant 0 : index
    %c0_44 = arith.constant 0 : index
    %96 = vector.load %arg13[%c0_43, %c0_44] : memref<1x64xf32, #tpu.memory_space<vmem>>, vector<1x64xf32>
    %c0_45 = arith.constant 0 : index
    %c0_46 = arith.constant 0 : index
    %97 = vector.load %arg14[%c0_45, %c0_46] : memref<1x64xf32, #tpu.memory_space<vmem>>, vector<1x64xf32>
    %cst_47 = arith.constant dense<0.000000e+00> : vector<8xf32>
    %98 = vector.multi_reduction <add>, %95, %cst_47 [1] : vector<8x64xf32> to vector<8xf32>
    %99 = vector.shape_cast %98 : vector<8xf32> to vector<8x1xf32>
    %cst_48 = arith.constant 6.400000e+01 : f32
    %100 = vector.broadcast %cst_48 : f32 to vector<8x1xf32>
    %101 = arith.divf %99, %100 : vector<8x1xf32>
    %102 = vector.broadcast %101 : vector<8x1xf32> to vector<8x64xf32>
    %103 = arith.subf %95, %102 : vector<8x64xf32>
    %104 = arith.mulf %103, %103 : vector<8x64xf32>
    %cst_49 = arith.constant dense<0.000000e+00> : vector<8xf32>
    %105 = vector.multi_reduction <add>, %104, %cst_49 [1] : vector<8x64xf32> to vector<8xf32>
    %106 = vector.shape_cast %105 : vector<8xf32> to vector<8x1xf32>
    %cst_50 = arith.constant 6.400000e+01 : f32
    %107 = vector.broadcast %cst_50 : f32 to vector<8x1xf32>
    %108 = arith.divf %106, %107 : vector<8x1xf32>
    %cst_51 = arith.constant 9.99999974E-6 : f32
    %109 = vector.broadcast %cst_51 : f32 to vector<8x1xf32>
    %110 = arith.addf %108, %109 : vector<8x1xf32>
    %111 = math.rsqrt %110 : vector<8x1xf32>
    %112 = vector.broadcast %111 : vector<8x1xf32> to vector<8x64xf32>
    %113 = arith.mulf %103, %112 : vector<8x64xf32>
    %114 = vector.broadcast %96 : vector<1x64xf32> to vector<8x64xf32>
    %115 = arith.mulf %113, %114 : vector<8x64xf32>
    %116 = vector.broadcast %97 : vector<1x64xf32> to vector<8x64xf32>
    %117 = arith.addf %115, %116 : vector<8x64xf32>
    %c0_52 = arith.constant 0 : index
    %c0_53 = arith.constant 0 : index
    %118 = vector.load %arg15[%c0_52, %c0_53] : memref<256x64xbf16, #tpu.memory_space<vmem>>, vector<256x64xbf16>
    %c0_54 = arith.constant 0 : index
    %c0_55 = arith.constant 0 : index
    %119 = vector.load %arg16[%c0_54, %c0_55] : memref<1x256xf32, #tpu.memory_space<vmem>>, vector<1x256xf32>
    %120 = arith.truncf %117 : vector<8x64xf32> to vector<8x64xbf16>
    %cst_56 = arith.constant dense<0.000000e+00> : vector<8x256xf32>
    %121 = tpu.matmul %120, %118, %cst_56 {dimension_numbers = #tpu.dot_dimension_numbers<[1], [1], [0], [0], [0, 0, 1, 0], [], []>} : vector<8x64xbf16>, vector<256x64xbf16>, vector<8x256xf32> -> vector<8x256xf32>
    %122 = vector.broadcast %119 : vector<1x256xf32> to vector<8x256xf32>
    %123 = arith.addf %121, %122 : vector<8x256xf32>
    %cst_57 = arith.constant 5.000000e-01 : f32
    %124 = vector.broadcast %cst_57 : f32 to vector<8x256xf32>
    %125 = arith.mulf %124, %123 : vector<8x256xf32>
    %cst_58 = arith.constant 0.707106769 : f32
    %126 = vector.broadcast %cst_58 : f32 to vector<8x256xf32>
    %127 = arith.mulf %123, %126 : vector<8x256xf32>
    %128 = math.erf %127 : vector<8x256xf32>
    %cst_59 = arith.constant 1.000000e+00 : f32
    %129 = vector.broadcast %cst_59 : f32 to vector<8x256xf32>
    %130 = arith.addf %129, %128 : vector<8x256xf32>
    %131 = arith.mulf %125, %130 : vector<8x256xf32>
    %c0_60 = arith.constant 0 : index
    %c0_61 = arith.constant 0 : index
    %132 = vector.load %arg17[%c0_60, %c0_61] : memref<64x256xbf16, #tpu.memory_space<vmem>>, vector<64x256xbf16>
    %c0_62 = arith.constant 0 : index
    %c0_63 = arith.constant 0 : index
    %133 = vector.load %arg18[%c0_62, %c0_63] : memref<1x64xf32, #tpu.memory_space<vmem>>, vector<1x64xf32>
    %134 = arith.truncf %131 : vector<8x256xf32> to vector<8x256xbf16>
    %cst_64 = arith.constant dense<0.000000e+00> : vector<8x64xf32>
    %135 = tpu.matmul %134, %132, %cst_64 {dimension_numbers = #tpu.dot_dimension_numbers<[1], [1], [0], [0], [0, 0, 1, 0], [], []>} : vector<8x256xbf16>, vector<64x256xbf16>, vector<8x64xf32> -> vector<8x64xf32>
    %136 = vector.broadcast %133 : vector<1x64xf32> to vector<8x64xf32>
    %137 = arith.addf %135, %136 : vector<8x64xf32>
    %138 = arith.addf %95, %137 : vector<8x64xf32>
    %c0_65 = arith.constant 0 : index
    %c0_66 = arith.constant 0 : index
    %c0_67 = arith.constant 0 : index
    %139 = vector.load %arg19[%c0_65, %c0_66, %c0_67] : memref<1x8x64xf32, #tpu.memory_space<vmem>>, vector<1x8x64xf32>
    %140 = vector.shape_cast %139 : vector<1x8x64xf32> to vector<8x64xf32>
    %141 = vector.shape_cast %138 : vector<8x64xf32> to vector<1x8x64xf32>
    tpu.vector_store %arg19[%c0_65, %c0_66, %c0_67], %141 {strides = array<i32>} : memref<1x8x64xf32, #tpu.memory_space<vmem>>, vector<1x8x64xf32>,
    return
  }
  func.func @transform_0(%arg0: i32, %arg1: i32) -> (i32, i32, i32) {
    %c0_i32 = arith.constant 0 : i32
    %c0_i32_0 = arith.constant 0 : i32
    %c0_i32_1 = arith.constant 0 : i32
    return %arg0, %c0_i32, %c0_i32_0 : i32, i32, i32
  }
  func.func @transform_1(%arg0: i32, %arg1: i32) -> (i32, i32) {
    %c0_i32 = arith.constant 0 : i32
    %c0_i32_0 = arith.constant 0 : i32
    %c0_i32_1 = arith.constant 0 : i32
    return %c0_i32, %c0_i32_0 : i32, i32
  }
  func.func @transform_2(%arg0: i32, %arg1: i32) -> (i32, i32) {
    %c0_i32 = arith.constant 0 : i32
    %c0_i32_0 = arith.constant 0 : i32
    %c0_i32_1 = arith.constant 0 : i32
    return %c0_i32, %c0_i32_0 : i32, i32
  }
  func.func @transform_3(%arg0: i32, %arg1: i32) -> (i32, i32) {
    %c0_i32 = arith.constant 0 : i32
    %c0_i32_0 = arith.constant 0 : i32
    %c0_i32_1 = arith.constant 0 : i32
    return %c0_i32, %c0_i32_0 : i32, i32
  }
  func.func @transform_4(%arg0: i32, %arg1: i32) -> (i32, i32) {
    %c0_i32 = arith.constant 0 : i32
    %c0_i32_0 = arith.constant 0 : i32
    %c0_i32_1 = arith.constant 0 : i32
    return %c0_i32, %c0_i32_0 : i32, i32
  }
  func.func @transform_5(%arg0: i32, %arg1: i32) -> (i32, i32) {
    %c0_i32 = arith.constant 0 : i32
    %c0_i32_0 = arith.constant 0 : i32
    %c0_i32_1 = arith.constant 0 : i32
    return %c0_i32, %c0_i32_0 : i32, i32
  }
  func.func @transform_6(%arg0: i32, %arg1: i32) -> (i32, i32) {
    %c0_i32 = arith.constant 0 : i32
    %c0_i32_0 = arith.constant 0 : i32
    %c0_i32_1 = arith.constant 0 : i32
    return %c0_i32, %c0_i32_0 : i32, i32
  }
  func.func @transform_7(%arg0: i32, %arg1: i32) -> (i32, i32) {
    %c0_i32 = arith.constant 0 : i32
    %c0_i32_0 = arith.constant 0 : i32
    %c0_i32_1 = arith.constant 0 : i32
    return %c0_i32, %c0_i32_0 : i32, i32
  }
  func.func @transform_8(%arg0: i32, %arg1: i32) -> (i32, i32) {
    %c0_i32 = arith.constant 0 : i32
    %c0_i32_0 = arith.constant 0 : i32
    %c0_i32_1 = arith.constant 0 : i32
    return %c0_i32, %c0_i32_0 : i32, i32
  }
  func.func @transform_9(%arg0: i32, %arg1: i32) -> (i32, i32) {
    %c0_i32 = arith.constant 0 : i32
    %c0_i32_0 = arith.constant 0 : i32
    %c0_i32_1 = arith.constant 0 : i32
    return %c0_i32, %c0_i32_0 : i32, i32
  }
  func.func @transform_10(%arg0: i32, %arg1: i32) -> (i32, i32) {
    %c0_i32 = arith.constant 0 : i32
    %c0_i32_0 = arith.constant 0 : i32
    %c0_i32_1 = arith.constant 0 : i32
    return %c0_i32, %c0_i32_0 : i32, i32
  }
  func.func @transform_11(%arg0: i32, %arg1: i32) -> (i32, i32) {
    %c0_i32 = arith.constant 0 : i32
    %c0_i32_0 = arith.constant 0 : i32
    %c0_i32_1 = arith.constant 0 : i32
    return %c0_i32, %c0_i32_0 : i32, i32
  }
  func.func @transform_12(%arg0: i32, %arg1: i32) -> (i32, i32) {
    %c0_i32 = arith.constant 0 : i32
    %c0_i32_0 = arith.constant 0 : i32
    %c0_i32_1 = arith.constant 0 : i32
    return %c0_i32, %c0_i32_0 : i32, i32
  }
  func.func @transform_13(%arg0: i32, %arg1: i32) -> (i32, i32) {
    %c0_i32 = arith.constant 0 : i32
    %c0_i32_0 = arith.constant 0 : i32
    %c0_i32_1 = arith.constant 0 : i32
    return %c0_i32, %c0_i32_0 : i32, i32
  }
  func.func @transform_14(%arg0: i32, %arg1: i32) -> (i32, i32) {
    %c0_i32 = arith.constant 0 : i32
    %c0_i32_0 = arith.constant 0 : i32
    %c0_i32_1 = arith.constant 0 : i32
    return %c0_i32, %c0_i32_0 : i32, i32
  }
  func.func @transform_15(%arg0: i32, %arg1: i32) -> (i32, i32) {
    %c0_i32 = arith.constant 0 : i32
    %c0_i32_0 = arith.constant 0 : i32
    %c0_i32_1 = arith.constant 0 : i32
    return %c0_i32, %c0_i32_0 : i32, i32
  }
  func.func @transform_16(%arg0: i32, %arg1: i32) -> (i32, i32) {
    %c0_i32 = arith.constant 0 : i32
    %c0_i32_0 = arith.constant 0 : i32
    %c0_i32_1 = arith.constant 0 : i32
    return %c0_i32, %c0_i32_0 : i32, i32
  }
  func.func @transform_17(%arg0: i32, %arg1: i32) -> (i32, i32, i32) {
    %c0_i32 = arith.constant 0 : i32
    %c0_i32_0 = arith.constant 0 : i32
    return %arg0, %arg1, %c0_i32 : i32, i32, i32
  }
}

</mosaic_0001>

<bundles_post_ra>
// kernel: custom_transformer.2
= control target key start
LH: loop header
LB: loop body
LE: loop exit
PB: predicated region body
PF: predicated region fallthrough
CT: control target
= control target key end

     0   :  { %s3163_s24 = smov 0   ;;  %s3165_s25 = smov 0   ;;  %s3911_s0 = inlined_call_operand.vmem [shape: f32[2,16,64], index: 0, kind: input, shape index: {}]   ;;  %s3912_s1 = inlined_call_operand.vmem [shape: f32[1,64], index: 1, kind: input, shape index: {}]   ;;  %s3913_s2 = inlined_call_operand.vmem [shape: f32[1,64], index: 2, kind: input, shape index: {}]   ;;  %s3914_s3 = inlined_call_operand.vmem [shape: bf16[64,64], index: 3, kind: input, shape index: {}]   ;;  %s3915_s4 = inlined_call_operand.vmem [shape: f32[1,64], index: 4, kind: input, shape index: {}]   ;;  %s3916_s5 = inlined_call_operand.vmem [shape: bf16[64,64], index: 5, kind: input, shape index: {}]   ;;  %s3917_s6 = inlined_call_operand.vmem [shape: f32[1,64], index: 6, kind: input, shape index: {}]   ;;  %s3918_s7 = inlined_call_operand.vmem [shape: bf16[64,64], index: 7, kind: input, shape index: {}]   ;;  %s3919_s8 = inlined_call_operand.vmem [shape: f32[1,64], index: 8, kind: input, shape index: {}]   ;;  %s3920_s9 = inlined_call_operand.vmem [shape: bf16[64,64], index: 9, kind: input, shape index: {}]   ;;  %s3921_s10 = inlined_call_operand.vmem [shape: f32[1,64], index: 10, kind: input, shape index: {}]   ;;  %s3922_s11 = inlined_call_operand.vmem [shape: f32[1,64], index: 11, kind: input, shape index: {}]   ;;  %s3923_s12 = inlined_call_operand.vmem [shape: f32[1,64], index: 12, kind: input, shape index: {}]   ;;  %s3924_s13 = inlined_call_operand.vmem [shape: bf16[256,64], index: 13, kind: input, shape index: {}]   ;;  %s3925_s14 = inlined_call_operand.vmem [shape: f32[1,256], index: 14, kind: input, shape index: {}]   ;;  %s3926_s15 = inlined_call_operand.vmem [shape: bf16[64,256], index: 15, kind: input, shape index: {}]   ;;  %s3927_s16 = inlined_call_operand.vmem [shape: f32[1,64], index: 16, kind: input, shape index: {}]   ;;  %s3928_s17 = inlined_call_operand.vmem [shape: f32[2,16,64], index: 17, kind: output, shape index: {}]  }
   0x1   :  { %3931 = sst [smem:[#allocation8_spill]] %s3911_s0  ;;  %s3167_s26 = smov 0  }
   0x2   :  { %3932 = sst [smem:[#allocation9_spill]] %s3912_s1  ;;  %s3169_s27 = smov 0  }
   0x3   :  { %s3171_s28 = smov 0  }
   0x4 LB: > { %3933 = sst [smem:[#allocation4_spill]] %s3048_s26  ;;  %s36_s29 = sadd.s32 1, %s3048_s26  ;;  %s3056_s28 = sphi %s3171_s28, %s27_s28   ;;  %s3052_s27 = sphi %s3169_s27, %s3943_s27   ;;  %s3048_s26 = sphi %s3167_s26, %s3942_s26   ;;  %s3044_s25 = sphi %s3165_s25, %s3941_s25   ;;  %s3040_s24 = sphi %s3163_s24, %s3940_s24  }
   0x5   : > { %3934 = sst [smem:[#allocation5_spill]] %s3052_s27  ;;  %s39_s0 = sadd.s32 1, %s3052_s27 }
   0x6   : > { %p37_p0 = scmp.ge.s32.totalorder %s36_s29, 2  ;;  %p2632_p1 = scmp.ge.s32.totalorder %s3056_s28, 1 }
   0x7   : > { %p501_p2 = scmp.lt.s32.totalorder %s3056_s28, 5 }
   0x8   : > { %s3945_s29 = smov (%p37_p0, %s36_s29), 0  ;;  %s3947_s0 = smov (!%p37_p0, %s39_s0), %s3052_s27 }
   0x9   : > { %3935 = sst [smem:[#allocation6_spill]] %s3945_s29  ;;  %p502_p3 = pnand %p2632_p1, %p501_p2 }
   0xa   : > { %p41_p4 = scmp.ge.s32.totalorder %s3947_s0, 2  ;;  %p556_p5 = scmp.lt.s32.totalorder (!%p502_p3), %s3044_s25, 1 }
   0xb   : > { %505 = sbr.rel (%p502_p3) target bundleno = 2753 (0xac1), region = 88  ;;  %p563_p6 = scmp.lt.s32.totalorder (!%p502_p3), %s3040_s24, 1 }
   0xc   : > { %s3949_s0 = smov (%p41_p4, %s3947_s0), 0  ;;  %s3937_s21 = sld [smem:[#allocation8_spill]] (!%p502_p3) }
   0xd   : > { %3936 = sst [smem:[#allocation7_spill]] %s3949_s0  ;;  %p2637_p7 = scmp.ne.s32.totalorder (!%p502_p3), %s3040_s24, 0 }
  0x10   : > { %s3951_s25 = smov (!%p556_p5, %s3044_s25), 1  ;;  %s3938_s1 = sld [smem:[#allocation9_spill]] (!%p2637_p7) }
  0x11   : > { %s564_s30 = scalar_select %p563_p6, %s3040_s24, 1 }
  0x12   : > { %s2825_s18 = sshll.u32 %s3951_s25, 4  ;;  %s2635_s19 = sshll.u32 %s3951_s25, 1 }
  0x13   : > { %s3200_s22 = scalar_lea.vmem %s3937_s21, %s2825_s18  ;;  %s566_s23 = sadd.s32 %s2635_s19, %s564_s30 }
  0x14   : > { %s2636_s29 = sshll.u32 %s566_s23, 3  ;;  %573 = sbr.rel (%p2637_p7) target bundleno = 622 (0x26e), region = 92 }
  0x15   : > { %s3205_s0 = scalar_lea.vmem %s3928_s17, %s2636_s29  ;;  %s3059_s26 = smov (!%p2637_p7), 80  }
  0x16   : > { %s3060_s27 = smov (!%p2637_p7), 112   ;;  %s3061_s18 = smov (!%p2637_p7), 96  }
  0x19   : > { %v574_v0 = vld [vmem:[%s3200_s22] sm:$0xff]  ;;  %vm578_vm0 = vcmask 523264   ;;  %v575_v2 = vld [vmem:[%s3200_s22 + $0x8] sm:$0xff]  ;;  %v3058_v4 = vmov 64.0   ;;  %v2829_v21 = vld [vmem:[%s3916_s5 + $0x18] sm:$0xff]  ;;  %vm723_vm8 = vcmask 1047556  }
  0x1a   : > { %v579_v1 = vsel %vm578_vm0, %v574_v0, 0.0  ;;  %v582_v3 = vsel %vm578_vm0, %v575_v2, 0.0  ;;  %2955 = vrcp.f32 %v3058_v4  ;;  %v2833_v22 = vld [vmem:[%s3918_s7 + $0x18] sm:$0xff]  ;;  %v686_v23 = vsel %vm578_vm0, %v2829_v21, 0  ;;  %v2828_v25 = vld [vmem:[%s3916_s5 + $0x10] sm:$0xff]  ;;  %v2827_v29 = vld [vmem:[%s3916_s5 + $0x8] sm:$0xff] }
  0x1b   : > { %580 = vadd.xlane.f32.xlu0 %v579_v1  ;;  %v1002_v24 = vsel %vm578_vm0, %v2833_v22, 0  ;;  %692 = vmatpush.bf16.xpose.msra.mxu0 %v686_v23  ;;  %v2832_v26 = vld [vmem:[%s3918_s7 + $0x10] sm:$0xff]  ;;  %v683_v27 = vsel %vm578_vm0, %v2828_v25, 0  ;;  %v2831_v30 = vld [vmem:[%s3918_s7 + $0x8] sm:$0xff]  ;;  %v680_v31 = vsel %vm578_vm0, %v2827_v29, 0  ;;  %v2826_v33 = vld [vmem:[%s3916_s5] sm:$0xff] }
  0x1c   : > { %1008 = vmatpush.bf16.xpose.msra.mxu1 %v1002_v24  ;;  %v999_v28 = vsel %vm578_vm0, %v2832_v26, 0  ;;  %v996_v32 = vsel %vm578_vm0, %v2831_v30, 0  ;;  %v2830_v34 = vld [vmem:[%s3918_s7] sm:$0xff]  ;;  %v677_v35 = vsel %vm578_vm0, %v2826_v33, 0  ;;  %vm951_vm9 = vcmask 125952  }
  0x1d   : > { %v993_v36 = vsel %vm578_vm0, %v2830_v34, 0  ;;  %v2951_v56 = vld [vmem:[%s3938_s1] ss:$0 sm:$0xff] }
  0x1e   : > { %v2952_v61 = vld [vmem:[%s3913_s2] ss:$0 sm:$0xff] }
  0x1f   : > { %v2953_v4 = vld [vmem:[%s3917_s6] ss:$0 sm:$0xff] }
  0x20   : > { %v2956_v5 = vpop.eup %2955 }
  0x21   : > { %v586_v6 = vmul.f32 64.0, %v2956_v5  ;;  %vm590_vm1 = vweird.f32 %v2956_v5 }
  0x23   : > { %583 = vadd.xlane.f32.xlu0 %v582_v3  ;;  %v587_v7 = vsub.f32 1.0, %v586_v6  ;;  %693 = vmatpush.bf16.xpose.msra.mxu0 %v683_v27 }
  0x24   : > { %1009 = vmatpush.bf16.xpose.msra.mxu1 %v999_v28 }
  0x25   : > { %v588_v8 = vmul.f32 %v2956_v5, %v587_v7 }
  0x27   : > { %v589_v9 = vadd.f32 %v2956_v5, %v588_v8 }
  0x29   : > { %v591_v10 = vsel %vm590_vm1, %v2956_v5, %v589_v9 }
  0x2b   : > { %694 = vmatpush.bf16.xpose.msra.mxu0 %v680_v31 }
  0x2c   : > { %1010 = vmatpush.bf16.xpose.msra.mxu1 %v996_v32 }
  0x33   : > { %695 = vmatpush.bf16.xpose.msra.mxu0 %v677_v35 }
  0x34   : > { %1011 = vmatpush.bf16.xpose.msra.mxu1 %v993_v36 }
  0x8e   : > { %v581_v11 = vpop.xlane.xlu0 %580 }
  0x8f   : > { %v592_v12 = vmul.f32 %v591_v10, %v581_v11 }
  0x91   : > { %v594_v13 = vsub.f32 %v574_v0, %v592_v12 }
  0x93   : > { %v596_v14 = vmul.f32 %v594_v13, %v594_v13 }
  0x95   : > { %v598_v15 = vsel %vm578_vm0, %v596_v14, 0.0 }
  0x96   : > { %599 = vadd.xlane.f32.xlu1 %v598_v15  ;;  %v584_v16 = vpop.xlane.xlu0 %583 }
  0x97   : > { %v593_v17 = vmul.f32 %v591_v10, %v584_v16 }
  0x99   : > { %v595_v18 = vsub.f32 %v575_v2, %v593_v17 }
  0x9b   : > { %v597_v19 = vmul.f32 %v595_v18, %v595_v18 }
  0x9d   : > { %v601_v20 = vsel %vm578_vm0, %v597_v19, 0.0 }
  0x9e   : > { %602 = vadd.xlane.f32.xlu1 %v601_v20  ;;  %v3062_v20 = vmov 1983009808  }
  0x9f   : > { %v728_v21 = vunpack.c.l.s4 %v3062_v20 }
  0xa1   : > { %v3260_v28 = vunpack.c.0.s8 %v728_v21 }
 0x109   : > { %v600_v37 = vpop.xlane.xlu1 %599 }
 0x10a   : > { %v604_v38 = vmul.f32 %v600_v37, %v591_v10 }
 0x10c   : > { %v606_v39 = vadd.f32 1e-05, %v604_v38 }
 0x10e   : > { %2957 = vrsqrt.f32 %v606_v39  ;;  %vm614_vm3 = vweird.f32 %v606_v39 }
 0x111   : > { %v603_v40 = vpop.xlane.xlu1 %602 }
 0x112   : > { %v605_v41 = vmul.f32 %v603_v40, %v591_v10  ;;  %v2954_v10 = vld [vmem:[%s3919_s8] ss:$0 sm:$0xff]  ;;  %v3063_v40 = vmov 1934713408  }
 0x114   : > { %v2958_v42 = vpop.eup %2957  ;;  %v607_v43 = vadd.f32 1e-05, %v605_v41  ;;  %v752_v41 = vunpack.c.l.s4 %v3063_v40 }
 0x115   : > { %v609_v44 = vmul.f32 %v2958_v42, %v606_v39  ;;  %vm615_vm2 = vweird.f32 %v2958_v42 }
 0x116   : > { %2959 = vrsqrt.f32 %v607_v43  ;;  %vm616_vm4 = vmor %vm614_vm3, %vm615_vm2  ;;  %vm624_vm6 = vweird.f32 %v607_v43 }
 0x117   : > { %v610_v45 = vmul.f32 %v2958_v42, %v609_v44 }
 0x119   : > { %v611_v46 = vmul.f32 0.5, %v610_v45 }
 0x11b   : > { %v612_v47 = vsub.f32 1.5, %v611_v46 }
 0x11c   : > { %v2960_v48 = vpop.eup %2959 }
 0x11d   : > { %v613_v49 = vmul.f32 %v2958_v42, %v612_v47  ;;  %v619_v50 = vmul.f32 %v2960_v48, %v607_v43  ;;  %vm625_vm5 = vweird.f32 %v2960_v48 }
 0x11e   : > { %vm626_vm7 = vmor %vm624_vm6, %vm625_vm5 }
 0x11f   : > { %v620_v51 = vmul.f32 %v2960_v48, %v619_v50  ;;  %v617_v52 = vsel %vm616_vm4, %v2958_v42, %v613_v49 }
 0x120   : > { %v628_v55 = vmul.f32 %v617_v52, %v594_v13  ;;  %v3288_v52 = vunpack.c.0.s8 %v752_v41 }
 0x121   : > { %v621_v53 = vmul.f32 0.5, %v620_v51 }
 0x122   : > { %v633_v60 = vmul.f32 %v2951_v56, %v628_v55 }
 0x123   : > { %v622_v54 = vsub.f32 1.5, %v621_v53 }
 0x124   : > { %v638_v63 = vadd.f32 %v2952_v61, %v633_v60 }
 0x125   : > { %v623_v57 = vmul.f32 %v2960_v48, %v622_v54 }
 0x127   : > { %v627_v58 = vsel %vm626_vm7, %v2960_v48, %v623_v57 }
 0x128   : > { %v629_v59 = vmul.f32 %v627_v58, %v595_v18 }
 0x12a   : > { %v634_v62 = vmul.f32 %v2951_v56, %v629_v59 }
 0x12c   : > { %v639_v0 = vadd.f32 %v2952_v61, %v634_v62 }
 0x12e   : > { %v649_v1 = vpack.c.bf16 %v639_v0, %v638_v63 }
 0x130   : > { %2654 = vmatmul.msk.bf16.vlgmr.msra.gmra.mxu0 %vm578_vm0, %v649_v1  ;;  %2671 = vmatmul.msk.bf16.vlgmr.msra.gmra.mxu1 %vm578_vm0, %v649_v1 }
 0x1ad   : > { %v697_v2 = vpop.f32.mrf.mxu0  ;;  %v1013_v3 = vpop.f32.mrf.mxu1 }
 0x1ae   : > { %v698_v6 = vadd.f32 %v2953_v4, %v697_v2  ;;  %v1014_v12 = vadd.f32 %v2954_v10, %v1013_v3 }
 0x1b0   : > { %v725_v27 = vrot.slane %v698_v6, 4  ;;  %v1040_v29 = vrot.slane %v1014_v12, 4 }
 0x1b5   : > { %v699_v5 = vpop.f32.mrf.mxu0  ;;  %v1015_v9 = vpop.f32.mrf.mxu1 }
 0x1b6   : > { %v700_v7 = vadd.f32 %v2953_v4, %v699_v5  ;;  %v1016_v11 = vadd.f32 %v2954_v10, %v1015_v9 }
 0x1b8   : > { %v2936_v8 = vpack.i.bf16 %v700_v7, %v698_v6  ;;  %v2926_v13 = vpack.i.bf16 %v1016_v11, %v1014_v12  ;;  %v781_v26 = vrot.slane %v700_v7, 4  ;;  %v1096_v30 = vrot.slane %v1016_v11, 4 }
 0x1ba   : > { %2937 = vrot.lane.b32.xlu1 %v2936_v8, %s3059_s26  ;;  %2932 = vrot.lane.b32.xlu0 %v2936_v8, %s3060_s27 }
 0x1bb   : > { %2922 = vrot.lane.b32.xlu2 %v2936_v8, %s3061_s18 }
 0x1c3   : > { %2927 = vrot.lane.b32.xlu2 %v2926_v13, %s3061_s18 }
 0x1cb   : > { %2942 = vrot.lane.b32.xlu2 %v2926_v13, %s3060_s27 }
 0x1d3   : > { %2947 = vrot.lane.b32.xlu2 %v2926_v13, %s3059_s26 }
 0x215   : > { %v2923_v14 = vpop.permute.xlu2 %2922 }
 0x216   : > { %v2925_v15 = vunpack.i.h.bf16 %v2923_v14  ;;  %v2924_v16 = vunpack.i.l.bf16 %v2923_v14 }
 0x218   : > { %v779_v22 = vrot.slane %v2925_v15, 4  ;;  %v722_v23 = vrot.slane %v2924_v16, 4  ;;  %v782_v32 = vsel %vm723_vm8, %v2925_v15, %v781_v26  ;;  %v726_v34 = vsel %vm723_vm8, %v2924_v16, %v725_v27 }
 0x219   : > { %v3272_v43 = vperm.slane %v782_v32, %v3260_v28  ;;  %v734_v45 = vperm.slane %v726_v34, %v3260_v28 }
 0x21a   : > { %v780_v31 = vsel %vm723_vm8, %v779_v22, %v700_v7  ;;  %v724_v33 = vsel %vm723_vm8, %v722_v23, %v698_v6 }
 0x21b   : > { %v786_v42 = vperm.slane %v780_v31, %v3260_v28  ;;  %v730_v44 = vperm.slane %v724_v33, %v3260_v28  ;;  %v817_v54 = vrot.slane %v3272_v43, 4  ;;  %v761_v56 = vrot.slane %v734_v45, 4 }
 0x21d   : > { %v2928_v17 = vpop.permute.xlu2 %2927  ;;  %v805_v53 = vrot.slane %v786_v42, 4  ;;  %v749_v55 = vrot.slane %v730_v44, 4 }
 0x21e   : > { %v2930_v18 = vunpack.i.h.bf16 %v2928_v17  ;;  %v2929_v19 = vunpack.i.l.bf16 %v2928_v17 }
 0x220   : > { %v1094_v24 = vrot.slane %v2930_v18, 4  ;;  %v1038_v25 = vrot.slane %v2929_v19, 4  ;;  %v1097_v36 = vsel %vm723_vm8, %v2930_v18, %v1096_v30  ;;  %v1041_v38 = vsel %vm723_vm8, %v2929_v19, %v1040_v29 }
 0x221   : > { %v3280_v47 = vperm.slane %v1097_v36, %v3260_v28  ;;  %v3286_v49 = vperm.slane %v1041_v38, %v3260_v28 }
 0x222   : > { %v1095_v35 = vsel %vm723_vm8, %v1094_v24, %v1016_v11  ;;  %v1039_v37 = vsel %vm723_vm8, %v1038_v25, %v1014_v12 }
 0x223   : > { %v3277_v46 = vperm.slane %v1095_v35, %v3260_v28  ;;  %v3283_v48 = vperm.slane %v1039_v37, %v3260_v28  ;;  %v1132_v58 = vrot.slane %v3280_v47, 4  ;;  %v1076_v60 = vrot.slane %v3286_v49, 4 }
 0x225   : > { %v2943_v39 = vpop.permute.xlu2 %2942  ;;  %v1120_v57 = vrot.slane %v3277_v46, 4  ;;  %v1064_v59 = vrot.slane %v3283_v48, 4 }
 0x226   : > { %v2945_v50 = vunpack.i.h.bf16 %v2943_v39  ;;  %v2944_v51 = vunpack.i.l.bf16 %v2943_v39 }
 0x228   : > { %v1108_v4 = vrot.slane %v2945_v50, 4  ;;  %v1052_v5 = vrot.slane %v2944_v51, 4 }
 0x22c   : > { %v2938_v61 = vpop.permute.xlu1 %2937  ;;  %v2933_v62 = vpop.permute.xlu0 %2932 }
 0x22d   : > { %v2940_v63 = vunpack.i.h.bf16 %v2938_v61  ;;  %v2939_v0 = vunpack.i.l.bf16 %v2938_v61  ;;  %v2935_v1 = vunpack.i.h.bf16 %v2933_v62  ;;  %v2934_v2 = vunpack.i.l.bf16 %v2933_v62  ;;  %v2948_v3 = vpop.permute.xlu2 %2947 }
 0x22e   : > { %v2950_v6 = vunpack.i.h.bf16 %v2948_v3  ;;  %v2949_v7 = vunpack.i.l.bf16 %v2948_v3 }
 0x22f   : > { %v791_v8 = vrot.slane %v2940_v63, 4  ;;  %v735_v9 = vrot.slane %v2939_v0, 4  ;;  %v793_v10 = vrot.slane %v2935_v1, 4  ;;  %v737_v11 = vrot.slane %v2934_v2, 4 }
 0x230   : > { %v1106_v12 = vrot.slane %v2950_v6, 4  ;;  %v1050_v13 = vrot.slane %v2949_v7, 4  ;;  %v1053_v14 = vsel %vm723_vm8, %v2949_v7, %v1052_v5  ;;  %v1109_v15 = vsel %vm723_vm8, %v2950_v6, %v1108_v4 }
 0x231   : > { %v792_v16 = vsel %vm723_vm8, %v791_v8, %v2935_v1  ;;  %v794_v17 = vsel %vm723_vm8, %v2940_v63, %v793_v10  ;;  %v736_v18 = vsel %vm723_vm8, %v735_v9, %v2934_v2  ;;  %v738_v19 = vsel %vm723_vm8, %v2939_v0, %v737_v11 }
 0x232   : > { %v798_v20 = vperm.slane %v792_v16, %v3260_v28  ;;  %v802_v21 = vperm.slane %v794_v17, %v3260_v28  ;;  %v742_v22 = vperm.slane %v736_v18, %v3260_v28  ;;  %v746_v23 = vperm.slane %v738_v19, %v3260_v28 }
 0x233   : > { %v3306_v24 = vsel %vm723_vm8, %v1050_v13, %v2944_v51  ;;  %v3309_v25 = vperm.slane %v1053_v14, %v3260_v28  ;;  %v3312_v26 = vsel %vm723_vm8, %v1106_v12, %v2945_v50  ;;  %v3315_v27 = vperm.slane %v1109_v15, %v3260_v28 }
 0x234   : > { %v803_v29 = vrot.slane %v798_v20, 4  ;;  %v815_v30 = vrot.slane %v802_v21, 4  ;;  %v747_v31 = vrot.slane %v742_v22, 4  ;;  %v750_v32 = vsel %vm723_vm8, %v742_v22, %v749_v55 }
 0x235   : > { %v758_v33 = vperm.slane %v750_v32, %v3288_v52  ;;  %v759_v34 = vrot.slane %v746_v23, 4  ;;  %v762_v35 = vsel %vm723_vm8, %v746_v23, %v761_v56  ;;  %v806_v36 = vsel %vm723_vm8, %v798_v20, %v805_v53 }
 0x236   : > { %v748_v37 = vsel %vm723_vm8, %v747_v31, %v730_v44  ;;  %v770_v38 = vperm.slane %v762_v35, %v3288_v52  ;;  %v804_v39 = vsel %vm723_vm8, %v803_v29, %v786_v42  ;;  %v814_v40 = vperm.slane %v806_v36, %v3288_v52 }
 0x237   : > { %v754_v41 = vperm.slane %v748_v37, %v3288_v52  ;;  %v760_v50 = vsel %vm723_vm8, %v759_v34, %v734_v45  ;;  %v773_v51 = vrot.slane %v758_v33, 4  ;;  %v810_v55 = vperm.slane %v804_v39, %v3288_v52 }
 0x238   : > { %v766_v61 = vperm.slane %v760_v50, %v3288_v52  ;;  %v777_v56 = vrot.slane %v770_v38, 4  ;;  %v816_v53 = vsel %vm723_vm8, %v815_v30, %v3272_v43  ;;  %v818_v44 = vsel %vm723_vm8, %v802_v21, %v817_v54 }
 0x239   : > { %v771_v62 = vrot.slane %v754_v41, 4  ;;  %v774_v42 = vsel %vm723_vm8, 0.0, %v773_v51  ;;  %v822_v63 = vperm.slane %v816_v53, %v3288_v52  ;;  %v826_v0 = vperm.slane %v818_v44, %v3288_v52 }
 0x23a   : > { %v775_v1 = vrot.slane %v766_v61, 4  ;;  %v778_v45 = vsel %vm723_vm8, 0.0, %v777_v56  ;;  %v827_v2 = vrot.slane %v810_v55, 4  ;;  %v829_v3 = vrot.slane %v814_v40, 4 }
 0x23b   : > { %v772_v4 = vsel %vm723_vm8, 0.0, %v771_v62  ;;  %v831_v5 = vrot.slane %v822_v63, 4  ;;  %v833_v6 = vrot.slane %v826_v0, 4  ;;  %v835_v43 = vsel %vm723_vm8, %v773_v51, %v754_v41 }
 0x23c   : > { %v776_v54 = vsel %vm723_vm8, 0.0, %v775_v1  ;;  %v828_v7 = vsel %vm723_vm8, 0.0, %v827_v2  ;;  %v830_v8 = vsel %vm723_vm8, 0.0, %v829_v3  ;;  %v839_v9 = vperm.slane %v835_v43, %v3260_v28 }
 0x23d   : > { %v832_v10 = vsel %vm723_vm8, 0.0, %v831_v5  ;;  %v834_v11 = vsel %vm723_vm8, 0.0, %v833_v6  ;;  %v840_v12 = vrot.slane %v774_v42, 4  ;;  %v846_v13 = vsel %vm723_vm8, %v777_v56, %v766_v61 }
 0x23e   : > { %v850_v14 = vperm.slane %v846_v13, %v3260_v28  ;;  %v851_v15 = vrot.slane %v778_v45, 4  ;;  %v859_v16 = vrot.slane %v839_v9, 4  ;;  %v889_v17 = vsel %vm723_vm8, %v829_v3, %v810_v55 }
 0x23f   : > { %v841_v18 = vsel %vm723_vm8, %v840_v12, %v772_v4  ;;  %v893_v19 = vperm.slane %v889_v17, %v3260_v28  ;;  %v894_v20 = vrot.slane %v830_v8, 4  ;;  %v900_v21 = vsel %vm723_vm8, %v833_v6, %v822_v63 }
 0x240   : > { %v845_v22 = vperm.slane %v841_v18, %v3260_v28  ;;  %v852_v23 = vsel %vm723_vm8, %v851_v15, %v776_v54  ;;  %v871_v29 = vrot.slane %v850_v14, 4  ;;  %v904_v30 = vperm.slane %v900_v21, %v3260_v28 }
 0x241   : > { %v856_v31 = vperm.slane %v852_v23, %v3260_v28  ;;  %v895_v32 = vsel %vm723_vm8, %v894_v20, %v828_v7  ;;  %v905_v33 = vrot.slane %v834_v11, 4  ;;  %v913_v34 = vrot.slane %v893_v19, 4 }
 0x242   : > { %v857_v35 = vrot.slane %v845_v22, 4  ;;  %v860_v36 = vsel %vm723_vm8, %v845_v22, %v859_v16  ;;  %v899_v37 = vperm.slane %v895_v32, %v3260_v28  ;;  %v925_v38 = vrot.slane %v904_v30, 4 }
 0x243   : > { %v868_v39 = vperm.slane %v860_v36, %v3288_v52  ;;  %v869_v40 = vrot.slane %v856_v31, 4  ;;  %v872_v41 = vsel %vm723_vm8, %v856_v31, %v871_v29  ;;  %v906_v50 = vsel %vm723_vm8, %v905_v33, %v832_v10 }
 0x244   : > { %v858_v51 = vsel %vm723_vm8, %v857_v35, %v839_v9  ;;  %v880_v55 = vperm.slane %v872_v41, %v3288_v52  ;;  %v910_v61 = vperm.slane %v906_v50, %v3260_v28  ;;  %v911_v56 = vrot.slane %v899_v37, 4 }
 0x245   : > { %v864_v53 = vperm.slane %v858_v51, %v3288_v52  ;;  %v870_v44 = vsel %vm723_vm8, %v869_v40, %v850_v14  ;;  %v887_v62 = vrot.slane %v868_v39, 4  ;;  %v914_v42 = vsel %vm723_vm8, %v899_v37, %v913_v34 }
 0x246   : > { %v876_v63 = vperm.slane %v870_v44, %v3288_v52  ;;  %v885_v0 = vrot.slane %v880_v55, 4  ;;  %v912_v1 = vsel %vm723_vm8, %v911_v56, %v893_v19  ;;  %v922_v45 = vperm.slane %v914_v42, %v3288_v52 }
 0x247   : > { %v883_v2 = vrot.slane %v864_v53, 4  ;;  %v888_v3 = vsel %vm723_vm8, %v880_v55, %v887_v62  ;;  %v918_v4 = vperm.slane %v912_v1, %v3288_v52  ;;  %v923_v5 = vrot.slane %v910_v61, 4 }
 0x248   : > { %v881_v6 = vrot.slane %v876_v63, 4  ;;  %v886_v43 = vsel %vm723_vm8, %v885_v0, %v868_v39  ;;  %v926_v54 = vsel %vm723_vm8, %v910_v61, %v925_v38  ;;  %v941_v7 = vrot.slane %v922_v45, 4 }
 0x249   : > { %v884_v8 = vsel %vm723_vm8, %v876_v63, %v883_v2  ;;  %v924_v9 = vsel %vm723_vm8, %v923_v5, %v904_v30  ;;  %v934_v10 = vperm.slane %v926_v54, %v3288_v52  ;;  %v937_v11 = vrot.slane %v918_v4, 4 }
 0x24a   : > { %v882_v12 = vsel %vm723_vm8, %v881_v6, %v864_v53  ;;  %v930_v13 = vperm.slane %v924_v9, %v3288_v52  ;;  %v945_v14 = vpack.c.bf16 %v884_v8, %v884_v8  ;;  %v947_v15 = vpack.c.bf16 %v886_v43, %v886_v43 }
 0x24b   : > { %v939_v16 = vrot.slane %v934_v10, 4  ;;  %v942_v17 = vsel %vm723_vm8, %v934_v10, %v941_v7  ;;  %v943_v18 = vpack.c.bf16 %v882_v12, %v882_v12  ;;  %v949_v19 = vpack.c.bf16 %v888_v3, %v888_v3 }
 0x24c   : > { %v935_v20 = vrot.slane %v930_v13, 4  ;;  %v938_v21 = vsel %vm723_vm8, %v930_v13, %v937_v11  ;;  %v950_v22 = vpack.c.bf16 %v942_v17, %v942_v17  ;;  %954 = vst.msk [vmem:[#allocation2 + $0x8] sm:$0xf] %vm951_vm9, %v945_v14  ;;  %v1057_v23 = vperm.slane %v3306_v24, %v3260_v28 }
 0x24d   : > { %v940_v29 = vsel %vm723_vm8, %v939_v16, %v922_v45  ;;  %v946_v30 = vpack.c.bf16 %v938_v21, %v938_v21  ;;  %952 = vst.msk [vmem:[#allocation2] sm:$0xf] %vm951_vm9, %v943_v18  ;;  %v1074_v31 = vrot.slane %v3309_v25, 4  ;;  %v1077_v32 = vsel %vm723_vm8, %v3309_v25, %v1076_v60 }
 0x24e   : > { %v936_v33 = vsel %vm723_vm8, %v935_v20, %v918_v4  ;;  %v948_v34 = vpack.c.bf16 %v940_v29, %v940_v29  ;;  %956 = vst.msk [vmem:[#allocation2 + $0x10] sm:$0xf] %vm951_vm9, %v947_v15  ;;  %v1062_v35 = vrot.slane %v1057_v23, 4  ;;  %v1065_v24 = vsel %vm723_vm8, %v1057_v23, %v1064_v59 }
 0x24f   : > { %v944_v36 = vpack.c.bf16 %v936_v33, %v936_v33  ;;  %955 = vst.msk [vmem:[#allocation2 + $0xc] sm:$0xf] %vm951_vm9, %v946_v30  ;;  %v1073_v37 = vperm.slane %v1065_v24, %v3288_v52  ;;  %v1075_v38 = vsel %vm723_vm8, %v1074_v31, %v3286_v49  ;;  %v1085_v60 = vperm.slane %v1077_v32, %v3288_v52 }
 0x250   : > { %957 = vst.msk [vmem:[#allocation2 + $0x14] sm:$0xf] %vm951_vm9, %v948_v34  ;;  %v1063_v25 = vsel %vm723_vm8, %v1062_v35, %v3283_v48  ;;  %v1081_v39 = vperm.slane %v1075_v38, %v3288_v52  ;;  %v1113_v59 = vperm.slane %v3312_v26, %v3260_v28  ;;  %v1130_v40 = vrot.slane %v3315_v27, 4 }
 0x251   : > { %953 = vst.msk [vmem:[#allocation2 + $0x4] sm:$0xf] %vm951_vm9, %v944_v36  ;;  %v1069_v41 = vperm.slane %v1063_v25, %v3288_v52  ;;  %v1088_v50 = vrot.slane %v1073_v37, 4  ;;  %v1092_v49 = vrot.slane %v1085_v60, 4  ;;  %v1133_v51 = vsel %vm723_vm8, %v3315_v27, %v1132_v58 }
 0x252   : > { %958 = vst.msk [vmem:[#allocation2 + $0x18] sm:$0xf] %vm951_vm9, %v949_v19  ;;  %v1090_v48 = vrot.slane %v1081_v39, 4  ;;  %v1118_v55 = vrot.slane %v1113_v59, 4  ;;  %v1121_v26 = vsel %vm723_vm8, %v1113_v59, %v1120_v57  ;;  %v1131_v61 = vsel %vm723_vm8, %v1130_v40, %v3280_v47 }
 0x253   : > { %959 = vst.msk [vmem:[#allocation2 + $0x1c] sm:$0xf] %vm951_vm9, %v950_v22  ;;  %v1086_v56 = vrot.slane %v1069_v41, 4  ;;  %v1089_v53 = vsel %vm723_vm8, 0.0, %v1088_v50  ;;  %v1093_v44 = vsel %vm723_vm8, 0.0, %v1092_v49  ;;  %v1129_v58 = vperm.slane %v1121_v26, %v3288_v52 }
 0x254   : > { %v1091_v27 = vsel %vm723_vm8, 0.0, %v1090_v48  ;;  %v1119_v62 = vsel %vm723_vm8, %v1118_v55, %v3277_v46  ;;  %v1137_v42 = vperm.slane %v1131_v61, %v3288_v52  ;;  %v1141_v57 = vperm.slane %v1133_v51, %v3288_v52 }
 0x255   : > { %v1087_v47 = vsel %vm723_vm8, 0.0, %v1086_v56  ;;  %v1125_v63 = vperm.slane %v1119_v62, %v3288_v52  ;;  %v1144_v0 = vrot.slane %v1129_v58, 4  ;;  %v1150_v1 = vsel %vm723_vm8, %v1088_v50, %v1069_v41 }
 0x256   : > { %v1146_v45 = vrot.slane %v1137_v42, 4  ;;  %v1148_v2 = vrot.slane %v1141_v57, 4  ;;  %v1154_v3 = vperm.slane %v1150_v1, %v3260_v28  ;;  %v1155_v4 = vrot.slane %v1089_v53, 4 }
 0x257   : > { %v1142_v5 = vrot.slane %v1125_v63, 4  ;;  %v1145_v6 = vsel %vm723_vm8, 0.0, %v1144_v0  ;;  %v1161_v46 = vsel %vm723_vm8, %v1092_v49, %v1081_v39  ;;  %v1166_v43 = vrot.slane %v1093_v44, 4 }
 0x258   : > { %v1147_v54 = vsel %vm723_vm8, 0.0, %v1146_v45  ;;  %v1149_v7 = vsel %vm723_vm8, 0.0, %v1148_v2  ;;  %v1156_v8 = vsel %vm723_vm8, %v1155_v4, %v1087_v47  ;;  %v1165_v9 = vperm.slane %v1161_v46, %v3260_v28 }
 0x259   : > { %v1143_v10 = vsel %vm723_vm8, 0.0, %v1142_v5  ;;  %v1160_v11 = vperm.slane %v1156_v8, %v3260_v28  ;;  %v1167_v12 = vsel %vm723_vm8, %v1166_v43, %v1091_v27  ;;  %v1174_v13 = vrot.slane %v1154_v3, 4 }
 0x25a   : > { %v1171_v14 = vperm.slane %v1167_v12, %v3260_v28  ;;  %v1186_v15 = vrot.slane %v1165_v9, 4  ;;  %v1204_v16 = vsel %vm723_vm8, %v1144_v0, %v1125_v63  ;;  %v1209_v17 = vrot.slane %v1145_v6, 4 }
 0x25b   : > { %v1172_v18 = vrot.slane %v1160_v11, 4  ;;  %v1175_v19 = vsel %vm723_vm8, %v1160_v11, %v1174_v13  ;;  %v1208_v20 = vperm.slane %v1204_v16, %v3260_v28  ;;  %v1215_v21 = vsel %vm723_vm8, %v1148_v2, %v1137_v42 }
 0x25c   : > { %v1183_v22 = vperm.slane %v1175_v19, %v3288_v52  ;;  %v1184_v23 = vrot.slane %v1171_v14, 4  ;;  %v1187_v29 = vsel %vm723_vm8, %v1171_v14, %v1186_v15  ;;  %v1210_v30 = vsel %vm723_vm8, %v1209_v17, %v1143_v10 }
 0x25d   : > { %v1173_v31 = vsel %vm723_vm8, %v1172_v18, %v1154_v3  ;;  %v1195_v32 = vperm.slane %v1187_v29, %v3288_v52  ;;  %v1214_v33 = vperm.slane %v1210_v30, %v3260_v28  ;;  %v1219_v34 = vperm.slane %v1215_v21, %v3260_v28 }
 0x25e   : > { %v1179_v35 = vperm.slane %v1173_v31, %v3288_v52  ;;  %v1185_v24 = vsel %vm723_vm8, %v1184_v23, %v1165_v9  ;;  %v1202_v36 = vrot.slane %v1183_v22, 4  ;;  %v1220_v37 = vrot.slane %v1149_v7, 4 }
 0x25f   : > { %v1191_v38 = vperm.slane %v1185_v24, %v3288_v52  ;;  %v1200_v60 = vrot.slane %v1195_v32, 4  ;;  %v1226_v25 = vrot.slane %v1214_v33, 4  ;;  %v1228_v39 = vrot.slane %v1208_v20, 4 }
 0x260   : > { %v1198_v59 = vrot.slane %v1179_v35, 4  ;;  %v1203_v40 = vsel %vm723_vm8, %v1195_v32, %v1202_v36  ;;  %v1221_v41 = vsel %vm723_vm8, %v1220_v37, %v1147_v54  ;;  %v1240_v50 = vrot.slane %v1219_v34, 4 }
 0x261   : > { %v1196_v49 = vrot.slane %v1191_v38, 4  ;;  %v1201_v51 = vsel %vm723_vm8, %v1200_v60, %v1183_v22  ;;  %v1225_v48 = vperm.slane %v1221_v41, %v3260_v28  ;;  %v1227_v55 = vsel %vm723_vm8, %v1226_v25, %v1208_v20 }
 0x262   : > { %v1199_v26 = vsel %vm723_vm8, %v1191_v38, %v1198_v59  ;;  %v1229_v61 = vsel %vm723_vm8, %v1214_v33, %v1228_v39  ;;  %v1233_v56 = vperm.slane %v1227_v55, %v3288_v52  ;;  %v1262_v53 = vpack.c.bf16 %v1201_v51, %v1201_v51 }
 0x263   : > { %v1197_v44 = vsel %vm723_vm8, %v1196_v49, %v1179_v35  ;;  %v1237_v58 = vperm.slane %v1229_v61, %v3288_v52  ;;  %v1238_v27 = vrot.slane %v1225_v48, 4  ;;  %v1241_v62 = vsel %vm723_vm8, %v1225_v48, %v1240_v50 }
 0x264   : > { %v1249_v42 = vperm.slane %v1241_v62, %v3288_v52  ;;  %v1252_v57 = vrot.slane %v1233_v56, 4  ;;  %v1258_v28 = vpack.c.bf16 %v1197_v44, %v1197_v44  ;;  %v1260_v47 = vpack.c.bf16 %v1199_v26, %v1199_v26  ;;  %1270 = vst.msk [vmem:[#allocation3 + $0x10] sm:$0xf] %vm951_vm9, %v1262_v53 }
 0x265   : > { %v1239_v63 = vsel %vm723_vm8, %v1238_v27, %v1219_v34  ;;  %v1256_v0 = vrot.slane %v1237_v58, 4  ;;  %v1264_v1 = vpack.c.bf16 %v1203_v40, %v1203_v40 }
 0x266   : > { %v1245_v45 = vperm.slane %v1239_v63, %v3288_v52  ;;  %v1254_v2 = vrot.slane %v1249_v42, 4  ;;  %1266 = vst.msk [vmem:[#allocation3] sm:$0xf] %vm951_vm9, %v1258_v28 }
 0x267   : > { %v1257_v3 = vsel %vm723_vm8, %v1249_v42, %v1256_v0  ;;  %1268 = vst.msk [vmem:[#allocation3 + $0x8] sm:$0xf] %vm951_vm9, %v1260_v47 }
 0x268   : > { %v1250_v4 = vrot.slane %v1245_v45, 4  ;;  %v1253_v5 = vsel %vm723_vm8, %v1245_v45, %v1252_v57  ;;  %v1255_v6 = vsel %vm723_vm8, %v1254_v2, %v1237_v58  ;;  %v1265_v46 = vpack.c.bf16 %v1257_v3, %v1257_v3  ;;  %1272 = vst.msk [vmem:[#allocation3 + $0x18] sm:$0xf] %vm951_vm9, %v1264_v1 }
 0x269   : > { %v1261_v43 = vpack.c.bf16 %v1253_v5, %v1253_v5  ;;  %v1263_v54 = vpack.c.bf16 %v1255_v6, %v1255_v6 }
 0x26a   : > { %v1251_v7 = vsel %vm723_vm8, %v1250_v4, %v1233_v56  ;;  %1273 = vst.msk [vmem:[#allocation3 + $0x1c] sm:$0xf] %vm951_vm9, %v1265_v46 }
 0x26b   : > { %v1259_v52 = vpack.c.bf16 %v1251_v7, %v1251_v7  ;;  %1269 = vst.msk [vmem:[#allocation3 + $0xc] sm:$0xf] %vm951_vm9, %v1261_v43 }
 0x26c   : > { %1271 = vst.msk [vmem:[#allocation3 + $0x14] sm:$0xf] %vm951_vm9, %v1263_v54 }
 0x26d   : > { %1267 = vst.msk [vmem:[#allocation3 + $0x4] sm:$0xf] %vm951_vm9, %v1259_v52 }
 0x26e PF: > { %s2672_s19 = sshll.u32 %s3040_s24, 3  ;;  %vm1279_vm10 = vcmask 523264   ;;  %v3064_v10 = vmov 64.0   ;;  %v2837_v11 = vld [vmem:[%s3914_s3 + $0x18] sm:$0xff]  ;;  %v2836_v29 = vld [vmem:[%s3914_s3 + $0x10] sm:$0xff]  ;;  %v2835_v31 = vld [vmem:[%s3914_s3 + $0x8] sm:$0xff] }
 0x26f   : > { %s1275_s1 = scalar_lea.vmem %s3200_s22, %s2672_s19  ;;  %2968 = vrcp.f32 %v3064_v10  ;;  %v1363_v12 = vsel %vm1279_vm10, %v2837_v11, 0  ;;  %v1360_v30 = vsel %vm1279_vm10, %v2836_v29, 0  ;;  %v1357_v32 = vsel %vm1279_vm10, %v2835_v31, 0  ;;  %v2834_v33 = vld [vmem:[%s3914_s3] sm:$0xff]  ;;  %s3939_s18 = sld [smem:[#allocation9_spill]] }
 0x270   : > { %v3484_v8 = vld [vmem:[%s1275_s1] sm:$0xff]  ;;  %1369 = vmatpush.bf16.xpose.msra.mxu0 %v1363_v12  ;;  %v1354_v34 = vsel %vm1279_vm10, %v2834_v33, 0  ;;  %s3065_s24 = smov 80   ;;  %s3066_s22 = smov 112   ;;  %v1506_v58 = vld [vmem:[#allocation2 + $0x10] sm:$0xf] }
 0x271   : > { %v1280_v9 = vsel %vm1279_vm10, %v3484_v8, 0.0  ;;  %v2962_v49 = vld [vmem:[%s3913_s2] ss:$0 sm:$0xff]  ;;  %s3067_s23 = smov 96   ;;  %vm1512_vm15 = vcmask 130048   ;;  %vm1390_vm0 = vcmask 1047556  }
 0x272   : > { %1281 = vadd.xlane.f32.xlu0 %v1280_v9  ;;  %v2963_v26 = vld [vmem:[%s3915_s4] ss:$0 sm:$0xff]  ;;  %v1555_v62 = vsel %vm1512_vm15, %v1506_v58, 0  ;;  %v1507_v57 = vld [vmem:[#allocation2 + $0x18] sm:$0xf]  ;;  %vm1589_vm1 = vcmask 64512  }
 0x273   : > { %v1504_v27 = vld [vmem:[#allocation2] sm:$0xf]  ;;  %v1732_v28 = vld [vmem:[#allocation2 + $0xc] sm:$0xf]  ;;  %1564 = vmatpush.bf16.xpose.msra.mxu3 %v1555_v62  ;;  %v1574_v47 = vsel %vm1512_vm15, %v1507_v57, 0  ;;  %vm1653_vm2 = vcmask 1043456  }
 0x274   : > { %v1517_v42 = vsel %vm1512_vm15, %v1504_v27, 0  ;;  %v1756_v63 = vsel %vm1512_vm15, %v1732_v28, 0  ;;  %1583 = vmatpush.bf16.xpose.msra.mxu1 %v1574_v47  ;;  %v3068_v1 = vmov 1983009808   ;;  %v1505_v6 = vld [vmem:[#allocation2 + $0x8] sm:$0xf] }
 0x275   : > { %v2969_v13 = vpop.eup %2968  ;;  %v2961_v40 = vld [vmem:[%s3939_s18] ss:$0 sm:$0xff]  ;;  %1526 = vmatpush.bf16.xpose.msra.mxu2 %v1517_v42  ;;  %v1395_v45 = vunpack.c.l.s4 %v3068_v1  ;;  %v1536_v43 = vsel %vm1512_vm15, %v1505_v6, 0  ;;  %v3069_v7 = vmov 1934713408   ;;  %s3070_s25 = smov 48  }
 0x276   : > { %v1284_v14 = vmul.f32 64.0, %v2969_v13  ;;  %vm1288_vm11 = vweird.f32 %v2969_v13  ;;  %v1419_v52 = vunpack.c.l.s4 %v3069_v7  ;;  %s3071_s26 = smov 32   ;;  %s3072_s27 = smov 16   ;;  %vm2082_vm3 = vcmask 261120  }
 0x277   : > { %v3525_v46 = vunpack.c.0.s8 %v1395_v45  ;;  %vm2084_vm4 = vcmask 392192  }
 0x278   : > { %v1285_v15 = vsub.f32 1.0, %v1284_v14  ;;  %1370 = vmatpush.bf16.xpose.msra.mxu0 %v1360_v30 }
 0x27a   : > { %v1286_v16 = vmul.f32 %v2969_v13, %v1285_v15 }
 0x27c   : > { %v1287_v17 = vadd.f32 %v2969_v13, %v1286_v16 }
 0x27d   : > { %1545 = vmatpush.bf16.xpose.msrb.mxu2 %v1536_v43 }
 0x27e   : > { %v3492_v18 = vsel %vm1288_vm11, %v2969_v13, %v1287_v17  ;;  %v3531_v13 = vunpack.c.0.s8 %v1419_v52 }
 0x280   : > { %1371 = vmatpush.bf16.xpose.msra.mxu0 %v1357_v32 }
 0x288   : > { %1372 = vmatpush.bf16.xpose.msra.mxu0 %v1354_v34 }
 0x290   : > { %1765 = vmatpush.bf16.xpose.msrb.mxu0 %v1756_v63 }
 0x2e5   : > { %v1282_v19 = vpop.xlane.xlu0 %1281 }
 0x2e6   : > { %v1290_v20 = vmul.f32 %v3492_v18, %v1282_v19 }
 0x2e8   : > { %v1291_v21 = vsub.f32 %v3484_v8, %v1290_v20 }
 0x2ea   : > { %v1292_v22 = vmul.f32 %v1291_v21, %v1291_v21 }
 0x2ec   : > { %v1293_v23 = vsel %vm1279_vm10, %v1292_v22, 0.0 }
 0x2ed   : > { %1294 = vadd.xlane.f32.xlu0 %v1293_v23 }
 0x360   : > { %v1295_v35 = vpop.xlane.xlu0 %1294 }
 0x361   : > { %v1296_v24 = vmul.f32 %v1295_v35, %v3492_v18 }
 0x363   : > { %v1297_v36 = vadd.f32 1e-05, %v1296_v24 }
 0x365   : > { %2970 = vrsqrt.f32 %v1297_v36  ;;  %vm1304_vm13 = vweird.f32 %v1297_v36 }
 0x36b   : > { %v2971_v37 = vpop.eup %2970 }
 0x36c   : > { %v1299_v38 = vmul.f32 %v2971_v37, %v1297_v36  ;;  %vm1305_vm12 = vweird.f32 %v2971_v37 }
 0x36d   : > { %vm1306_vm14 = vmor %vm1304_vm13, %vm1305_vm12 }
 0x36e   : > { %v1300_v60 = vmul.f32 %v2971_v37, %v1299_v38 }
 0x370   : > { %v1301_v25 = vmul.f32 0.5, %v1300_v60 }
 0x372   : > { %v1302_v39 = vsub.f32 1.5, %v1301_v25 }
 0x374   : > { %v1303_v59 = vmul.f32 %v2971_v37, %v1302_v39 }
 0x376   : > { %v1307_v41 = vsel %vm1306_vm14, %v2971_v37, %v1303_v59 }
 0x377   : > { %v1308_v50 = vmul.f32 %v1307_v41, %v1291_v21 }
 0x379   : > { %v1312_v51 = vmul.f32 %v2961_v40, %v1308_v50 }
 0x37b   : > { %v1316_v48 = vadd.f32 %v2962_v49, %v1312_v51 }
 0x37d   : > { %v1326_v55 = vpack.c.bf16 %v1316_v48, %v1316_v48 }
 0x37f   : > { %2689 = vmatmul.msk.bf16.vlgmr.msra.gmra.mxu0 %vm1279_vm10, %v1326_v55 }
 0x3fc   : > { %v1374_v61 = vpop.f32.mrf.mxu0 }
 0x3fd   : > { %v1375_v56 = vadd.f32 %v2963_v26, %v1374_v61 }
 0x3ff   : > { %v1378_v53 = vmul.f32 0.25, %v1375_v56 }
 0x401   : > { %1386 = vrot.lane.b32.xlu2 %v1378_v53, %s3065_s24  ;;  %1380 = vrot.lane.b32.xlu1 %v1378_v53, %s3066_s22  ;;  %v1392_v10 = vrot.slane %v1378_v53, 4 }
 0x404   : > { %v1376_v44 = vpop.f32.mrf.mxu0 }
 0x409   : > { %1383 = vrot.lane.b32.xlu1 %v1378_v53, %s3067_s23 }
 0x45b   : > { %v1387_v0 = vpop.permute.xlu2 %1386 }
 0x45c   : > { %v1402_v4 = vrot.slane %v1387_v0, 4 }
 0x473   : > { %v1381_v2 = vpop.permute.xlu1 %1380 }
 0x474   : > { %v1404_v3 = vrot.slane %v1381_v2, 4  ;;  %v1403_v54 = vsel %vm1390_vm0, %v1402_v4, %v1381_v2 }
 0x475   : > { %v1409_v11 = vperm.slane %v1403_v54, %v3525_v46 }
 0x476   : > { %v1405_v5 = vsel %vm1390_vm0, %v1387_v0, %v1404_v3 }
 0x477   : > { %v1413_v9 = vperm.slane %v1405_v5, %v3525_v46  ;;  %v1414_v20 = vrot.slane %v1409_v11, 4 }
 0x479   : > { %v1426_v16 = vrot.slane %v1413_v9, 4 }
 0x47b   : > { %v1384_v12 = vpop.permute.xlu1 %1383 }
 0x47c   : > { %v1389_v14 = vrot.slane %v1384_v12, 4  ;;  %v1393_v15 = vsel %vm1390_vm0, %v1384_v12, %v1392_v10 }
 0x47d   : > { %v1401_v17 = vperm.slane %v1393_v15, %v3525_v46 }
 0x47e   : > { %v1391_v19 = vsel %vm1390_vm0, %v1389_v14, %v1378_v53 }
 0x47f   : > { %v1397_v21 = vperm.slane %v1391_v19, %v3525_v46  ;;  %v1427_v22 = vsel %vm1390_vm0, %v1426_v16, %v1401_v17  ;;  %v1428_v23 = vrot.slane %v1401_v17, 4 }
 0x480   : > { %v1433_v29 = vperm.slane %v1427_v22, %v3531_v13 }
 0x481   : > { %v1415_v30 = vsel %vm1390_vm0, %v1414_v20, %v1397_v21  ;;  %v1416_v31 = vrot.slane %v1397_v21, 4  ;;  %v1429_v32 = vsel %vm1390_vm0, %v1413_v9, %v1428_v23 }
 0x482   : > { %v1421_v33 = vperm.slane %v1415_v30, %v3531_v13  ;;  %v1437_v34 = vperm.slane %v1429_v32, %v3531_v13  ;;  %v1442_v36 = vrot.slane %v1433_v29, 4 }
 0x483   : > { %v1417_v35 = vsel %vm1390_vm0, %v1409_v11, %v1416_v31 }
 0x484   : > { %v1425_v24 = vperm.slane %v1417_v35, %v3531_v13  ;;  %v1444_v37 = vrot.slane %v1437_v34, 4  ;;  %v1438_v38 = vrot.slane %v1421_v33, 4  ;;  %v1443_v50 = vsel %vm1390_vm0, 0.0, %v1442_v36  ;;  %v1508_v34 = vld [vmem:[#allocation3] sm:$0xf] }
 0x485   : > { %v1655_v35 = vsel %vm1653_vm2, %v1508_v34, 0 }
 0x486   : > { %v1440_v60 = vrot.slane %v1425_v24, 4  ;;  %v1445_v25 = vsel %vm1390_vm0, 0.0, %v1444_v37  ;;  %v1457_v39 = vsel %vm1390_vm0, %v1444_v37, %v1433_v29  ;;  %v1439_v61 = vsel %vm1390_vm0, 0.0, %v1438_v38  ;;  %v1509_v24 = vld [vmem:[#allocation3 + $0x8] sm:$0xf] }
 0x487   : > { %v1461_v59 = vperm.slane %v1457_v39, %v3525_v46  ;;  %v1462_v40 = vrot.slane %v1445_v25, 4  ;;  %v1674_v36 = vsel %vm1653_vm2, %v1509_v24, 0  ;;  %v1511_v37 = vld [vmem:[#allocation3 + $0x18] sm:$0xf]  ;;  %v1736_v39 = vld [vmem:[#allocation3 + $0xc] sm:$0xf] }
 0x488   : > { %v1441_v41 = vsel %vm1390_vm0, 0.0, %v1440_v60  ;;  %v1446_v49 = vsel %vm1390_vm0, %v1440_v60, %v1421_v33  ;;  %1683 = vmatpush.bf16.msrb.mxu3 %v1674_v36  ;;  %v1712_v38 = vsel %vm1653_vm2, %v1511_v37, 0 }
 0x489   : > { %v1451_v51 = vrot.slane %v1441_v41, 4  ;;  %v1463_v48 = vsel %vm1390_vm0, %v1462_v40, %v1443_v50  ;;  %v1482_v55 = vrot.slane %v1461_v59, 4  ;;  %v1450_v26 = vperm.slane %v1446_v49, %v3525_v46  ;;  %v1731_v41 = vld [vmem:[#allocation2 + $0x4] sm:$0xf] }
 0x48a   : > { %v1467_v56 = vperm.slane %v1463_v48, %v3525_v46  ;;  %v1894_v40 = vsel %vm1653_vm2, %v1736_v39, 0  ;;  %v1740_v50 = vsel %vm1512_vm15, %v1731_v41, 0  ;;  %v1510_v48 = vld [vmem:[#allocation3 + $0x10] sm:$0xf] }
 0x48b   : > { %v1452_v53 = vsel %vm1390_vm0, %v1451_v51, %v1439_v61  ;;  %v1470_v44 = vrot.slane %v1450_v26, 4  ;;  %1903 = vmatpush.bf16.msra.mxu0 %v1894_v40 }
 0x48c   : > { %v1456_v58 = vperm.slane %v1452_v53, %v3525_v46  ;;  %v1483_v27 = vsel %vm1390_vm0, %v1467_v56, %v1482_v55  ;;  %v1480_v62 = vrot.slane %v1467_v56, 4  ;;  %v1693_v55 = vsel %vm1653_vm2, %v1510_v48, 0  ;;  %v1734_v53 = vld [vmem:[#allocation2 + $0x1c] sm:$0xf] }
 0x48d   : > { %v1491_v42 = vperm.slane %v1483_v27, %v3531_v13  ;;  %1702 = vmatpush.bf16.msrb.mxu1 %v1693_v55 }
 0x48e   : > { %v1471_v57 = vsel %vm1390_vm0, %v1456_v58, %v1470_v44  ;;  %v1468_v28 = vrot.slane %v1456_v58, 4  ;;  %v1481_v47 = vsel %vm1390_vm0, %v1480_v62, %v1461_v59  ;;  %v1788_v62 = vsel %vm1512_vm15, %v1734_v53, 0 }
 0x48f   : > { %v1479_v63 = vperm.slane %v1471_v57, %v3531_v13  ;;  %v1496_v0 = vrot.slane %v1491_v42, 4  ;;  %v1487_v1 = vperm.slane %v1481_v47, %v3531_v13 }
 0x490   : > { %v1469_v45 = vsel %vm1390_vm0, %v1468_v28, %v1450_v26 }
 0x491   : > { %v1497_v2 = vsel %vm1390_vm0, %v1496_v0, %v1479_v63  ;;  %v1475_v3 = vperm.slane %v1469_v45, %v3531_v13  ;;  %v1492_v4 = vrot.slane %v1487_v1, 4  ;;  %v1498_v5 = vrot.slane %v1479_v63, 4 }
 0x492   : > { %v3566_v6 = vpack.c.bf16 %v1497_v2, %v1497_v2 }
 0x493   : > { %v1493_v43 = vsel %vm1390_vm0, %v1492_v4, %v1475_v3  ;;  %v1494_v54 = vrot.slane %v1475_v3, 4  ;;  %v1499_v7 = vsel %vm1390_vm0, %v1491_v42, %v1498_v5  ;;  %v1733_v42 = vld [vmem:[#allocation2 + $0x14] sm:$0xf] }
 0x494   : > { %2692 = vmatmul.msk.bf16.vlgmr.msra.gmra.mxu3 %vm1512_vm15, %v3566_v6  ;;  %v3572_v52 = vpack.c.bf16 %v1493_v43, %v1493_v43  ;;  %v3574_v9 = vpack.c.bf16 %v1499_v7, %v1499_v7  ;;  %v1772_v57 = vsel %vm1512_vm15, %v1733_v42, 0 }
 0x495   : > { %v1495_v10 = vsel %vm1390_vm0, %v1487_v1, %v1494_v54  ;;  %1749 = vmatpush.bf16.xpose.msra.mxu3 %v1740_v50 }
 0x496   : > { %2690 = vmatmul.msk.bf16.vlgmr.msra.gmra.mxu2 %vm1512_vm15, %v3572_v52  ;;  %2693 = vmatmul.msk.bf16.vlgmr.msra.gmra.mxu1 %vm1512_vm15, %v3574_v9  ;;  %v1501_v11 = vpack.c.bf16 %v1495_v10, %v1495_v10 }
 0x497   : > { %1664 = vmatpush.bf16.msra.mxu2 %v1655_v35  ;;  %1781 = vmatpush.bf16.xpose.msra.mxu1 %v1772_v57 }
 0x498   : > { %2699 = vmatmul.msk.bf16.vlgmr.msrb.gmra.mxu0 %vm1512_vm15, %v1501_v11 }
 0x4a6   : > { %2691 = vmatmul.msk.bf16.vlgmr.msrb.gmra.mxu2 %vm1512_vm15, %v1501_v11 }
 0x4a7   : > { %1721 = vmatpush.bf16.msrb.mxu2 %v1712_v38 }
 0x513   : > { %v1585_v12 = vpop.f32.mrf.mxu1 }
 0x514   : > { %v1599_v14 = vsel %vm1589_vm1, %v1585_v12, -inf }
 0x515   : > { %1600 = vmax.xlane.f32.xlu1 %v1599_v14  ;;  %v3584_v15 = vpop.f32.mrf.mxu0 }
 0x516   : > { %v1806_v29 = vsel %vm1589_vm1, %v3584_v15, -inf }
 0x517   : > { %v3586_v16 = vpop.f32.mrf.mxu3 }
 0x518   : > { %v1596_v33 = vsel %vm1589_vm1, %v3586_v16, -inf }
 0x519   : > { %v1528_v17 = vpop.f32.mrf.mxu2 }
 0x51a   : > { %v1590_v19 = vsel %vm1589_vm1, %v1528_v17, -inf }
 0x51b   : > { %v1587_v20 = vpop.f32.mrf.mxu1  ;;  %1591 = vmax.xlane.f32.xlu2 %v1590_v19 }
 0x51d   : > { %v1769_v21 = vpop.f32.mrf.mxu0 }
 0x51f   : > { %v1568_v22 = vpop.f32.mrf.mxu3 }
 0x521   : > { %v1530_v23 = vpop.f32.mrf.mxu2 }
 0x523   : > { %1807 = vmax.xlane.f32.xlu2 %v1806_v29 }
 0x529   : > { %v1547_v30 = vpop.f32.mrf.mxu2 }
 0x52a   : > { %v1593_v31 = vsel %vm1589_vm1, %v1547_v30, -inf }
 0x52b   : > { %1594 = vmax.xlane.f32.xlu0 %v1593_v31 }
 0x531   : > { %v1549_v32 = vpop.f32.mrf.mxu2 }
 0x533   : > { %1597 = vmax.xlane.f32.xlu0 %v1596_v33 }
 0x588   : > { %v3597_v60 = vpop.xlane.xlu1 %1600 }
 0x589   : > { %v1617_v25 = vsub.f32 %v1585_v12, %v3597_v60  ;;  %v1605_v57 = vsub.f32 -inf, %v3597_v60 }
 0x58b   : > { %v1624_v59 = vmul.f32 1.442695, %v1617_v25 }
 0x58d   : > { %2972 = vpow2.f32 %v1624_v59 }
 0x58e   : > { %v3602_v49 = vpop.xlane.xlu2 %1591 }
 0x58f   : > { %v1614_v51 = vsub.f32 %v1528_v17, %v3602_v49 }
 0x591   : > { %v1618_v26 = vmul.f32 1.442695, %v1614_v51 }
 0x593   : > { %v2973_v61 = vpop.eup %2972  ;;  %2974 = vpow2.f32 %v1618_v26  ;;  %v1735_v26 = vld [vmem:[#allocation3 + $0x4] sm:$0xf] }
 0x594   : > { %v1639_v56 = vsel %vm1589_vm1, %v2973_v61, 0.0  ;;  %v1649_v10 = vpack.c.bf16 %v2973_v61, %v2973_v61  ;;  %v1875_v61 = vsel %vm1653_vm2, %v1735_v26, 0 }
 0x595   : > { %1640 = vadd.xlane.f32.xlu1 %v1639_v56  ;;  %v1738_v56 = vld [vmem:[#allocation3 + $0x1c] sm:$0xf] }
 0x596   : > { %v1808_v28 = vpop.xlane.xlu2 %1807  ;;  %v1932_v53 = vsel %vm1653_vm2, %v1738_v56, 0 }
 0x599   : > { %v2975_v44 = vpop.eup %2974 }
 0x59a   : > { %v1630_v58 = vsel %vm1589_vm1, %v2975_v44, 0.0  ;;  %v1646_v27 = vpack.c.bf16 %v2975_v44, %v2975_v44  ;;  %v1737_v44 = vld [vmem:[#allocation3 + $0x14] sm:$0xf] }
 0x59b   : > { %1631 = vadd.xlane.f32.xlu2 %v1630_v58  ;;  %v1913_v58 = vsel %vm1653_vm2, %v1737_v44, 0 }
 0x59c   : > { %2694 = vmatmul.msk.bf16.vlgmr.msra.gmra.mxu2 %vm1589_vm1, %v1646_v27  ;;  %v1602_v27 = vsub.f32 -inf, %v3602_v49 }
 0x59d   : > { %1797 = vmatpush.bf16.xpose.msra.mxu2 %v1788_v62 }
 0x59e   : > { %v1595_v47 = vpop.xlane.xlu0 %1594  ;;  %v1606_v62 = vmul.f32 1.442695, %v1602_v27 }
 0x59f   : > { %v1615_v63 = vsub.f32 %v1547_v30, %v1595_v47  ;;  %v1816_v0 = vmax.f32 %v1595_v47, %v1808_v28 }
 0x5a1   : > { %v1620_v1 = vmul.f32 1.442695, %v1615_v63  ;;  %v1820_v45 = vsub.f32 %v1595_v47, %v1816_v0  ;;  %v1832_v2 = vsub.f32 %v3584_v15, %v1816_v0  ;;  %v1612_v0 = vmul.f32 1.442695, %v1605_v57 }
 0x5a3   : > { %2976 = vpow2.f32 %v1620_v1  ;;  %v1837_v3 = vmul.f32 1.442695, %v1832_v2  ;;  %v1825_v20 = vmul.f32 1.442695, %v1820_v45 }
 0x5a5   : > { %2978 = vpow2.f32 %v1837_v3 }
 0x5a6   : > { %v3612_v4 = vpop.xlane.xlu0 %1597 }
 0x5a7   : > { %v1616_v5 = vsub.f32 %v3586_v16, %v3612_v4  ;;  %v1603_v16 = vsub.f32 -inf, %v1595_v47 }
 0x5a9   : > { %v2977_v43 = vpop.eup %2976  ;;  %v1622_v54 = vmul.f32 1.442695, %v1616_v5  ;;  %v1608_v19 = vmul.f32 1.442695, %v1603_v16  ;;  %v1604_v5 = vsub.f32 -inf, %v3612_v4 }
 0x5aa   : > { %v1647_v7 = vpack.c.bf16 %v2977_v43, %v2977_v43  ;;  %v1633_v55 = vsel %vm1589_vm1, %v2977_v43, 0.0 }
 0x5ab   : > { %2980 = vpow2.f32 %v1622_v54  ;;  %v3616_v11 = vpop.eup %2978 }
 0x5ac   : > { %2695 = vmatmul.msk.bf16.vlgmr.msrb.gmra.mxu3 %vm1589_vm1, %v1647_v7  ;;  %2697 = vmatmul.msk.bf16.vlgmr.msrb.gmra.mxu2 %vm1589_vm1, %v1649_v10  ;;  %v1868_v12 = vpack.c.bf16 %v3616_v11, %v3616_v11  ;;  %2982 = vpow2.f32 %v1608_v19 }
 0x5ad   : > { %2984 = vpow2.f32 %v1825_v20  ;;  %1884 = vmatpush.bf16.msrb.mxu3 %v1875_v61  ;;  %1941 = vmatpush.bf16.msrb.mxu2 %v1932_v53  ;;  %v1850_v53 = vsel %vm1589_vm1, %v3616_v11, 0.0 }
 0x5ae   : > { %2703 = vmatmul.msk.bf16.vlgmr.msra.gmra.mxu0 %vm1589_vm1, %v1868_v12  ;;  %2986 = vpow2.f32 %v1606_v62 }
 0x5b1   : > { %v2981_v14 = vpop.eup %2980 }
 0x5b2   : > { %v1648_v15 = vpack.c.bf16 %v2981_v14, %v2981_v14  ;;  %v2983_v22 = vpop.eup %2982  ;;  %v1636_v48 = vsel %vm1589_vm1, %v2981_v14, 0.0  ;;  %v1610_v14 = vmul.f32 1.442695, %v1604_v5 }
 0x5b3   : > { %v3632_v29 = vmul.f32 0.0, %v2983_v22  ;;  %v3637_v31 = vpop.eup %2984 }
 0x5b4   : > { %2696 = vmatmul.msk.bf16.vlgmr.msrb.gmra.mxu1 %vm1589_vm1, %v1648_v15  ;;  %v2987_v2 = vpop.eup %2986 }
 0x5b5   : > { %1922 = vmatpush.bf16.msrb.mxu1 %v1913_v58  ;;  %v1626_v54 = vmul.f32 0.0, %v2987_v2 }
 0x5bc   : > { %2698 = vmatmul.msk.bf16.vlgmr.msra.gmra.mxu3 %vm1512_vm15, %v3572_v52  ;;  %2701 = vmatmul.msk.bf16.vlgmr.msra.gmra.mxu2 %vm1512_vm15, %v3574_v9 }
 0x5c4   : > { %2700 = vmatmul.msk.bf16.vlgmr.msra.gmra.mxu1 %vm1512_vm15, %v3566_v6 }
 0x608   : > { %v1641_v44 = vpop.xlane.xlu1 %1640 }
 0x61f   : > { %v3630_v17 = vpop.f32.mrf.mxu2 }
 0x620   : > { %v1727_v12 = vadd.f32 %v3630_v17, %v1626_v54 }
 0x627   : > { %v1668_v21 = vpop.f32.mrf.mxu2 }
 0x62b   : > { %v1905_v23 = vpop.f32.mrf.mxu0 }
 0x62f   : > { %v1685_v30 = vpop.f32.mrf.mxu3  ;;  %v3634_v52 = vpop.f32.mrf.mxu2 }
 0x630   : > { %v1728_v9 = vadd.f32 %v1685_v30, %v3632_v29 }
 0x631   : > { %v3639_v6 = vpop.f32.mrf.mxu1 }
 0x632   : > { %v1864_v32 = vmul.f32 %v3637_v31, %v1728_v9 }
 0x633   : > { %v1907_v34 = vpop.f32.mrf.mxu0 }
 0x634   : > { %v3642_v33 = vadd.f32 %v1905_v23, %v1864_v32 }
 0x637   : > { %v1687_v35 = vpop.f32.mrf.mxu3  ;;  %v1725_v24 = vpop.f32.mrf.mxu2 }
 0x639   : > { %v1706_v36 = vpop.f32.mrf.mxu1 }
 0x63f   : > { %v1751_v37 = vpop.f32.mrf.mxu3  ;;  %v1799_v38 = vpop.f32.mrf.mxu2 }
 0x640   : > { %v1803_v25 = vsel %vm1589_vm1, %v1751_v37, -inf  ;;  %v1812_v41 = vsel %vm1589_vm1, %v1799_v38, -inf }
 0x641   : > { %1804 = vmax.xlane.f32.xlu0 %v1803_v25  ;;  %v3645_v39 = vpop.f32.mrf.mxu1 }
 0x642   : > { %v1809_v51 = vsel %vm1589_vm1, %v3645_v39, -inf }
 0x647   : > { %v1753_v59 = vpop.f32.mrf.mxu3  ;;  %v1801_v40 = vpop.f32.mrf.mxu2 }
 0x649   : > { %v1785_v50 = vpop.f32.mrf.mxu1  ;;  %1813 = vmax.xlane.f32.xlu0 %v1812_v41 }
 0x651   : > { %1810 = vmax.xlane.f32.xlu0 %v1809_v51 }
 0x659   : > { %1637 = vadd.xlane.f32.xlu0 %v1636_v48 }
 0x661   : > { %1634 = vadd.xlane.f32.xlu0 %v1633_v55 }
 0x6b4   : > { %v1805_v42 = vpop.xlane.xlu0 %1804 }
 0x6b5   : > { %v1815_v28 = vmax.f32 %v3602_v49, %v1805_v42 }
 0x6b7   : > { %v1819_v47 = vsub.f32 %v3602_v49, %v1815_v28  ;;  %v1831_v63 = vsub.f32 %v1751_v37, %v1815_v28 }
 0x6b9   : > { %v1823_v1 = vmul.f32 1.442695, %v1819_v47  ;;  %v1835_v45 = vmul.f32 1.442695, %v1831_v63 }
 0x6bb   : > { %2988 = vpow2.f32 %v1823_v1 }
 0x6bc   : > { %2990 = vpow2.f32 %v1835_v45  ;;  %v1814_v3 = vpop.xlane.xlu0 %1813 }
 0x6bd   : > { %2992 = vpow2.f32 %v1612_v0  ;;  %v1818_v43 = vmax.f32 %v3597_v60, %v1814_v3 }
 0x6bf   : > { %v1822_v7 = vsub.f32 %v3597_v60, %v1818_v43  ;;  %v1834_v10 = vsub.f32 %v1799_v38, %v1818_v43 }
 0x6c1   : > { %v2989_v49 = vpop.eup %2988  ;;  %v1829_v15 = vmul.f32 1.442695, %v1822_v7  ;;  %v1841_v16 = vmul.f32 1.442695, %v1834_v10 }
 0x6c2   : > { %v2991_v19 = vpop.eup %2990  ;;  %v1863_v20 = vmul.f32 %v2989_v49, %v1727_v12 }
 0x6c3   : > { %v2993_v21 = vpop.eup %2992  ;;  %v1867_v22 = vpack.c.bf16 %v2991_v19, %v2991_v19  ;;  %2994 = vpow2.f32 %v1829_v15  ;;  %v1847_v23 = vsel %vm1589_vm1, %v2991_v19, 0.0 }
 0x6c4   : > { %2996 = vpow2.f32 %v1841_v16  ;;  %1848 = vadd.xlane.f32.xlu1 %v1847_v23  ;;  %v1811_v30 = vpop.xlane.xlu0 %1810  ;;  %v1629_v17 = vmul.f32 0.0, %v2993_v21 }
 0x6c5   : > { %2998 = vpow2.f32 %v1610_v14  ;;  %2702 = vmatmul.msk.bf16.vlgmr.msrb.gmra.mxu3 %vm1589_vm1, %v1867_v22  ;;  %v1817_v60 = vmax.f32 %v3612_v4, %v1811_v30 }
 0x6c6   : > { %v1730_v34 = vadd.f32 %v3634_v52, %v1629_v17  ;;  %v1645_v57 = vadd.f32 %v1641_v44, %v1629_v17 }
 0x6c7   : > { %v1821_v9 = vsub.f32 %v3612_v4, %v1817_v60  ;;  %v1833_v32 = vsub.f32 %v3645_v39, %v1817_v60 }
 0x6c9   : > { %v2995_v35 = vpop.eup %2994  ;;  %v1827_v24 = vmul.f32 1.442695, %v1821_v9  ;;  %v1839_v36 = vmul.f32 1.442695, %v1833_v32 }
 0x6ca   : > { %v2997_v37 = vpop.eup %2996  ;;  %v1866_v38 = vmul.f32 %v2995_v35, %v1730_v34  ;;  %v1846_v63 = vmul.f32 %v2995_v35, %v1645_v57 }
 0x6cb   : > { %v2999_v25 = vpop.eup %2998  ;;  %v1870_v59 = vpack.c.bf16 %v2997_v37, %v2997_v37  ;;  %3000 = vpow2.f32 %v1827_v24  ;;  %v1856_v40 = vsel %vm1589_vm1, %v2997_v37, 0.0 }
 0x6cc   : > { %3002 = vpow2.f32 %v1839_v36  ;;  %1857 = vadd.xlane.f32.xlu0 %v1856_v40  ;;  %v1638_v41 = vpop.xlane.xlu0 %1637  ;;  %v1628_v4 = vmul.f32 0.0, %v2999_v25 }
 0x6cd   : > { %2705 = vmatmul.msk.bf16.vlgmr.msrb.gmra.mxu2 %vm1589_vm1, %v1870_v59 }
 0x6ce   : > { %v1729_v39 = vadd.f32 %v3639_v6, %v1628_v4  ;;  %v1632_v6 = vpop.xlane.xlu2 %1631  ;;  %v1644_v47 = vadd.f32 %v1638_v41, %v1628_v4 }
 0x6cf   : > { %v1642_v58 = vadd.f32 %v1632_v6, %v1626_v54 }
 0x6d1   : > { %v3001_v50 = vpop.eup %3000  ;;  %v1843_v62 = vmul.f32 %v2989_v49, %v1642_v58 }
 0x6d2   : > { %v3003_v52 = vpop.eup %3002  ;;  %v1865_v51 = vmul.f32 %v3001_v50, %v1729_v39 }
 0x6d3   : > { %v1869_v48 = vpack.c.bf16 %v3003_v52, %v3003_v52  ;;  %v1853_v55 = vsel %vm1589_vm1, %v3003_v52, 0.0 }
 0x6d4   : > { %1854 = vadd.xlane.f32.xlu2 %v1853_v55  ;;  %v1635_v26 = vpop.xlane.xlu0 %1634 }
 0x6d5   : > { %2704 = vmatmul.msk.bf16.vlgmr.msrb.gmra.mxu1 %vm1589_vm1, %v1869_v48  ;;  %v1643_v61 = vadd.f32 %v1635_v26, %v3632_v29  ;;  %v1845_v29 = vmul.f32 %v3001_v50, %v1644_v47 }
 0x6d7   : > { %v1844_v56 = vmul.f32 %v3637_v31, %v1643_v61 }
 0x6dc   : > { %1851 = vadd.xlane.f32.xlu2 %v1850_v53 }
 0x737   : > { %v1849_v27 = vpop.xlane.xlu1 %1848 }
 0x738   : > { %v1859_v42 = vadd.f32 %v1849_v27, %v1843_v62 }
 0x73a   : > { %3004 = vrcp.f32 %v1859_v42 }
 0x73f   : > { %v1858_v28 = vpop.xlane.xlu0 %1857 }
 0x740   : > { %v1862_v1 = vadd.f32 %v1858_v28, %v1846_v63  ;;  %v3005_v2 = vpop.eup %3004 }
 0x742   : > { %3006 = vrcp.f32 %v1862_v1 }
 0x747   : > { %v1855_v0 = vpop.xlane.xlu2 %1854 }
 0x748   : > { %v1886_v45 = vpop.f32.mrf.mxu3  ;;  %v1861_v3 = vadd.f32 %v1855_v0, %v1845_v29  ;;  %v3007_v12 = vpop.eup %3006 }
 0x749   : > { %v1947_v31 = vadd.f32 %v1886_v45, %v1863_v20 }
 0x74a   : > { %3008 = vrcp.f32 %v1861_v3 }
 0x74b   : > { %v1955_v11 = vmul.f32 %v3005_v2, %v1947_v31 }
 0x74d   : > { %v1961_v19 = vrot.slane %v1955_v11, 4 }
 0x74f   : > { %v1852_v5 = vpop.xlane.xlu2 %1851 }
 0x750   : > { %v1860_v43 = vadd.f32 %v1852_v5, %v1844_v56  ;;  %v1888_v54 = vpop.f32.mrf.mxu3  ;;  %v1943_v7 = vpop.f32.mrf.mxu2 }
 0x751   : > { %v1950_v10 = vadd.f32 %v1943_v7, %v1866_v38  ;;  %v3009_v16 = vpop.eup %3008 }
 0x752   : > { %3010 = vrcp.f32 %v1860_v43  ;;  %v1924_v49 = vpop.f32.mrf.mxu1 }
 0x753   : > { %v1958_v14 = vmul.f32 %v3007_v12, %v1950_v10  ;;  %v1949_v15 = vadd.f32 %v1924_v49, %v1865_v51 }
 0x755   : > { %v1957_v21 = vmul.f32 %v3009_v16, %v1949_v15  ;;  %v1971_v17 = vrot.slane %v1958_v14, 4 }
 0x757   : > { %v1959_v22 = vrot.slane %v1957_v21, 4  ;;  %v1962_v20 = vsel %vm1390_vm0, %v1957_v21, %v1961_v19 }
 0x758   : > { %v3011_v23 = vpop.eup %3010  ;;  %v1945_v30 = vpop.f32.mrf.mxu2  ;;  %v1970_v34 = vperm.slane %v1962_v20, %v3525_v46 }
 0x759   : > { %v1956_v60 = vmul.f32 %v3011_v23, %v3642_v33  ;;  %v1960_v9 = vsel %vm1390_vm0, %v1959_v22, %v1955_v11 }
 0x75a   : > { %v1966_v32 = vperm.slane %v1960_v9, %v3525_v46  ;;  %v1926_v35 = vpop.f32.mrf.mxu1  ;;  %v1997_v41 = vrot.slane %v1970_v34, 4 }
 0x75b   : > { %v1973_v24 = vrot.slane %v1956_v60, 4  ;;  %v1972_v36 = vsel %vm1390_vm0, %v1971_v17, %v1956_v60  ;;  %v2841_v60 = vld [vmem:[%s3920_s9 + $0x18] sm:$0xff]  ;;  %v2840_v17 = vld [vmem:[%s3920_s9 + $0x10] sm:$0xff]  ;;  %v2838_v35 = vld [vmem:[%s3920_s9] sm:$0xff] }
 0x75c   : > { %v1978_v37 = vperm.slane %v1972_v36, %v3525_v46  ;;  %v1985_v38 = vrot.slane %v1966_v32, 4  ;;  %v2129_v9 = vsel %vm1279_vm10, %v2840_v17, 0 }
 0x75d   : > { %v1974_v25 = vsel %vm1390_vm0, %v1958_v14, %v1973_v24  ;;  %v2123_v24 = vsel %vm1279_vm10, %v2838_v35, 0 }
 0x75e   : > { %v1982_v59 = vperm.slane %v1974_v25, %v3525_v46  ;;  %v1983_v40 = vrot.slane %v1978_v37, 4  ;;  %v1986_v33 = vsel %vm1390_vm0, %v1978_v37, %v1985_v38 }
 0x75f   : > { %v1994_v4 = vperm.slane %v1986_v33, %v3531_v13 }
 0x760   : > { %v1995_v39 = vrot.slane %v1982_v59, 4  ;;  %v1984_v50 = vsel %vm1390_vm0, %v1983_v40, %v1966_v32  ;;  %v1998_v52 = vsel %vm1390_vm0, %v1982_v59, %v1997_v41  ;;  %v2839_v32 = vld [vmem:[%s3920_s9 + $0x8] sm:$0xff]  ;;  %v2964_v41 = vld [vmem:[%s3921_s10] ss:$0 sm:$0xff] }
 0x761   : > { %v1990_v51 = vperm.slane %v1984_v50, %v3531_v13  ;;  %v2006_v48 = vperm.slane %v1998_v52, %v3531_v13  ;;  %v2009_v55 = vrot.slane %v1994_v4, 4 }
 0x762   : > { %v1996_v26 = vsel %vm1390_vm0, %v1995_v39, %v1970_v34  ;;  %v2126_v34 = vsel %vm1279_vm10, %v2839_v32, 0  ;;  %v2965_v32 = vld [vmem:[%s3922_s11] ss:$0 sm:$0xff] }
 0x763   : > { %v2002_v61 = vperm.slane %v1996_v26, %v3531_v13  ;;  %v2007_v56 = vrot.slane %v1990_v51, 4  ;;  %v2013_v53 = vrot.slane %v2006_v48, 4  ;;  %v2010_v44 = vsel %vm1390_vm0, 0.0, %v2009_v55  ;;  %v2849_v48 = vld [vmem:[%s3924_s13 + $0x38] sm:$0xff] }
 0x764   : > { %v2015_v6 = vsel %vm1390_vm0, %v2009_v55, %v1990_v51  ;;  %v2020_v58 = vrot.slane %v2010_v44, 4  ;;  %v2857_v55 = vld [vmem:[%s3924_s13 + $0x78] sm:$0xff]  ;;  %v2324_v26 = vsel %vm1279_vm10, %v2849_v48, 0 }
 0x765   : > { %v2011_v27 = vrot.slane %v2002_v61, 4  ;;  %v2008_v62 = vsel %vm1390_vm0, 0.0, %v2007_v56  ;;  %v2014_v42 = vsel %vm1390_vm0, 0.0, %v2013_v53  ;;  %v2019_v57 = vperm.slane %v2015_v6, %v3525_v46  ;;  %2350 = vmatpush.bf16.xpose.msrb.mxu0 %v2324_v26  ;;  %v2856_v56 = vld [vmem:[%s3924_s13 + $0x70] sm:$0xff]  ;;  %v2847_v6 = vld [vmem:[%s3924_s13 + $0x28] sm:$0xff] }
 0x766   : > { %v2021_v28 = vsel %vm1390_vm0, %v2020_v58, %v2008_v62  ;;  %v2026_v47 = vsel %vm1390_vm0, %v2013_v53, %v2002_v61  ;;  %v2031_v63 = vrot.slane %v2014_v42, 4  ;;  %v2348_v61 = vsel %vm1279_vm10, %v2857_v55, 0  ;;  %v2855_v58 = vld [vmem:[%s3924_s13 + $0x68] sm:$0xff]  ;;  %v2846_v42 = vld [vmem:[%s3924_s13 + $0x20] sm:$0xff] }
 0x767   : > { %v2012_v0 = vsel %vm1390_vm0, 0.0, %v2011_v27  ;;  %v2025_v1 = vperm.slane %v2021_v28, %v3525_v46  ;;  %v2030_v29 = vperm.slane %v2026_v47, %v3525_v46  ;;  %v2039_v45 = vrot.slane %v2019_v57, 4  ;;  %2363 = vmatpush.bf16.xpose.msra.mxu1 %v2348_v61  ;;  %v2809_v55 = vld [vmem:[%s3926_s15 + $0x20] sm:$0xf]  ;;  %v2863_v26 = vld [vmem:[%s3926_s15 + $0x24] sm:$0xf0] }
 0x768   : > { %v2032_v31 = vsel %vm1390_vm0, %v2031_v63, %v2012_v0  ;;  %v2345_v44 = vsel %vm1279_vm10, %v2856_v56, 0  ;;  %v2318_v27 = vsel %vm1279_vm10, %v2847_v6, 0  ;;  %v2342_v62 = vsel %vm1279_vm10, %v2855_v58, 0  ;;  %v2862_v61 = vld [vmem:[%s3926_s15 + $0x24] sm:$0xf] }
 0x769   : > { %v2036_v2 = vperm.slane %v2032_v31, %v3525_v46  ;;  %v2040_v3 = vsel %vm1390_vm0, %v2025_v1, %v2039_v45  ;;  %v2051_v11 = vrot.slane %v2030_v29, 4  ;;  %v2037_v5 = vrot.slane %v2025_v1, 4  ;;  %v2853_v45 = vld [vmem:[%s3924_s13 + $0x58] sm:$0xff] }
 0x76a   : > { %v2048_v43 = vperm.slane %v2040_v3, %v3531_v13  ;;  %v2315_v47 = vsel %vm1279_vm10, %v2846_v42, 0 }
 0x76b   : > { %v2052_v54 = vsel %vm1390_vm0, %v2036_v2, %v2051_v11  ;;  %v2038_v7 = vsel %vm1390_vm0, %v2037_v5, %v2019_v57  ;;  %v2049_v10 = vrot.slane %v2036_v2, 4  ;;  %v2854_v57 = vld [vmem:[%s3924_s13 + $0x60] sm:$0xff]  ;;  %v2336_v11 = vsel %vm1279_vm10, %v2853_v45, 0  ;;  %v2844_v5 = vld [vmem:[%s3924_s13 + $0x10] sm:$0xff] }
 0x76c   : > { %v2060_v12 = vperm.slane %v2052_v54, %v3531_v13  ;;  %v2067_v49 = vrot.slane %v2048_v43, 4  ;;  %v2044_v14 = vperm.slane %v2038_v7, %v3531_v13  ;;  %v2339_v63 = vsel %vm1279_vm10, %v2854_v57, 0 }
 0x76d   : > { %v2050_v15 = vsel %vm1390_vm0, %v2049_v10, %v2030_v29  ;;  %v2845_v29 = vld [vmem:[%s3924_s13 + $0x18] sm:$0xff]  ;;  %v2309_v54 = vsel %vm1279_vm10, %v2844_v5, 0  ;;  %v2843_v10 = vld [vmem:[%s3924_s13 + $0x8] sm:$0xff] }
 0x76e   : > { %v2068_v46 = vsel %vm1390_vm0, %v2060_v12, %v2067_v49  ;;  %v2065_v16 = vrot.slane %v2060_v12, 4  ;;  %v2056_v19 = vperm.slane %v2050_v15, %v3531_v13  ;;  %v2063_v21 = vrot.slane %v2044_v14, 4  ;;  %v2851_v12 = vld [vmem:[%s3924_s13 + $0x48] sm:$0xff]  ;;  %v2842_v15 = vld [vmem:[%s3924_s13] sm:$0xff]  ;;  %v2803_v5 = vld [vmem:[%s3926_s15 + $0x18] sm:$0xf0] }
 0x76f   : > { %2078 = vrot.lane.b32.xlu2 %v2068_v46, %s3070_s25  ;;  %v2132_v13 = vsel %vm1279_vm10, %v2841_v60, 0  ;;  %2364 = vmatpush.bf16.xpose.msra.mxu1 %v2345_v44  ;;  %v2312_v3 = vsel %vm1279_vm10, %v2845_v29, 0  ;;  %v2306_v49 = vsel %vm1279_vm10, %v2843_v10, 0  ;;  %v2850_v46 = vld [vmem:[%s3924_s13 + $0x40] sm:$0xff]  ;;  %v2811_v44 = vld [vmem:[%s3926_s15 + $0x28] sm:$0xf0] }
 0x770   : > { %v2066_v22 = vsel %vm1390_vm0, %v2065_v16, %v2048_v43  ;;  %v2061_v20 = vrot.slane %v2056_v19, 4  ;;  %v2064_v23 = vsel %vm1390_vm0, %v2056_v19, %v2063_v21  ;;  %2138 = vmatpush.bf16.xpose.msra.mxu3 %v2132_v13  ;;  %v2852_v43 = vld [vmem:[%s3924_s13 + $0x50] sm:$0xff]  ;;  %v2303_v16 = vsel %vm1279_vm10, %v2842_v15, 0 }
 0x771   : > { %2074 = vrot.lane.b32.xlu0 %v2066_v22, %s3071_s26  ;;  %2070 = vrot.lane.b32.xlu1 %v2064_v23, %s3072_s27  ;;  %v2333_v7 = vsel %vm1279_vm10, %v2852_v43, 0  ;;  %v2327_v19 = vsel %vm1279_vm10, %v2850_v46, 0  ;;  %v2814_v6 = vor.u32 %v2862_v61, %v2811_v44  ;;  %v2860_v29 = vld [vmem:[%s3926_s15 + $0x14] sm:$0xf] }
 0x772   : > { %v2062_v30 = vsel %vm1390_vm0, %v2061_v20, %v2044_v14  ;;  %v2330_v14 = vsel %vm1279_vm10, %v2851_v12, 0  ;;  %v2806_v10 = vor.u32 %v2860_v29, %v2803_v5 }
 0x777   : > { %2365 = vmatpush.bf16.xpose.msra.mxu1 %v2342_v62 }
 0x778   : > { %2139 = vmatpush.bf16.xpose.msra.mxu3 %v2129_v9 }
 0x77f   : > { %2366 = vmatpush.bf16.xpose.msra.mxu1 %v2339_v63 }
 0x780   : > { %2140 = vmatpush.bf16.xpose.msra.mxu3 %v2126_v34 }
 0x787   : > { %2367 = vmatpush.bf16.xpose.msra.mxu1 %v2336_v11 }
 0x788   : > { %2141 = vmatpush.bf16.xpose.msra.mxu3 %v2123_v24 }
 0x78f   : > { %2368 = vmatpush.bf16.xpose.msra.mxu1 %v2333_v7 }
 0x797   : > { %2369 = vmatpush.bf16.xpose.msra.mxu1 %v2330_v14 }
 0x79f   : > { %2370 = vmatpush.bf16.xpose.msra.mxu1 %v2327_v19 }
 0x7c9   : > { %v2079_v25 = vpop.permute.xlu2 %2078 }
 0x7e3   : > { %v2075_v36 = vpop.permute.xlu0 %2074  ;;  %v2071_v37 = vpop.permute.xlu1 %2070 }
 0x7e4   : > { %v2081_v38 = vsel %vm1512_vm15, %v2062_v30, %v2071_v37 }
 0x7e5   : > { %v2083_v59 = vsel %vm2082_vm3, %v2081_v38, %v2075_v36  ;;  %v2817_v38 = vld [vmem:[%s3926_s15 + $0x30] sm:$0xf] }
 0x7e6   : > { %v2085_v40 = vsel %vm2084_vm4, %v2083_v59, %v2079_v25  ;;  %v2865_v25 = vld [vmem:[%s3926_s15 + $0x34] sm:$0xf0]  ;;  %v2864_v59 = vld [vmem:[%s3926_s15 + $0x34] sm:$0xf] }
 0x7e7   : > { %v2095_v33 = vpack.c.bf16 %v2085_v40, %v2085_v40  ;;  %v2818_v40 = vor.u32 %v2865_v25, %v2817_v38 }
 0x7e9   : > { %2722 = vmatmul.msk.bf16.vlgmr.msra.gmra.mxu3 %vm1279_vm10, %v2095_v33  ;;  %v2819_v33 = vld [vmem:[%s3926_s15 + $0x38] sm:$0xf0]  ;;  %2522 = vmatpush.bf16.xpose.msra.mxu2 %v2818_v40 }
 0x86c   : > { %v2143_v4 = vpop.f32.mrf.mxu3 }
 0x86d   : > { %v2144_v39 = vadd.f32 %v2964_v41, %v2143_v4  ;;  %v2212_v41 = vld [vmem:[%s3925_s14] sm:$0x3]  ;;  %v2822_v4 = vor.u32 %v2864_v59, %v2819_v33 }
 0x86f   : > { %v3741_v50 = vadd.f32 %v2144_v39, %v3484_v8  ;;  %v2848_v8 = vld [vmem:[%s3924_s13 + $0x30] sm:$0xff]  ;;  %2535 = vmatpush.bf16.xpose.msrb.mxu3 %v2822_v4  ;;  %v2215_v39 = vperm.slane %v2212_v41, 0 }
 0x870   : > { %v2321_v53 = vsel %vm1279_vm10, %v2848_v8, 0 }
 0x871   : > { %v2150_v52 = vsel %vm1279_vm10, %v3741_v50, 0.0  ;;  %2351 = vmatpush.bf16.xpose.msrb.mxu0 %v2321_v53  ;;  %v2810_v53 = vor.u32 %v2863_v26, %v2809_v55 }
 0x872   : > { %2151 = vadd.xlane.f32.xlu1 %v2150_v52  ;;  %v2216_v52 = vperm.slane %v2212_v41, 1 }
 0x873   : > { %2523 = vmatpush.bf16.xpose.msra.mxu2 %v2810_v53 }
 0x874   : > { %v2145_v51 = vpop.f32.mrf.mxu3 }
 0x877   : > { %2536 = vmatpush.bf16.xpose.msrb.mxu3 %v2814_v6 }
 0x879   : > { %2352 = vmatpush.bf16.xpose.msrb.mxu0 %v2318_v27 }
 0x87f   : > { %2537 = vmatpush.bf16.xpose.msrb.mxu3 %v2806_v10 }
 0x881   : > { %2353 = vmatpush.bf16.xpose.msrb.mxu0 %v2315_v47 }
 0x889   : > { %2354 = vmatpush.bf16.xpose.msrb.mxu0 %v2312_v3 }
 0x891   : > { %2355 = vmatpush.bf16.xpose.msrb.mxu0 %v2309_v54 }
 0x899   : > { %2356 = vmatpush.bf16.xpose.msrb.mxu0 %v2306_v49 }
 0x8a1   : > { %2357 = vmatpush.bf16.xpose.msrb.mxu0 %v2303_v16 }
 0x8e5   : > { %v2152_v28 = vpop.xlane.xlu1 %2151 }
 0x8e6   : > { %v2153_v0 = vmul.f32 %v2152_v28, %v3492_v18 }
 0x8e8   : > { %v2154_v1 = vsub.f32 %v3741_v50, %v2153_v0  ;;  %v2801_v0 = vld [vmem:[%s3926_s15 + $0x10] sm:$0xf] }
 0x8ea   : > { %v2155_v31 = vmul.f32 %v2154_v1, %v2154_v1 }
 0x8ec   : > { %v2156_v2 = vsel %vm1279_vm10, %v2155_v31, 0.0 }
 0x8ed   : > { %2157 = vadd.xlane.f32.xlu0 %v2156_v2 }
 0x960   : > { %v2158_v21 = vpop.xlane.xlu0 %2157 }
 0x961   : > { %v2159_v22 = vmul.f32 %v2158_v21, %v3492_v18  ;;  %v2966_v18 = vld [vmem:[%s3923_s12] ss:$0 sm:$0xff] }
 0x963   : > { %v2160_v20 = vadd.f32 1e-05, %v2159_v22  ;;  %v2793_v22 = vld [vmem:[%s3926_s15] sm:$0xf] }
 0x965   : > { %3012 = vrsqrt.f32 %v2160_v20  ;;  %vm2167_vm6 = vweird.f32 %v2160_v20 }
 0x96b   : > { %v3013_v23 = vpop.eup %3012 }
 0x96c   : > { %v2162_v30 = vmul.f32 %v3013_v23, %v2160_v20  ;;  %vm2168_vm5 = vweird.f32 %v3013_v23  ;;  %v2859_v20 = vld [vmem:[%s3926_s15 + $0x4] sm:$0xf0] }
 0x96d   : > { %vm2169_vm7 = vmor %vm2167_vm6, %vm2168_vm5 }
 0x96e   : > { %v2163_v60 = vmul.f32 %v3013_v23, %v2162_v30 }
 0x970   : > { %v2164_v13 = vmul.f32 0.5, %v2163_v60  ;;  %v2794_v60 = vor.u32 %v2859_v20, %v2793_v22 }
 0x972   : > { %v2165_v17 = vsub.f32 1.5, %v2164_v13  ;;  %v2858_v13 = vld [vmem:[%s3926_s15 + $0x4] sm:$0xf] }
 0x974   : > { %v2166_v9 = vmul.f32 %v3013_v23, %v2165_v17  ;;  %v2795_v17 = vld [vmem:[%s3926_s15 + $0x8] sm:$0xf0] }
 0x976   : > { %v2170_v34 = vsel %vm2169_vm7, %v3013_v23, %v2166_v9 }
 0x977   : > { %v2171_v35 = vmul.f32 %v2170_v34, %v2154_v1  ;;  %v2861_v1 = vld [vmem:[%s3926_s15 + $0x14] sm:$0xf0] }
 0x978   : > { %v2802_v3 = vor.u32 %v2861_v1, %v2801_v0 }
 0x979   : > { %v2175_v24 = vmul.f32 %v2965_v32, %v2171_v35  ;;  %v2798_v32 = vor.u32 %v2858_v13, %v2795_v17 }
 0x97a   : > { %2524 = vmatpush.bf16.xpose.msra.mxu2 %v2802_v3 }
 0x97b   : > { %v2179_v36 = vadd.f32 %v2966_v18, %v2175_v24  ;;  %2538 = vmatpush.bf16.xpose.msrb.mxu3 %v2798_v32 }
 0x97d   : > { %v2213_v37 = vpack.c.bf16 %v2179_v36, %v2179_v36 }
 0x97f   : > { %2787 = vmatmul.msk.bf16.vlgmr.msrb.gmra.mxu0 %vm1279_vm10, %v2213_v37  ;;  %2788 = vmatmul.msk.bf16.vlgmr.msra.gmra.mxu1 %vm1279_vm10, %v2213_v37 }
 0x982   : > { %2525 = vmatpush.bf16.xpose.msra.mxu2 %v2794_v60 }
 0x9fc   : > { %v2359_v51 = vpop.f32.mrf.mxu0  ;;  %v2372_v48 = vpop.f32.mrf.mxu1 }
 0x9fd   : > { %v3845_v8 = vadd.f32 %v2359_v51, %v2215_v39  ;;  %v3847_v56 = vadd.f32 %v2372_v48, %v2216_v52 }
 0x9ff   : > { %v3853_v58 = vmul.f32 0.70710677, %v3845_v8  ;;  %v3856_v27 = vmul.f32 0.70710677, %v3847_v56 }
 0xa01   : > { %v2380_v62 = vmul.f32 %v3853_v58, %v3853_v58  ;;  %v2420_v42 = vmul.f32 %v3856_v27, %v3856_v27 }
 0xa03   : > { %v2381_v57 = vmin.f32 %v2380_v62, 16.0  ;;  %v2421_v28 = vmin.f32 %v2420_v42, 16.0 }
 0xa04   : > { %v2361_v47 = vpop.f32.mrf.mxu0  ;;  %v2374_v63 = vpop.f32.mrf.mxu1 }
 0xa05   : > { %v2382_v45 = vmul.f32 2.1237322e-06, %v2381_v57  ;;  %v2393_v31 = vmul.f32 3.8918573e-05, %v2381_v57  ;;  %v2422_v2 = vmul.f32 2.1237322e-06, %v2421_v28 }
 0xa06   : > { %v2433_v11 = vmul.f32 3.8918573e-05, %v2421_v28 }
 0xa07   : > { %v2383_v43 = vadd.f32 0.00028619796, %v2382_v45  ;;  %v2394_v54 = vadd.f32 0.001143296, %v2393_v31  ;;  %v2423_v7 = vadd.f32 0.00028619796, %v2422_v2 }
 0xa08   : > { %v2434_v12 = vadd.f32 0.001143296, %v2433_v11 }
 0xa09   : > { %v2384_v49 = vmul.f32 %v2383_v43, %v2381_v57  ;;  %v2395_v14 = vmul.f32 %v2394_v54, %v2381_v57  ;;  %v2424_v15 = vmul.f32 %v2423_v7, %v2421_v28 }
 0xa0a   : > { %v2435_v46 = vmul.f32 %v2434_v12, %v2421_v28 }
 0xa0b   : > { %v2385_v16 = vadd.f32 0.0036580483, %v2384_v49  ;;  %v2396_v19 = vadd.f32 0.014752088, %v2395_v14  ;;  %v2425_v30 = vadd.f32 0.0036580483, %v2424_v15 }
 0xa0c   : > { %v2436_v21 = vadd.f32 0.014752088, %v2435_v46 }
 0xa0d   : > { %v2397_v23 = vmul.f32 %v2396_v19, %v2381_v57  ;;  %v2386_v34 = vmul.f32 %v2385_v16, %v2381_v57  ;;  %v2426_v36 = vmul.f32 %v2425_v30, %v2421_v28  ;;  %v2376_v19 = vmul.f32 0.5, %v3845_v8 }
 0xa0e   : > { %v2437_v9 = vmul.f32 %v2436_v21, %v2421_v28 }
 0xa0f   : > { %v2398_v35 = vadd.f32 0.112945676, %v2397_v23  ;;  %v2387_v38 = vadd.f32 0.05243302, %v2386_v34  ;;  %v2427_v33 = vadd.f32 0.05243302, %v2426_v36 }
 0xa10   : > { %v2438_v18 = vadd.f32 0.112945676, %v2437_v9 }
 0xa11   : > { %v2399_v24 = vmul.f32 %v2398_v35, %v2381_v57  ;;  %v2388_v4 = vmul.f32 %v2387_v38, %v2381_v57  ;;  %v2428_v51 = vmul.f32 %v2427_v33, %v2421_v28 }
 0xa12   : > { %v2439_v37 = vmul.f32 %v2438_v18, %v2421_v28 }
 0xa13   : > { %v2400_v25 = vadd.f32 0.4994258, %v2399_v24  ;;  %v2389_v48 = vadd.f32 0.18741608, %v2388_v4  ;;  %v2429_v55 = vadd.f32 0.18741608, %v2428_v51 }
 0xa14   : > { %v2440_v59 = vadd.f32 0.4994258, %v2439_v37 }
 0xa15   : > { %v2401_v40 = vmul.f32 %v2400_v25, %v2381_v57  ;;  %v2390_v61 = vmul.f32 %v2389_v48, %v2381_v57  ;;  %v2430_v6 = vmul.f32 %v2429_v55, %v2421_v28 }
 0xa16   : > { %v2441_v41 = vmul.f32 %v2440_v59, %v2421_v28 }
 0xa17   : > { %v2402_v39 = vadd.f32 1.0, %v2401_v40  ;;  %v2391_v47 = vadd.f32 1.1283791, %v2390_v61  ;;  %v2431_v31 = vadd.f32 1.1283791, %v2430_v6 }
 0xa18   : > { %v2442_v52 = vadd.f32 1.0, %v2441_v41 }
 0xa19   : > { %3014 = vrcp.f32 %v2402_v39  ;;  %v2414_v63 = vand.u32 2147483648, %v2402_v39  ;;  %v2412_v29 = vand.u32 2147483647, %v2402_v39  ;;  %vm2408_vm11 = vweird.f32 %v2402_v39 }
 0xa1a   : > { %3016 = vrcp.f32 %v2442_v52  ;;  %v2454_v45 = vand.u32 2147483648, %v2442_v52  ;;  %v2452_v3 = vand.u32 2147483647, %v2442_v52  ;;  %vm2448_vm13 = vweird.f32 %v2442_v52 }
 0xa1b   : > { %v2415_v57 = vor.u32 1.1754944e-38, %v2414_v63  ;;  %v2392_v28 = vmul.f32 %v2391_v47, %v3853_v58  ;;  %vm2413_vm14 = vcmp.eq.f32.partialorder %v2412_v29, 8.507059e+37  ;;  %v2432_v10 = vmul.f32 %v2431_v31, %v3856_v27  ;;  %v2967_v27 = vld [vmem:[%s3927_s16] ss:$0 sm:$0xff] }
 0xa1c   : > { %v2455_v54 = vor.u32 1.1754944e-38, %v2454_v45  ;;  %vm2453_vm0 = vcmp.eq.f32.partialorder %v2452_v3, 8.507059e+37  ;;  %v2377_v58 = vmul.f32 0.5, %v3847_v56 }
 0xa1f   : > { %v3015_v26 = vpop.eup %3014 }
 0xa20   : > { %v3017_v53 = vpop.eup %3016  ;;  %v2404_v44 = vmul.f32 %v3015_v26, %v2402_v39  ;;  %vm2409_vm8 = vweird.f32 %v3015_v26 }
 0xa21   : > { %v2444_v62 = vmul.f32 %v3017_v53, %v2442_v52  ;;  %vm2449_vm9 = vweird.f32 %v3017_v53  ;;  %vm2410_vm12 = vmor %vm2408_vm11, %vm2409_vm8 }
 0xa22   : > { %v2405_v42 = vsub.f32 1.0, %v2404_v44  ;;  %vm2450_vm15 = vmor %vm2448_vm13, %vm2449_vm9 }
 0xa23   : > { %v2445_v0 = vsub.f32 1.0, %v2444_v62 }
 0xa24   : > { %v2406_v1 = vmul.f32 %v3015_v26, %v2405_v42 }
 0xa25   : > { %v2446_v2 = vmul.f32 %v3017_v53, %v2445_v0 }
 0xa26   : > { %v2407_v11 = vadd.f32 %v3015_v26, %v2406_v1 }
 0xa27   : > { %v2447_v5 = vadd.f32 %v3017_v53, %v2446_v2 }
 0xa28   : > { %v2411_v43 = vsel %vm2410_vm12, %v3015_v26, %v2407_v11 }
 0xa29   : > { %v2416_v7 = vsel %vm2413_vm14, %v2415_v57, %v2411_v43  ;;  %v2451_v12 = vsel %vm2450_vm15, %v3017_v53, %v2447_v5 }
 0xa2a   : > { %v2417_v49 = vmul.f32 %v2416_v7, %v2392_v28  ;;  %v2456_v14 = vsel %vm2453_vm0, %v2455_v54, %v2451_v12 }
 0xa2b   : > { %v2457_v15 = vmul.f32 %v2456_v14, %v2432_v10 }
 0xa2c   : > { %v2789_v46 = vclamps-f32 %v2417_v49, 1.0 }
 0xa2d   : > { %v2790_v16 = vclamps-f32 %v2457_v15, 1.0 }
 0xa2e   : > { %v2460_v21 = vadd.f32 1.0, %v2789_v46 }
 0xa2f   : > { %v2461_v22 = vadd.f32 1.0, %v2790_v16 }
 0xa30   : > { %v2462_v20 = vmul.f32 %v2460_v21, %v2376_v19 }
 0xa31   : > { %v2463_v23 = vmul.f32 %v2461_v22, %v2377_v58 }
 0xa32   : > { %v2473_v30 = vpack.c.bf16 %v2462_v20, %v2462_v20 }
 0xa33   : > { %v2474_v60 = vpack.c.bf16 %v2463_v23, %v2463_v23 }
 0xa34   : > { %2526 = vmatmul.bf16.vlgmr.msra.gmra.mxu2 %v2473_v30 }
 0xa35   : > { %2539 = vmatmul.bf16.vlgmr.msrb.gmra.mxu3 %v2474_v60 }
 0xab7   : > { %v2527_v13 = vpop.f32.mrf.mxu2 }
 0xab8   : > { %v2528_v17 = vadd.f32 %v2967_v27, %v2527_v13  ;;  %v2540_v9 = vpop.f32.mrf.mxu3 }
 0xaba   : > { %v2541_v32 = vadd.f32 %v2540_v9, %v2528_v17 }
 0xabc   : > { %v2544_v8 = vadd.f32 %v2541_v32, %v3741_v50 }
 0xabe   : > { %2545 = vst.msk [vmem:[%s3205_s0] sm:$0xff] %vm1279_vm10, %v2544_v8 }
 0xabf   : > { %v2529_v56 = vpop.f32.mrf.mxu2 }
 0xac0   : > { %v2542_v34 = vpop.f32.mrf.mxu3 }
 0xac1 PF: > { %s27_s28 = sadd.s32 1, %s3056_s28   ;;  %s3940_s24 = sld [smem:[#allocation4_spill]] }
 0xac2   : > { %p24_p8 = scmp.ge.s32.totalorder %s27_s28, 6   ;;  %s3941_s25 = sld [smem:[#allocation5_spill]] }
 0xac3   : > { %s3942_s26 = sld [smem:[#allocation6_spill]] }
 0xac4   : > { %s3943_s27 = sld [smem:[#allocation7_spill]]  ;;  %26 = sbr.rel (!%p24_p8) target bundleno = 4 (0x4), region = 123 }

// kernel: custom_transformer.3
= control target key start
LH: loop header
LB: loop body
LE: loop exit
PB: predicated region body
PF: predicated region fallthrough
CT: control target
= control target key end

     0   :  { %s4075_s0 = inlined_call_operand.vmem [shape: f32[2,16,64], index: 0, kind: input, shape index: {}]   ;;  %s4076_s1 = inlined_call_operand.vmem [shape: f32[1,64], index: 1, kind: input, shape index: {}]   ;;  %s4077_s2 = inlined_call_operand.vmem [shape: f32[1,64], index: 2, kind: input, shape index: {}]   ;;  %s4078_s3 = inlined_call_operand.vmem [shape: bf16[64,64], index: 3, kind: input, shape index: {}]   ;;  %s4079_s4 = inlined_call_operand.vmem [shape: f32[1,64], index: 4, kind: input, shape index: {}]   ;;  %s4080_s5 = inlined_call_operand.vmem [shape: bf16[64,64], index: 5, kind: input, shape index: {}]   ;;  %s4081_s6 = inlined_call_operand.vmem [shape: f32[1,64], index: 6, kind: input, shape index: {}]   ;;  %s4082_s7 = inlined_call_operand.vmem [shape: bf16[64,64], index: 7, kind: input, shape index: {}]   ;;  %s4083_s8 = inlined_call_operand.vmem [shape: f32[1,64], index: 8, kind: input, shape index: {}]   ;;  %s4084_s9 = inlined_call_operand.vmem [shape: bf16[64,64], index: 9, kind: input, shape index: {}]   ;;  %s4085_s10 = inlined_call_operand.vmem [shape: f32[1,64], index: 10, kind: input, shape index: {}]   ;;  %s4086_s11 = inlined_call_operand.vmem [shape: f32[1,64], index: 11, kind: input, shape index: {}]   ;;  %s4087_s12 = inlined_call_operand.vmem [shape: f32[1,64], index: 12, kind: input, shape index: {}]   ;;  %s4088_s13 = inlined_call_operand.vmem [shape: bf16[256,64], index: 13, kind: input, shape index: {}]   ;;  %s4089_s14 = inlined_call_operand.vmem [shape: f32[1,256], index: 14, kind: input, shape index: {}]   ;;  %s4090_s15 = inlined_call_operand.vmem [shape: bf16[64,256], index: 15, kind: input, shape index: {}]   ;;  %s4091_s16 = inlined_call_operand.vmem [shape: f32[1,64], index: 16, kind: input, shape index: {}]   ;;  %s4092_s17 = inlined_call_operand.hbm [shape: f32[2,16,64], index: 17, kind: output, shape index: {}]  }
   0x1   :  { %4101 = sst [smem:[#allocation13_spill]] %s4075_s0 }
   0x2   :  { %4102 = sst [smem:[#allocation14_spill]] %s4076_s1 }
   0x3   :  { %4103 = sst [smem:[#allocation15_spill]] %s4077_s2 }
   0x4   :  { %4104 = sst [smem:[#allocation16_spill]] %s4078_s3 }
   0x5   :  { %4105 = sst [smem:[#allocation17_spill]] %s4079_s4 }
   0x6   :  { %4106 = sst [smem:[#allocation18_spill]] %s4080_s5 }
   0x7   :  { %4107 = sst [smem:[#allocation19_spill]] %s4091_s16 }
   0x8   :  { %4108 = sst [smem:[#allocation20_spill]] %s4092_s17 }
   0x9   :  { %22 = vsyncpa [#allocation5], 0 }
   0xa   :  { %24 = vsyncpa [#allocation5 + $0x1], 0  ;;  %s3254_s24 = smov 0   ;;  %s3256_s25 = smov 0  }
   0xb   :  { %s3258_s26 = smov 0   ;;  %s3260_s27 = smov 0  }
   0xc   :  { %s3262_s28 = smov 0   ;;  %s3264_s29 = smov 0  }
   0xd   :  { %s3266_s0 = smov 0   ;;  %s3268_s30 = smov 0  }
   0xe LB: > { %4109 = sst [smem:[#allocation7_spill]] %s3119_s24  ;;  %s2630_s18 = sadd.s32 4294967295, %s3147_s30   ;;  %s3147_s30 = sphi %s3268_s30, %s30_s30   ;;  %s3143_s0 = sphi %s3266_s0, %s4135_s0   ;;  %s3139_s29 = sphi %s3264_s29, %s4134_s29   ;;  %s3135_s28 = sphi %s3262_s28, %s4133_s28   ;;  %s3131_s27 = sphi %s3260_s27, %s4132_s27   ;;  %s3127_s26 = sphi %s3258_s26, %s4138_s26   ;;  %s3123_s25 = sphi %s3256_s25, %s4137_s25   ;;  %s3119_s24 = sphi %s3254_s24, %s4136_s24  }
   0xf   : > { %4110 = sst [smem:[#allocation8_spill]] %s3139_s29  ;;  %s2631_s19 = sadd.s32 4294967294, %s3147_s30  }
  0x10   : > { %4111 = sst [smem:[#allocation9_spill]] %s3143_s0  ;;  %s39_s1 = sadd.s32 1, %s3139_s29 }
  0x11   : > { %p40_p0 = scmp.ge.s32.totalorder %s39_s1, 2  ;;  %s42_s20 = sadd.s32 1, %s3143_s0 }
  0x12   : > { %p423_p1 = scmp.ne.s32.totalorder %s3127_s26, %s3123_s25  ;;  %p424_p2 = scmp.eq.s32.totalorder %s2630_s18, 3 }
  0x13   : > { %s4140_s1 = smov (%p40_p0, %s39_s1), 0  ;;  %s4142_s20 = smov (!%p40_p0, %s42_s20), %s3143_s0 }
  0x14   : > { %4112 = sst [smem:[#allocation10_spill]] %s4140_s1  ;;  %s409_s21 = ssub.s32 %s3139_s29, %s4140_s1 }
  0x15   : > { %p3305_p3 = por %p424_p2, %p423_p1  ;;  %p44_p4 = scmp.ge.s32.totalorder %s4142_s20, 2 }
  0x16   : > { %p429_p5 = scmp.ne.s32.totalorder %s3123_s25, %s3119_s24  ;;  %p430_p6 = scmp.eq.s32.totalorder %s2631_s19, 3 }
  0x17   : > { %p2634_p7 = scmp.ge.s32.totalorder %s3147_s30, 1  ;;  %s4144_s20 = smov (%p44_p4, %s4142_s20), 0 }
  0x18   : > { %4114 = sst [smem:[#allocation11_spill]] %s4144_s20  ;;  %p3314_p8 = por %p430_p6, %p429_p5 }
  0x19   : > { %p504_p9 = scmp.lt.s32.totalorder %s3147_s30, 5  ;;  %s408_s18 = ssub.s32 %s3143_s0, %s4144_s20 }
  0x1a   : > { %s4115_s23 = scalar_select %p3314_p8, 1, 0 }
  0x1b   : > { %s413_s17 = sadd.s32 1, %s3127_s26  ;;  %s410_s16 = sor.u32 %s409_s21, %s408_s18 }
  0x1c   : > { %4116 = sst [smem:[#allocation12_spill]] %s4115_s23  ;;  %p505_p10 = pnand %p2634_p7, %p504_p9 }
  0x1d   : > { %p411_p11 = scmp.eq.s32.totalorder %s410_s16, 0  ;;  %s4100_s19 = sand.u32 (!%p505_p10), 1, %s3123_s25  }
  0x1e   : > { %508 = sbr.rel (%p505_p10) target bundleno = 2770 (0xad2), region = 88  ;;  %p556_p12 = scmp.lt.s32.totalorder (!%p505_p10), %s3135_s28, 1 }
  0x1f   : > { %s3323_s1 = scalar_select %p411_p11, %s3127_s26, %s413_s17  }
  0x20   : > { %s3329_s29 = sshll.u32 (!%p505_p10), %s4100_s19, 3  ;;  %s4117_s21 = sld [smem:[#allocation13_spill]] (!%p505_p10) }
  0x21   : > { %p2638_p13 = scmp.ne.s32.totalorder (!%p505_p10), %s3131_s27, 0 }
  0x23   : > { %s557_s23 = scalar_select %p556_p12, %s3135_s28, 1 }
  0x24   : > { %565 = sbr.rel (%p2638_p13) target bundleno = 638 (0x27e), region = 92  ;;  %s4118_s5 = sld [smem:[#allocation18_spill]] (!%p2638_p13) }
  0x25   : > { %s2829_s24 = sshll.u32 %s557_s23, 4  ;;  %s4119_s0 = sld [smem:[#allocation14_spill]] (!%p2638_p13) }
  0x26   : > { %s3335_s18 = scalar_lea.vmem %s4117_s21, %s2829_s24  ;;  %s4120_s2 = sld [smem:[#allocation15_spill]] (!%p2638_p13) }
  0x27   : > { %s3150_s21 = smov (!%p2638_p13), 80   ;;  %s3151_s17 = smov (!%p2638_p13), 112  }
  0x28   : > { %s3152_s20 = smov (!%p2638_p13), 96  }
  0x29   : > { %v566_v0 = vld [vmem:[%s3335_s18] sm:$0xff]  ;;  %vm570_vm0 = vcmask 523264   ;;  %v567_v2 = vld [vmem:[%s3335_s18 + $0x8] sm:$0xff]  ;;  %v3149_v4 = vmov 64.0   ;;  %v2837_v22 = vld [vmem:[%s4082_s7 + $0x18] sm:$0xff]  ;;  %vm715_vm8 = vcmask 1047556  }
  0x2a   : > { %v571_v1 = vsel %vm570_vm0, %v566_v0, 0.0  ;;  %v574_v3 = vsel %vm570_vm0, %v567_v2, 0.0  ;;  %2990 = vrcp.f32 %v3149_v4  ;;  %v2833_v21 = vld [vmem:[%s4118_s5 + $0x18] sm:$0xff]  ;;  %v994_v24 = vsel %vm570_vm0, %v2837_v22, 0  ;;  %v2832_v25 = vld [vmem:[%s4118_s5 + $0x10] sm:$0xff]  ;;  %v2831_v29 = vld [vmem:[%s4118_s5 + $0x8] sm:$0xff] }
  0x2b   : > { %572 = vadd.xlane.f32.xlu0 %v571_v1  ;;  %v678_v23 = vsel %vm570_vm0, %v2833_v21, 0  ;;  %1000 = vmatpush.bf16.xpose.msra.mxu1 %v994_v24  ;;  %v2836_v26 = vld [vmem:[%s4082_s7 + $0x10] sm:$0xff]  ;;  %v675_v27 = vsel %vm570_vm0, %v2832_v25, 0  ;;  %v2835_v30 = vld [vmem:[%s4082_s7 + $0x8] sm:$0xff]  ;;  %v672_v31 = vsel %vm570_vm0, %v2831_v29, 0  ;;  %v2830_v33 = vld [vmem:[%s4118_s5] sm:$0xff] }
  0x2c   : > { %684 = vmatpush.bf16.xpose.msra.mxu0 %v678_v23  ;;  %v991_v28 = vsel %vm570_vm0, %v2836_v26, 0  ;;  %v988_v32 = vsel %vm570_vm0, %v2835_v30, 0  ;;  %v2834_v34 = vld [vmem:[%s4082_s7] sm:$0xff]  ;;  %v669_v35 = vsel %vm570_vm0, %v2830_v33, 0  ;;  %vm943_vm9 = vcmask 125952  }
  0x2d   : > { %v985_v36 = vsel %vm570_vm0, %v2834_v34, 0  ;;  %v2986_v56 = vld [vmem:[%s4119_s0] ss:$0 sm:$0xff] }
  0x2e   : > { %v2987_v61 = vld [vmem:[%s4120_s2] ss:$0 sm:$0xff] }
  0x2f   : > { %v2988_v4 = vld [vmem:[%s4081_s6] ss:$0 sm:$0xff] }
  0x30   : > { %v2991_v5 = vpop.eup %2990 }
  0x31   : > { %v578_v6 = vmul.f32 64.0, %v2991_v5  ;;  %vm582_vm1 = vweird.f32 %v2991_v5 }
  0x33   : > { %575 = vadd.xlane.f32.xlu0 %v574_v3  ;;  %v579_v7 = vsub.f32 1.0, %v578_v6  ;;  %1001 = vmatpush.bf16.xpose.msra.mxu1 %v991_v28 }
  0x34   : > { %685 = vmatpush.bf16.xpose.msra.mxu0 %v675_v27 }
  0x35   : > { %v580_v8 = vmul.f32 %v2991_v5, %v579_v7 }
  0x37   : > { %v581_v9 = vadd.f32 %v2991_v5, %v580_v8 }
  0x39   : > { %v583_v10 = vsel %vm582_vm1, %v2991_v5, %v581_v9 }
  0x3b   : > { %1002 = vmatpush.bf16.xpose.msra.mxu1 %v988_v32 }
  0x3c   : > { %686 = vmatpush.bf16.xpose.msra.mxu0 %v672_v31 }
  0x43   : > { %1003 = vmatpush.bf16.xpose.msra.mxu1 %v985_v36 }
  0x44   : > { %687 = vmatpush.bf16.xpose.msra.mxu0 %v669_v35 }
  0x9e   : > { %v573_v11 = vpop.xlane.xlu0 %572 }
  0x9f   : > { %v584_v12 = vmul.f32 %v583_v10, %v573_v11 }
  0xa1   : > { %v586_v13 = vsub.f32 %v566_v0, %v584_v12 }
  0xa3   : > { %v588_v14 = vmul.f32 %v586_v13, %v586_v13 }
  0xa5   : > { %v590_v15 = vsel %vm570_vm0, %v588_v14, 0.0 }
  0xa6   : > { %591 = vadd.xlane.f32.xlu1 %v590_v15  ;;  %v576_v16 = vpop.xlane.xlu0 %575 }
  0xa7   : > { %v585_v17 = vmul.f32 %v583_v10, %v576_v16 }
  0xa9   : > { %v587_v18 = vsub.f32 %v567_v2, %v585_v17 }
  0xab   : > { %v589_v19 = vmul.f32 %v587_v18, %v587_v18 }
  0xad   : > { %v593_v20 = vsel %vm570_vm0, %v589_v19, 0.0 }
  0xae   : > { %594 = vadd.xlane.f32.xlu1 %v593_v20  ;;  %v3153_v20 = vmov 1983009808  }
  0xaf   : > { %v720_v21 = vunpack.c.l.s4 %v3153_v20 }
  0xb1   : > { %v3391_v28 = vunpack.c.0.s8 %v720_v21 }
 0x119   : > { %v592_v37 = vpop.xlane.xlu1 %591 }
 0x11a   : > { %v596_v38 = vmul.f32 %v592_v37, %v583_v10 }
 0x11c   : > { %v598_v39 = vadd.f32 1e-05, %v596_v38 }
 0x11e   : > { %2992 = vrsqrt.f32 %v598_v39  ;;  %vm606_vm3 = vweird.f32 %v598_v39 }
 0x121   : > { %v595_v40 = vpop.xlane.xlu1 %594 }
 0x122   : > { %v597_v41 = vmul.f32 %v595_v40, %v583_v10  ;;  %v2989_v10 = vld [vmem:[%s4083_s8] ss:$0 sm:$0xff]  ;;  %v3154_v40 = vmov 1934713408  }
 0x124   : > { %v2993_v42 = vpop.eup %2992  ;;  %v599_v43 = vadd.f32 1e-05, %v597_v41  ;;  %v744_v41 = vunpack.c.l.s4 %v3154_v40 }
 0x125   : > { %v601_v44 = vmul.f32 %v2993_v42, %v598_v39  ;;  %vm607_vm2 = vweird.f32 %v2993_v42 }
 0x126   : > { %2994 = vrsqrt.f32 %v599_v43  ;;  %vm608_vm4 = vmor %vm606_vm3, %vm607_vm2  ;;  %vm616_vm6 = vweird.f32 %v599_v43 }
 0x127   : > { %v602_v45 = vmul.f32 %v2993_v42, %v601_v44 }
 0x129   : > { %v603_v46 = vmul.f32 0.5, %v602_v45 }
 0x12b   : > { %v604_v47 = vsub.f32 1.5, %v603_v46 }
 0x12c   : > { %v2995_v48 = vpop.eup %2994 }
 0x12d   : > { %v605_v49 = vmul.f32 %v2993_v42, %v604_v47  ;;  %v611_v50 = vmul.f32 %v2995_v48, %v599_v43  ;;  %vm617_vm5 = vweird.f32 %v2995_v48 }
 0x12e   : > { %vm618_vm7 = vmor %vm616_vm6, %vm617_vm5 }
 0x12f   : > { %v612_v51 = vmul.f32 %v2995_v48, %v611_v50  ;;  %v609_v52 = vsel %vm608_vm4, %v2993_v42, %v605_v49 }
 0x130   : > { %v620_v55 = vmul.f32 %v609_v52, %v586_v13  ;;  %v3419_v52 = vunpack.c.0.s8 %v744_v41 }
 0x131   : > { %v613_v53 = vmul.f32 0.5, %v612_v51 }
 0x132   : > { %v625_v60 = vmul.f32 %v2986_v56, %v620_v55 }
 0x133   : > { %v614_v54 = vsub.f32 1.5, %v613_v53 }
 0x134   : > { %v630_v63 = vadd.f32 %v2987_v61, %v625_v60 }
 0x135   : > { %v615_v57 = vmul.f32 %v2995_v48, %v614_v54 }
 0x137   : > { %v619_v58 = vsel %vm618_vm7, %v2995_v48, %v615_v57 }
 0x138   : > { %v621_v59 = vmul.f32 %v619_v58, %v587_v18 }
 0x13a   : > { %v626_v62 = vmul.f32 %v2986_v56, %v621_v59 }
 0x13c   : > { %v631_v0 = vadd.f32 %v2987_v61, %v626_v62 }
 0x13e   : > { %v641_v1 = vpack.c.bf16 %v631_v0, %v630_v63 }
 0x140   : > { %2655 = vmatmul.msk.bf16.vlgmr.msra.gmra.mxu0 %vm570_vm0, %v641_v1  ;;  %2672 = vmatmul.msk.bf16.vlgmr.msra.gmra.mxu1 %vm570_vm0, %v641_v1 }
 0x1bd   : > { %v689_v2 = vpop.f32.mrf.mxu0  ;;  %v1005_v3 = vpop.f32.mrf.mxu1 }
 0x1be   : > { %v690_v6 = vadd.f32 %v2988_v4, %v689_v2  ;;  %v1006_v12 = vadd.f32 %v2989_v10, %v1005_v3 }
 0x1c0   : > { %v717_v27 = vrot.slane %v690_v6, 4  ;;  %v1032_v29 = vrot.slane %v1006_v12, 4 }
 0x1c5   : > { %v691_v5 = vpop.f32.mrf.mxu0  ;;  %v1007_v9 = vpop.f32.mrf.mxu1 }
 0x1c6   : > { %v692_v7 = vadd.f32 %v2988_v4, %v691_v5  ;;  %v1008_v11 = vadd.f32 %v2989_v10, %v1007_v9 }
 0x1c8   : > { %v2971_v8 = vpack.i.bf16 %v692_v7, %v690_v6  ;;  %v2961_v13 = vpack.i.bf16 %v1008_v11, %v1006_v12  ;;  %v773_v26 = vrot.slane %v692_v7, 4  ;;  %v1088_v30 = vrot.slane %v1008_v11, 4 }
 0x1ca   : > { %2972 = vrot.lane.b32.xlu1 %v2971_v8, %s3150_s21  ;;  %2967 = vrot.lane.b32.xlu0 %v2971_v8, %s3151_s17 }
 0x1cb   : > { %2957 = vrot.lane.b32.xlu2 %v2971_v8, %s3152_s20 }
 0x1d3   : > { %2962 = vrot.lane.b32.xlu2 %v2961_v13, %s3152_s20 }
 0x1db   : > { %2977 = vrot.lane.b32.xlu2 %v2961_v13, %s3151_s17 }
 0x1e3   : > { %2982 = vrot.lane.b32.xlu2 %v2961_v13, %s3150_s21 }
 0x225   : > { %v2958_v14 = vpop.permute.xlu2 %2957 }
 0x226   : > { %v2960_v15 = vunpack.i.h.bf16 %v2958_v14  ;;  %v2959_v16 = vunpack.i.l.bf16 %v2958_v14 }
 0x228   : > { %v771_v22 = vrot.slane %v2960_v15, 4  ;;  %v714_v23 = vrot.slane %v2959_v16, 4  ;;  %v774_v32 = vsel %vm715_vm8, %v2960_v15, %v773_v26  ;;  %v718_v34 = vsel %vm715_vm8, %v2959_v16, %v717_v27 }
 0x229   : > { %v3403_v43 = vperm.slane %v774_v32, %v3391_v28  ;;  %v726_v45 = vperm.slane %v718_v34, %v3391_v28 }
 0x22a   : > { %v772_v31 = vsel %vm715_vm8, %v771_v22, %v692_v7  ;;  %v716_v33 = vsel %vm715_vm8, %v714_v23, %v690_v6 }
 0x22b   : > { %v778_v42 = vperm.slane %v772_v31, %v3391_v28  ;;  %v722_v44 = vperm.slane %v716_v33, %v3391_v28  ;;  %v809_v54 = vrot.slane %v3403_v43, 4  ;;  %v753_v56 = vrot.slane %v726_v45, 4 }
 0x22d   : > { %v2963_v17 = vpop.permute.xlu2 %2962  ;;  %v797_v53 = vrot.slane %v778_v42, 4  ;;  %v741_v55 = vrot.slane %v722_v44, 4 }
 0x22e   : > { %v2965_v18 = vunpack.i.h.bf16 %v2963_v17  ;;  %v2964_v19 = vunpack.i.l.bf16 %v2963_v17 }
 0x230   : > { %v1086_v24 = vrot.slane %v2965_v18, 4  ;;  %v1030_v25 = vrot.slane %v2964_v19, 4  ;;  %v1089_v36 = vsel %vm715_vm8, %v2965_v18, %v1088_v30  ;;  %v1033_v38 = vsel %vm715_vm8, %v2964_v19, %v1032_v29 }
 0x231   : > { %v3411_v47 = vperm.slane %v1089_v36, %v3391_v28  ;;  %v3417_v49 = vperm.slane %v1033_v38, %v3391_v28 }
 0x232   : > { %v1087_v35 = vsel %vm715_vm8, %v1086_v24, %v1008_v11  ;;  %v1031_v37 = vsel %vm715_vm8, %v1030_v25, %v1006_v12 }
 0x233   : > { %v3408_v46 = vperm.slane %v1087_v35, %v3391_v28  ;;  %v3414_v48 = vperm.slane %v1031_v37, %v3391_v28  ;;  %v1124_v58 = vrot.slane %v3411_v47, 4  ;;  %v1068_v60 = vrot.slane %v3417_v49, 4 }
 0x235   : > { %v2978_v39 = vpop.permute.xlu2 %2977  ;;  %v1112_v57 = vrot.slane %v3408_v46, 4  ;;  %v1056_v59 = vrot.slane %v3414_v48, 4 }
 0x236   : > { %v2980_v50 = vunpack.i.h.bf16 %v2978_v39  ;;  %v2979_v51 = vunpack.i.l.bf16 %v2978_v39 }
 0x238   : > { %v1100_v4 = vrot.slane %v2980_v50, 4  ;;  %v1044_v5 = vrot.slane %v2979_v51, 4 }
 0x23c   : > { %v2973_v61 = vpop.permute.xlu1 %2972  ;;  %v2968_v62 = vpop.permute.xlu0 %2967 }
 0x23d   : > { %v2975_v63 = vunpack.i.h.bf16 %v2973_v61  ;;  %v2974_v0 = vunpack.i.l.bf16 %v2973_v61  ;;  %v2970_v1 = vunpack.i.h.bf16 %v2968_v62  ;;  %v2969_v2 = vunpack.i.l.bf16 %v2968_v62  ;;  %v2983_v3 = vpop.permute.xlu2 %2982 }
 0x23e   : > { %v2985_v6 = vunpack.i.h.bf16 %v2983_v3  ;;  %v2984_v7 = vunpack.i.l.bf16 %v2983_v3 }
 0x23f   : > { %v783_v8 = vrot.slane %v2975_v63, 4  ;;  %v727_v9 = vrot.slane %v2974_v0, 4  ;;  %v785_v10 = vrot.slane %v2970_v1, 4  ;;  %v729_v11 = vrot.slane %v2969_v2, 4 }
 0x240   : > { %v1098_v12 = vrot.slane %v2985_v6, 4  ;;  %v1042_v13 = vrot.slane %v2984_v7, 4  ;;  %v1045_v14 = vsel %vm715_vm8, %v2984_v7, %v1044_v5  ;;  %v1101_v15 = vsel %vm715_vm8, %v2985_v6, %v1100_v4 }
 0x241   : > { %v784_v16 = vsel %vm715_vm8, %v783_v8, %v2970_v1  ;;  %v786_v17 = vsel %vm715_vm8, %v2975_v63, %v785_v10  ;;  %v728_v18 = vsel %vm715_vm8, %v727_v9, %v2969_v2  ;;  %v730_v19 = vsel %vm715_vm8, %v2974_v0, %v729_v11 }
 0x242   : > { %v790_v20 = vperm.slane %v784_v16, %v3391_v28  ;;  %v794_v21 = vperm.slane %v786_v17, %v3391_v28  ;;  %v734_v22 = vperm.slane %v728_v18, %v3391_v28  ;;  %v738_v23 = vperm.slane %v730_v19, %v3391_v28 }
 0x243   : > { %v3437_v24 = vsel %vm715_vm8, %v1042_v13, %v2979_v51  ;;  %v3440_v25 = vperm.slane %v1045_v14, %v3391_v28  ;;  %v3443_v26 = vsel %vm715_vm8, %v1098_v12, %v2980_v50  ;;  %v3446_v27 = vperm.slane %v1101_v15, %v3391_v28 }
 0x244   : > { %v795_v29 = vrot.slane %v790_v20, 4  ;;  %v807_v30 = vrot.slane %v794_v21, 4  ;;  %v739_v31 = vrot.slane %v734_v22, 4  ;;  %v742_v32 = vsel %vm715_vm8, %v734_v22, %v741_v55 }
 0x245   : > { %v750_v33 = vperm.slane %v742_v32, %v3419_v52  ;;  %v751_v34 = vrot.slane %v738_v23, 4  ;;  %v754_v35 = vsel %vm715_vm8, %v738_v23, %v753_v56  ;;  %v798_v36 = vsel %vm715_vm8, %v790_v20, %v797_v53 }
 0x246   : > { %v740_v37 = vsel %vm715_vm8, %v739_v31, %v722_v44  ;;  %v762_v38 = vperm.slane %v754_v35, %v3419_v52  ;;  %v796_v39 = vsel %vm715_vm8, %v795_v29, %v778_v42  ;;  %v806_v40 = vperm.slane %v798_v36, %v3419_v52 }
 0x247   : > { %v746_v41 = vperm.slane %v740_v37, %v3419_v52  ;;  %v752_v50 = vsel %vm715_vm8, %v751_v34, %v726_v45  ;;  %v765_v51 = vrot.slane %v750_v33, 4  ;;  %v802_v55 = vperm.slane %v796_v39, %v3419_v52 }
 0x248   : > { %v758_v61 = vperm.slane %v752_v50, %v3419_v52  ;;  %v769_v56 = vrot.slane %v762_v38, 4  ;;  %v808_v53 = vsel %vm715_vm8, %v807_v30, %v3403_v43  ;;  %v810_v44 = vsel %vm715_vm8, %v794_v21, %v809_v54 }
 0x249   : > { %v763_v62 = vrot.slane %v746_v41, 4  ;;  %v766_v42 = vsel %vm715_vm8, 0.0, %v765_v51  ;;  %v814_v63 = vperm.slane %v808_v53, %v3419_v52  ;;  %v818_v0 = vperm.slane %v810_v44, %v3419_v52 }
 0x24a   : > { %v767_v1 = vrot.slane %v758_v61, 4  ;;  %v770_v45 = vsel %vm715_vm8, 0.0, %v769_v56  ;;  %v819_v2 = vrot.slane %v802_v55, 4  ;;  %v821_v3 = vrot.slane %v806_v40, 4 }
 0x24b   : > { %v764_v4 = vsel %vm715_vm8, 0.0, %v763_v62  ;;  %v823_v5 = vrot.slane %v814_v63, 4  ;;  %v825_v6 = vrot.slane %v818_v0, 4  ;;  %v827_v43 = vsel %vm715_vm8, %v765_v51, %v746_v41 }
 0x24c   : > { %v768_v54 = vsel %vm715_vm8, 0.0, %v767_v1  ;;  %v820_v7 = vsel %vm715_vm8, 0.0, %v819_v2  ;;  %v822_v8 = vsel %vm715_vm8, 0.0, %v821_v3  ;;  %v831_v9 = vperm.slane %v827_v43, %v3391_v28 }
 0x24d   : > { %v824_v10 = vsel %vm715_vm8, 0.0, %v823_v5  ;;  %v826_v11 = vsel %vm715_vm8, 0.0, %v825_v6  ;;  %v832_v12 = vrot.slane %v766_v42, 4  ;;  %v838_v13 = vsel %vm715_vm8, %v769_v56, %v758_v61 }
 0x24e   : > { %v842_v14 = vperm.slane %v838_v13, %v3391_v28  ;;  %v843_v15 = vrot.slane %v770_v45, 4  ;;  %v851_v16 = vrot.slane %v831_v9, 4  ;;  %v881_v17 = vsel %vm715_vm8, %v821_v3, %v802_v55 }
 0x24f   : > { %v833_v18 = vsel %vm715_vm8, %v832_v12, %v764_v4  ;;  %v885_v19 = vperm.slane %v881_v17, %v3391_v28  ;;  %v886_v20 = vrot.slane %v822_v8, 4  ;;  %v892_v21 = vsel %vm715_vm8, %v825_v6, %v814_v63 }
 0x250   : > { %v837_v22 = vperm.slane %v833_v18, %v3391_v28  ;;  %v844_v23 = vsel %vm715_vm8, %v843_v15, %v768_v54  ;;  %v863_v29 = vrot.slane %v842_v14, 4  ;;  %v896_v30 = vperm.slane %v892_v21, %v3391_v28 }
 0x251   : > { %v848_v31 = vperm.slane %v844_v23, %v3391_v28  ;;  %v887_v32 = vsel %vm715_vm8, %v886_v20, %v820_v7  ;;  %v897_v33 = vrot.slane %v826_v11, 4  ;;  %v905_v34 = vrot.slane %v885_v19, 4 }
 0x252   : > { %v849_v35 = vrot.slane %v837_v22, 4  ;;  %v852_v36 = vsel %vm715_vm8, %v837_v22, %v851_v16  ;;  %v891_v37 = vperm.slane %v887_v32, %v3391_v28  ;;  %v917_v38 = vrot.slane %v896_v30, 4 }
 0x253   : > { %v860_v39 = vperm.slane %v852_v36, %v3419_v52  ;;  %v861_v40 = vrot.slane %v848_v31, 4  ;;  %v864_v41 = vsel %vm715_vm8, %v848_v31, %v863_v29  ;;  %v898_v50 = vsel %vm715_vm8, %v897_v33, %v824_v10 }
 0x254   : > { %v850_v51 = vsel %vm715_vm8, %v849_v35, %v831_v9  ;;  %v872_v55 = vperm.slane %v864_v41, %v3419_v52  ;;  %v902_v61 = vperm.slane %v898_v50, %v3391_v28  ;;  %v903_v56 = vrot.slane %v891_v37, 4 }
 0x255   : > { %v856_v53 = vperm.slane %v850_v51, %v3419_v52  ;;  %v862_v44 = vsel %vm715_vm8, %v861_v40, %v842_v14  ;;  %v879_v62 = vrot.slane %v860_v39, 4  ;;  %v906_v42 = vsel %vm715_vm8, %v891_v37, %v905_v34 }
 0x256   : > { %v868_v63 = vperm.slane %v862_v44, %v3419_v52  ;;  %v877_v0 = vrot.slane %v872_v55, 4  ;;  %v904_v1 = vsel %vm715_vm8, %v903_v56, %v885_v19  ;;  %v914_v45 = vperm.slane %v906_v42, %v3419_v52 }
 0x257   : > { %v875_v2 = vrot.slane %v856_v53, 4  ;;  %v880_v3 = vsel %vm715_vm8, %v872_v55, %v879_v62  ;;  %v910_v4 = vperm.slane %v904_v1, %v3419_v52  ;;  %v915_v5 = vrot.slane %v902_v61, 4 }
 0x258   : > { %v873_v6 = vrot.slane %v868_v63, 4  ;;  %v878_v43 = vsel %vm715_vm8, %v877_v0, %v860_v39  ;;  %v918_v54 = vsel %vm715_vm8, %v902_v61, %v917_v38  ;;  %v933_v7 = vrot.slane %v914_v45, 4 }
 0x259   : > { %v876_v8 = vsel %vm715_vm8, %v868_v63, %v875_v2  ;;  %v916_v9 = vsel %vm715_vm8, %v915_v5, %v896_v30  ;;  %v926_v10 = vperm.slane %v918_v54, %v3419_v52  ;;  %v929_v11 = vrot.slane %v910_v4, 4 }
 0x25a   : > { %v874_v12 = vsel %vm715_vm8, %v873_v6, %v856_v53  ;;  %v922_v13 = vperm.slane %v916_v9, %v3419_v52  ;;  %v937_v14 = vpack.c.bf16 %v876_v8, %v876_v8  ;;  %v939_v15 = vpack.c.bf16 %v878_v43, %v878_v43 }
 0x25b   : > { %v931_v16 = vrot.slane %v926_v10, 4  ;;  %v934_v17 = vsel %vm715_vm8, %v926_v10, %v933_v7  ;;  %v935_v18 = vpack.c.bf16 %v874_v12, %v874_v12  ;;  %v941_v19 = vpack.c.bf16 %v880_v3, %v880_v3 }
 0x25c   : > { %v927_v20 = vrot.slane %v922_v13, 4  ;;  %v930_v21 = vsel %vm715_vm8, %v922_v13, %v929_v11  ;;  %v942_v22 = vpack.c.bf16 %v934_v17, %v934_v17  ;;  %946 = vst.msk [vmem:[#allocation2 + $0x8] sm:$0xf] %vm943_vm9, %v937_v14  ;;  %v1049_v23 = vperm.slane %v3437_v24, %v3391_v28 }
 0x25d   : > { %v932_v29 = vsel %vm715_vm8, %v931_v16, %v914_v45  ;;  %v938_v30 = vpack.c.bf16 %v930_v21, %v930_v21  ;;  %944 = vst.msk [vmem:[#allocation2] sm:$0xf] %vm943_vm9, %v935_v18  ;;  %v1066_v31 = vrot.slane %v3440_v25, 4  ;;  %v1069_v32 = vsel %vm715_vm8, %v3440_v25, %v1068_v60 }
 0x25e   : > { %v928_v33 = vsel %vm715_vm8, %v927_v20, %v910_v4  ;;  %v940_v34 = vpack.c.bf16 %v932_v29, %v932_v29  ;;  %948 = vst.msk [vmem:[#allocation2 + $0x10] sm:$0xf] %vm943_vm9, %v939_v15  ;;  %v1054_v35 = vrot.slane %v1049_v23, 4  ;;  %v1057_v24 = vsel %vm715_vm8, %v1049_v23, %v1056_v59 }
 0x25f   : > { %v936_v36 = vpack.c.bf16 %v928_v33, %v928_v33  ;;  %947 = vst.msk [vmem:[#allocation2 + $0xc] sm:$0xf] %vm943_vm9, %v938_v30  ;;  %v1065_v37 = vperm.slane %v1057_v24, %v3419_v52  ;;  %v1067_v38 = vsel %vm715_vm8, %v1066_v31, %v3417_v49  ;;  %v1077_v60 = vperm.slane %v1069_v32, %v3419_v52 }
 0x260   : > { %949 = vst.msk [vmem:[#allocation2 + $0x14] sm:$0xf] %vm943_vm9, %v940_v34  ;;  %v1055_v25 = vsel %vm715_vm8, %v1054_v35, %v3414_v48  ;;  %v1073_v39 = vperm.slane %v1067_v38, %v3419_v52  ;;  %v1105_v59 = vperm.slane %v3443_v26, %v3391_v28  ;;  %v1122_v40 = vrot.slane %v3446_v27, 4 }
 0x261   : > { %945 = vst.msk [vmem:[#allocation2 + $0x4] sm:$0xf] %vm943_vm9, %v936_v36  ;;  %v1061_v41 = vperm.slane %v1055_v25, %v3419_v52  ;;  %v1080_v50 = vrot.slane %v1065_v37, 4  ;;  %v1084_v49 = vrot.slane %v1077_v60, 4  ;;  %v1125_v51 = vsel %vm715_vm8, %v3446_v27, %v1124_v58 }
 0x262   : > { %950 = vst.msk [vmem:[#allocation2 + $0x18] sm:$0xf] %vm943_vm9, %v941_v19  ;;  %v1082_v48 = vrot.slane %v1073_v39, 4  ;;  %v1110_v55 = vrot.slane %v1105_v59, 4  ;;  %v1113_v26 = vsel %vm715_vm8, %v1105_v59, %v1112_v57  ;;  %v1123_v61 = vsel %vm715_vm8, %v1122_v40, %v3411_v47 }
 0x263   : > { %951 = vst.msk [vmem:[#allocation2 + $0x1c] sm:$0xf] %vm943_vm9, %v942_v22  ;;  %v1078_v56 = vrot.slane %v1061_v41, 4  ;;  %v1081_v53 = vsel %vm715_vm8, 0.0, %v1080_v50  ;;  %v1085_v44 = vsel %vm715_vm8, 0.0, %v1084_v49  ;;  %v1121_v58 = vperm.slane %v1113_v26, %v3419_v52 }
 0x264   : > { %v1083_v27 = vsel %vm715_vm8, 0.0, %v1082_v48  ;;  %v1111_v62 = vsel %vm715_vm8, %v1110_v55, %v3408_v46  ;;  %v1129_v42 = vperm.slane %v1123_v61, %v3419_v52  ;;  %v1133_v57 = vperm.slane %v1125_v51, %v3419_v52 }
 0x265   : > { %v1079_v47 = vsel %vm715_vm8, 0.0, %v1078_v56  ;;  %v1117_v63 = vperm.slane %v1111_v62, %v3419_v52  ;;  %v1136_v0 = vrot.slane %v1121_v58, 4  ;;  %v1142_v1 = vsel %vm715_vm8, %v1080_v50, %v1061_v41 }
 0x266   : > { %v1138_v45 = vrot.slane %v1129_v42, 4  ;;  %v1140_v2 = vrot.slane %v1133_v57, 4  ;;  %v1146_v3 = vperm.slane %v1142_v1, %v3391_v28  ;;  %v1147_v4 = vrot.slane %v1081_v53, 4 }
 0x267   : > { %v1134_v5 = vrot.slane %v1117_v63, 4  ;;  %v1137_v6 = vsel %vm715_vm8, 0.0, %v1136_v0  ;;  %v1153_v46 = vsel %vm715_vm8, %v1084_v49, %v1073_v39  ;;  %v1158_v43 = vrot.slane %v1085_v44, 4 }
 0x268   : > { %v1139_v54 = vsel %vm715_vm8, 0.0, %v1138_v45  ;;  %v1141_v7 = vsel %vm715_vm8, 0.0, %v1140_v2  ;;  %v1148_v8 = vsel %vm715_vm8, %v1147_v4, %v1079_v47  ;;  %v1157_v9 = vperm.slane %v1153_v46, %v3391_v28 }
 0x269   : > { %v1135_v10 = vsel %vm715_vm8, 0.0, %v1134_v5  ;;  %v1152_v11 = vperm.slane %v1148_v8, %v3391_v28  ;;  %v1159_v12 = vsel %vm715_vm8, %v1158_v43, %v1083_v27  ;;  %v1166_v13 = vrot.slane %v1146_v3, 4 }
 0x26a   : > { %v1163_v14 = vperm.slane %v1159_v12, %v3391_v28  ;;  %v1178_v15 = vrot.slane %v1157_v9, 4  ;;  %v1196_v16 = vsel %vm715_vm8, %v1136_v0, %v1117_v63  ;;  %v1201_v17 = vrot.slane %v1137_v6, 4 }
 0x26b   : > { %v1164_v18 = vrot.slane %v1152_v11, 4  ;;  %v1167_v19 = vsel %vm715_vm8, %v1152_v11, %v1166_v13  ;;  %v1200_v20 = vperm.slane %v1196_v16, %v3391_v28  ;;  %v1207_v21 = vsel %vm715_vm8, %v1140_v2, %v1129_v42 }
 0x26c   : > { %v1175_v22 = vperm.slane %v1167_v19, %v3419_v52  ;;  %v1176_v23 = vrot.slane %v1163_v14, 4  ;;  %v1179_v29 = vsel %vm715_vm8, %v1163_v14, %v1178_v15  ;;  %v1202_v30 = vsel %vm715_vm8, %v1201_v17, %v1135_v10 }
 0x26d   : > { %v1165_v31 = vsel %vm715_vm8, %v1164_v18, %v1146_v3  ;;  %v1187_v32 = vperm.slane %v1179_v29, %v3419_v52  ;;  %v1206_v33 = vperm.slane %v1202_v30, %v3391_v28  ;;  %v1211_v34 = vperm.slane %v1207_v21, %v3391_v28 }
 0x26e   : > { %v1171_v35 = vperm.slane %v1165_v31, %v3419_v52  ;;  %v1177_v24 = vsel %vm715_vm8, %v1176_v23, %v1157_v9  ;;  %v1194_v36 = vrot.slane %v1175_v22, 4  ;;  %v1212_v37 = vrot.slane %v1141_v7, 4 }
 0x26f   : > { %v1183_v38 = vperm.slane %v1177_v24, %v3419_v52  ;;  %v1192_v60 = vrot.slane %v1187_v32, 4  ;;  %v1218_v25 = vrot.slane %v1206_v33, 4  ;;  %v1220_v39 = vrot.slane %v1200_v20, 4 }
 0x270   : > { %v1190_v59 = vrot.slane %v1171_v35, 4  ;;  %v1195_v40 = vsel %vm715_vm8, %v1187_v32, %v1194_v36  ;;  %v1213_v41 = vsel %vm715_vm8, %v1212_v37, %v1139_v54  ;;  %v1232_v50 = vrot.slane %v1211_v34, 4 }
 0x271   : > { %v1188_v49 = vrot.slane %v1183_v38, 4  ;;  %v1193_v51 = vsel %vm715_vm8, %v1192_v60, %v1175_v22  ;;  %v1217_v48 = vperm.slane %v1213_v41, %v3391_v28  ;;  %v1219_v55 = vsel %vm715_vm8, %v1218_v25, %v1200_v20 }
 0x272   : > { %v1191_v26 = vsel %vm715_vm8, %v1183_v38, %v1190_v59  ;;  %v1221_v61 = vsel %vm715_vm8, %v1206_v33, %v1220_v39  ;;  %v1225_v56 = vperm.slane %v1219_v55, %v3419_v52  ;;  %v1254_v53 = vpack.c.bf16 %v1193_v51, %v1193_v51 }
 0x273   : > { %v1189_v44 = vsel %vm715_vm8, %v1188_v49, %v1171_v35  ;;  %v1229_v58 = vperm.slane %v1221_v61, %v3419_v52  ;;  %v1230_v27 = vrot.slane %v1217_v48, 4  ;;  %v1233_v62 = vsel %vm715_vm8, %v1217_v48, %v1232_v50 }
 0x274   : > { %v1241_v42 = vperm.slane %v1233_v62, %v3419_v52  ;;  %v1244_v57 = vrot.slane %v1225_v56, 4  ;;  %v1250_v28 = vpack.c.bf16 %v1189_v44, %v1189_v44  ;;  %v1252_v47 = vpack.c.bf16 %v1191_v26, %v1191_v26  ;;  %1262 = vst.msk [vmem:[#allocation3 + $0x10] sm:$0xf] %vm943_vm9, %v1254_v53 }
 0x275   : > { %v1231_v63 = vsel %vm715_vm8, %v1230_v27, %v1211_v34  ;;  %v1248_v0 = vrot.slane %v1229_v58, 4  ;;  %v1256_v1 = vpack.c.bf16 %v1195_v40, %v1195_v40 }
 0x276   : > { %v1237_v45 = vperm.slane %v1231_v63, %v3419_v52  ;;  %v1246_v2 = vrot.slane %v1241_v42, 4  ;;  %1258 = vst.msk [vmem:[#allocation3] sm:$0xf] %vm943_vm9, %v1250_v28 }
 0x277   : > { %v1249_v3 = vsel %vm715_vm8, %v1241_v42, %v1248_v0  ;;  %1260 = vst.msk [vmem:[#allocation3 + $0x8] sm:$0xf] %vm943_vm9, %v1252_v47 }
 0x278   : > { %v1242_v4 = vrot.slane %v1237_v45, 4  ;;  %v1245_v5 = vsel %vm715_vm8, %v1237_v45, %v1244_v57  ;;  %v1247_v6 = vsel %vm715_vm8, %v1246_v2, %v1229_v58  ;;  %v1257_v46 = vpack.c.bf16 %v1249_v3, %v1249_v3  ;;  %1264 = vst.msk [vmem:[#allocation3 + $0x18] sm:$0xf] %vm943_vm9, %v1256_v1 }
 0x279   : > { %v1253_v43 = vpack.c.bf16 %v1245_v5, %v1245_v5  ;;  %v1255_v54 = vpack.c.bf16 %v1247_v6, %v1247_v6 }
 0x27a   : > { %v1243_v7 = vsel %vm715_vm8, %v1242_v4, %v1225_v56  ;;  %1265 = vst.msk [vmem:[#allocation3 + $0x1c] sm:$0xf] %vm943_vm9, %v1257_v46 }
 0x27b   : > { %v1251_v52 = vpack.c.bf16 %v1243_v7, %v1243_v7  ;;  %1261 = vst.msk [vmem:[#allocation3 + $0xc] sm:$0xf] %vm943_vm9, %v1253_v43 }
 0x27c   : > { %1263 = vst.msk [vmem:[#allocation3 + $0x14] sm:$0xf] %vm943_vm9, %v1255_v54 }
 0x27d   : > { %1259 = vst.msk [vmem:[#allocation3 + $0x4] sm:$0xf] %vm943_vm9, %v1251_v52 }
 0x27e PF: > { %s2673_s19 = sshll.u32 %s3131_s27, 3  ;;  %vm1271_vm10 = vcmask 523264   ;;  %v3155_v10 = vmov 64.0   ;;  %s4121_s3 = sld [smem:[#allocation16_spill]]  ;;  %v1498_v58 = vld [vmem:[#allocation2 + $0x10] sm:$0xf] }
 0x27f   : > { %s1267_s16 = scalar_lea.vmem %s3335_s18, %s2673_s19  ;;  %3003 = vrcp.f32 %v3155_v10  ;;  %s4122_s21 = sld [smem:[#allocation14_spill]]  ;;  %vm1504_vm15 = vcmask 130048   ;;  %v1496_v27 = vld [vmem:[#allocation2] sm:$0xf]  ;;  %v1499_v57 = vld [vmem:[#allocation2 + $0x18] sm:$0xf] }
 0x280   : > { %v3615_v8 = vld [vmem:[%s1267_s16] sm:$0xff]  ;;  %s4123_s2 = sld [smem:[#allocation15_spill]]  ;;  %s3156_s20 = smov 80   ;;  %v1547_v62 = vsel %vm1504_vm15, %v1498_v58, 0  ;;  %v1509_v42 = vsel %vm1504_vm15, %v1496_v27, 0  ;;  %v1566_v47 = vsel %vm1504_vm15, %v1499_v57, 0 }
 0x281   : > { %v1272_v9 = vsel %vm1271_vm10, %v3615_v8, 0.0  ;;  %s4124_s4 = sld [smem:[#allocation17_spill]]  ;;  %s3157_s19 = smov 112   ;;  %v1724_v28 = vld [vmem:[#allocation2 + $0xc] sm:$0xf]  ;;  %1556 = vmatpush.bf16.xpose.msra.mxu3 %v1547_v62  ;;  %1518 = vmatpush.bf16.xpose.msra.mxu2 %v1509_v42  ;;  %vm1382_vm0 = vcmask 1047556  }
 0x282   : > { %1273 = vadd.xlane.f32.xlu0 %v1272_v9  ;;  %s3158_s16 = smov 96   ;;  %v1748_v63 = vsel %vm1504_vm15, %v1724_v28, 0  ;;  %1575 = vmatpush.bf16.xpose.msra.mxu1 %v1566_v47  ;;  %v3159_v1 = vmov 1983009808   ;;  %v1497_v6 = vld [vmem:[#allocation2 + $0x8] sm:$0xf] }
 0x283   : > { %v1387_v45 = vunpack.c.l.s4 %v3159_v1  ;;  %v1528_v43 = vsel %vm1504_vm15, %v1497_v6, 0  ;;  %v3160_v7 = vmov 1934713408   ;;  %vm1581_vm1 = vcmask 64512   ;;  %s3161_s23 = smov 48   ;;  %s3163_s18 = smov 16  }
 0x284   : > { %v2841_v11 = vld [vmem:[%s4121_s3 + $0x18] sm:$0xff]  ;;  %v2840_v29 = vld [vmem:[%s4121_s3 + $0x10] sm:$0xff]  ;;  %v2839_v31 = vld [vmem:[%s4121_s3 + $0x8] sm:$0xff]  ;;  %v1411_v52 = vunpack.c.l.s4 %v3160_v7  ;;  %vm1645_vm2 = vcmask 1043456   ;;  %vm2074_vm3 = vcmask 261120   ;;  %vm2076_vm4 = vcmask 392192  }
 0x285   : > { %v1355_v12 = vsel %vm1271_vm10, %v2841_v11, 0  ;;  %v3004_v13 = vpop.eup %3003  ;;  %v1352_v30 = vsel %vm1271_vm10, %v2840_v29, 0  ;;  %v1349_v32 = vsel %vm1271_vm10, %v2839_v31, 0  ;;  %v2838_v33 = vld [vmem:[%s4121_s3] sm:$0xff]  ;;  %v3656_v46 = vunpack.c.0.s8 %v1387_v45  ;;  %s4125_s17 = sld [smem:[#allocation19_spill]]  ;;  %s4127_s3 = scalar_lea.vmem [#allocation4], %s3329_s29 }
 0x286   : > { %1361 = vmatpush.bf16.xpose.msra.mxu0 %v1355_v12  ;;  %v1276_v14 = vmul.f32 64.0, %v3004_v13  ;;  %vm1280_vm11 = vweird.f32 %v3004_v13  ;;  %v1346_v34 = vsel %vm1271_vm10, %v2838_v33, 0  ;;  %v2996_v40 = vld [vmem:[%s4122_s21] ss:$0 sm:$0xff]  ;;  %s3162_s21 = smov 32  }
 0x287   : > { %v2997_v49 = vld [vmem:[%s4123_s2] ss:$0 sm:$0xff] }
 0x288   : > { %v1277_v15 = vsub.f32 1.0, %v1276_v14  ;;  %v2998_v26 = vld [vmem:[%s4124_s4] ss:$0 sm:$0xff]  ;;  %s2553_s4 = sshll.u32 %s4127_s3, 4  ;;  %s2554_s4 = int_to_ptr.vmem [resolvable:$true] %s2553_s4 }
 0x289   : > { %1537 = vmatpush.bf16.xpose.msrb.mxu2 %v1528_v43 }
 0x28a   : > { %v1278_v16 = vmul.f32 %v3004_v13, %v1277_v15 }
 0x28c   : > { %v1279_v17 = vadd.f32 %v3004_v13, %v1278_v16 }
 0x28e   : > { %v3623_v18 = vsel %vm1280_vm11, %v3004_v13, %v1279_v17  ;;  %1362 = vmatpush.bf16.xpose.msra.mxu0 %v1352_v30  ;;  %v3662_v13 = vunpack.c.0.s8 %v1411_v52 }
 0x296   : > { %1363 = vmatpush.bf16.xpose.msra.mxu0 %v1349_v32 }
 0x29e   : > { %1364 = vmatpush.bf16.xpose.msra.mxu0 %v1346_v34 }
 0x2a6   : > { %1757 = vmatpush.bf16.xpose.msrb.mxu0 %v1748_v63 }
 0x2f5   : > { %v1274_v19 = vpop.xlane.xlu0 %1273 }
 0x2f6   : > { %v1282_v20 = vmul.f32 %v3623_v18, %v1274_v19 }
 0x2f8   : > { %v1283_v21 = vsub.f32 %v3615_v8, %v1282_v20 }
 0x2fa   : > { %v1284_v22 = vmul.f32 %v1283_v21, %v1283_v21 }
 0x2fc   : > { %v1285_v23 = vsel %vm1271_vm10, %v1284_v22, 0.0 }
 0x2fd   : > { %1286 = vadd.xlane.f32.xlu0 %v1285_v23 }
 0x370   : > { %v1287_v35 = vpop.xlane.xlu0 %1286 }
 0x371   : > { %v1288_v24 = vmul.f32 %v1287_v35, %v3623_v18 }
 0x373   : > { %v1289_v36 = vadd.f32 1e-05, %v1288_v24 }
 0x375   : > { %3005 = vrsqrt.f32 %v1289_v36  ;;  %vm1296_vm13 = vweird.f32 %v1289_v36 }
 0x37b   : > { %v3006_v37 = vpop.eup %3005 }
 0x37c   : > { %v1291_v38 = vmul.f32 %v3006_v37, %v1289_v36  ;;  %vm1297_vm12 = vweird.f32 %v3006_v37 }
 0x37d   : > { %vm1298_vm14 = vmor %vm1296_vm13, %vm1297_vm12 }
 0x37e   : > { %v1292_v60 = vmul.f32 %v3006_v37, %v1291_v38 }
 0x380   : > { %v1293_v25 = vmul.f32 0.5, %v1292_v60 }
 0x382   : > { %v1294_v39 = vsub.f32 1.5, %v1293_v25 }
 0x384   : > { %v1295_v59 = vmul.f32 %v3006_v37, %v1294_v39 }
 0x386   : > { %v1299_v41 = vsel %vm1298_vm14, %v3006_v37, %v1295_v59 }
 0x387   : > { %v1300_v50 = vmul.f32 %v1299_v41, %v1283_v21 }
 0x389   : > { %v1304_v51 = vmul.f32 %v2996_v40, %v1300_v50 }
 0x38b   : > { %v1308_v48 = vadd.f32 %v2997_v49, %v1304_v51 }
 0x38d   : > { %v1318_v55 = vpack.c.bf16 %v1308_v48, %v1308_v48 }
 0x38f   : > { %2690 = vmatmul.msk.bf16.vlgmr.msra.gmra.mxu0 %vm1271_vm10, %v1318_v55 }
 0x40c   : > { %v1366_v61 = vpop.f32.mrf.mxu0 }
 0x40d   : > { %v1367_v56 = vadd.f32 %v2998_v26, %v1366_v61 }
 0x40f   : > { %v1370_v53 = vmul.f32 0.25, %v1367_v56 }
 0x411   : > { %1378 = vrot.lane.b32.xlu2 %v1370_v53, %s3156_s20  ;;  %1372 = vrot.lane.b32.xlu1 %v1370_v53, %s3157_s19  ;;  %v1384_v10 = vrot.slane %v1370_v53, 4  ;;  %s4126_s20 = sld [smem:[#allocation20_spill]] }
 0x414   : > { %v1368_v44 = vpop.f32.mrf.mxu0 }
 0x419   : > { %1375 = vrot.lane.b32.xlu1 %v1370_v53, %s3158_s16  ;;  %s2825_s16 = sshll.u32 %s3135_s28, 1  ;;  %s4129_s28 = sand.u32 1, %s3123_s25  }
 0x46b   : > { %v1379_v0 = vpop.permute.xlu2 %1378 }
 0x46c   : > { %v1394_v4 = vrot.slane %v1379_v0, 4 }
 0x483   : > { %v1373_v2 = vpop.permute.xlu1 %1372 }
 0x484   : > { %v1396_v3 = vrot.slane %v1373_v2, 4  ;;  %v1395_v54 = vsel %vm1382_vm0, %v1394_v4, %v1373_v2 }
 0x485   : > { %v1401_v11 = vperm.slane %v1395_v54, %v3656_v46 }
 0x486   : > { %v1397_v5 = vsel %vm1382_vm0, %v1379_v0, %v1396_v3 }
 0x487   : > { %v1405_v9 = vperm.slane %v1397_v5, %v3656_v46  ;;  %v1406_v20 = vrot.slane %v1401_v11, 4 }
 0x489   : > { %v1418_v16 = vrot.slane %v1405_v9, 4 }
 0x48b   : > { %v1376_v12 = vpop.permute.xlu1 %1375 }
 0x48c   : > { %v1381_v14 = vrot.slane %v1376_v12, 4  ;;  %v1385_v15 = vsel %vm1382_vm0, %v1376_v12, %v1384_v10 }
 0x48d   : > { %v1393_v17 = vperm.slane %v1385_v15, %v3656_v46 }
 0x48e   : > { %v1383_v19 = vsel %vm1382_vm0, %v1381_v14, %v1370_v53 }
 0x48f   : > { %v1389_v21 = vperm.slane %v1383_v19, %v3656_v46  ;;  %v1419_v22 = vsel %vm1382_vm0, %v1418_v16, %v1393_v17  ;;  %v1420_v23 = vrot.slane %v1393_v17, 4 }
 0x490   : > { %v1425_v29 = vperm.slane %v1419_v22, %v3662_v13 }
 0x491   : > { %v1407_v30 = vsel %vm1382_vm0, %v1406_v20, %v1389_v21  ;;  %v1408_v31 = vrot.slane %v1389_v21, 4  ;;  %v1421_v32 = vsel %vm1382_vm0, %v1405_v9, %v1420_v23 }
 0x492   : > { %v1413_v33 = vperm.slane %v1407_v30, %v3662_v13  ;;  %v1429_v34 = vperm.slane %v1421_v32, %v3662_v13  ;;  %v1434_v36 = vrot.slane %v1425_v29, 4 }
 0x493   : > { %v1409_v35 = vsel %vm1382_vm0, %v1401_v11, %v1408_v31 }
 0x494   : > { %v1417_v24 = vperm.slane %v1409_v35, %v3662_v13  ;;  %v1436_v37 = vrot.slane %v1429_v34, 4  ;;  %v1430_v38 = vrot.slane %v1413_v33, 4  ;;  %v1435_v50 = vsel %vm1382_vm0, 0.0, %v1434_v36  ;;  %v1500_v34 = vld [vmem:[#allocation3] sm:$0xf] }
 0x495   : > { %v1647_v35 = vsel %vm1645_vm2, %v1500_v34, 0 }
 0x496   : > { %v1432_v60 = vrot.slane %v1417_v24, 4  ;;  %v1437_v25 = vsel %vm1382_vm0, 0.0, %v1436_v37  ;;  %v1449_v39 = vsel %vm1382_vm0, %v1436_v37, %v1425_v29  ;;  %v1431_v61 = vsel %vm1382_vm0, 0.0, %v1430_v38  ;;  %v1501_v24 = vld [vmem:[#allocation3 + $0x8] sm:$0xf] }
 0x497   : > { %v1453_v59 = vperm.slane %v1449_v39, %v3656_v46  ;;  %v1454_v40 = vrot.slane %v1437_v25, 4  ;;  %v1666_v36 = vsel %vm1645_vm2, %v1501_v24, 0  ;;  %v1503_v37 = vld [vmem:[#allocation3 + $0x18] sm:$0xf]  ;;  %v1728_v39 = vld [vmem:[#allocation3 + $0xc] sm:$0xf] }
 0x498   : > { %v1433_v41 = vsel %vm1382_vm0, 0.0, %v1432_v60  ;;  %v1438_v49 = vsel %vm1382_vm0, %v1432_v60, %v1413_v33  ;;  %1675 = vmatpush.bf16.msrb.mxu3 %v1666_v36  ;;  %v1704_v38 = vsel %vm1645_vm2, %v1503_v37, 0 }
 0x499   : > { %v1443_v51 = vrot.slane %v1433_v41, 4  ;;  %v1455_v48 = vsel %vm1382_vm0, %v1454_v40, %v1435_v50  ;;  %v1474_v55 = vrot.slane %v1453_v59, 4  ;;  %v1442_v26 = vperm.slane %v1438_v49, %v3656_v46  ;;  %v1723_v41 = vld [vmem:[#allocation2 + $0x4] sm:$0xf] }
 0x49a   : > { %v1459_v56 = vperm.slane %v1455_v48, %v3656_v46  ;;  %v1886_v40 = vsel %vm1645_vm2, %v1728_v39, 0  ;;  %v1732_v50 = vsel %vm1504_vm15, %v1723_v41, 0  ;;  %v1502_v48 = vld [vmem:[#allocation3 + $0x10] sm:$0xf] }
 0x49b   : > { %v1444_v53 = vsel %vm1382_vm0, %v1443_v51, %v1431_v61  ;;  %v1462_v44 = vrot.slane %v1442_v26, 4  ;;  %1895 = vmatpush.bf16.msra.mxu0 %v1886_v40 }
 0x49c   : > { %v1448_v58 = vperm.slane %v1444_v53, %v3656_v46  ;;  %v1475_v27 = vsel %vm1382_vm0, %v1459_v56, %v1474_v55  ;;  %v1472_v62 = vrot.slane %v1459_v56, 4  ;;  %v1685_v55 = vsel %vm1645_vm2, %v1502_v48, 0  ;;  %v1726_v53 = vld [vmem:[#allocation2 + $0x1c] sm:$0xf] }
 0x49d   : > { %v1483_v42 = vperm.slane %v1475_v27, %v3662_v13  ;;  %1694 = vmatpush.bf16.msrb.mxu1 %v1685_v55 }
 0x49e   : > { %v1463_v57 = vsel %vm1382_vm0, %v1448_v58, %v1462_v44  ;;  %v1460_v28 = vrot.slane %v1448_v58, 4  ;;  %v1473_v47 = vsel %vm1382_vm0, %v1472_v62, %v1453_v59  ;;  %v1780_v62 = vsel %vm1504_vm15, %v1726_v53, 0 }
 0x49f   : > { %v1471_v63 = vperm.slane %v1463_v57, %v3662_v13  ;;  %v1488_v0 = vrot.slane %v1483_v42, 4  ;;  %v1479_v1 = vperm.slane %v1473_v47, %v3662_v13 }
 0x4a0   : > { %v1461_v45 = vsel %vm1382_vm0, %v1460_v28, %v1442_v26 }
 0x4a1   : > { %v1489_v2 = vsel %vm1382_vm0, %v1488_v0, %v1471_v63  ;;  %v1467_v3 = vperm.slane %v1461_v45, %v3662_v13  ;;  %v1484_v4 = vrot.slane %v1479_v1, 4  ;;  %v1490_v5 = vrot.slane %v1471_v63, 4 }
 0x4a2   : > { %v3697_v6 = vpack.c.bf16 %v1489_v2, %v1489_v2 }
 0x4a3   : > { %v1485_v43 = vsel %vm1382_vm0, %v1484_v4, %v1467_v3  ;;  %v1486_v54 = vrot.slane %v1467_v3, 4  ;;  %v1491_v7 = vsel %vm1382_vm0, %v1483_v42, %v1490_v5  ;;  %v1725_v42 = vld [vmem:[#allocation2 + $0x14] sm:$0xf] }
 0x4a4   : > { %2693 = vmatmul.msk.bf16.vlgmr.msra.gmra.mxu3 %vm1504_vm15, %v3697_v6  ;;  %v3703_v52 = vpack.c.bf16 %v1485_v43, %v1485_v43  ;;  %v3705_v9 = vpack.c.bf16 %v1491_v7, %v1491_v7  ;;  %v1764_v57 = vsel %vm1504_vm15, %v1725_v42, 0 }
 0x4a5   : > { %v1487_v10 = vsel %vm1382_vm0, %v1479_v1, %v1486_v54  ;;  %1741 = vmatpush.bf16.xpose.msra.mxu3 %v1732_v50 }
 0x4a6   : > { %2691 = vmatmul.msk.bf16.vlgmr.msra.gmra.mxu2 %vm1504_vm15, %v3703_v52  ;;  %2694 = vmatmul.msk.bf16.vlgmr.msra.gmra.mxu1 %vm1504_vm15, %v3705_v9  ;;  %v1493_v11 = vpack.c.bf16 %v1487_v10, %v1487_v10 }
 0x4a7   : > { %1656 = vmatpush.bf16.msra.mxu2 %v1647_v35  ;;  %1773 = vmatpush.bf16.xpose.msra.mxu1 %v1764_v57 }
 0x4a8   : > { %2700 = vmatmul.msk.bf16.vlgmr.msrb.gmra.mxu0 %vm1504_vm15, %v1493_v11 }
 0x4b6   : > { %2692 = vmatmul.msk.bf16.vlgmr.msrb.gmra.mxu2 %vm1504_vm15, %v1493_v11 }
 0x4b7   : > { %1713 = vmatpush.bf16.msrb.mxu2 %v1704_v38 }
 0x523   : > { %v1577_v12 = vpop.f32.mrf.mxu1 }
 0x524   : > { %v1591_v14 = vsel %vm1581_vm1, %v1577_v12, -inf }
 0x525   : > { %1592 = vmax.xlane.f32.xlu1 %v1591_v14  ;;  %v3715_v15 = vpop.f32.mrf.mxu0 }
 0x526   : > { %v1798_v29 = vsel %vm1581_vm1, %v3715_v15, -inf }
 0x527   : > { %v3717_v16 = vpop.f32.mrf.mxu3 }
 0x528   : > { %v1588_v33 = vsel %vm1581_vm1, %v3717_v16, -inf }
 0x529   : > { %v1520_v17 = vpop.f32.mrf.mxu2 }
 0x52a   : > { %v1582_v19 = vsel %vm1581_vm1, %v1520_v17, -inf }
 0x52b   : > { %v1579_v20 = vpop.f32.mrf.mxu1  ;;  %1583 = vmax.xlane.f32.xlu2 %v1582_v19 }
 0x52d   : > { %v1761_v21 = vpop.f32.mrf.mxu0 }
 0x52f   : > { %v1560_v22 = vpop.f32.mrf.mxu3 }
 0x531   : > { %v1522_v23 = vpop.f32.mrf.mxu2 }
 0x533   : > { %1799 = vmax.xlane.f32.xlu2 %v1798_v29 }
 0x539   : > { %v1539_v30 = vpop.f32.mrf.mxu2 }
 0x53a   : > { %v1585_v31 = vsel %vm1581_vm1, %v1539_v30, -inf }
 0x53b   : > { %1586 = vmax.xlane.f32.xlu0 %v1585_v31 }
 0x541   : > { %v1541_v32 = vpop.f32.mrf.mxu2 }
 0x543   : > { %1589 = vmax.xlane.f32.xlu0 %v1588_v33 }
 0x598   : > { %v3728_v60 = vpop.xlane.xlu1 %1592 }
 0x599   : > { %v1609_v25 = vsub.f32 %v1577_v12, %v3728_v60  ;;  %v1597_v57 = vsub.f32 -inf, %v3728_v60 }
 0x59b   : > { %v1616_v59 = vmul.f32 1.442695, %v1609_v25 }
 0x59d   : > { %3007 = vpow2.f32 %v1616_v59 }
 0x59e   : > { %v3733_v49 = vpop.xlane.xlu2 %1583 }
 0x59f   : > { %v1606_v51 = vsub.f32 %v1520_v17, %v3733_v49 }
 0x5a1   : > { %v1610_v26 = vmul.f32 1.442695, %v1606_v51 }
 0x5a3   : > { %v3008_v61 = vpop.eup %3007  ;;  %3009 = vpow2.f32 %v1610_v26  ;;  %v1727_v26 = vld [vmem:[#allocation3 + $0x4] sm:$0xf] }
 0x5a4   : > { %v1631_v56 = vsel %vm1581_vm1, %v3008_v61, 0.0  ;;  %v1641_v10 = vpack.c.bf16 %v3008_v61, %v3008_v61  ;;  %v1867_v61 = vsel %vm1645_vm2, %v1727_v26, 0 }
 0x5a5   : > { %1632 = vadd.xlane.f32.xlu1 %v1631_v56  ;;  %v1730_v56 = vld [vmem:[#allocation3 + $0x1c] sm:$0xf] }
 0x5a6   : > { %v1800_v28 = vpop.xlane.xlu2 %1799  ;;  %v1924_v53 = vsel %vm1645_vm2, %v1730_v56, 0 }
 0x5a9   : > { %v3010_v44 = vpop.eup %3009 }
 0x5aa   : > { %v1622_v58 = vsel %vm1581_vm1, %v3010_v44, 0.0  ;;  %v1638_v27 = vpack.c.bf16 %v3010_v44, %v3010_v44  ;;  %v1729_v44 = vld [vmem:[#allocation3 + $0x14] sm:$0xf] }
 0x5ab   : > { %1623 = vadd.xlane.f32.xlu2 %v1622_v58  ;;  %v1905_v58 = vsel %vm1645_vm2, %v1729_v44, 0 }
 0x5ac   : > { %2695 = vmatmul.msk.bf16.vlgmr.msra.gmra.mxu2 %vm1581_vm1, %v1638_v27  ;;  %v1594_v27 = vsub.f32 -inf, %v3733_v49 }
 0x5ad   : > { %1789 = vmatpush.bf16.xpose.msra.mxu2 %v1780_v62 }
 0x5ae   : > { %v1587_v47 = vpop.xlane.xlu0 %1586  ;;  %v1598_v62 = vmul.f32 1.442695, %v1594_v27 }
 0x5af   : > { %v1607_v63 = vsub.f32 %v1539_v30, %v1587_v47  ;;  %v1808_v0 = vmax.f32 %v1587_v47, %v1800_v28 }
 0x5b1   : > { %v1612_v1 = vmul.f32 1.442695, %v1607_v63  ;;  %v1812_v45 = vsub.f32 %v1587_v47, %v1808_v0  ;;  %v1824_v2 = vsub.f32 %v3715_v15, %v1808_v0  ;;  %v1604_v0 = vmul.f32 1.442695, %v1597_v57 }
 0x5b3   : > { %3011 = vpow2.f32 %v1612_v1  ;;  %v1829_v3 = vmul.f32 1.442695, %v1824_v2  ;;  %v1817_v20 = vmul.f32 1.442695, %v1812_v45 }
 0x5b5   : > { %3013 = vpow2.f32 %v1829_v3 }
 0x5b6   : > { %v3743_v4 = vpop.xlane.xlu0 %1589 }
 0x5b7   : > { %v1608_v5 = vsub.f32 %v3717_v16, %v3743_v4  ;;  %v1595_v16 = vsub.f32 -inf, %v1587_v47 }
 0x5b9   : > { %v3012_v43 = vpop.eup %3011  ;;  %v1614_v54 = vmul.f32 1.442695, %v1608_v5  ;;  %v1600_v19 = vmul.f32 1.442695, %v1595_v16  ;;  %v1596_v5 = vsub.f32 -inf, %v3743_v4 }
 0x5ba   : > { %v1639_v7 = vpack.c.bf16 %v3012_v43, %v3012_v43  ;;  %v1625_v55 = vsel %vm1581_vm1, %v3012_v43, 0.0 }
 0x5bb   : > { %3015 = vpow2.f32 %v1614_v54  ;;  %v3747_v11 = vpop.eup %3013 }
 0x5bc   : > { %2696 = vmatmul.msk.bf16.vlgmr.msrb.gmra.mxu3 %vm1581_vm1, %v1639_v7  ;;  %2698 = vmatmul.msk.bf16.vlgmr.msrb.gmra.mxu2 %vm1581_vm1, %v1641_v10  ;;  %v1860_v12 = vpack.c.bf16 %v3747_v11, %v3747_v11  ;;  %3017 = vpow2.f32 %v1600_v19 }
 0x5bd   : > { %3019 = vpow2.f32 %v1817_v20  ;;  %1876 = vmatpush.bf16.msrb.mxu3 %v1867_v61  ;;  %1933 = vmatpush.bf16.msrb.mxu2 %v1924_v53  ;;  %v1842_v53 = vsel %vm1581_vm1, %v3747_v11, 0.0 }
 0x5be   : > { %2704 = vmatmul.msk.bf16.vlgmr.msra.gmra.mxu0 %vm1581_vm1, %v1860_v12  ;;  %3021 = vpow2.f32 %v1598_v62 }
 0x5c1   : > { %v3016_v14 = vpop.eup %3015 }
 0x5c2   : > { %v1640_v15 = vpack.c.bf16 %v3016_v14, %v3016_v14  ;;  %v3018_v22 = vpop.eup %3017  ;;  %v1628_v48 = vsel %vm1581_vm1, %v3016_v14, 0.0  ;;  %v1602_v14 = vmul.f32 1.442695, %v1596_v5 }
 0x5c3   : > { %v3763_v29 = vmul.f32 0.0, %v3018_v22  ;;  %v3768_v31 = vpop.eup %3019 }
 0x5c4   : > { %2697 = vmatmul.msk.bf16.vlgmr.msrb.gmra.mxu1 %vm1581_vm1, %v1640_v15  ;;  %v3022_v2 = vpop.eup %3021 }
 0x5c5   : > { %1914 = vmatpush.bf16.msrb.mxu1 %v1905_v58  ;;  %v1618_v54 = vmul.f32 0.0, %v3022_v2 }
 0x5cc   : > { %2699 = vmatmul.msk.bf16.vlgmr.msra.gmra.mxu3 %vm1504_vm15, %v3703_v52  ;;  %2702 = vmatmul.msk.bf16.vlgmr.msra.gmra.mxu2 %vm1504_vm15, %v3705_v9 }
 0x5d4   : > { %2701 = vmatmul.msk.bf16.vlgmr.msra.gmra.mxu1 %vm1504_vm15, %v3697_v6 }
 0x618   : > { %v1633_v44 = vpop.xlane.xlu1 %1632 }
 0x62f   : > { %v3761_v17 = vpop.f32.mrf.mxu2 }
 0x630   : > { %v1719_v12 = vadd.f32 %v3761_v17, %v1618_v54 }
 0x637   : > { %v1660_v21 = vpop.f32.mrf.mxu2 }
 0x63b   : > { %v1897_v23 = vpop.f32.mrf.mxu0 }
 0x63f   : > { %v1677_v30 = vpop.f32.mrf.mxu3  ;;  %v3765_v52 = vpop.f32.mrf.mxu2 }
 0x640   : > { %v1720_v9 = vadd.f32 %v1677_v30, %v3763_v29 }
 0x641   : > { %v3770_v6 = vpop.f32.mrf.mxu1 }
 0x642   : > { %v1856_v32 = vmul.f32 %v3768_v31, %v1720_v9 }
 0x643   : > { %v1899_v34 = vpop.f32.mrf.mxu0 }
 0x644   : > { %v3773_v33 = vadd.f32 %v1897_v23, %v1856_v32 }
 0x647   : > { %v1679_v35 = vpop.f32.mrf.mxu3  ;;  %v1717_v24 = vpop.f32.mrf.mxu2 }
 0x649   : > { %v1698_v36 = vpop.f32.mrf.mxu1 }
 0x64f   : > { %v1743_v37 = vpop.f32.mrf.mxu3  ;;  %v1791_v38 = vpop.f32.mrf.mxu2 }
 0x650   : > { %v1795_v25 = vsel %vm1581_vm1, %v1743_v37, -inf  ;;  %v1804_v41 = vsel %vm1581_vm1, %v1791_v38, -inf }
 0x651   : > { %1796 = vmax.xlane.f32.xlu0 %v1795_v25  ;;  %v3776_v39 = vpop.f32.mrf.mxu1 }
 0x652   : > { %v1801_v51 = vsel %vm1581_vm1, %v3776_v39, -inf }
 0x657   : > { %v1745_v59 = vpop.f32.mrf.mxu3  ;;  %v1793_v40 = vpop.f32.mrf.mxu2 }
 0x659   : > { %v1777_v50 = vpop.f32.mrf.mxu1  ;;  %1805 = vmax.xlane.f32.xlu0 %v1804_v41 }
 0x661   : > { %1802 = vmax.xlane.f32.xlu0 %v1801_v51 }
 0x669   : > { %1629 = vadd.xlane.f32.xlu0 %v1628_v48 }
 0x671   : > { %1626 = vadd.xlane.f32.xlu0 %v1625_v55 }
 0x6c4   : > { %v1797_v42 = vpop.xlane.xlu0 %1796 }
 0x6c5   : > { %v1807_v28 = vmax.f32 %v3733_v49, %v1797_v42 }
 0x6c7   : > { %v1811_v47 = vsub.f32 %v3733_v49, %v1807_v28  ;;  %v1823_v63 = vsub.f32 %v1743_v37, %v1807_v28 }
 0x6c9   : > { %v1815_v1 = vmul.f32 1.442695, %v1811_v47  ;;  %v1827_v45 = vmul.f32 1.442695, %v1823_v63 }
 0x6cb   : > { %3023 = vpow2.f32 %v1815_v1 }
 0x6cc   : > { %3025 = vpow2.f32 %v1827_v45  ;;  %v1806_v3 = vpop.xlane.xlu0 %1805 }
 0x6cd   : > { %3027 = vpow2.f32 %v1604_v0  ;;  %v1810_v43 = vmax.f32 %v3728_v60, %v1806_v3 }
 0x6cf   : > { %v1814_v7 = vsub.f32 %v3728_v60, %v1810_v43  ;;  %v1826_v10 = vsub.f32 %v1791_v38, %v1810_v43 }
 0x6d1   : > { %v3024_v49 = vpop.eup %3023  ;;  %v1821_v15 = vmul.f32 1.442695, %v1814_v7  ;;  %v1833_v16 = vmul.f32 1.442695, %v1826_v10 }
 0x6d2   : > { %v3026_v19 = vpop.eup %3025  ;;  %v1855_v20 = vmul.f32 %v3024_v49, %v1719_v12 }
 0x6d3   : > { %v3028_v21 = vpop.eup %3027  ;;  %v1859_v22 = vpack.c.bf16 %v3026_v19, %v3026_v19  ;;  %3029 = vpow2.f32 %v1821_v15  ;;  %v1839_v23 = vsel %vm1581_vm1, %v3026_v19, 0.0 }
 0x6d4   : > { %3031 = vpow2.f32 %v1833_v16  ;;  %1840 = vadd.xlane.f32.xlu1 %v1839_v23  ;;  %v1803_v30 = vpop.xlane.xlu0 %1802  ;;  %v1621_v17 = vmul.f32 0.0, %v3028_v21 }
 0x6d5   : > { %3033 = vpow2.f32 %v1602_v14  ;;  %2703 = vmatmul.msk.bf16.vlgmr.msrb.gmra.mxu3 %vm1581_vm1, %v1859_v22  ;;  %v1809_v60 = vmax.f32 %v3743_v4, %v1803_v30 }
 0x6d6   : > { %v1722_v34 = vadd.f32 %v3765_v52, %v1621_v17  ;;  %v1637_v57 = vadd.f32 %v1633_v44, %v1621_v17 }
 0x6d7   : > { %v1813_v9 = vsub.f32 %v3743_v4, %v1809_v60  ;;  %v1825_v32 = vsub.f32 %v3776_v39, %v1809_v60 }
 0x6d9   : > { %v3030_v35 = vpop.eup %3029  ;;  %v1819_v24 = vmul.f32 1.442695, %v1813_v9  ;;  %v1831_v36 = vmul.f32 1.442695, %v1825_v32 }
 0x6da   : > { %v3032_v37 = vpop.eup %3031  ;;  %v1858_v38 = vmul.f32 %v3030_v35, %v1722_v34  ;;  %v1838_v63 = vmul.f32 %v3030_v35, %v1637_v57 }
 0x6db   : > { %v3034_v25 = vpop.eup %3033  ;;  %v1862_v59 = vpack.c.bf16 %v3032_v37, %v3032_v37  ;;  %3035 = vpow2.f32 %v1819_v24  ;;  %v1848_v40 = vsel %vm1581_vm1, %v3032_v37, 0.0 }
 0x6dc   : > { %3037 = vpow2.f32 %v1831_v36  ;;  %1849 = vadd.xlane.f32.xlu0 %v1848_v40  ;;  %v1630_v41 = vpop.xlane.xlu0 %1629  ;;  %v1620_v4 = vmul.f32 0.0, %v3034_v25 }
 0x6dd   : > { %2706 = vmatmul.msk.bf16.vlgmr.msrb.gmra.mxu2 %vm1581_vm1, %v1862_v59 }
 0x6de   : > { %v1721_v39 = vadd.f32 %v3770_v6, %v1620_v4  ;;  %v1624_v6 = vpop.xlane.xlu2 %1623  ;;  %v1636_v47 = vadd.f32 %v1630_v41, %v1620_v4 }
 0x6df   : > { %v1634_v58 = vadd.f32 %v1624_v6, %v1618_v54 }
 0x6e1   : > { %v3036_v50 = vpop.eup %3035  ;;  %v1835_v62 = vmul.f32 %v3024_v49, %v1634_v58 }
 0x6e2   : > { %v3038_v52 = vpop.eup %3037  ;;  %v1857_v51 = vmul.f32 %v3036_v50, %v1721_v39 }
 0x6e3   : > { %v1861_v48 = vpack.c.bf16 %v3038_v52, %v3038_v52  ;;  %v1845_v55 = vsel %vm1581_vm1, %v3038_v52, 0.0 }
 0x6e4   : > { %1846 = vadd.xlane.f32.xlu2 %v1845_v55  ;;  %v1627_v26 = vpop.xlane.xlu0 %1626 }
 0x6e5   : > { %2705 = vmatmul.msk.bf16.vlgmr.msrb.gmra.mxu1 %vm1581_vm1, %v1861_v48  ;;  %v1635_v61 = vadd.f32 %v1627_v26, %v3763_v29  ;;  %v1837_v29 = vmul.f32 %v3036_v50, %v1636_v47 }
 0x6e7   : > { %v1836_v56 = vmul.f32 %v3768_v31, %v1635_v61 }
 0x6ec   : > { %1843 = vadd.xlane.f32.xlu2 %v1842_v53 }
 0x747   : > { %v1841_v27 = vpop.xlane.xlu1 %1840 }
 0x748   : > { %v1851_v42 = vadd.f32 %v1841_v27, %v1835_v62 }
 0x74a   : > { %3039 = vrcp.f32 %v1851_v42 }
 0x74f   : > { %v1850_v28 = vpop.xlane.xlu0 %1849 }
 0x750   : > { %v1854_v1 = vadd.f32 %v1850_v28, %v1838_v63  ;;  %v3040_v2 = vpop.eup %3039 }
 0x752   : > { %3041 = vrcp.f32 %v1854_v1 }
 0x757   : > { %v1847_v0 = vpop.xlane.xlu2 %1846 }
 0x758   : > { %v1878_v45 = vpop.f32.mrf.mxu3  ;;  %v1853_v3 = vadd.f32 %v1847_v0, %v1837_v29  ;;  %v3042_v12 = vpop.eup %3041 }
 0x759   : > { %v1939_v31 = vadd.f32 %v1878_v45, %v1855_v20 }
 0x75a   : > { %3043 = vrcp.f32 %v1853_v3 }
 0x75b   : > { %v1947_v11 = vmul.f32 %v3040_v2, %v1939_v31 }
 0x75d   : > { %v1953_v19 = vrot.slane %v1947_v11, 4 }
 0x75f   : > { %v1844_v5 = vpop.xlane.xlu2 %1843 }
 0x760   : > { %v1852_v43 = vadd.f32 %v1844_v5, %v1836_v56  ;;  %v1880_v54 = vpop.f32.mrf.mxu3  ;;  %v1935_v7 = vpop.f32.mrf.mxu2 }
 0x761   : > { %v1942_v10 = vadd.f32 %v1935_v7, %v1858_v38  ;;  %v3044_v16 = vpop.eup %3043 }
 0x762   : > { %3045 = vrcp.f32 %v1852_v43  ;;  %v1916_v49 = vpop.f32.mrf.mxu1 }
 0x763   : > { %v1950_v14 = vmul.f32 %v3042_v12, %v1942_v10  ;;  %v1941_v15 = vadd.f32 %v1916_v49, %v1857_v51 }
 0x765   : > { %v1949_v21 = vmul.f32 %v3044_v16, %v1941_v15  ;;  %v1963_v17 = vrot.slane %v1950_v14, 4 }
 0x767   : > { %v1951_v22 = vrot.slane %v1949_v21, 4  ;;  %v1954_v20 = vsel %vm1382_vm0, %v1949_v21, %v1953_v19 }
 0x768   : > { %v3046_v23 = vpop.eup %3045  ;;  %v1937_v30 = vpop.f32.mrf.mxu2  ;;  %v1962_v34 = vperm.slane %v1954_v20, %v3656_v46 }
 0x769   : > { %v1948_v60 = vmul.f32 %v3046_v23, %v3773_v33  ;;  %v1952_v9 = vsel %vm1382_vm0, %v1951_v22, %v1947_v11 }
 0x76a   : > { %v1958_v32 = vperm.slane %v1952_v9, %v3656_v46  ;;  %v1918_v35 = vpop.f32.mrf.mxu1  ;;  %v1989_v41 = vrot.slane %v1962_v34, 4 }
 0x76b   : > { %v1965_v24 = vrot.slane %v1948_v60, 4  ;;  %v1964_v36 = vsel %vm1382_vm0, %v1963_v17, %v1948_v60  ;;  %v2845_v60 = vld [vmem:[%s4084_s9 + $0x18] sm:$0xff]  ;;  %v2844_v17 = vld [vmem:[%s4084_s9 + $0x10] sm:$0xff]  ;;  %v2842_v35 = vld [vmem:[%s4084_s9] sm:$0xff] }
 0x76c   : > { %v1970_v37 = vperm.slane %v1964_v36, %v3656_v46  ;;  %v1977_v38 = vrot.slane %v1958_v32, 4  ;;  %v2121_v9 = vsel %vm1271_vm10, %v2844_v17, 0 }
 0x76d   : > { %v1966_v25 = vsel %vm1382_vm0, %v1950_v14, %v1965_v24  ;;  %v2115_v24 = vsel %vm1271_vm10, %v2842_v35, 0 }
 0x76e   : > { %v1974_v59 = vperm.slane %v1966_v25, %v3656_v46  ;;  %v1975_v40 = vrot.slane %v1970_v37, 4  ;;  %v1978_v33 = vsel %vm1382_vm0, %v1970_v37, %v1977_v38 }
 0x76f   : > { %v1986_v4 = vperm.slane %v1978_v33, %v3662_v13 }
 0x770   : > { %v1987_v39 = vrot.slane %v1974_v59, 4  ;;  %v1976_v50 = vsel %vm1382_vm0, %v1975_v40, %v1958_v32  ;;  %v1990_v52 = vsel %vm1382_vm0, %v1974_v59, %v1989_v41  ;;  %v2843_v32 = vld [vmem:[%s4084_s9 + $0x8] sm:$0xff]  ;;  %v2999_v41 = vld [vmem:[%s4085_s10] ss:$0 sm:$0xff] }
 0x771   : > { %v1982_v51 = vperm.slane %v1976_v50, %v3662_v13  ;;  %v1998_v48 = vperm.slane %v1990_v52, %v3662_v13  ;;  %v2001_v55 = vrot.slane %v1986_v4, 4 }
 0x772   : > { %v1988_v26 = vsel %vm1382_vm0, %v1987_v39, %v1962_v34  ;;  %v2118_v34 = vsel %vm1271_vm10, %v2843_v32, 0  ;;  %v3000_v32 = vld [vmem:[%s4086_s11] ss:$0 sm:$0xff] }
 0x773   : > { %v1994_v61 = vperm.slane %v1988_v26, %v3662_v13  ;;  %v1999_v56 = vrot.slane %v1982_v51, 4  ;;  %v2005_v53 = vrot.slane %v1998_v48, 4  ;;  %v2002_v44 = vsel %vm1382_vm0, 0.0, %v2001_v55  ;;  %v2853_v48 = vld [vmem:[%s4088_s13 + $0x38] sm:$0xff] }
 0x774   : > { %v2007_v6 = vsel %vm1382_vm0, %v2001_v55, %v1982_v51  ;;  %v2012_v58 = vrot.slane %v2002_v44, 4  ;;  %v2861_v55 = vld [vmem:[%s4088_s13 + $0x78] sm:$0xff]  ;;  %v2316_v26 = vsel %vm1271_vm10, %v2853_v48, 0 }
 0x775   : > { %v2003_v27 = vrot.slane %v1994_v61, 4  ;;  %v2000_v62 = vsel %vm1382_vm0, 0.0, %v1999_v56  ;;  %v2006_v42 = vsel %vm1382_vm0, 0.0, %v2005_v53  ;;  %v2011_v57 = vperm.slane %v2007_v6, %v3656_v46  ;;  %2342 = vmatpush.bf16.xpose.msrb.mxu0 %v2316_v26  ;;  %v2860_v56 = vld [vmem:[%s4088_s13 + $0x70] sm:$0xff]  ;;  %v2851_v6 = vld [vmem:[%s4088_s13 + $0x28] sm:$0xff] }
 0x776   : > { %v2013_v28 = vsel %vm1382_vm0, %v2012_v58, %v2000_v62  ;;  %v2018_v47 = vsel %vm1382_vm0, %v2005_v53, %v1994_v61  ;;  %v2023_v63 = vrot.slane %v2006_v42, 4  ;;  %v2340_v61 = vsel %vm1271_vm10, %v2861_v55, 0  ;;  %v2859_v58 = vld [vmem:[%s4088_s13 + $0x68] sm:$0xff]  ;;  %v2850_v42 = vld [vmem:[%s4088_s13 + $0x20] sm:$0xff] }
 0x777   : > { %v2004_v0 = vsel %vm1382_vm0, 0.0, %v2003_v27  ;;  %v2017_v1 = vperm.slane %v2013_v28, %v3656_v46  ;;  %v2022_v29 = vperm.slane %v2018_v47, %v3656_v46  ;;  %v2031_v45 = vrot.slane %v2011_v57, 4  ;;  %2355 = vmatpush.bf16.xpose.msra.mxu1 %v2340_v61  ;;  %v2810_v55 = vld [vmem:[%s4090_s15 + $0x20] sm:$0xf]  ;;  %v2867_v26 = vld [vmem:[%s4090_s15 + $0x24] sm:$0xf0] }
 0x778   : > { %v2024_v31 = vsel %vm1382_vm0, %v2023_v63, %v2004_v0  ;;  %v2337_v44 = vsel %vm1271_vm10, %v2860_v56, 0  ;;  %v2310_v27 = vsel %vm1271_vm10, %v2851_v6, 0  ;;  %v2334_v62 = vsel %vm1271_vm10, %v2859_v58, 0  ;;  %v2866_v61 = vld [vmem:[%s4090_s15 + $0x24] sm:$0xf] }
 0x779   : > { %v2028_v2 = vperm.slane %v2024_v31, %v3656_v46  ;;  %v2032_v3 = vsel %vm1382_vm0, %v2017_v1, %v2031_v45  ;;  %v2043_v11 = vrot.slane %v2022_v29, 4  ;;  %v2029_v5 = vrot.slane %v2017_v1, 4  ;;  %v2857_v45 = vld [vmem:[%s4088_s13 + $0x58] sm:$0xff] }
 0x77a   : > { %v2040_v43 = vperm.slane %v2032_v3, %v3662_v13  ;;  %v2307_v47 = vsel %vm1271_vm10, %v2850_v42, 0 }
 0x77b   : > { %v2044_v54 = vsel %vm1382_vm0, %v2028_v2, %v2043_v11  ;;  %v2030_v7 = vsel %vm1382_vm0, %v2029_v5, %v2011_v57  ;;  %v2041_v10 = vrot.slane %v2028_v2, 4  ;;  %v2858_v57 = vld [vmem:[%s4088_s13 + $0x60] sm:$0xff]  ;;  %v2328_v11 = vsel %vm1271_vm10, %v2857_v45, 0  ;;  %v2848_v5 = vld [vmem:[%s4088_s13 + $0x10] sm:$0xff] }
 0x77c   : > { %v2052_v12 = vperm.slane %v2044_v54, %v3662_v13  ;;  %v2059_v49 = vrot.slane %v2040_v43, 4  ;;  %v2036_v14 = vperm.slane %v2030_v7, %v3662_v13  ;;  %v2331_v63 = vsel %vm1271_vm10, %v2858_v57, 0 }
 0x77d   : > { %v2042_v15 = vsel %vm1382_vm0, %v2041_v10, %v2022_v29  ;;  %v2849_v29 = vld [vmem:[%s4088_s13 + $0x18] sm:$0xff]  ;;  %v2301_v54 = vsel %vm1271_vm10, %v2848_v5, 0  ;;  %v2847_v10 = vld [vmem:[%s4088_s13 + $0x8] sm:$0xff] }
 0x77e   : > { %v2060_v46 = vsel %vm1382_vm0, %v2052_v12, %v2059_v49  ;;  %v2057_v16 = vrot.slane %v2052_v12, 4  ;;  %v2048_v19 = vperm.slane %v2042_v15, %v3662_v13  ;;  %v2055_v21 = vrot.slane %v2036_v14, 4  ;;  %v2855_v12 = vld [vmem:[%s4088_s13 + $0x48] sm:$0xff]  ;;  %v2846_v15 = vld [vmem:[%s4088_s13] sm:$0xff]  ;;  %v2804_v5 = vld [vmem:[%s4090_s15 + $0x18] sm:$0xf0] }
 0x77f   : > { %2070 = vrot.lane.b32.xlu2 %v2060_v46, %s3161_s23  ;;  %v2124_v13 = vsel %vm1271_vm10, %v2845_v60, 0  ;;  %2356 = vmatpush.bf16.xpose.msra.mxu1 %v2337_v44  ;;  %v2304_v3 = vsel %vm1271_vm10, %v2849_v29, 0  ;;  %v2298_v49 = vsel %vm1271_vm10, %v2847_v10, 0  ;;  %v2854_v46 = vld [vmem:[%s4088_s13 + $0x40] sm:$0xff]  ;;  %v2812_v44 = vld [vmem:[%s4090_s15 + $0x28] sm:$0xf0]  ;;  %s2549_s23 = sadd.s32 %s3131_s27, %s2825_s16  ;;  %s4128_s27 = smov %s4127_s3 }
 0x780   : > { %v2058_v22 = vsel %vm1382_vm0, %v2057_v16, %v2040_v43  ;;  %v2053_v20 = vrot.slane %v2048_v19, 4  ;;  %v2056_v23 = vsel %vm1382_vm0, %v2048_v19, %v2055_v21  ;;  %2130 = vmatpush.bf16.xpose.msra.mxu3 %v2124_v13  ;;  %v2856_v43 = vld [vmem:[%s4088_s13 + $0x50] sm:$0xff]  ;;  %v2295_v16 = vsel %vm1271_vm10, %v2846_v15, 0  ;;  %s2826_s2 = sshll.u32 %s2549_s23, 3  ;;  %s2539_s16 = scalar_lea.sflag [#allocation5], %s4129_s28 }
 0x781   : > { %2066 = vrot.lane.b32.xlu0 %v2058_v22, %s3162_s21  ;;  %2062 = vrot.lane.b32.xlu1 %v2056_v23, %s3163_s18  ;;  %v2325_v7 = vsel %vm1271_vm10, %v2856_v43, 0  ;;  %v2319_v19 = vsel %vm1271_vm10, %v2854_v46, 0  ;;  %v2815_v6 = vor.u32 %v2866_v61, %v2812_v44  ;;  %v2864_v29 = vld [vmem:[%s4090_s15 + $0x14] sm:$0xf]  ;;  %s2551_s19 = scalar_lea.hbm %s4126_s20, %s2826_s2  ;;  %s3073_s18 = scalar_lea.hbm %s4126_s20, 32 }
 0x782   : > { %v2054_v30 = vsel %vm1382_vm0, %v2053_v20, %v2036_v14  ;;  %v2322_v14 = vsel %vm1271_vm10, %v2855_v12, 0  ;;  %v2807_v10 = vor.u32 %v2864_v29, %v2804_v5  ;;  %s2555_s5 = sshll.u32 %s2551_s19, 4  ;;  %s2556_s5 = int_to_ptr.hbm [resolvable:$true] %s2555_s5 }
 0x783   : > { %s3067_s23 = sshra.s32 %s2556_s5, 4  ;;  %s3068_s23 = int_to_ptr.hbm [resolvable:$true] %s3067_s23 }
 0x784   : > { %s3069_s2 = scalar_lea.hbm %s3068_s23, 8  ;;  %p3074_p4 = scmp.lt.s32.totalorder %s3068_s23, %s4126_s20 }
 0x785   : > { %p3070_p0 = scmp.ne.s32.totalorder %s3068_s23, %s3069_s2  ;;  %p3075_p5 = scmp.lt.s32.totalorder %s3073_s18, %s3069_s2 }
 0x787   : > { %2357 = vmatpush.bf16.xpose.msra.mxu1 %v2334_v62  ;;  %p3071_p1 = pnand %p3070_p0, %p3305_p3  ;;  %p3076_p6 = por %p3075_p5, %p3074_p4 }
 0x788   : > { %2131 = vmatpush.bf16.xpose.msra.mxu3 %v2121_v9 }
 0x789   : > { %p3072_p2 = pneg %p3071_p1 }
 0x78b   : > { %p3077_p7 = pnand %p3076_p6, %p3072_p2 }
 0x78f   : > { %2358 = vmatpush.bf16.xpose.msra.mxu1 %v2331_v63 }
 0x790   : > { %2132 = vmatpush.bf16.xpose.msra.mxu3 %v2118_v34 }
 0x797   : > { %2359 = vmatpush.bf16.xpose.msra.mxu1 %v2328_v11 }
 0x798   : > { %2133 = vmatpush.bf16.xpose.msra.mxu3 %v2115_v24 }
 0x79f   : > { %2360 = vmatpush.bf16.xpose.msra.mxu1 %v2325_v7 }
 0x7a7   : > { %2361 = vmatpush.bf16.xpose.msra.mxu1 %v2322_v14 }
 0x7af   : > { %2362 = vmatpush.bf16.xpose.msra.mxu1 %v2319_v19 }
 0x7d9   : > { %v2071_v25 = vpop.permute.xlu2 %2070 }
 0x7f3   : > { %v2067_v36 = vpop.permute.xlu0 %2066  ;;  %v2063_v37 = vpop.permute.xlu1 %2062 }
 0x7f4   : > { %v2073_v38 = vsel %vm1504_vm15, %v2054_v30, %v2063_v37 }
 0x7f5   : > { %v2075_v59 = vsel %vm2074_vm3, %v2073_v38, %v2067_v36  ;;  %v2818_v38 = vld [vmem:[%s4090_s15 + $0x30] sm:$0xf] }
 0x7f6   : > { %v2077_v40 = vsel %vm2076_vm4, %v2075_v59, %v2071_v25  ;;  %v2869_v25 = vld [vmem:[%s4090_s15 + $0x34] sm:$0xf0]  ;;  %v2868_v59 = vld [vmem:[%s4090_s15 + $0x34] sm:$0xf] }
 0x7f7   : > { %v2087_v33 = vpack.c.bf16 %v2077_v40, %v2077_v40  ;;  %v2819_v40 = vor.u32 %v2869_v25, %v2818_v38 }
 0x7f9   : > { %2723 = vmatmul.msk.bf16.vlgmr.msra.gmra.mxu3 %vm1271_vm10, %v2087_v33  ;;  %v2820_v33 = vld [vmem:[%s4090_s15 + $0x38] sm:$0xf0]  ;;  %2514 = vmatpush.bf16.xpose.msra.mxu2 %v2819_v40 }
 0x87c   : > { %v2135_v4 = vpop.f32.mrf.mxu3 }
 0x87d   : > { %v2136_v39 = vadd.f32 %v2999_v41, %v2135_v4  ;;  %v2204_v41 = vld [vmem:[%s4089_s14] sm:$0x3]  ;;  %v2823_v4 = vor.u32 %v2868_v59, %v2820_v33 }
 0x87f   : > { %v3872_v50 = vadd.f32 %v2136_v39, %v3615_v8  ;;  %v2852_v8 = vld [vmem:[%s4088_s13 + $0x30] sm:$0xff]  ;;  %2527 = vmatpush.bf16.xpose.msrb.mxu3 %v2823_v4  ;;  %v2207_v39 = vperm.slane %v2204_v41, 0 }
 0x880   : > { %v2313_v53 = vsel %vm1271_vm10, %v2852_v8, 0 }
 0x881   : > { %v2142_v52 = vsel %vm1271_vm10, %v3872_v50, 0.0  ;;  %2343 = vmatpush.bf16.xpose.msrb.mxu0 %v2313_v53  ;;  %v2811_v53 = vor.u32 %v2867_v26, %v2810_v55 }
 0x882   : > { %2143 = vadd.xlane.f32.xlu1 %v2142_v52  ;;  %v2208_v52 = vperm.slane %v2204_v41, 1 }
 0x883   : > { %2515 = vmatpush.bf16.xpose.msra.mxu2 %v2811_v53 }
 0x884   : > { %v2137_v51 = vpop.f32.mrf.mxu3 }
 0x887   : > { %2528 = vmatpush.bf16.xpose.msrb.mxu3 %v2815_v6 }
 0x889   : > { %2344 = vmatpush.bf16.xpose.msrb.mxu0 %v2310_v27 }
 0x88f   : > { %2529 = vmatpush.bf16.xpose.msrb.mxu3 %v2807_v10 }
 0x891   : > { %2345 = vmatpush.bf16.xpose.msrb.mxu0 %v2307_v47 }
 0x899   : > { %2346 = vmatpush.bf16.xpose.msrb.mxu0 %v2304_v3 }
 0x8a1   : > { %2347 = vmatpush.bf16.xpose.msrb.mxu0 %v2301_v54 }
 0x8a9   : > { %2348 = vmatpush.bf16.xpose.msrb.mxu0 %v2298_v49 }
 0x8b1   : > { %2349 = vmatpush.bf16.xpose.msrb.mxu0 %v2295_v16 }
 0x8f5   : > { %v2144_v28 = vpop.xlane.xlu1 %2143 }
 0x8f6   : > { %v2145_v0 = vmul.f32 %v2144_v28, %v3623_v18 }
 0x8f8   : > { %v2146_v1 = vsub.f32 %v3872_v50, %v2145_v0  ;;  %v2802_v0 = vld [vmem:[%s4090_s15 + $0x10] sm:$0xf] }
 0x8fa   : > { %v2147_v31 = vmul.f32 %v2146_v1, %v2146_v1 }
 0x8fc   : > { %v2148_v2 = vsel %vm1271_vm10, %v2147_v31, 0.0 }
 0x8fd   : > { %2149 = vadd.xlane.f32.xlu0 %v2148_v2 }
 0x970   : > { %v2150_v21 = vpop.xlane.xlu0 %2149 }
 0x971   : > { %v2151_v22 = vmul.f32 %v2150_v21, %v3623_v18  ;;  %v3001_v18 = vld [vmem:[%s4087_s12] ss:$0 sm:$0xff] }
 0x973   : > { %v2152_v20 = vadd.f32 1e-05, %v2151_v22  ;;  %v2794_v22 = vld [vmem:[%s4090_s15] sm:$0xf] }
 0x975   : > { %3047 = vrsqrt.f32 %v2152_v20  ;;  %vm2159_vm6 = vweird.f32 %v2152_v20 }
 0x97b   : > { %v3048_v23 = vpop.eup %3047 }
 0x97c   : > { %v2154_v30 = vmul.f32 %v3048_v23, %v2152_v20  ;;  %vm2160_vm5 = vweird.f32 %v3048_v23  ;;  %v2863_v20 = vld [vmem:[%s4090_s15 + $0x4] sm:$0xf0] }
 0x97d   : > { %vm2161_vm7 = vmor %vm2159_vm6, %vm2160_vm5 }
 0x97e   : > { %v2155_v60 = vmul.f32 %v3048_v23, %v2154_v30 }
 0x980   : > { %v2156_v13 = vmul.f32 0.5, %v2155_v60  ;;  %v2795_v60 = vor.u32 %v2863_v20, %v2794_v22 }
 0x982   : > { %v2157_v17 = vsub.f32 1.5, %v2156_v13  ;;  %v2862_v13 = vld [vmem:[%s4090_s15 + $0x4] sm:$0xf] }
 0x984   : > { %v2158_v9 = vmul.f32 %v3048_v23, %v2157_v17  ;;  %v2796_v17 = vld [vmem:[%s4090_s15 + $0x8] sm:$0xf0] }
 0x986   : > { %v2162_v34 = vsel %vm2161_vm7, %v3048_v23, %v2158_v9 }
 0x987   : > { %v2163_v35 = vmul.f32 %v2162_v34, %v2146_v1  ;;  %v2865_v1 = vld [vmem:[%s4090_s15 + $0x14] sm:$0xf0] }
 0x988   : > { %v2803_v3 = vor.u32 %v2865_v1, %v2802_v0 }
 0x989   : > { %v2167_v24 = vmul.f32 %v3000_v32, %v2163_v35  ;;  %v2799_v32 = vor.u32 %v2862_v13, %v2796_v17 }
 0x98a   : > { %2516 = vmatpush.bf16.xpose.msra.mxu2 %v2803_v3 }
 0x98b   : > { %v2171_v36 = vadd.f32 %v3001_v18, %v2167_v24  ;;  %2530 = vmatpush.bf16.xpose.msrb.mxu3 %v2799_v32 }
 0x98d   : > { %v2205_v37 = vpack.c.bf16 %v2171_v36, %v2171_v36 }
 0x98f   : > { %2788 = vmatmul.msk.bf16.vlgmr.msrb.gmra.mxu0 %vm1271_vm10, %v2205_v37  ;;  %2789 = vmatmul.msk.bf16.vlgmr.msra.gmra.mxu1 %vm1271_vm10, %v2205_v37 }
 0x992   : > { %2517 = vmatpush.bf16.xpose.msra.mxu2 %v2795_v60 }
 0xa0c   : > { %v2351_v51 = vpop.f32.mrf.mxu0  ;;  %v2364_v48 = vpop.f32.mrf.mxu1 }
 0xa0d   : > { %v3976_v8 = vadd.f32 %v2351_v51, %v2207_v39  ;;  %v3978_v56 = vadd.f32 %v2364_v48, %v2208_v52 }
 0xa0f   : > { %v3984_v58 = vmul.f32 0.70710677, %v3976_v8  ;;  %v3987_v27 = vmul.f32 0.70710677, %v3978_v56 }
 0xa11   : > { %v2372_v62 = vmul.f32 %v3984_v58, %v3984_v58  ;;  %v2412_v42 = vmul.f32 %v3987_v27, %v3987_v27 }
 0xa13   : > { %v2373_v57 = vmin.f32 %v2372_v62, 16.0  ;;  %v2413_v28 = vmin.f32 %v2412_v42, 16.0 }
 0xa14   : > { %v2353_v47 = vpop.f32.mrf.mxu0  ;;  %v2366_v63 = vpop.f32.mrf.mxu1 }
 0xa15   : > { %v2374_v45 = vmul.f32 2.1237322e-06, %v2373_v57  ;;  %v2385_v31 = vmul.f32 3.8918573e-05, %v2373_v57  ;;  %v2414_v2 = vmul.f32 2.1237322e-06, %v2413_v28 }
 0xa16   : > { %v2425_v11 = vmul.f32 3.8918573e-05, %v2413_v28 }
 0xa17   : > { %v2375_v43 = vadd.f32 0.00028619796, %v2374_v45  ;;  %v2386_v54 = vadd.f32 0.001143296, %v2385_v31  ;;  %v2415_v7 = vadd.f32 0.00028619796, %v2414_v2 }
 0xa18   : > { %v2426_v12 = vadd.f32 0.001143296, %v2425_v11 }
 0xa19   : > { %v2376_v49 = vmul.f32 %v2375_v43, %v2373_v57  ;;  %v2387_v14 = vmul.f32 %v2386_v54, %v2373_v57  ;;  %v2416_v15 = vmul.f32 %v2415_v7, %v2413_v28 }
 0xa1a   : > { %v2427_v46 = vmul.f32 %v2426_v12, %v2413_v28 }
 0xa1b   : > { %v2377_v16 = vadd.f32 0.0036580483, %v2376_v49  ;;  %v2388_v19 = vadd.f32 0.014752088, %v2387_v14  ;;  %v2417_v30 = vadd.f32 0.0036580483, %v2416_v15 }
 0xa1c   : > { %v2428_v21 = vadd.f32 0.014752088, %v2427_v46 }
 0xa1d   : > { %v2389_v23 = vmul.f32 %v2388_v19, %v2373_v57  ;;  %v2378_v34 = vmul.f32 %v2377_v16, %v2373_v57  ;;  %v2418_v36 = vmul.f32 %v2417_v30, %v2413_v28  ;;  %v2368_v19 = vmul.f32 0.5, %v3976_v8  ;;  %v3002_v8 = vld [vmem:[%s4125_s17] ss:$0 sm:$0xff] }
 0xa1e   : > { %v2429_v9 = vmul.f32 %v2428_v21, %v2413_v28 }
 0xa1f   : > { %v2390_v35 = vadd.f32 0.112945676, %v2389_v23  ;;  %v2379_v38 = vadd.f32 0.05243302, %v2378_v34  ;;  %v2419_v33 = vadd.f32 0.05243302, %v2418_v36 }
 0xa20   : > { %v2430_v18 = vadd.f32 0.112945676, %v2429_v9 }
 0xa21   : > { %v2391_v24 = vmul.f32 %v2390_v35, %v2373_v57  ;;  %v2380_v4 = vmul.f32 %v2379_v38, %v2373_v57  ;;  %v2420_v51 = vmul.f32 %v2419_v33, %v2413_v28 }
 0xa22   : > { %v2431_v37 = vmul.f32 %v2430_v18, %v2413_v28 }
 0xa23   : > { %v2392_v25 = vadd.f32 0.4994258, %v2391_v24  ;;  %v2381_v48 = vadd.f32 0.18741608, %v2380_v4  ;;  %v2421_v55 = vadd.f32 0.18741608, %v2420_v51 }
 0xa24   : > { %v2432_v59 = vadd.f32 0.4994258, %v2431_v37 }
 0xa25   : > { %v2393_v40 = vmul.f32 %v2392_v25, %v2373_v57  ;;  %v2382_v61 = vmul.f32 %v2381_v48, %v2373_v57  ;;  %v2422_v6 = vmul.f32 %v2421_v55, %v2413_v28 }
 0xa26   : > { %v2433_v41 = vmul.f32 %v2432_v59, %v2413_v28 }
 0xa27   : > { %v2394_v39 = vadd.f32 1.0, %v2393_v40  ;;  %v2383_v47 = vadd.f32 1.1283791, %v2382_v61  ;;  %v2423_v31 = vadd.f32 1.1283791, %v2422_v6 }
 0xa28   : > { %v2434_v52 = vadd.f32 1.0, %v2433_v41 }
 0xa29   : > { %3049 = vrcp.f32 %v2394_v39  ;;  %v2406_v63 = vand.u32 2147483648, %v2394_v39  ;;  %v2404_v29 = vand.u32 2147483647, %v2394_v39  ;;  %vm2400_vm11 = vweird.f32 %v2394_v39 }
 0xa2a   : > { %3051 = vrcp.f32 %v2434_v52  ;;  %v2446_v45 = vand.u32 2147483648, %v2434_v52  ;;  %v2444_v3 = vand.u32 2147483647, %v2434_v52  ;;  %vm2440_vm13 = vweird.f32 %v2434_v52 }
 0xa2b   : > { %v2407_v57 = vor.u32 1.1754944e-38, %v2406_v63  ;;  %v2384_v28 = vmul.f32 %v2383_v47, %v3984_v58  ;;  %vm2405_vm14 = vcmp.eq.f32.partialorder %v2404_v29, 8.507059e+37  ;;  %v2424_v10 = vmul.f32 %v2423_v31, %v3987_v27 }
 0xa2c   : > { %v2447_v54 = vor.u32 1.1754944e-38, %v2446_v45  ;;  %vm2445_vm0 = vcmp.eq.f32.partialorder %v2444_v3, 8.507059e+37  ;;  %v2369_v58 = vmul.f32 0.5, %v3978_v56 }
 0xa2f   : > { %v3050_v26 = vpop.eup %3049 }
 0xa30   : > { %v3052_v53 = vpop.eup %3051  ;;  %v2396_v44 = vmul.f32 %v3050_v26, %v2394_v39  ;;  %vm2401_vm8 = vweird.f32 %v3050_v26 }
 0xa31   : > { %v2436_v62 = vmul.f32 %v3052_v53, %v2434_v52  ;;  %vm2441_vm9 = vweird.f32 %v3052_v53  ;;  %vm2402_vm12 = vmor %vm2400_vm11, %vm2401_vm8 }
 0xa32   : > { %v2397_v42 = vsub.f32 1.0, %v2396_v44  ;;  %vm2442_vm15 = vmor %vm2440_vm13, %vm2441_vm9 }
 0xa33   : > { %v2437_v0 = vsub.f32 1.0, %v2436_v62 }
 0xa34   : > { %v2398_v1 = vmul.f32 %v3050_v26, %v2397_v42 }
 0xa35   : > { %v2438_v2 = vmul.f32 %v3052_v53, %v2437_v0 }
 0xa36   : > { %v2399_v11 = vadd.f32 %v3050_v26, %v2398_v1 }
 0xa37   : > { %v2439_v5 = vadd.f32 %v3052_v53, %v2438_v2 }
 0xa38   : > { %v2403_v43 = vsel %vm2402_vm12, %v3050_v26, %v2399_v11 }
 0xa39   : > { %v2408_v7 = vsel %vm2405_vm14, %v2407_v57, %v2403_v43  ;;  %v2443_v12 = vsel %vm2442_vm15, %v3052_v53, %v2439_v5 }
 0xa3a   : > { %v2409_v49 = vmul.f32 %v2408_v7, %v2384_v28  ;;  %v2448_v14 = vsel %vm2445_vm0, %v2447_v54, %v2443_v12 }
 0xa3b   : > { %v2449_v15 = vmul.f32 %v2448_v14, %v2424_v10 }
 0xa3c   : > { %v2790_v46 = vclamps-f32 %v2409_v49, 1.0 }
 0xa3d   : > { %v2791_v16 = vclamps-f32 %v2449_v15, 1.0 }
 0xa3e   : > { %v2452_v21 = vadd.f32 1.0, %v2790_v46 }
 0xa3f   : > { %v2453_v22 = vadd.f32 1.0, %v2791_v16 }
 0xa40   : > { %v2454_v20 = vmul.f32 %v2452_v21, %v2368_v19 }
 0xa41   : > { %v2455_v23 = vmul.f32 %v2453_v22, %v2369_v58 }
 0xa42   : > { %v2465_v30 = vpack.c.bf16 %v2454_v20, %v2454_v20 }
 0xa43   : > { %v2466_v27 = vpack.c.bf16 %v2455_v23, %v2455_v23 }
 0xa44   : > { %2518 = vmatmul.bf16.vlgmr.msra.gmra.mxu2 %v2465_v30 }
 0xa45   : > { %2531 = vmatmul.bf16.vlgmr.msrb.gmra.mxu3 %v2466_v27 }
 0xac7   : > { %v2519_v56 = vpop.f32.mrf.mxu2 }
 0xac8   : > { %v2520_v60 = vadd.f32 %v3002_v8, %v2519_v56  ;;  %v2532_v13 = vpop.f32.mrf.mxu3 }
 0xaca   : > { %v2533_v17 = vadd.f32 %v2532_v13, %v2520_v60 }
 0xacc   : > { %v2536_v9 = vadd.f32 %v2533_v17, %v3872_v50 }
 0xace   : > { %2537 = vst.msk [vmem:[%s4128_s27] sm:$0xff] %vm1271_vm10, %v2536_v9 }
 0xacf   : > { %v2521_v32 = vpop.f32.mrf.mxu2 }
 0xad0   : > { %3080 = shalt.err (!%p3077_p7)
}
 0xad1   : > { %2870 = dma.vmem_to_hbm [thread:$0]  (%p3305_p3), %s2554_s4, 128, %s2556_s5, %s2539_s16   ;;  %v2534_v50 = vpop.f32.mrf.mxu3 }
 0xad2 PF: > { %s4130_s29 = sld [smem:[#allocation7_spill]]  ;;  %p2876_p9 = scmp.ge.s32.totalorder %s3147_s30, 2 }
 0xad4   : > { %p2873_p10 = pnand %p2876_p9, %p3314_p8 }
 0xad6   : > { %p2874_p11 = pneg %p2873_p10 }
 0xad8   : > { %s2567_s19 = sand.u32 1, %s4130_s29  }
 0xad9   : > { %s2568_s27 = scalar_lea.sflag [#allocation5], %s2567_s19 }
 0xada   : > { %3114 = dma.done.wait (%p2874_p11), %s2568_s27, 128  }
 0xadb   : > { %3116 = vsyncadd (%p2874_p11), %s2568_s27, 4294967168  ;;  %s30_s30 = sadd.s32 1, %s3147_s30   ;;  %s4132_s27 = sld [smem:[#allocation8_spill]] }
 0xadc   : > { %p27_p12 = scmp.ge.s32.totalorder %s30_s30, 6   ;;  %s4133_s28 = sld [smem:[#allocation9_spill]] }
 0xadd   : > { %s4134_s29 = sld [smem:[#allocation10_spill]]  ;;  %s4136_s24 = smov %s3123_s25 }
 0xade   : > { %s4135_s0 = sld [smem:[#allocation11_spill]]  ;;  %s4137_s25 = smov %s3127_s26 }
 0xadf   : > { %s4138_s26 = smov %s3323_s1  ;;  %29 = sbr.rel (!%p27_p12) target bundleno = 14 (0xe), region = 128 }
 0xae4   :  { %2574 = vsyncpa [#allocation5], 1 }
 0xae5   :  { %2576 = vsyncpa [#allocation5 + $0x1], 1 }

// kernel: custom_transformer.3
= control target key start
LH: loop header
LB: loop body
LE: loop exit
PB: predicated region body
PF: predicated region fallthrough
CT: control target
= control target key end

     0   :  { %s4075_s0 = inlined_call_operand.vmem [shape: f32[2,16,64], index: 0, kind: input, shape index: {}]   ;;  %s4076_s1 = inlined_call_operand.vmem [shape: f32[1,64], index: 1, kind: input, shape index: {}]   ;;  %s4077_s2 = inlined_call_operand.vmem [shape: f32[1,64], index: 2, kind: input, shape index: {}]   ;;  %s4078_s3 = inlined_call_operand.vmem [shape: bf16[64,64], index: 3, kind: input, shape index: {}]   ;;  %s4079_s4 = inlined_call_operand.vmem [shape: f32[1,64], index: 4, kind: input, shape index: {}]   ;;  %s4080_s5 = inlined_call_operand.vmem [shape: bf16[64,64], index: 5, kind: input, shape index: {}]   ;;  %s4081_s6 = inlined_call_operand.vmem [shape: f32[1,64], index: 6, kind: input, shape index: {}]   ;;  %s4082_s7 = inlined_call_operand.vmem [shape: bf16[64,64], index: 7, kind: input, shape index: {}]   ;;  %s4083_s8 = inlined_call_operand.vmem [shape: f32[1,64], index: 8, kind: input, shape index: {}]   ;;  %s4084_s9 = inlined_call_operand.vmem [shape: bf16[64,64], index: 9, kind: input, shape index: {}]   ;;  %s4085_s10 = inlined_call_operand.vmem [shape: f32[1,64], index: 10, kind: input, shape index: {}]   ;;  %s4086_s11 = inlined_call_operand.vmem [shape: f32[1,64], index: 11, kind: input, shape index: {}]   ;;  %s4087_s12 = inlined_call_operand.vmem [shape: f32[1,64], index: 12, kind: input, shape index: {}]   ;;  %s4088_s13 = inlined_call_operand.vmem [shape: bf16[256,64], index: 13, kind: input, shape index: {}]   ;;  %s4089_s14 = inlined_call_operand.vmem [shape: f32[1,256], index: 14, kind: input, shape index: {}]   ;;  %s4090_s15 = inlined_call_operand.vmem [shape: bf16[64,256], index: 15, kind: input, shape index: {}]   ;;  %s4091_s16 = inlined_call_operand.vmem [shape: f32[1,64], index: 16, kind: input, shape index: {}]   ;;  %s4092_s17 = inlined_call_operand.hbm [shape: f32[2,16,64], index: 17, kind: output, shape index: {}]  }
   0x1   :  { %4101 = sst [smem:[#allocation13_spill]] %s4075_s0 }
   0x2   :  { %4102 = sst [smem:[#allocation14_spill]] %s4076_s1 }
   0x3   :  { %4103 = sst [smem:[#allocation15_spill]] %s4077_s2 }
   0x4   :  { %4104 = sst [smem:[#allocation16_spill]] %s4078_s3 }
   0x5   :  { %4105 = sst [smem:[#allocation17_spill]] %s4079_s4 }
   0x6   :  { %4106 = sst [smem:[#allocation18_spill]] %s4080_s5 }
   0x7   :  { %4107 = sst [smem:[#allocation19_spill]] %s4091_s16 }
   0x8   :  { %4108 = sst [smem:[#allocation20_spill]] %s4092_s17 }
   0x9   :  { %22 = vsyncpa [#allocation5], 0 }
   0xa   :  { %24 = vsyncpa [#allocation5 + $0x1], 0  ;;  %s3254_s24 = smov 0   ;;  %s3256_s25 = smov 0  }
   0xb   :  { %s3258_s26 = smov 0   ;;  %s3260_s27 = smov 0  }
   0xc   :  { %s3262_s28 = smov 0   ;;  %s3264_s29 = smov 0  }
   0xd   :  { %s3266_s0 = smov 0   ;;  %s3268_s30 = smov 0  }
   0xe LB: > { %4109 = sst [smem:[#allocation7_spill]] %s3119_s24  ;;  %s2630_s18 = sadd.s32 4294967295, %s3147_s30   ;;  %s3147_s30 = sphi %s3268_s30, %s30_s30   ;;  %s3143_s0 = sphi %s3266_s0, %s4135_s0   ;;  %s3139_s29 = sphi %s3264_s29, %s4134_s29   ;;  %s3135_s28 = sphi %s3262_s28, %s4133_s28   ;;  %s3131_s27 = sphi %s3260_s27, %s4132_s27   ;;  %s3127_s26 = sphi %s3258_s26, %s4138_s26   ;;  %s3123_s25 = sphi %s3256_s25, %s4137_s25   ;;  %s3119_s24 = sphi %s3254_s24, %s4136_s24  }
   0xf   : > { %4110 = sst [smem:[#allocation8_spill]] %s3139_s29  ;;  %s2631_s19 = sadd.s32 4294967294, %s3147_s30  }
  0x10   : > { %4111 = sst [smem:[#allocation9_spill]] %s3143_s0  ;;  %s39_s1 = sadd.s32 1, %s3139_s29 }
  0x11   : > { %p40_p0 = scmp.ge.s32.totalorder %s39_s1, 2  ;;  %s42_s20 = sadd.s32 1, %s3143_s0 }
  0x12   : > { %p423_p1 = scmp.ne.s32.totalorder %s3127_s26, %s3123_s25  ;;  %p424_p2 = scmp.eq.s32.totalorder %s2630_s18, 3 }
  0x13   : > { %s4140_s1 = smov (%p40_p0, %s39_s1), 0  ;;  %s4142_s20 = smov (!%p40_p0, %s42_s20), %s3143_s0 }
  0x14   : > { %4112 = sst [smem:[#allocation10_spill]] %s4140_s1  ;;  %s409_s21 = ssub.s32 %s3139_s29, %s4140_s1 }
  0x15   : > { %p3305_p3 = por %p424_p2, %p423_p1  ;;  %p44_p4 = scmp.ge.s32.totalorder %s4142_s20, 2 }
  0x16   : > { %p429_p5 = scmp.ne.s32.totalorder %s3123_s25, %s3119_s24  ;;  %p430_p6 = scmp.eq.s32.totalorder %s2631_s19, 3 }
  0x17   : > { %p2634_p7 = scmp.ge.s32.totalorder %s3147_s30, 1  ;;  %s4144_s20 = smov (%p44_p4, %s4142_s20), 0 }
  0x18   : > { %4114 = sst [smem:[#allocation11_spill]] %s4144_s20  ;;  %p3314_p8 = por %p430_p6, %p429_p5 }
  0x19   : > { %p504_p9 = scmp.lt.s32.totalorder %s3147_s30, 5  ;;  %s408_s18 = ssub.s32 %s3143_s0, %s4144_s20 }
  0x1a   : > { %s4115_s23 = scalar_select %p3314_p8, 1, 0 }
  0x1b   : > { %s413_s17 = sadd.s32 1, %s3127_s26  ;;  %s410_s16 = sor.u32 %s409_s21, %s408_s18 }
  0x1c   : > { %4116 = sst [smem:[#allocation12_spill]] %s4115_s23  ;;  %p505_p10 = pnand %p2634_p7, %p504_p9 }
  0x1d   : > { %p411_p11 = scmp.eq.s32.totalorder %s410_s16, 0  ;;  %s4100_s19 = sand.u32 (!%p505_p10), 1, %s3123_s25  }
  0x1e   : > { %508 = sbr.rel (%p505_p10) target bundleno = 2770 (0xad2), region = 88  ;;  %p556_p12 = scmp.lt.s32.totalorder (!%p505_p10), %s3135_s28, 1 }
  0x1f   : > { %s3323_s1 = scalar_select %p411_p11, %s3127_s26, %s413_s17  }
  0x20   : > { %s3329_s29 = sshll.u32 (!%p505_p10), %s4100_s19, 3  ;;  %s4117_s21 = sld [smem:[#allocation13_spill]] (!%p505_p10) }
  0x21   : > { %p2638_p13 = scmp.ne.s32.totalorder (!%p505_p10), %s3131_s27, 0 }
  0x23   : > { %s557_s23 = scalar_select %p556_p12, %s3135_s28, 1 }
  0x24   : > { %565 = sbr.rel (%p2638_p13) target bundleno = 638 (0x27e), region = 92  ;;  %s4118_s5 = sld [smem:[#allocation18_spill]] (!%p2638_p13) }
  0x25   : > { %s2829_s24 = sshll.u32 %s557_s23, 4  ;;  %s4119_s0 = sld [smem:[#allocation14_spill]] (!%p2638_p13) }
  0x26   : > { %s3335_s18 = scalar_lea.vmem %s4117_s21, %s2829_s24  ;;  %s4120_s2 = sld [smem:[#allocation15_spill]] (!%p2638_p13) }
  0x27   : > { %s3150_s21 = smov (!%p2638_p13), 80   ;;  %s3151_s17 = smov (!%p2638_p13), 112  }
  0x28   : > { %s3152_s20 = smov (!%p2638_p13), 96  }
  0x29   : > { %v566_v0 = vld [vmem:[%s3335_s18] sm:$0xff]  ;;  %vm570_vm0 = vcmask 523264   ;;  %v567_v2 = vld [vmem:[%s3335_s18 + $0x8] sm:$0xff]  ;;  %v3149_v4 = vmov 64.0   ;;  %v2837_v22 = vld [vmem:[%s4082_s7 + $0x18] sm:$0xff]  ;;  %vm715_vm8 = vcmask 1047556  }
  0x2a   : > { %v571_v1 = vsel %vm570_vm0, %v566_v0, 0.0  ;;  %v574_v3 = vsel %vm570_vm0, %v567_v2, 0.0  ;;  %2990 = vrcp.f32 %v3149_v4  ;;  %v2833_v21 = vld [vmem:[%s4118_s5 + $0x18] sm:$0xff]  ;;  %v994_v24 = vsel %vm570_vm0, %v2837_v22, 0  ;;  %v2832_v25 = vld [vmem:[%s4118_s5 + $0x10] sm:$0xff]  ;;  %v2831_v29 = vld [vmem:[%s4118_s5 + $0x8] sm:$0xff] }
  0x2b   : > { %572 = vadd.xlane.f32.xlu0 %v571_v1  ;;  %v678_v23 = vsel %vm570_vm0, %v2833_v21, 0  ;;  %1000 = vmatpush.bf16.xpose.msra.mxu1 %v994_v24  ;;  %v2836_v26 = vld [vmem:[%s4082_s7 + $0x10] sm:$0xff]  ;;  %v675_v27 = vsel %vm570_vm0, %v2832_v25, 0  ;;  %v2835_v30 = vld [vmem:[%s4082_s7 + $0x8] sm:$0xff]  ;;  %v672_v31 = vsel %vm570_vm0, %v2831_v29, 0  ;;  %v2830_v33 = vld [vmem:[%s4118_s5] sm:$0xff] }
  0x2c   : > { %684 = vmatpush.bf16.xpose.msra.mxu0 %v678_v23  ;;  %v991_v28 = vsel %vm570_vm0, %v2836_v26, 0  ;;  %v988_v32 = vsel %vm570_vm0, %v2835_v30, 0  ;;  %v2834_v34 = vld [vmem:[%s4082_s7] sm:$0xff]  ;;  %v669_v35 = vsel %vm570_vm0, %v2830_v33, 0  ;;  %vm943_vm9 = vcmask 125952  }
  0x2d   : > { %v985_v36 = vsel %vm570_vm0, %v2834_v34, 0  ;;  %v2986_v56 = vld [vmem:[%s4119_s0] ss:$0 sm:$0xff] }
  0x2e   : > { %v2987_v61 = vld [vmem:[%s4120_s2] ss:$0 sm:$0xff] }
  0x2f   : > { %v2988_v4 = vld [vmem:[%s4081_s6] ss:$0 sm:$0xff] }
  0x30   : > { %v2991_v5 = vpop.eup %2990 }
  0x31   : > { %v578_v6 = vmul.f32 64.0, %v2991_v5  ;;  %vm582_vm1 = vweird.f32 %v2991_v5 }
  0x33   : > { %575 = vadd.xlane.f32.xlu0 %v574_v3  ;;  %v579_v7 = vsub.f32 1.0, %v578_v6  ;;  %1001 = vmatpush.bf16.xpose.msra.mxu1 %v991_v28 }
  0x34   : > { %685 = vmatpush.bf16.xpose.msra.mxu0 %v675_v27 }
  0x35   : > { %v580_v8 = vmul.f32 %v2991_v5, %v579_v7 }
  0x37   : > { %v581_v9 = vadd.f32 %v2991_v5, %v580_v8 }
  0x39   : > { %v583_v10 = vsel %vm582_vm1, %v2991_v5, %v581_v9 }
  0x3b   : > { %1002 = vmatpush.bf16.xpose.msra.mxu1 %v988_v32 }
  0x3c   : > { %686 = vmatpush.bf16.xpose.msra.mxu0 %v672_v31 }
  0x43   : > { %1003 = vmatpush.bf16.xpose.msra.mxu1 %v985_v36 }
  0x44   : > { %687 = vmatpush.bf16.xpose.msra.mxu0 %v669_v35 }
  0x9e   : > { %v573_v11 = vpop.xlane.xlu0 %572 }
  0x9f   : > { %v584_v12 = vmul.f32 %v583_v10, %v573_v11 }
  0xa1   : > { %v586_v13 = vsub.f32 %v566_v0, %v584_v12 }
  0xa3   : > { %v588_v14 = vmul.f32 %v586_v13, %v586_v13 }
  0xa5   : > { %v590_v15 = vsel %vm570_vm0, %v588_v14, 0.0 }
  0xa6   : > { %591 = vadd.xlane.f32.xlu1 %v590_v15  ;;  %v576_v16 = vpop.xlane.xlu0 %575 }
  0xa7   : > { %v585_v17 = vmul.f32 %v583_v10, %v576_v16 }
  0xa9   : > { %v587_v18 = vsub.f32 %v567_v2, %v585_v17 }
  0xab   : > { %v589_v19 = vmul.f32 %v587_v18, %v587_v18 }
  0xad   : > { %v593_v20 = vsel %vm570_vm0, %v589_v19, 0.0 }
  0xae   : > { %594 = vadd.xlane.f32.xlu1 %v593_v20  ;;  %v3153_v20 = vmov 1983009808  }
  0xaf   : > { %v720_v21 = vunpack.c.l.s4 %v3153_v20 }
  0xb1   : > { %v3391_v28 = vunpack.c.0.s8 %v720_v21 }
 0x119   : > { %v592_v37 = vpop.xlane.xlu1 %591 }
 0x11a   : > { %v596_v38 = vmul.f32 %v592_v37, %v583_v10 }
 0x11c   : > { %v598_v39 = vadd.f32 1e-05, %v596_v38 }
 0x11e   : > { %2992 = vrsqrt.f32 %v598_v39  ;;  %vm606_vm3 = vweird.f32 %v598_v39 }
 0x121   : > { %v595_v40 = vpop.xlane.xlu1 %594 }
 0x122   : > { %v597_v41 = vmul.f32 %v595_v40, %v583_v10  ;;  %v2989_v10 = vld [vmem:[%s4083_s8] ss:$0 sm:$0xff]  ;;  %v3154_v40 = vmov 1934713408  }
 0x124   : > { %v2993_v42 = vpop.eup %2992  ;;  %v599_v43 = vadd.f32 1e-05, %v597_v41  ;;  %v744_v41 = vunpack.c.l.s4 %v3154_v40 }
 0x125   : > { %v601_v44 = vmul.f32 %v2993_v42, %v598_v39  ;;  %vm607_vm2 = vweird.f32 %v2993_v42 }
 0x126   : > { %2994 = vrsqrt.f32 %v599_v43  ;;  %vm608_vm4 = vmor %vm606_vm3, %vm607_vm2  ;;  %vm616_vm6 = vweird.f32 %v599_v43 }
 0x127   : > { %v602_v45 = vmul.f32 %v2993_v42, %v601_v44 }
 0x129   : > { %v603_v46 = vmul.f32 0.5, %v602_v45 }
 0x12b   : > { %v604_v47 = vsub.f32 1.5, %v603_v46 }
 0x12c   : > { %v2995_v48 = vpop.eup %2994 }
 0x12d   : > { %v605_v49 = vmul.f32 %v2993_v42, %v604_v47  ;;  %v611_v50 = vmul.f32 %v2995_v48, %v599_v43  ;;  %vm617_vm5 = vweird.f32 %v2995_v48 }
 0x12e   : > { %vm618_vm7 = vmor %vm616_vm6, %vm617_vm5 }
 0x12f   : > { %v612_v51 = vmul.f32 %v2995_v48, %v611_v50  ;;  %v609_v52 = vsel %vm608_vm4, %v2993_v42, %v605_v49 }
 0x130   : > { %v620_v55 = vmul.f32 %v609_v52, %v586_v13  ;;  %v3419_v52 = vunpack.c.0.s8 %v744_v41 }
 0x131   : > { %v613_v53 = vmul.f32 0.5, %v612_v51 }
 0x132   : > { %v625_v60 = vmul.f32 %v2986_v56, %v620_v55 }
 0x133   : > { %v614_v54 = vsub.f32 1.5, %v613_v53 }
 0x134   : > { %v630_v63 = vadd.f32 %v2987_v61, %v625_v60 }
 0x135   : > { %v615_v57 = vmul.f32 %v2995_v48, %v614_v54 }
 0x137   : > { %v619_v58 = vsel %vm618_vm7, %v2995_v48, %v615_v57 }
 0x138   : > { %v621_v59 = vmul.f32 %v619_v58, %v587_v18 }
 0x13a   : > { %v626_v62 = vmul.f32 %v2986_v56, %v621_v59 }
 0x13c   : > { %v631_v0 = vadd.f32 %v2987_v61, %v626_v62 }
 0x13e   : > { %v641_v1 = vpack.c.bf16 %v631_v0, %v630_v63 }
 0x140   : > { %2655 = vmatmul.msk.bf16.vlgmr.msra.gmra.mxu0 %vm570_vm0, %v641_v1  ;;  %2672 = vmatmul.msk.bf16.vlgmr.msra.gmra.mxu1 %vm570_vm0, %v641_v1 }
 0x1bd   : > { %v689_v2 = vpop.f32.mrf.mxu0  ;;  %v1005_v3 = vpop.f32.mrf.mxu1 }
 0x1be   : > { %v690_v6 = vadd.f32 %v2988_v4, %v689_v2  ;;  %v1006_v12 = vadd.f32 %v2989_v10, %v1005_v3 }
 0x1c0   : > { %v717_v27 = vrot.slane %v690_v6, 4  ;;  %v1032_v29 = vrot.slane %v1006_v12, 4 }
 0x1c5   : > { %v691_v5 = vpop.f32.mrf.mxu0  ;;  %v1007_v9 = vpop.f32.mrf.mxu1 }
 0x1c6   : > { %v692_v7 = vadd.f32 %v2988_v4, %v691_v5  ;;  %v1008_v11 = vadd.f32 %v2989_v10, %v1007_v9 }
 0x1c8   : > { %v2971_v8 = vpack.i.bf16 %v692_v7, %v690_v6  ;;  %v2961_v13 = vpack.i.bf16 %v1008_v11, %v1006_v12  ;;  %v773_v26 = vrot.slane %v692_v7, 4  ;;  %v1088_v30 = vrot.slane %v1008_v11, 4 }
 0x1ca   : > { %2972 = vrot.lane.b32.xlu1 %v2971_v8, %s3150_s21  ;;  %2967 = vrot.lane.b32.xlu0 %v2971_v8, %s3151_s17 }
 0x1cb   : > { %2957 = vrot.lane.b32.xlu2 %v2971_v8, %s3152_s20 }
 0x1d3   : > { %2962 = vrot.lane.b32.xlu2 %v2961_v13, %s3152_s20 }
 0x1db   : > { %2977 = vrot.lane.b32.xlu2 %v2961_v13, %s3151_s17 }
 0x1e3   : > { %2982 = vrot.lane.b32.xlu2 %v2961_v13, %s3150_s21 }
 0x225   : > { %v2958_v14 = vpop.permute.xlu2 %2957 }
 0x226   : > { %v2960_v15 = vunpack.i.h.bf16 %v2958_v14  ;;  %v2959_v16 = vunpack.i.l.bf16 %v2958_v14 }
 0x228   : > { %v771_v22 = vrot.slane %v2960_v15, 4  ;;  %v714_v23 = vrot.slane %v2959_v16, 4  ;;  %v774_v32 = vsel %vm715_vm8, %v2960_v15, %v773_v26  ;;  %v718_v34 = vsel %vm715_vm8, %v2959_v16, %v717_v27 }
 0x229   : > { %v3403_v43 = vperm.slane %v774_v32, %v3391_v28  ;;  %v726_v45 = vperm.slane %v718_v34, %v3391_v28 }
 0x22a   : > { %v772_v31 = vsel %vm715_vm8, %v771_v22, %v692_v7  ;;  %v716_v33 = vsel %vm715_vm8, %v714_v23, %v690_v6 }
 0x22b   : > { %v778_v42 = vperm.slane %v772_v31, %v3391_v28  ;;  %v722_v44 = vperm.slane %v716_v33, %v3391_v28  ;;  %v809_v54 = vrot.slane %v3403_v43, 4  ;;  %v753_v56 = vrot.slane %v726_v45, 4 }
 0x22d   : > { %v2963_v17 = vpop.permute.xlu2 %2962  ;;  %v797_v53 = vrot.slane %v778_v42, 4  ;;  %v741_v55 = vrot.slane %v722_v44, 4 }
 0x22e   : > { %v2965_v18 = vunpack.i.h.bf16 %v2963_v17  ;;  %v2964_v19 = vunpack.i.l.bf16 %v2963_v17 }
 0x230   : > { %v1086_v24 = vrot.slane %v2965_v18, 4  ;;  %v1030_v25 = vrot.slane %v2964_v19, 4  ;;  %v1089_v36 = vsel %vm715_vm8, %v2965_v18, %v1088_v30  ;;  %v1033_v38 = vsel %vm715_vm8, %v2964_v19, %v1032_v29 }
 0x231   : > { %v3411_v47 = vperm.slane %v1089_v36, %v3391_v28  ;;  %v3417_v49 = vperm.slane %v1033_v38, %v3391_v28 }
 0x232   : > { %v1087_v35 = vsel %vm715_vm8, %v1086_v24, %v1008_v11  ;;  %v1031_v37 = vsel %vm715_vm8, %v1030_v25, %v1006_v12 }
 0x233   : > { %v3408_v46 = vperm.slane %v1087_v35, %v3391_v28  ;;  %v3414_v48 = vperm.slane %v1031_v37, %v3391_v28  ;;  %v1124_v58 = vrot.slane %v3411_v47, 4  ;;  %v1068_v60 = vrot.slane %v3417_v49, 4 }
 0x235   : > { %v2978_v39 = vpop.permute.xlu2 %2977  ;;  %v1112_v57 = vrot.slane %v3408_v46, 4  ;;  %v1056_v59 = vrot.slane %v3414_v48, 4 }
 0x236   : > { %v2980_v50 = vunpack.i.h.bf16 %v2978_v39  ;;  %v2979_v51 = vunpack.i.l.bf16 %v2978_v39 }
 0x238   : > { %v1100_v4 = vrot.slane %v2980_v50, 4  ;;  %v1044_v5 = vrot.slane %v2979_v51, 4 }
 0x23c   : > { %v2973_v61 = vpop.permute.xlu1 %2972  ;;  %v2968_v62 = vpop.permute.xlu0 %2967 }
 0x23d   : > { %v2975_v63 = vunpack.i.h.bf16 %v2973_v61  ;;  %v2974_v0 = vunpack.i.l.bf16 %v2973_v61  ;;  %v2970_v1 = vunpack.i.h.bf16 %v2968_v62  ;;  %v2969_v2 = vunpack.i.l.bf16 %v2968_v62  ;;  %v2983_v3 = vpop.permute.xlu2 %2982 }
 0x23e   : > { %v2985_v6 = vunpack.i.h.bf16 %v2983_v3  ;;  %v2984_v7 = vunpack.i.l.bf16 %v2983_v3 }
 0x23f   : > { %v783_v8 = vrot.slane %v2975_v63, 4  ;;  %v727_v9 = vrot.slane %v2974_v0, 4  ;;  %v785_v10 = vrot.slane %v2970_v1, 4  ;;  %v729_v11 = vrot.slane %v2969_v2, 4 }
 0x240   : > { %v1098_v12 = vrot.slane %v2985_v6, 4  ;;  %v1042_v13 = vrot.slane %v2984_v7, 4  ;;  %v1045_v14 = vsel %vm715_vm8, %v2984_v7, %v1044_v5  ;;  %v1101_v15 = vsel %vm715_vm8, %v2985_v6, %v1100_v4 }
 0x241   : > { %v784_v16 = vsel %vm715_vm8, %v783_v8, %v2970_v1  ;;  %v786_v17 = vsel %vm715_vm8, %v2975_v63, %v785_v10  ;;  %v728_v18 = vsel %vm715_vm8, %v727_v9, %v2969_v2  ;;  %v730_v19 = vsel %vm715_vm8, %v2974_v0, %v729_v11 }
 0x242   : > { %v790_v20 = vperm.slane %v784_v16, %v3391_v28  ;;  %v794_v21 = vperm.slane %v786_v17, %v3391_v28  ;;  %v734_v22 = vperm.slane %v728_v18, %v3391_v28  ;;  %v738_v23 = vperm.slane %v730_v19, %v3391_v28 }
 0x243   : > { %v3437_v24 = vsel %vm715_vm8, %v1042_v13, %v2979_v51  ;;  %v3440_v25 = vperm.slane %v1045_v14, %v3391_v28  ;;  %v3443_v26 = vsel %vm715_vm8, %v1098_v12, %v2980_v50  ;;  %v3446_v27 = vperm.slane %v1101_v15, %v3391_v28 }
 0x244   : > { %v795_v29 = vrot.slane %v790_v20, 4  ;;  %v807_v30 = vrot.slane %v794_v21, 4  ;;  %v739_v31 = vrot.slane %v734_v22, 4  ;;  %v742_v32 = vsel %vm715_vm8, %v734_v22, %v741_v55 }
 0x245   : > { %v750_v33 = vperm.slane %v742_v32, %v3419_v52  ;;  %v751_v34 = vrot.slane %v738_v23, 4  ;;  %v754_v35 = vsel %vm715_vm8, %v738_v23, %v753_v56  ;;  %v798_v36 = vsel %vm715_vm8, %v790_v20, %v797_v53 }
 0x246   : > { %v740_v37 = vsel %vm715_vm8, %v739_v31, %v722_v44  ;;  %v762_v38 = vperm.slane %v754_v35, %v3419_v52  ;;  %v796_v39 = vsel %vm715_vm8, %v795_v29, %v778_v42  ;;  %v806_v40 = vperm.slane %v798_v36, %v3419_v52 }
 0x247   : > { %v746_v41 = vperm.slane %v740_v37, %v3419_v52  ;;  %v752_v50 = vsel %vm715_vm8, %v751_v34, %v726_v45  ;;  %v765_v51 = vrot.slane %v750_v33, 4  ;;  %v802_v55 = vperm.slane %v796_v39, %v3419_v52 }
 0x248   : > { %v758_v61 = vperm.slane %v752_v50, %v3419_v52  ;;  %v769_v56 = vrot.slane %v762_v38, 4  ;;  %v808_v53 = vsel %vm715_vm8, %v807_v30, %v3403_v43  ;;  %v810_v44 = vsel %vm715_vm8, %v794_v21, %v809_v54 }
 0x249   : > { %v763_v62 = vrot.slane %v746_v41, 4  ;;  %v766_v42 = vsel %vm715_vm8, 0.0, %v765_v51  ;;  %v814_v63 = vperm.slane %v808_v53, %v3419_v52  ;;  %v818_v0 = vperm.slane %v810_v44, %v3419_v52 }
 0x24a   : > { %v767_v1 = vrot.slane %v758_v61, 4  ;;  %v770_v45 = vsel %vm715_vm8, 0.0, %v769_v56  ;;  %v819_v2 = vrot.slane %v802_v55, 4  ;;  %v821_v3 = vrot.slane %v806_v40, 4 }
 0x24b   : > { %v764_v4 = vsel %vm715_vm8, 0.0, %v763_v62  ;;  %v823_v5 = vrot.slane %v814_v63, 4  ;;  %v825_v6 = vrot.slane %v818_v0, 4  ;;  %v827_v43 = vsel %vm715_vm8, %v765_v51, %v746_v41 }
 0x24c   : > { %v768_v54 = vsel %vm715_vm8, 0.0, %v767_v1  ;;  %v820_v7 = vsel %vm715_vm8, 0.0, %v819_v2  ;;  %v822_v8 = vsel %vm715_vm8, 0.0, %v821_v3  ;;  %v831_v9 = vperm.slane %v827_v43, %v3391_v28 }
 0x24d   : > { %v824_v10 = vsel %vm715_vm8, 0.0, %v823_v5  ;;  %v826_v11 = vsel %vm715_vm8, 0.0, %v825_v6  ;;  %v832_v12 = vrot.slane %v766_v42, 4  ;;  %v838_v13 = vsel %vm715_vm8, %v769_v56, %v758_v61 }
 0x24e   : > { %v842_v14 = vperm.slane %v838_v13, %v3391_v28  ;;  %v843_v15 = vrot.slane %v770_v45, 4  ;;  %v851_v16 = vrot.slane %v831_v9, 4  ;;  %v881_v17 = vsel %vm715_vm8, %v821_v3, %v802_v55 }
 0x24f   : > { %v833_v18 = vsel %vm715_vm8, %v832_v12, %v764_v4  ;;  %v885_v19 = vperm.slane %v881_v17, %v3391_v28  ;;  %v886_v20 = vrot.slane %v822_v8, 4  ;;  %v892_v21 = vsel %vm715_vm8, %v825_v6, %v814_v63 }
 0x250   : > { %v837_v22 = vperm.slane %v833_v18, %v3391_v28  ;;  %v844_v23 = vsel %vm715_vm8, %v843_v15, %v768_v54  ;;  %v863_v29 = vrot.slane %v842_v14, 4  ;;  %v896_v30 = vperm.slane %v892_v21, %v3391_v28 }
 0x251   : > { %v848_v31 = vperm.slane %v844_v23, %v3391_v28  ;;  %v887_v32 = vsel %vm715_vm8, %v886_v20, %v820_v7  ;;  %v897_v33 = vrot.slane %v826_v11, 4  ;;  %v905_v34 = vrot.slane %v885_v19, 4 }
 0x252   : > { %v849_v35 = vrot.slane %v837_v22, 4  ;;  %v852_v36 = vsel %vm715_vm8, %v837_v22, %v851_v16  ;;  %v891_v37 = vperm.slane %v887_v32, %v3391_v28  ;;  %v917_v38 = vrot.slane %v896_v30, 4 }
 0x253   : > { %v860_v39 = vperm.slane %v852_v36, %v3419_v52  ;;  %v861_v40 = vrot.slane %v848_v31, 4  ;;  %v864_v41 = vsel %vm715_vm8, %v848_v31, %v863_v29  ;;  %v898_v50 = vsel %vm715_vm8, %v897_v33, %v824_v10 }
 0x254   : > { %v850_v51 = vsel %vm715_vm8, %v849_v35, %v831_v9  ;;  %v872_v55 = vperm.slane %v864_v41, %v3419_v52  ;;  %v902_v61 = vperm.slane %v898_v50, %v3391_v28  ;;  %v903_v56 = vrot.slane %v891_v37, 4 }
 0x255   : > { %v856_v53 = vperm.slane %v850_v51, %v3419_v52  ;;  %v862_v44 = vsel %vm715_vm8, %v861_v40, %v842_v14  ;;  %v879_v62 = vrot.slane %v860_v39, 4  ;;  %v906_v42 = vsel %vm715_vm8, %v891_v37, %v905_v34 }
 0x256   : > { %v868_v63 = vperm.slane %v862_v44, %v3419_v52  ;;  %v877_v0 = vrot.slane %v872_v55, 4  ;;  %v904_v1 = vsel %vm715_vm8, %v903_v56, %v885_v19  ;;  %v914_v45 = vperm.slane %v906_v42, %v3419_v52 }
 0x257   : > { %v875_v2 = vrot.slane %v856_v53, 4  ;;  %v880_v3 = vsel %vm715_vm8, %v872_v55, %v879_v62  ;;  %v910_v4 = vperm.slane %v904_v1, %v3419_v52  ;;  %v915_v5 = vrot.slane %v902_v61, 4 }
 0x258   : > { %v873_v6 = vrot.slane %v868_v63, 4  ;;  %v878_v43 = vsel %vm715_vm8, %v877_v0, %v860_v39  ;;  %v918_v54 = vsel %vm715_vm8, %v902_v61, %v917_v38  ;;  %v933_v7 = vrot.slane %v914_v45, 4 }
 0x259   : > { %v876_v8 = vsel %vm715_vm8, %v868_v63, %v875_v2  ;;  %v916_v9 = vsel %vm715_vm8, %v915_v5, %v896_v30  ;;  %v926_v10 = vperm.slane %v918_v54, %v3419_v52  ;;  %v929_v11 = vrot.slane %v910_v4, 4 }
 0x25a   : > { %v874_v12 = vsel %vm715_vm8, %v873_v6, %v856_v53  ;;  %v922_v13 = vperm.slane %v916_v9, %v3419_v52  ;;  %v937_v14 = vpack.c.bf16 %v876_v8, %v876_v8  ;;  %v939_v15 = vpack.c.bf16 %v878_v43, %v878_v43 }
 0x25b   : > { %v931_v16 = vrot.slane %v926_v10, 4  ;;  %v934_v17 = vsel %vm715_vm8, %v926_v10, %v933_v7  ;;  %v935_v18 = vpack.c.bf16 %v874_v12, %v874_v12  ;;  %v941_v19 = vpack.c.bf16 %v880_v3, %v880_v3 }
 0x25c   : > { %v927_v20 = vrot.slane %v922_v13, 4  ;;  %v930_v21 = vsel %vm715_vm8, %v922_v13, %v929_v11  ;;  %v942_v22 = vpack.c.bf16 %v934_v17, %v934_v17  ;;  %946 = vst.msk [vmem:[#allocation2 + $0x8] sm:$0xf] %vm943_vm9, %v937_v14  ;;  %v1049_v23 = vperm.slane %v3437_v24, %v3391_v28 }
 0x25d   : > { %v932_v29 = vsel %vm715_vm8, %v931_v16, %v914_v45  ;;  %v938_v30 = vpack.c.bf16 %v930_v21, %v930_v21  ;;  %944 = vst.msk [vmem:[#allocation2] sm:$0xf] %vm943_vm9, %v935_v18  ;;  %v1066_v31 = vrot.slane %v3440_v25, 4  ;;  %v1069_v32 = vsel %vm715_vm8, %v3440_v25, %v1068_v60 }
 0x25e   : > { %v928_v33 = vsel %vm715_vm8, %v927_v20, %v910_v4  ;;  %v940_v34 = vpack.c.bf16 %v932_v29, %v932_v29  ;;  %948 = vst.msk [vmem:[#allocation2 + $0x10] sm:$0xf] %vm943_vm9, %v939_v15  ;;  %v1054_v35 = vrot.slane %v1049_v23, 4  ;;  %v1057_v24 = vsel %vm715_vm8, %v1049_v23, %v1056_v59 }
 0x25f   : > { %v936_v36 = vpack.c.bf16 %v928_v33, %v928_v33  ;;  %947 = vst.msk [vmem:[#allocation2 + $0xc] sm:$0xf] %vm943_vm9, %v938_v30  ;;  %v1065_v37 = vperm.slane %v1057_v24, %v3419_v52  ;;  %v1067_v38 = vsel %vm715_vm8, %v1066_v31, %v3417_v49  ;;  %v1077_v60 = vperm.slane %v1069_v32, %v3419_v52 }
 0x260   : > { %949 = vst.msk [vmem:[#allocation2 + $0x14] sm:$0xf] %vm943_vm9, %v940_v34  ;;  %v1055_v25 = vsel %vm715_vm8, %v1054_v35, %v3414_v48  ;;  %v1073_v39 = vperm.slane %v1067_v38, %v3419_v52  ;;  %v1105_v59 = vperm.slane %v3443_v26, %v3391_v28  ;;  %v1122_v40 = vrot.slane %v3446_v27, 4 }
 0x261   : > { %945 = vst.msk [vmem:[#allocation2 + $0x4] sm:$0xf] %vm943_vm9, %v936_v36  ;;  %v1061_v41 = vperm.slane %v1055_v25, %v3419_v52  ;;  %v1080_v50 = vrot.slane %v1065_v37, 4  ;;  %v1084_v49 = vrot.slane %v1077_v60, 4  ;;  %v1125_v51 = vsel %vm715_vm8, %v3446_v27, %v1124_v58 }
 0x262   : > { %950 = vst.msk [vmem:[#allocation2 + $0x18] sm:$0xf] %vm943_vm9, %v941_v19  ;;  %v1082_v48 = vrot.slane %v1073_v39, 4  ;;  %v1110_v55 = vrot.slane %v1105_v59, 4  ;;  %v1113_v26 = vsel %vm715_vm8, %v1105_v59, %v1112_v57  ;;  %v1123_v61 = vsel %vm715_vm8, %v1122_v40, %v3411_v47 }
 0x263   : > { %951 = vst.msk [vmem:[#allocation2 + $0x1c] sm:$0xf] %vm943_vm9, %v942_v22  ;;  %v1078_v56 = vrot.slane %v1061_v41, 4  ;;  %v1081_v53 = vsel %vm715_vm8, 0.0, %v1080_v50  ;;  %v1085_v44 = vsel %vm715_vm8, 0.0, %v1084_v49  ;;  %v1121_v58 = vperm.slane %v1113_v26, %v3419_v52 }
 0x264   : > { %v1083_v27 = vsel %vm715_vm8, 0.0, %v1082_v48  ;;  %v1111_v62 = vsel %vm715_vm8, %v1110_v55, %v3408_v46  ;;  %v1129_v42 = vperm.slane %v1123_v61, %v3419_v52  ;;  %v1133_v57 = vperm.slane %v1125_v51, %v3419_v52 }
 0x265   : > { %v1079_v47 = vsel %vm715_vm8, 0.0, %v1078_v56  ;;  %v1117_v63 = vperm.slane %v1111_v62, %v3419_v52  ;;  %v1136_v0 = vrot.slane %v1121_v58, 4  ;;  %v1142_v1 = vsel %vm715_vm8, %v1080_v50, %v1061_v41 }
 0x266   : > { %v1138_v45 = vrot.slane %v1129_v42, 4  ;;  %v1140_v2 = vrot.slane %v1133_v57, 4  ;;  %v1146_v3 = vperm.slane %v1142_v1, %v3391_v28  ;;  %v1147_v4 = vrot.slane %v1081_v53, 4 }
 0x267   : > { %v1134_v5 = vrot.slane %v1117_v63, 4  ;;  %v1137_v6 = vsel %vm715_vm8, 0.0, %v1136_v0  ;;  %v1153_v46 = vsel %vm715_vm8, %v1084_v49, %v1073_v39  ;;  %v1158_v43 = vrot.slane %v1085_v44, 4 }
 0x268   : > { %v1139_v54 = vsel %vm715_vm8, 0.0, %v1138_v45  ;;  %v1141_v7 = vsel %vm715_vm8, 0.0, %v1140_v2  ;;  %v1148_v8 = vsel %vm715_vm8, %v1147_v4, %v1079_v47  ;;  %v1157_v9 = vperm.slane %v1153_v46, %v3391_v28 }
 0x269   : > { %v1135_v10 = vsel %vm715_vm8, 0.0, %v1134_v5  ;;  %v1152_v11 = vperm.slane %v1148_v8, %v3391_v28  ;;  %v1159_v12 = vsel %vm715_vm8, %v1158_v43, %v1083_v27  ;;  %v1166_v13 = vrot.slane %v1146_v3, 4 }
 0x26a   : > { %v1163_v14 = vperm.slane %v1159_v12, %v3391_v28  ;;  %v1178_v15 = vrot.slane %v1157_v9, 4  ;;  %v1196_v16 = vsel %vm715_vm8, %v1136_v0, %v1117_v63  ;;  %v1201_v17 = vrot.slane %v1137_v6, 4 }
 0x26b   : > { %v1164_v18 = vrot.slane %v1152_v11, 4  ;;  %v1167_v19 = vsel %vm715_vm8, %v1152_v11, %v1166_v13  ;;  %v1200_v20 = vperm.slane %v1196_v16, %v3391_v28  ;;  %v1207_v21 = vsel %vm715_vm8, %v1140_v2, %v1129_v42 }
 0x26c   : > { %v1175_v22 = vperm.slane %v1167_v19, %v3419_v52  ;;  %v1176_v23 = vrot.slane %v1163_v14, 4  ;;  %v1179_v29 = vsel %vm715_vm8, %v1163_v14, %v1178_v15  ;;  %v1202_v30 = vsel %vm715_vm8, %v1201_v17, %v1135_v10 }
 0x26d   : > { %v1165_v31 = vsel %vm715_vm8, %v1164_v18, %v1146_v3  ;;  %v1187_v32 = vperm.slane %v1179_v29, %v3419_v52  ;;  %v1206_v33 = vperm.slane %v1202_v30, %v3391_v28  ;;  %v1211_v34 = vperm.slane %v1207_v21, %v3391_v28 }
 0x26e   : > { %v1171_v35 = vperm.slane %v1165_v31, %v3419_v52  ;;  %v1177_v24 = vsel %vm715_vm8, %v1176_v23, %v1157_v9  ;;  %v1194_v36 = vrot.slane %v1175_v22, 4  ;;  %v1212_v37 = vrot.slane %v1141_v7, 4 }
 0x26f   : > { %v1183_v38 = vperm.slane %v1177_v24, %v3419_v52  ;;  %v1192_v60 = vrot.slane %v1187_v32, 4  ;;  %v1218_v25 = vrot.slane %v1206_v33, 4  ;;  %v1220_v39 = vrot.slane %v1200_v20, 4 }
 0x270   : > { %v1190_v59 = vrot.slane %v1171_v35, 4  ;;  %v1195_v40 = vsel %vm715_vm8, %v1187_v32, %v1194_v36  ;;  %v1213_v41 = vsel %vm715_vm8, %v1212_v37, %v1139_v54  ;;  %v1232_v50 = vrot.slane %v1211_v34, 4 }
 0x271   : > { %v1188_v49 = vrot.slane %v1183_v38, 4  ;;  %v1193_v51 = vsel %vm715_vm8, %v1192_v60, %v1175_v22  ;;  %v1217_v48 = vperm.slane %v1213_v41, %v3391_v28  ;;  %v1219_v55 = vsel %vm715_vm8, %v1218_v25, %v1200_v20 }
 0x272   : > { %v1191_v26 = vsel %vm715_vm8, %v1183_v38, %v1190_v59  ;;  %v1221_v61 = vsel %vm715_vm8, %v1206_v33, %v1220_v39  ;;  %v1225_v56 = vperm.slane %v1219_v55, %v3419_v52  ;;  %v1254_v53 = vpack.c.bf16 %v1193_v51, %v1193_v51 }
 0x273   : > { %v1189_v44 = vsel %vm715_vm8, %v1188_v49, %v1171_v35  ;;  %v1229_v58 = vperm.slane %v1221_v61, %v3419_v52  ;;  %v1230_v27 = vrot.slane %v1217_v48, 4  ;;  %v1233_v62 = vsel %vm715_vm8, %v1217_v48, %v1232_v50 }
 0x274   : > { %v1241_v42 = vperm.slane %v1233_v62, %v3419_v52  ;;  %v1244_v57 = vrot.slane %v1225_v56, 4  ;;  %v1250_v28 = vpack.c.bf16 %v1189_v44, %v1189_v44  ;;  %v1252_v47 = vpack.c.bf16 %v1191_v26, %v1191_v26  ;;  %1262 = vst.msk [vmem:[#allocation3 + $0x10] sm:$0xf] %vm943_vm9, %v1254_v53 }
 0x275   : > { %v1231_v63 = vsel %vm715_vm8, %v1230_v27, %v1211_v34  ;;  %v1248_v0 = vrot.slane %v1229_v58, 4  ;;  %v1256_v1 = vpack.c.bf16 %v1195_v40, %v1195_v40 }
 0x276   : > { %v1237_v45 = vperm.slane %v1231_v63, %v3419_v52  ;;  %v1246_v2 = vrot.slane %v1241_v42, 4  ;;  %1258 = vst.msk [vmem:[#allocation3] sm:$0xf] %vm943_vm9, %v1250_v28 }
 0x277   : > { %v1249_v3 = vsel %vm715_vm8, %v1241_v42, %v1248_v0  ;;  %1260 = vst.msk [vmem:[#allocation3 + $0x8] sm:$0xf] %vm943_vm9, %v1252_v47 }
 0x278   : > { %v1242_v4 = vrot.slane %v1237_v45, 4  ;;  %v1245_v5 = vsel %vm715_vm8, %v1237_v45, %v1244_v57  ;;  %v1247_v6 = vsel %vm715_vm8, %v1246_v2, %v1229_v58  ;;  %v1257_v46 = vpack.c.bf16 %v1249_v3, %v1249_v3  ;;  %1264 = vst.msk [vmem:[#allocation3 + $0x18] sm:$0xf] %vm943_vm9, %v1256_v1 }
 0x279   : > { %v1253_v43 = vpack.c.bf16 %v1245_v5, %v1245_v5  ;;  %v1255_v54 = vpack.c.bf16 %v1247_v6, %v1247_v6 }
 0x27a   : > { %v1243_v7 = vsel %vm715_vm8, %v1242_v4, %v1225_v56  ;;  %1265 = vst.msk [vmem:[#allocation3 + $0x1c] sm:$0xf] %vm943_vm9, %v1257_v46 }
 0x27b   : > { %v1251_v52 = vpack.c.bf16 %v1243_v7, %v1243_v7  ;;  %1261 = vst.msk [vmem:[#allocation3 + $0xc] sm:$0xf] %vm943_vm9, %v1253_v43 }
 0x27c   : > { %1263 = vst.msk [vmem:[#allocation3 + $0x14] sm:$0xf] %vm943_vm9, %v1255_v54 }
 0x27d   : > { %1259 = vst.msk [vmem:[#allocation3 + $0x4] sm:$0xf] %vm943_vm9, %v1251_v52 }
 0x27e PF: > { %s2673_s19 = sshll.u32 %s3131_s27, 3  ;;  %vm1271_vm10 = vcmask 523264   ;;  %v3155_v10 = vmov 64.0   ;;  %s4121_s3 = sld [smem:[#allocation16_spill]]  ;;  %v1498_v58 = vld [vmem:[#allocation2 + $0x10] sm:$0xf] }
 0x27f   : > { %s1267_s16 = scalar_lea.vmem %s3335_s18, %s2673_s19  ;;  %3003 = vrcp.f32 %v3155_v10  ;;  %s4122_s21 = sld [smem:[#allocation14_spill]]  ;;  %vm1504_vm15 = vcmask 130048   ;;  %v1496_v27 = vld [vmem:[#allocation2] sm:$0xf]  ;;  %v1499_v57 = vld [vmem:[#allocation2 + $0x18] sm:$0xf] }
 0x280   : > { %v3615_v8 = vld [vmem:[%s1267_s16] sm:$0xff]  ;;  %s4123_s2 = sld [smem:[#allocation15_spill]]  ;;  %s3156_s20 = smov 80   ;;  %v1547_v62 = vsel %vm1504_vm15, %v1498_v58, 0  ;;  %v1509_v42 = vsel %vm1504_vm15, %v1496_v27, 0  ;;  %v1566_v47 = vsel %vm1504_vm15, %v1499_v57, 0 }
 0x281   : > { %v1272_v9 = vsel %vm1271_vm10, %v3615_v8, 0.0  ;;  %s4124_s4 = sld [smem:[#allocation17_spill]]  ;;  %s3157_s19 = smov 112   ;;  %v1724_v28 = vld [vmem:[#allocation2 + $0xc] sm:$0xf]  ;;  %1556 = vmatpush.bf16.xpose.msra.mxu3 %v1547_v62  ;;  %1518 = vmatpush.bf16.xpose.msra.mxu2 %v1509_v42  ;;  %vm1382_vm0 = vcmask 1047556  }
 0x282   : > { %1273 = vadd.xlane.f32.xlu0 %v1272_v9  ;;  %s3158_s16 = smov 96   ;;  %v1748_v63 = vsel %vm1504_vm15, %v1724_v28, 0  ;;  %1575 = vmatpush.bf16.xpose.msra.mxu1 %v1566_v47  ;;  %v3159_v1 = vmov 1983009808   ;;  %v1497_v6 = vld [vmem:[#allocation2 + $0x8] sm:$0xf] }
 0x283   : > { %v1387_v45 = vunpack.c.l.s4 %v3159_v1  ;;  %v1528_v43 = vsel %vm1504_vm15, %v1497_v6, 0  ;;  %v3160_v7 = vmov 1934713408   ;;  %vm1581_vm1 = vcmask 64512   ;;  %s3161_s23 = smov 48   ;;  %s3163_s18 = smov 16  }
 0x284   : > { %v2841_v11 = vld [vmem:[%s4121_s3 + $0x18] sm:$0xff]  ;;  %v2840_v29 = vld [vmem:[%s4121_s3 + $0x10] sm:$0xff]  ;;  %v2839_v31 = vld [vmem:[%s4121_s3 + $0x8] sm:$0xff]  ;;  %v1411_v52 = vunpack.c.l.s4 %v3160_v7  ;;  %vm1645_vm2 = vcmask 1043456   ;;  %vm2074_vm3 = vcmask 261120   ;;  %vm2076_vm4 = vcmask 392192  }
 0x285   : > { %v1355_v12 = vsel %vm1271_vm10, %v2841_v11, 0  ;;  %v3004_v13 = vpop.eup %3003  ;;  %v1352_v30 = vsel %vm1271_vm10, %v2840_v29, 0  ;;  %v1349_v32 = vsel %vm1271_vm10, %v2839_v31, 0  ;;  %v2838_v33 = vld [vmem:[%s4121_s3] sm:$0xff]  ;;  %v3656_v46 = vunpack.c.0.s8 %v1387_v45  ;;  %s4125_s17 = sld [smem:[#allocation19_spill]]  ;;  %s4127_s3 = scalar_lea.vmem [#allocation4], %s3329_s29 }
 0x286   : > { %1361 = vmatpush.bf16.xpose.msra.mxu0 %v1355_v12  ;;  %v1276_v14 = vmul.f32 64.0, %v3004_v13  ;;  %vm1280_vm11 = vweird.f32 %v3004_v13  ;;  %v1346_v34 = vsel %vm1271_vm10, %v2838_v33, 0  ;;  %v2996_v40 = vld [vmem:[%s4122_s21] ss:$0 sm:$0xff]  ;;  %s3162_s21 = smov 32  }
 0x287   : > { %v2997_v49 = vld [vmem:[%s4123_s2] ss:$0 sm:$0xff] }
 0x288   : > { %v1277_v15 = vsub.f32 1.0, %v1276_v14  ;;  %v2998_v26 = vld [vmem:[%s4124_s4] ss:$0 sm:$0xff]  ;;  %s2553_s4 = sshll.u32 %s4127_s3, 4  ;;  %s2554_s4 = int_to_ptr.vmem [resolvable:$true] %s2553_s4 }
 0x289   : > { %1537 = vmatpush.bf16.xpose.msrb.mxu2 %v1528_v43 }
 0x28a   : > { %v1278_v16 = vmul.f32 %v3004_v13, %v1277_v15 }
 0x28c   : > { %v1279_v17 = vadd.f32 %v3004_v13, %v1278_v16 }
 0x28e   : > { %v3623_v18 = vsel %vm1280_vm11, %v3004_v13, %v1279_v17  ;;  %1362 = vmatpush.bf16.xpose.msra.mxu0 %v1352_v30  ;;  %v3662_v13 = vunpack.c.0.s8 %v1411_v52 }
 0x296   : > { %1363 = vmatpush.bf16.xpose.msra.mxu0 %v1349_v32 }
 0x29e   : > { %1364 = vmatpush.bf16.xpose.msra.mxu0 %v1346_v34 }
 0x2a6   : > { %1757 = vmatpush.bf16.xpose.msrb.mxu0 %v1748_v63 }
 0x2f5   : > { %v1274_v19 = vpop.xlane.xlu0 %1273 }
 0x2f6   : > { %v1282_v20 = vmul.f32 %v3623_v18, %v1274_v19 }
 0x2f8   : > { %v1283_v21 = vsub.f32 %v3615_v8, %v1282_v20 }
 0x2fa   : > { %v1284_v22 = vmul.f32 %v1283_v21, %v1283_v21 }
 0x2fc   : > { %v1285_v23 = vsel %vm1271_vm10, %v1284_v22, 0.0 }
 0x2fd   : > { %1286 = vadd.xlane.f32.xlu0 %v1285_v23 }
 0x370   : > { %v1287_v35 = vpop.xlane.xlu0 %1286 }
 0x371   : > { %v1288_v24 = vmul.f32 %v1287_v35, %v3623_v18 }
 0x373   : > { %v1289_v36 = vadd.f32 1e-05, %v1288_v24 }
 0x375   : > { %3005 = vrsqrt.f32 %v1289_v36  ;;  %vm1296_vm13 = vweird.f32 %v1289_v36 }
 0x37b   : > { %v3006_v37 = vpop.eup %3005 }
 0x37c   : > { %v1291_v38 = vmul.f32 %v3006_v37, %v1289_v36  ;;  %vm1297_vm12 = vweird.f32 %v3006_v37 }
 0x37d   : > { %vm1298_vm14 = vmor %vm1296_vm13, %vm1297_vm12 }
 0x37e   : > { %v1292_v60 = vmul.f32 %v3006_v37, %v1291_v38 }
 0x380   : > { %v1293_v25 = vmul.f32 0.5, %v1292_v60 }
 0x382   : > { %v1294_v39 = vsub.f32 1.5, %v1293_v25 }
 0x384   : > { %v1295_v59 = vmul.f32 %v3006_v37, %v1294_v39 }
 0x386   : > { %v1299_v41 = vsel %vm1298_vm14, %v3006_v37, %v1295_v59 }
 0x387   : > { %v1300_v50 = vmul.f32 %v1299_v41, %v1283_v21 }
 0x389   : > { %v1304_v51 = vmul.f32 %v2996_v40, %v1300_v50 }
 0x38b   : > { %v1308_v48 = vadd.f32 %v2997_v49, %v1304_v51 }
 0x38d   : > { %v1318_v55 = vpack.c.bf16 %v1308_v48, %v1308_v48 }
 0x38f   : > { %2690 = vmatmul.msk.bf16.vlgmr.msra.gmra.mxu0 %vm1271_vm10, %v1318_v55 }
 0x40c   : > { %v1366_v61 = vpop.f32.mrf.mxu0 }
 0x40d   : > { %v1367_v56 = vadd.f32 %v2998_v26, %v1366_v61 }
 0x40f   : > { %v1370_v53 = vmul.f32 0.25, %v1367_v56 }
 0x411   : > { %1378 = vrot.lane.b32.xlu2 %v1370_v53, %s3156_s20  ;;  %1372 = vrot.lane.b32.xlu1 %v1370_v53, %s3157_s19  ;;  %v1384_v10 = vrot.slane %v1370_v53, 4  ;;  %s4126_s20 = sld [smem:[#allocation20_spill]] }
 0x414   : > { %v1368_v44 = vpop.f32.mrf.mxu0 }
 0x419   : > { %1375 = vrot.lane.b32.xlu1 %v1370_v53, %s3158_s16  ;;  %s2825_s16 = sshll.u32 %s3135_s28, 1  ;;  %s4129_s28 = sand.u32 1, %s3123_s25  }
 0x46b   : > { %v1379_v0 = vpop.permute.xlu2 %1378 }
 0x46c   : > { %v1394_v4 = vrot.slane %v1379_v0, 4 }
 0x483   : > { %v1373_v2 = vpop.permute.xlu1 %1372 }
 0x484   : > { %v1396_v3 = vrot.slane %v1373_v2, 4  ;;  %v1395_v54 = vsel %vm1382_vm0, %v1394_v4, %v1373_v2 }
 0x485   : > { %v1401_v11 = vperm.slane %v1395_v54, %v3656_v46 }
 0x486   : > { %v1397_v5 = vsel %vm1382_vm0, %v1379_v0, %v1396_v3 }
 0x487   : > { %v1405_v9 = vperm.slane %v1397_v5, %v3656_v46  ;;  %v1406_v20 = vrot.slane %v1401_v11, 4 }
 0x489   : > { %v1418_v16 = vrot.slane %v1405_v9, 4 }
 0x48b   : > { %v1376_v12 = vpop.permute.xlu1 %1375 }
 0x48c   : > { %v1381_v14 = vrot.slane %v1376_v12, 4  ;;  %v1385_v15 = vsel %vm1382_vm0, %v1376_v12, %v1384_v10 }
 0x48d   : > { %v1393_v17 = vperm.slane %v1385_v15, %v3656_v46 }
 0x48e   : > { %v1383_v19 = vsel %vm1382_vm0, %v1381_v14, %v1370_v53 }
 0x48f   : > { %v1389_v21 = vperm.slane %v1383_v19, %v3656_v46  ;;  %v1419_v22 = vsel %vm1382_vm0, %v1418_v16, %v1393_v17  ;;  %v1420_v23 = vrot.slane %v1393_v17, 4 }
 0x490   : > { %v1425_v29 = vperm.slane %v1419_v22, %v3662_v13 }
 0x491   : > { %v1407_v30 = vsel %vm1382_vm0, %v1406_v20, %v1389_v21  ;;  %v1408_v31 = vrot.slane %v1389_v21, 4  ;;  %v1421_v32 = vsel %vm1382_vm0, %v1405_v9, %v1420_v23 }
 0x492   : > { %v1413_v33 = vperm.slane %v1407_v30, %v3662_v13  ;;  %v1429_v34 = vperm.slane %v1421_v32, %v3662_v13  ;;  %v1434_v36 = vrot.slane %v1425_v29, 4 }
 0x493   : > { %v1409_v35 = vsel %vm1382_vm0, %v1401_v11, %v1408_v31 }
 0x494   : > { %v1417_v24 = vperm.slane %v1409_v35, %v3662_v13  ;;  %v1436_v37 = vrot.slane %v1429_v34, 4  ;;  %v1430_v38 = vrot.slane %v1413_v33, 4  ;;  %v1435_v50 = vsel %vm1382_vm0, 0.0, %v1434_v36  ;;  %v1500_v34 = vld [vmem:[#allocation3] sm:$0xf] }
 0x495   : > { %v1647_v35 = vsel %vm1645_vm2, %v1500_v34, 0 }
 0x496   : > { %v1432_v60 = vrot.slane %v1417_v24, 4  ;;  %v1437_v25 = vsel %vm1382_vm0, 0.0, %v1436_v37  ;;  %v1449_v39 = vsel %vm1382_vm0, %v1436_v37, %v1425_v29  ;;  %v1431_v61 = vsel %vm1382_vm0, 0.0, %v1430_v38  ;;  %v1501_v24 = vld [vmem:[#allocation3 + $0x8] sm:$0xf] }
 0x497   : > { %v1453_v59 = vperm.slane %v1449_v39, %v3656_v46  ;;  %v1454_v40 = vrot.slane %v1437_v25, 4  ;;  %v1666_v36 = vsel %vm1645_vm2, %v1501_v24, 0  ;;  %v1503_v37 = vld [vmem:[#allocation3 + $0x18] sm:$0xf]  ;;  %v1728_v39 = vld [vmem:[#allocation3 + $0xc] sm:$0xf] }
 0x498   : > { %v1433_v41 = vsel %vm1382_vm0, 0.0, %v1432_v60  ;;  %v1438_v49 = vsel %vm1382_vm0, %v1432_v60, %v1413_v33  ;;  %1675 = vmatpush.bf16.msrb.mxu3 %v1666_v36  ;;  %v1704_v38 = vsel %vm1645_vm2, %v1503_v37, 0 }
 0x499   : > { %v1443_v51 = vrot.slane %v1433_v41, 4  ;;  %v1455_v48 = vsel %vm1382_vm0, %v1454_v40, %v1435_v50  ;;  %v1474_v55 = vrot.slane %v1453_v59, 4  ;;  %v1442_v26 = vperm.slane %v1438_v49, %v3656_v46  ;;  %v1723_v41 = vld [vmem:[#allocation2 + $0x4] sm:$0xf] }
 0x49a   : > { %v1459_v56 = vperm.slane %v1455_v48, %v3656_v46  ;;  %v1886_v40 = vsel %vm1645_vm2, %v1728_v39, 0  ;;  %v1732_v50 = vsel %vm1504_vm15, %v1723_v41, 0  ;;  %v1502_v48 = vld [vmem:[#allocation3 + $0x10] sm:$0xf] }
 0x49b   : > { %v1444_v53 = vsel %vm1382_vm0, %v1443_v51, %v1431_v61  ;;  %v1462_v44 = vrot.slane %v1442_v26, 4  ;;  %1895 = vmatpush.bf16.msra.mxu0 %v1886_v40 }
 0x49c   : > { %v1448_v58 = vperm.slane %v1444_v53, %v3656_v46  ;;  %v1475_v27 = vsel %vm1382_vm0, %v1459_v56, %v1474_v55  ;;  %v1472_v62 = vrot.slane %v1459_v56, 4  ;;  %v1685_v55 = vsel %vm1645_vm2, %v1502_v48, 0  ;;  %v1726_v53 = vld [vmem:[#allocation2 + $0x1c] sm:$0xf] }
 0x49d   : > { %v1483_v42 = vperm.slane %v1475_v27, %v3662_v13  ;;  %1694 = vmatpush.bf16.msrb.mxu1 %v1685_v55 }
 0x49e   : > { %v1463_v57 = vsel %vm1382_vm0, %v1448_v58, %v1462_v44  ;;  %v1460_v28 = vrot.slane %v1448_v58, 4  ;;  %v1473_v47 = vsel %vm1382_vm0, %v1472_v62, %v1453_v59  ;;  %v1780_v62 = vsel %vm1504_vm15, %v1726_v53, 0 }
 0x49f   : > { %v1471_v63 = vperm.slane %v1463_v57, %v3662_v13  ;;  %v1488_v0 = vrot.slane %v1483_v42, 4  ;;  %v1479_v1 = vperm.slane %v1473_v47, %v3662_v13 }
 0x4a0   : > { %v1461_v45 = vsel %vm1382_vm0, %v1460_v28, %v1442_v26 }
 0x4a1   : > { %v1489_v2 = vsel %vm1382_vm0, %v1488_v0, %v1471_v63  ;;  %v1467_v3 = vperm.slane %v1461_v45, %v3662_v13  ;;  %v1484_v4 = vrot.slane %v1479_v1, 4  ;;  %v1490_v5 = vrot.slane %v1471_v63, 4 }
 0x4a2   : > { %v3697_v6 = vpack.c.bf16 %v1489_v2, %v1489_v2 }
 0x4a3   : > { %v1485_v43 = vsel %vm1382_vm0, %v1484_v4, %v1467_v3  ;;  %v1486_v54 = vrot.slane %v1467_v3, 4  ;;  %v1491_v7 = vsel %vm1382_vm0, %v1483_v42, %v1490_v5  ;;  %v1725_v42 = vld [vmem:[#allocation2 + $0x14] sm:$0xf] }
 0x4a4   : > { %2693 = vmatmul.msk.bf16.vlgmr.msra.gmra.mxu3 %vm1504_vm15, %v3697_v6  ;;  %v3703_v52 = vpack.c.bf16 %v1485_v43, %v1485_v43  ;;  %v3705_v9 = vpack.c.bf16 %v1491_v7, %v1491_v7  ;;  %v1764_v57 = vsel %vm1504_vm15, %v1725_v42, 0 }
 0x4a5   : > { %v1487_v10 = vsel %vm1382_vm0, %v1479_v1, %v1486_v54  ;;  %1741 = vmatpush.bf16.xpose.msra.mxu3 %v1732_v50 }
 0x4a6   : > { %2691 = vmatmul.msk.bf16.vlgmr.msra.gmra.mxu2 %vm1504_vm15, %v3703_v52  ;;  %2694 = vmatmul.msk.bf16.vlgmr.msra.gmra.mxu1 %vm1504_vm15, %v3705_v9  ;;  %v1493_v11 = vpack.c.bf16 %v1487_v10, %v1487_v10 }
 0x4a7   : > { %1656 = vmatpush.bf16.msra.mxu2 %v1647_v35  ;;  %1773 = vmatpush.bf16.xpose.msra.mxu1 %v1764_v57 }
 0x4a8   : > { %2700 = vmatmul.msk.bf16.vlgmr.msrb.gmra.mxu0 %vm1504_vm15, %v1493_v11 }
 0x4b6   : > { %2692 = vmatmul.msk.bf16.vlgmr.msrb.gmra.mxu2 %vm1504_vm15, %v1493_v11 }
 0x4b7   : > { %1713 = vmatpush.bf16.msrb.mxu2 %v1704_v38 }
 0x523   : > { %v1577_v12 = vpop.f32.mrf.mxu1 }
 0x524   : > { %v1591_v14 = vsel %vm1581_vm1, %v1577_v12, -inf }
 0x525   : > { %1592 = vmax.xlane.f32.xlu1 %v1591_v14  ;;  %v3715_v15 = vpop.f32.mrf.mxu0 }
 0x526   : > { %v1798_v29 = vsel %vm1581_vm1, %v3715_v15, -inf }
 0x527   : > { %v3717_v16 = vpop.f32.mrf.mxu3 }
 0x528   : > { %v1588_v33 = vsel %vm1581_vm1, %v3717_v16, -inf }
 0x529   : > { %v1520_v17 = vpop.f32.mrf.mxu2 }
 0x52a   : > { %v1582_v19 = vsel %vm1581_vm1, %v1520_v17, -inf }
 0x52b   : > { %v1579_v20 = vpop.f32.mrf.mxu1  ;;  %1583 = vmax.xlane.f32.xlu2 %v1582_v19 }
 0x52d   : > { %v1761_v21 = vpop.f32.mrf.mxu0 }
 0x52f   : > { %v1560_v22 = vpop.f32.mrf.mxu3 }
 0x531   : > { %v1522_v23 = vpop.f32.mrf.mxu2 }
 0x533   : > { %1799 = vmax.xlane.f32.xlu2 %v1798_v29 }
 0x539   : > { %v1539_v30 = vpop.f32.mrf.mxu2 }
 0x53a   : > { %v1585_v31 = vsel %vm1581_vm1, %v1539_v30, -inf }
 0x53b   : > { %1586 = vmax.xlane.f32.xlu0 %v1585_v31 }
 0x541   : > { %v1541_v32 = vpop.f32.mrf.mxu2 }
 0x543   : > { %1589 = vmax.xlane.f32.xlu0 %v1588_v33 }
 0x598   : > { %v3728_v60 = vpop.xlane.xlu1 %1592 }
 0x599   : > { %v1609_v25 = vsub.f32 %v1577_v12, %v3728_v60  ;;  %v1597_v57 = vsub.f32 -inf, %v3728_v60 }
 0x59b   : > { %v1616_v59 = vmul.f32 1.442695, %v1609_v25 }
 0x59d   : > { %3007 = vpow2.f32 %v1616_v59 }
 0x59e   : > { %v3733_v49 = vpop.xlane.xlu2 %1583 }
 0x59f   : > { %v1606_v51 = vsub.f32 %v1520_v17, %v3733_v49 }
 0x5a1   : > { %v1610_v26 = vmul.f32 1.442695, %v1606_v51 }
 0x5a3   : > { %v3008_v61 = vpop.eup %3007  ;;  %3009 = vpow2.f32 %v1610_v26  ;;  %v1727_v26 = vld [vmem:[#allocation3 + $0x4] sm:$0xf] }
 0x5a4   : > { %v1631_v56 = vsel %vm1581_vm1, %v3008_v61, 0.0  ;;  %v1641_v10 = vpack.c.bf16 %v3008_v61, %v3008_v61  ;;  %v1867_v61 = vsel %vm1645_vm2, %v1727_v26, 0 }
 0x5a5   : > { %1632 = vadd.xlane.f32.xlu1 %v1631_v56  ;;  %v1730_v56 = vld [vmem:[#allocation3 + $0x1c] sm:$0xf] }
 0x5a6   : > { %v1800_v28 = vpop.xlane.xlu2 %1799  ;;  %v1924_v53 = vsel %vm1645_vm2, %v1730_v56, 0 }
 0x5a9   : > { %v3010_v44 = vpop.eup %3009 }
 0x5aa   : > { %v1622_v58 = vsel %vm1581_vm1, %v3010_v44, 0.0  ;;  %v1638_v27 = vpack.c.bf16 %v3010_v44, %v3010_v44  ;;  %v1729_v44 = vld [vmem:[#allocation3 + $0x14] sm:$0xf] }
 0x5ab   : > { %1623 = vadd.xlane.f32.xlu2 %v1622_v58  ;;  %v1905_v58 = vsel %vm1645_vm2, %v1729_v44, 0 }
 0x5ac   : > { %2695 = vmatmul.msk.bf16.vlgmr.msra.gmra.mxu2 %vm1581_vm1, %v1638_v27  ;;  %v1594_v27 = vsub.f32 -inf, %v3733_v49 }
 0x5ad   : > { %1789 = vmatpush.bf16.xpose.msra.mxu2 %v1780_v62 }
 0x5ae   : > { %v1587_v47 = vpop.xlane.xlu0 %1586  ;;  %v1598_v62 = vmul.f32 1.442695, %v1594_v27 }
 0x5af   : > { %v1607_v63 = vsub.f32 %v1539_v30, %v1587_v47  ;;  %v1808_v0 = vmax.f32 %v1587_v47, %v1800_v28 }
 0x5b1   : > { %v1612_v1 = vmul.f32 1.442695, %v1607_v63  ;;  %v1812_v45 = vsub.f32 %v1587_v47, %v1808_v0  ;;  %v1824_v2 = vsub.f32 %v3715_v15, %v1808_v0  ;;  %v1604_v0 = vmul.f32 1.442695, %v1597_v57 }
 0x5b3   : > { %3011 = vpow2.f32 %v1612_v1  ;;  %v1829_v3 = vmul.f32 1.442695, %v1824_v2  ;;  %v1817_v20 = vmul.f32 1.442695, %v1812_v45 }
 0x5b5   : > { %3013 = vpow2.f32 %v1829_v3 }
 0x5b6   : > { %v3743_v4 = vpop.xlane.xlu0 %1589 }
 0x5b7   : > { %v1608_v5 = vsub.f32 %v3717_v16, %v3743_v4  ;;  %v1595_v16 = vsub.f32 -inf, %v1587_v47 }
 0x5b9   : > { %v3012_v43 = vpop.eup %3011  ;;  %v1614_v54 = vmul.f32 1.442695, %v1608_v5  ;;  %v1600_v19 = vmul.f32 1.442695, %v1595_v16  ;;  %v1596_v5 = vsub.f32 -inf, %v3743_v4 }
 0x5ba   : > { %v1639_v7 = vpack.c.bf16 %v3012_v43, %v3012_v43  ;;  %v1625_v55 = vsel %vm1581_vm1, %v3012_v43, 0.0 }
 0x5bb   : > { %3015 = vpow2.f32 %v1614_v54  ;;  %v3747_v11 = vpop.eup %3013 }
 0x5bc   : > { %2696 = vmatmul.msk.bf16.vlgmr.msrb.gmra.mxu3 %vm1581_vm1, %v1639_v7  ;;  %2698 = vmatmul.msk.bf16.vlgmr.msrb.gmra.mxu2 %vm1581_vm1, %v1641_v10  ;;  %v1860_v12 = vpack.c.bf16 %v3747_v11, %v3747_v11  ;;  %3017 = vpow2.f32 %v1600_v19 }
 0x5bd   : > { %3019 = vpow2.f32 %v1817_v20  ;;  %1876 = vmatpush.bf16.msrb.mxu3 %v1867_v61  ;;  %1933 = vmatpush.bf16.msrb.mxu2 %v1924_v53  ;;  %v1842_v53 = vsel %vm1581_vm1, %v3747_v11, 0.0 }
 0x5be   : > { %2704 = vmatmul.msk.bf16.vlgmr.msra.gmra.mxu0 %vm1581_vm1, %v1860_v12  ;;  %3021 = vpow2.f32 %v1598_v62 }
 0x5c1   : > { %v3016_v14 = vpop.eup %3015 }
 0x5c2   : > { %v1640_v15 = vpack.c.bf16 %v3016_v14, %v3016_v14  ;;  %v3018_v22 = vpop.eup %3017  ;;  %v1628_v48 = vsel %vm1581_vm1, %v3016_v14, 0.0  ;;  %v1602_v14 = vmul.f32 1.442695, %v1596_v5 }
 0x5c3   : > { %v3763_v29 = vmul.f32 0.0, %v3018_v22  ;;  %v3768_v31 = vpop.eup %3019 }
 0x5c4   : > { %2697 = vmatmul.msk.bf16.vlgmr.msrb.gmra.mxu1 %vm1581_vm1, %v1640_v15  ;;  %v3022_v2 = vpop.eup %3021 }
 0x5c5   : > { %1914 = vmatpush.bf16.msrb.mxu1 %v1905_v58  ;;  %v1618_v54 = vmul.f32 0.0, %v3022_v2 }
 0x5cc   : > { %2699 = vmatmul.msk.bf16.vlgmr.msra.gmra.mxu3 %vm1504_vm15, %v3703_v52  ;;  %2702 = vmatmul.msk.bf16.vlgmr.msra.gmra.mxu2 %vm1504_vm15, %v3705_v9 }
 0x5d4   : > { %2701 = vmatmul.msk.bf16.vlgmr.msra.gmra.mxu1 %vm1504_vm15, %v3697_v6 }
 0x618   : > { %v1633_v44 = vpop.xlane.xlu1 %1632 }
 0x62f   : > { %v3761_v17 = vpop.f32.mrf.mxu2 }
 0x630   : > { %v1719_v12 = vadd.f32 %v3761_v17, %v1618_v54 }
 0x637   : > { %v1660_v21 = vpop.f32.mrf.mxu2 }
 0x63b   : > { %v1897_v23 = vpop.f32.mrf.mxu0 }
 0x63f   : > { %v1677_v30 = vpop.f32.mrf.mxu3  ;;  %v3765_v52 = vpop.f32.mrf.mxu2 }
 0x640   : > { %v1720_v9 = vadd.f32 %v1677_v30, %v3763_v29 }
 0x641   : > { %v3770_v6 = vpop.f32.mrf.mxu1 }
 0x642   : > { %v1856_v32 = vmul.f32 %v3768_v31, %v1720_v9 }
 0x643   : > { %v1899_v34 = vpop.f32.mrf.mxu0 }
 0x644   : > { %v3773_v33 = vadd.f32 %v1897_v23, %v1856_v32 }
 0x647   : > { %v1679_v35 = vpop.f32.mrf.mxu3  ;;  %v1717_v24 = vpop.f32.mrf.mxu2 }
 0x649   : > { %v1698_v36 = vpop.f32.mrf.mxu1 }
 0x64f   : > { %v1743_v37 = vpop.f32.mrf.mxu3  ;;  %v1791_v38 = vpop.f32.mrf.mxu2 }
 0x650   : > { %v1795_v25 = vsel %vm1581_vm1, %v1743_v37, -inf  ;;  %v1804_v41 = vsel %vm1581_vm1, %v1791_v38, -inf }
 0x651   : > { %1796 = vmax.xlane.f32.xlu0 %v1795_v25  ;;  %v3776_v39 = vpop.f32.mrf.mxu1 }
 0x652   : > { %v1801_v51 = vsel %vm1581_vm1, %v3776_v39, -inf }
 0x657   : > { %v1745_v59 = vpop.f32.mrf.mxu3  ;;  %v1793_v40 = vpop.f32.mrf.mxu2 }
 0x659   : > { %v1777_v50 = vpop.f32.mrf.mxu1  ;;  %1805 = vmax.xlane.f32.xlu0 %v1804_v41 }
 0x661   : > { %1802 = vmax.xlane.f32.xlu0 %v1801_v51 }
 0x669   : > { %1629 = vadd.xlane.f32.xlu0 %v1628_v48 }
 0x671   : > { %1626 = vadd.xlane.f32.xlu0 %v1625_v55 }
 0x6c4   : > { %v1797_v42 = vpop.xlane.xlu0 %1796 }
 0x6c5   : > { %v1807_v28 = vmax.f32 %v3733_v49, %v1797_v42 }
 0x6c7   : > { %v1811_v47 = vsub.f32 %v3733_v49, %v1807_v28  ;;  %v1823_v63 = vsub.f32 %v1743_v37, %v1807_v28 }
 0x6c9   : > { %v1815_v1 = vmul.f32 1.442695, %v1811_v47  ;;  %v1827_v45 = vmul.f32 1.442695, %v1823_v63 }
 0x6cb   : > { %3023 = vpow2.f32 %v1815_v1 }
 0x6cc   : > { %3025 = vpow2.f32 %v1827_v45  ;;  %v1806_v3 = vpop.xlane.xlu0 %1805 }
 0x6cd   : > { %3027 = vpow2.f32 %v1604_v0  ;;  %v1810_v43 = vmax.f32 %v3728_v60, %v1806_v3 }
 0x6cf   : > { %v1814_v7 = vsub.f32 %v3728_v60, %v1810_v43  ;;  %v1826_v10 = vsub.f32 %v1791_v38, %v1810_v43 }
 0x6d1   : > { %v3024_v49 = vpop.eup %3023  ;;  %v1821_v15 = vmul.f32 1.442695, %v1814_v7  ;;  %v1833_v16 = vmul.f32 1.442695, %v1826_v10 }
 0x6d2   : > { %v3026_v19 = vpop.eup %3025  ;;  %v1855_v20 = vmul.f32 %v3024_v49, %v1719_v12 }
 0x6d3   : > { %v3028_v21 = vpop.eup %3027  ;;  %v1859_v22 = vpack.c.bf16 %v3026_v19, %v3026_v19  ;;  %3029 = vpow2.f32 %v1821_v15  ;;  %v1839_v23 = vsel %vm1581_vm1, %v3026_v19, 0.0 }
 0x6d4   : > { %3031 = vpow2.f32 %v1833_v16  ;;  %1840 = vadd.xlane.f32.xlu1 %v1839_v23  ;;  %v1803_v30 = vpop.xlane.xlu0 %1802  ;;  %v1621_v17 = vmul.f32 0.0, %v3028_v21 }
 0x6d5   : > { %3033 = vpow2.f32 %v1602_v14  ;;  %2703 = vmatmul.msk.bf16.vlgmr.msrb.gmra.mxu3 %vm1581_vm1, %v1859_v22  ;;  %v1809_v60 = vmax.f32 %v3743_v4, %v1803_v30 }
 0x6d6   : > { %v1722_v34 = vadd.f32 %v3765_v52, %v1621_v17  ;;  %v1637_v57 = vadd.f32 %v1633_v44, %v1621_v17 }
 0x6d7   : > { %v1813_v9 = vsub.f32 %v3743_v4, %v1809_v60  ;;  %v1825_v32 = vsub.f32 %v3776_v39, %v1809_v60 }
 0x6d9   : > { %v3030_v35 = vpop.eup %3029  ;;  %v1819_v24 = vmul.f32 1.442695, %v1813_v9  ;;  %v1831_v36 = vmul.f32 1.442695, %v1825_v32 }
 0x6da   : > { %v3032_v37 = vpop.eup %3031  ;;  %v1858_v38 = vmul.f32 %v3030_v35, %v1722_v34  ;;  %v1838_v63 = vmul.f32 %v3030_v35, %v1637_v57 }
 0x6db   : > { %v3034_v25 = vpop.eup %3033  ;;  %v1862_v59 = vpack.c.bf16 %v3032_v37, %v3032_v37  ;;  %3035 = vpow2.f32 %v1819_v24  ;;  %v1848_v40 = vsel %vm1581_vm1, %v3032_v37, 0.0 }
 0x6dc   : > { %3037 = vpow2.f32 %v1831_v36  ;;  %1849 = vadd.xlane.f32.xlu0 %v1848_v40  ;;  %v1630_v41 = vpop.xlane.xlu0 %1629  ;;  %v1620_v4 = vmul.f32 0.0, %v3034_v25 }
 0x6dd   : > { %2706 = vmatmul.msk.bf16.vlgmr.msrb.gmra.mxu2 %vm1581_vm1, %v1862_v59 }
 0x6de   : > { %v1721_v39 = vadd.f32 %v3770_v6, %v1620_v4  ;;  %v1624_v6 = vpop.xlane.xlu2 %1623  ;;  %v1636_v47 = vadd.f32 %v1630_v41, %v1620_v4 }
 0x6df   : > { %v1634_v58 = vadd.f32 %v1624_v6, %v1618_v54 }
 0x6e1   : > { %v3036_v50 = vpop.eup %3035  ;;  %v1835_v62 = vmul.f32 %v3024_v49, %v1634_v58 }
 0x6e2   : > { %v3038_v52 = vpop.eup %3037  ;;  %v1857_v51 = vmul.f32 %v3036_v50, %v1721_v39 }
 0x6e3   : > { %v1861_v48 = vpack.c.bf16 %v3038_v52, %v3038_v52  ;;  %v1845_v55 = vsel %vm1581_vm1, %v3038_v52, 0.0 }
 0x6e4   : > { %1846 = vadd.xlane.f32.xlu2 %v1845_v55  ;;  %v1627_v26 = vpop.xlane.xlu0 %1626 }
 0x6e5   : > { %2705 = vmatmul.msk.bf16.vlgmr.msrb.gmra.mxu1 %vm1581_vm1, %v1861_v48  ;;  %v1635_v61 = vadd.f32 %v1627_v26, %v3763_v29  ;;  %v1837_v29 = vmul.f32 %v3036_v50, %v1636_v47 }
 0x6e7   : > { %v1836_v56 = vmul.f32 %v3768_v31, %v1635_v61 }
 0x6ec   : > { %1843 = vadd.xlane.f32.xlu2 %v1842_v53 }
 0x747   : > { %v1841_v27 = vpop.xlane.xlu1 %1840 }
 0x748   : > { %v1851_v42 = vadd.f32 %v1841_v27, %v1835_v62 }
 0x74a   : > { %3039 = vrcp.f32 %v1851_v42 }
 0x74f   : > { %v1850_v28 = vpop.xlane.xlu0 %1849 }
 0x750   : > { %v1854_v1 = vadd.f32 %v1850_v28, %v1838_v63  ;;  %v3040_v2 = vpop.eup %3039 }
 0x752   : > { %3041 = vrcp.f32 %v1854_v1 }
 0x757   : > { %v1847_v0 = vpop.xlane.xlu2 %1846 }
 0x758   : > { %v1878_v45 = vpop.f32.mrf.mxu3  ;;  %v1853_v3 = vadd.f32 %v1847_v0, %v1837_v29  ;;  %v3042_v12 = vpop.eup %3041 }
 0x759   : > { %v1939_v31 = vadd.f32 %v1878_v45, %v1855_v20 }
 0x75a   : > { %3043 = vrcp.f32 %v1853_v3 }
 0x75b   : > { %v1947_v11 = vmul.f32 %v3040_v2, %v1939_v31 }
 0x75d   : > { %v1953_v19 = vrot.slane %v1947_v11, 4 }
 0x75f   : > { %v1844_v5 = vpop.xlane.xlu2 %1843 }
 0x760   : > { %v1852_v43 = vadd.f32 %v1844_v5, %v1836_v56  ;;  %v1880_v54 = vpop.f32.mrf.mxu3  ;;  %v1935_v7 = vpop.f32.mrf.mxu2 }
 0x761   : > { %v1942_v10 = vadd.f32 %v1935_v7, %v1858_v38  ;;  %v3044_v16 = vpop.eup %3043 }
 0x762   : > { %3045 = vrcp.f32 %v1852_v43  ;;  %v1916_v49 = vpop.f32.mrf.mxu1 }
 0x763   : > { %v1950_v14 = vmul.f32 %v3042_v12, %v1942_v10  ;;  %v1941_v15 = vadd.f32 %v1916_v49, %v1857_v51 }
 0x765   : > { %v1949_v21 = vmul.f32 %v3044_v16, %v1941_v15  ;;  %v1963_v17 = vrot.slane %v1950_v14, 4 }
 0x767   : > { %v1951_v22 = vrot.slane %v1949_v21, 4  ;;  %v1954_v20 = vsel %vm1382_vm0, %v1949_v21, %v1953_v19 }
 0x768   : > { %v3046_v23 = vpop.eup %3045  ;;  %v1937_v30 = vpop.f32.mrf.mxu2  ;;  %v1962_v34 = vperm.slane %v1954_v20, %v3656_v46 }
 0x769   : > { %v1948_v60 = vmul.f32 %v3046_v23, %v3773_v33  ;;  %v1952_v9 = vsel %vm1382_vm0, %v1951_v22, %v1947_v11 }
 0x76a   : > { %v1958_v32 = vperm.slane %v1952_v9, %v3656_v46  ;;  %v1918_v35 = vpop.f32.mrf.mxu1  ;;  %v1989_v41 = vrot.slane %v1962_v34, 4 }
 0x76b   : > { %v1965_v24 = vrot.slane %v1948_v60, 4  ;;  %v1964_v36 = vsel %vm1382_vm0, %v1963_v17, %v1948_v60  ;;  %v2845_v60 = vld [vmem:[%s4084_s9 + $0x18] sm:$0xff]  ;;  %v2844_v17 = vld [vmem:[%s4084_s9 + $0x10] sm:$0xff]  ;;  %v2842_v35 = vld [vmem:[%s4084_s9] sm:$0xff] }
 0x76c   : > { %v1970_v37 = vperm.slane %v1964_v36, %v3656_v46  ;;  %v1977_v38 = vrot.slane %v1958_v32, 4  ;;  %v2121_v9 = vsel %vm1271_vm10, %v2844_v17, 0 }
 0x76d   : > { %v1966_v25 = vsel %vm1382_vm0, %v1950_v14, %v1965_v24  ;;  %v2115_v24 = vsel %vm1271_vm10, %v2842_v35, 0 }
 0x76e   : > { %v1974_v59 = vperm.slane %v1966_v25, %v3656_v46  ;;  %v1975_v40 = vrot.slane %v1970_v37, 4  ;;  %v1978_v33 = vsel %vm1382_vm0, %v1970_v37, %v1977_v38 }
 0x76f   : > { %v1986_v4 = vperm.slane %v1978_v33, %v3662_v13 }
 0x770   : > { %v1987_v39 = vrot.slane %v1974_v59, 4  ;;  %v1976_v50 = vsel %vm1382_vm0, %v1975_v40, %v1958_v32  ;;  %v1990_v52 = vsel %vm1382_vm0, %v1974_v59, %v1989_v41  ;;  %v2843_v32 = vld [vmem:[%s4084_s9 + $0x8] sm:$0xff]  ;;  %v2999_v41 = vld [vmem:[%s4085_s10] ss:$0 sm:$0xff] }
 0x771   : > { %v1982_v51 = vperm.slane %v1976_v50, %v3662_v13  ;;  %v1998_v48 = vperm.slane %v1990_v52, %v3662_v13  ;;  %v2001_v55 = vrot.slane %v1986_v4, 4 }
 0x772   : > { %v1988_v26 = vsel %vm1382_vm0, %v1987_v39, %v1962_v34  ;;  %v2118_v34 = vsel %vm1271_vm10, %v2843_v32, 0  ;;  %v3000_v32 = vld [vmem:[%s4086_s11] ss:$0 sm:$0xff] }
 0x773   : > { %v1994_v61 = vperm.slane %v1988_v26, %v3662_v13  ;;  %v1999_v56 = vrot.slane %v1982_v51, 4  ;;  %v2005_v53 = vrot.slane %v1998_v48, 4  ;;  %v2002_v44 = vsel %vm1382_vm0, 0.0, %v2001_v55  ;;  %v2853_v48 = vld [vmem:[%s4088_s13 + $0x38] sm:$0xff] }
 0x774   : > { %v2007_v6 = vsel %vm1382_vm0, %v2001_v55, %v1982_v51  ;;  %v2012_v58 = vrot.slane %v2002_v44, 4  ;;  %v2861_v55 = vld [vmem:[%s4088_s13 + $0x78] sm:$0xff]  ;;  %v2316_v26 = vsel %vm1271_vm10, %v2853_v48, 0 }
 0x775   : > { %v2003_v27 = vrot.slane %v1994_v61, 4  ;;  %v2000_v62 = vsel %vm1382_vm0, 0.0, %v1999_v56  ;;  %v2006_v42 = vsel %vm1382_vm0, 0.0, %v2005_v53  ;;  %v2011_v57 = vperm.slane %v2007_v6, %v3656_v46  ;;  %2342 = vmatpush.bf16.xpose.msrb.mxu0 %v2316_v26  ;;  %v2860_v56 = vld [vmem:[%s4088_s13 + $0x70] sm:$0xff]  ;;  %v2851_v6 = vld [vmem:[%s4088_s13 + $0x28] sm:$0xff] }
 0x776   : > { %v2013_v28 = vsel %vm1382_vm0, %v2012_v58, %v2000_v62  ;;  %v2018_v47 = vsel %vm1382_vm0, %v2005_v53, %v1994_v61  ;;  %v2023_v63 = vrot.slane %v2006_v42, 4  ;;  %v2340_v61 = vsel %vm1271_vm10, %v2861_v55, 0  ;;  %v2859_v58 = vld [vmem:[%s4088_s13 + $0x68] sm:$0xff]  ;;  %v2850_v42 = vld [vmem:[%s4088_s13 + $0x20] sm:$0xff] }
 0x777   : > { %v2004_v0 = vsel %vm1382_vm0, 0.0, %v2003_v27  ;;  %v2017_v1 = vperm.slane %v2013_v28, %v3656_v46  ;;  %v2022_v29 = vperm.slane %v2018_v47, %v3656_v46  ;;  %v2031_v45 = vrot.slane %v2011_v57, 4  ;;  %2355 = vmatpush.bf16.xpose.msra.mxu1 %v2340_v61  ;;  %v2810_v55 = vld [vmem:[%s4090_s15 + $0x20] sm:$0xf]  ;;  %v2867_v26 = vld [vmem:[%s4090_s15 + $0x24] sm:$0xf0] }
 0x778   : > { %v2024_v31 = vsel %vm1382_vm0, %v2023_v63, %v2004_v0  ;;  %v2337_v44 = vsel %vm1271_vm10, %v2860_v56, 0  ;;  %v2310_v27 = vsel %vm1271_vm10, %v2851_v6, 0  ;;  %v2334_v62 = vsel %vm1271_vm10, %v2859_v58, 0  ;;  %v2866_v61 = vld [vmem:[%s4090_s15 + $0x24] sm:$0xf] }
 0x779   : > { %v2028_v2 = vperm.slane %v2024_v31, %v3656_v46  ;;  %v2032_v3 = vsel %vm1382_vm0, %v2017_v1, %v2031_v45  ;;  %v2043_v11 = vrot.slane %v2022_v29, 4  ;;  %v2029_v5 = vrot.slane %v2017_v1, 4  ;;  %v2857_v45 = vld [vmem:[%s4088_s13 + $0x58] sm:$0xff] }
 0x77a   : > { %v2040_v43 = vperm.slane %v2032_v3, %v3662_v13  ;;  %v2307_v47 = vsel %vm1271_vm10, %v2850_v42, 0 }
 0x77b   : > { %v2044_v54 = vsel %vm1382_vm0, %v2028_v2, %v2043_v11  ;;  %v2030_v7 = vsel %vm1382_vm0, %v2029_v5, %v2011_v57  ;;  %v2041_v10 = vrot.slane %v2028_v2, 4  ;;  %v2858_v57 = vld [vmem:[%s4088_s13 + $0x60] sm:$0xff]  ;;  %v2328_v11 = vsel %vm1271_vm10, %v2857_v45, 0  ;;  %v2848_v5 = vld [vmem:[%s4088_s13 + $0x10] sm:$0xff] }
 0x77c   : > { %v2052_v12 = vperm.slane %v2044_v54, %v3662_v13  ;;  %v2059_v49 = vrot.slane %v2040_v43, 4  ;;  %v2036_v14 = vperm.slane %v2030_v7, %v3662_v13  ;;  %v2331_v63 = vsel %vm1271_vm10, %v2858_v57, 0 }
 0x77d   : > { %v2042_v15 = vsel %vm1382_vm0, %v2041_v10, %v2022_v29  ;;  %v2849_v29 = vld [vmem:[%s4088_s13 + $0x18] sm:$0xff]  ;;  %v2301_v54 = vsel %vm1271_vm10, %v2848_v5, 0  ;;  %v2847_v10 = vld [vmem:[%s4088_s13 + $0x8] sm:$0xff] }
 0x77e   : > { %v2060_v46 = vsel %vm1382_vm0, %v2052_v12, %v2059_v49  ;;  %v2057_v16 = vrot.slane %v2052_v12, 4  ;;  %v2048_v19 = vperm.slane %v2042_v15, %v3662_v13  ;;  %v2055_v21 = vrot.slane %v2036_v14, 4  ;;  %v2855_v12 = vld [vmem:[%s4088_s13 + $0x48] sm:$0xff]  ;;  %v2846_v15 = vld [vmem:[%s4088_s13] sm:$0xff]  ;;  %v2804_v5 = vld [vmem:[%s4090_s15 + $0x18] sm:$0xf0] }
 0x77f   : > { %2070 = vrot.lane.b32.xlu2 %v2060_v46, %s3161_s23  ;;  %v2124_v13 = vsel %vm1271_vm10, %v2845_v60, 0  ;;  %2356 = vmatpush.bf16.xpose.msra.mxu1 %v2337_v44  ;;  %v2304_v3 = vsel %vm1271_vm10, %v2849_v29, 0  ;;  %v2298_v49 = vsel %vm1271_vm10, %v2847_v10, 0  ;;  %v2854_v46 = vld [vmem:[%s4088_s13 + $0x40] sm:$0xff]  ;;  %v2812_v44 = vld [vmem:[%s4090_s15 + $0x28] sm:$0xf0]  ;;  %s2549_s23 = sadd.s32 %s3131_s27, %s2825_s16  ;;  %s4128_s27 = smov %s4127_s3 }
 0x780   : > { %v2058_v22 = vsel %vm1382_vm0, %v2057_v16, %v2040_v43  ;;  %v2053_v20 = vrot.slane %v2048_v19, 4  ;;  %v2056_v23 = vsel %vm1382_vm0, %v2048_v19, %v2055_v21  ;;  %2130 = vmatpush.bf16.xpose.msra.mxu3 %v2124_v13  ;;  %v2856_v43 = vld [vmem:[%s4088_s13 + $0x50] sm:$0xff]  ;;  %v2295_v16 = vsel %vm1271_vm10, %v2846_v15, 0  ;;  %s2826_s2 = sshll.u32 %s2549_s23, 3  ;;  %s2539_s16 = scalar_lea.sflag [#allocation5], %s4129_s28 }
 0x781   : > { %2066 = vrot.lane.b32.xlu0 %v2058_v22, %s3162_s21  ;;  %2062 = vrot.lane.b32.xlu1 %v2056_v23, %s3163_s18  ;;  %v2325_v7 = vsel %vm1271_vm10, %v2856_v43, 0  ;;  %v2319_v19 = vsel %vm1271_vm10, %v2854_v46, 0  ;;  %v2815_v6 = vor.u32 %v2866_v61, %v2812_v44  ;;  %v2864_v29 = vld [vmem:[%s4090_s15 + $0x14] sm:$0xf]  ;;  %s2551_s19 = scalar_lea.hbm %s4126_s20, %s2826_s2  ;;  %s3073_s18 = scalar_lea.hbm %s4126_s20, 32 }
 0x782   : > { %v2054_v30 = vsel %vm1382_vm0, %v2053_v20, %v2036_v14  ;;  %v2322_v14 = vsel %vm1271_vm10, %v2855_v12, 0  ;;  %v2807_v10 = vor.u32 %v2864_v29, %v2804_v5  ;;  %s2555_s5 = sshll.u32 %s2551_s19, 4  ;;  %s2556_s5 = int_to_ptr.hbm [resolvable:$true] %s2555_s5 }
 0x783   : > { %s3067_s23 = sshra.s32 %s2556_s5, 4  ;;  %s3068_s23 = int_to_ptr.hbm [resolvable:$true] %s3067_s23 }
 0x784   : > { %s3069_s2 = scalar_lea.hbm %s3068_s23, 8  ;;  %p3074_p4 = scmp.lt.s32.totalorder %s3068_s23, %s4126_s20 }
 0x785   : > { %p3070_p0 = scmp.ne.s32.totalorder %s3068_s23, %s3069_s2  ;;  %p3075_p5 = scmp.lt.s32.totalorder %s3073_s18, %s3069_s2 }
 0x787   : > { %2357 = vmatpush.bf16.xpose.msra.mxu1 %v2334_v62  ;;  %p3071_p1 = pnand %p3070_p0, %p3305_p3  ;;  %p3076_p6 = por %p3075_p5, %p3074_p4 }
 0x788   : > { %2131 = vmatpush.bf16.xpose.msra.mxu3 %v2121_v9 }
 0x789   : > { %p3072_p2 = pneg %p3071_p1 }
 0x78b   : > { %p3077_p7 = pnand %p3076_p6, %p3072_p2 }
 0x78f   : > { %2358 = vmatpush.bf16.xpose.msra.mxu1 %v2331_v63 }
 0x790   : > { %2132 = vmatpush.bf16.xpose.msra.mxu3 %v2118_v34 }
 0x797   : > { %2359 = vmatpush.bf16.xpose.msra.mxu1 %v2328_v11 }
 0x798   : > { %2133 = vmatpush.bf16.xpose.msra.mxu3 %v2115_v24 }
 0x79f   : > { %2360 = vmatpush.bf16.xpose.msra.mxu1 %v2325_v7 }
 0x7a7   : > { %2361 = vmatpush.bf16.xpose.msra.mxu1 %v2322_v14 }
 0x7af   : > { %2362 = vmatpush.bf16.xpose.msra.mxu1 %v2319_v19 }
 0x7d9   : > { %v2071_v25 = vpop.permute.xlu2 %2070 }
 0x7f3   : > { %v2067_v36 = vpop.permute.xlu0 %2066  ;;  %v2063_v37 = vpop.permute.xlu1 %2062 }
 0x7f4   : > { %v2073_v38 = vsel %vm1504_vm15, %v2054_v30, %v2063_v37 }
 0x7f5   : > { %v2075_v59 = vsel %vm2074_vm3, %v2073_v38, %v2067_v36  ;;  %v2818_v38 = vld [vmem:[%s4090_s15 + $0x30] sm:$0xf] }
 0x7f6   : > { %v2077_v40 = vsel %vm2076_vm4, %v2075_v59, %v2071_v25  ;;  %v2869_v25 = vld [vmem:[%s4090_s15 + $0x34] sm:$0xf0]  ;;  %v2868_v59 = vld [vmem:[%s4090_s15 + $0x34] sm:$0xf] }
 0x7f7   : > { %v2087_v33 = vpack.c.bf16 %v2077_v40, %v2077_v40  ;;  %v2819_v40 = vor.u32 %v2869_v25, %v2818_v38 }
 0x7f9   : > { %2723 = vmatmul.msk.bf16.vlgmr.msra.gmra.mxu3 %vm1271_vm10, %v2087_v33  ;;  %v2820_v33 = vld [vmem:[%s4090_s15 + $0x38] sm:$0xf0]  ;;  %2514 = vmatpush.bf16.xpose.msra.mxu2 %v2819_v40 }
 0x87c   : > { %v2135_v4 = vpop.f32.mrf.mxu3 }
 0x87d   : > { %v2136_v39 = vadd.f32 %v2999_v41, %v2135_v4  ;;  %v2204_v41 = vld [vmem:[%s4089_s14] sm:$0x3]  ;;  %v2823_v4 = vor.u32 %v2868_v59, %v2820_v33 }
 0x87f   : > { %v3872_v50 = vadd.f32 %v2136_v39, %v3615_v8  ;;  %v2852_v8 = vld [vmem:[%s4088_s13 + $0x30] sm:$0xff]  ;;  %2527 = vmatpush.bf16.xpose.msrb.mxu3 %v2823_v4  ;;  %v2207_v39 = vperm.slane %v2204_v41, 0 }
 0x880   : > { %v2313_v53 = vsel %vm1271_vm10, %v2852_v8, 0 }
 0x881   : > { %v2142_v52 = vsel %vm1271_vm10, %v3872_v50, 0.0  ;;  %2343 = vmatpush.bf16.xpose.msrb.mxu0 %v2313_v53  ;;  %v2811_v53 = vor.u32 %v2867_v26, %v2810_v55 }
 0x882   : > { %2143 = vadd.xlane.f32.xlu1 %v2142_v52  ;;  %v2208_v52 = vperm.slane %v2204_v41, 1 }
 0x883   : > { %2515 = vmatpush.bf16.xpose.msra.mxu2 %v2811_v53 }
 0x884   : > { %v2137_v51 = vpop.f32.mrf.mxu3 }
 0x887   : > { %2528 = vmatpush.bf16.xpose.msrb.mxu3 %v2815_v6 }
 0x889   : > { %2344 = vmatpush.bf16.xpose.msrb.mxu0 %v2310_v27 }
 0x88f   : > { %2529 = vmatpush.bf16.xpose.msrb.mxu3 %v2807_v10 }
 0x891   : > { %2345 = vmatpush.bf16.xpose.msrb.mxu0 %v2307_v47 }
 0x899   : > { %2346 = vmatpush.bf16.xpose.msrb.mxu0 %v2304_v3 }
 0x8a1   : > { %2347 = vmatpush.bf16.xpose.msrb.mxu0 %v2301_v54 }
 0x8a9   : > { %2348 = vmatpush.bf16.xpose.msrb.mxu0 %v2298_v49 }
 0x8b1   : > { %2349 = vmatpush.bf16.xpose.msrb.mxu0 %v2295_v16 }
 0x8f5   : > { %v2144_v28 = vpop.xlane.xlu1 %2143 }
 0x8f6   : > { %v2145_v0 = vmul.f32 %v2144_v28, %v3623_v18 }
 0x8f8   : > { %v2146_v1 = vsub.f32 %v3872_v50, %v2145_v0  ;;  %v2802_v0 = vld [vmem:[%s4090_s15 + $0x10] sm:$0xf] }
 0x8fa   : > { %v2147_v31 = vmul.f32 %v2146_v1, %v2146_v1 }
 0x8fc   : > { %v2148_v2 = vsel %vm1271_vm10, %v2147_v31, 0.0 }
 0x8fd   : > { %2149 = vadd.xlane.f32.xlu0 %v2148_v2 }
 0x970   : > { %v2150_v21 = vpop.xlane.xlu0 %2149 }
 0x971   : > { %v2151_v22 = vmul.f32 %v2150_v21, %v3623_v18  ;;  %v3001_v18 = vld [vmem:[%s4087_s12] ss:$0 sm:$0xff] }
 0x973   : > { %v2152_v20 = vadd.f32 1e-05, %v2151_v22  ;;  %v2794_v22 = vld [vmem:[%s4090_s15] sm:$0xf] }
 0x975   : > { %3047 = vrsqrt.f32 %v2152_v20  ;;  %vm2159_vm6 = vweird.f32 %v2152_v20 }
 0x97b   : > { %v3048_v23 = vpop.eup %3047 }
 0x97c   : > { %v2154_v30 = vmul.f32 %v3048_v23, %v2152_v20  ;;  %vm2160_vm5 = vweird.f32 %v3048_v23  ;;  %v2863_v20 = vld [vmem:[%s4090_s15 + $0x4] sm:$0xf0] }
 0x97d   : > { %vm2161_vm7 = vmor %vm2159_vm6, %vm2160_vm5 }
 0x97e   : > { %v2155_v60 = vmul.f32 %v3048_v23, %v2154_v30 }
 0x980   : > { %v2156_v13 = vmul.f32 0.5, %v2155_v60  ;;  %v2795_v60 = vor.u32 %v2863_v20, %v2794_v22 }
 0x982   : > { %v2157_v17 = vsub.f32 1.5, %v2156_v13  ;;  %v2862_v13 = vld [vmem:[%s4090_s15 + $0x4] sm:$0xf] }
 0x984   : > { %v2158_v9 = vmul.f32 %v3048_v23, %v2157_v17  ;;  %v2796_v17 = vld [vmem:[%s4090_s15 + $0x8] sm:$0xf0] }
 0x986   : > { %v2162_v34 = vsel %vm2161_vm7, %v3048_v23, %v2158_v9 }
 0x987   : > { %v2163_v35 = vmul.f32 %v2162_v34, %v2146_v1  ;;  %v2865_v1 = vld [vmem:[%s4090_s15 + $0x14] sm:$0xf0] }
 0x988   : > { %v2803_v3 = vor.u32 %v2865_v1, %v2802_v0 }
 0x989   : > { %v2167_v24 = vmul.f32 %v3000_v32, %v2163_v35  ;;  %v2799_v32 = vor.u32 %v2862_v13, %v2796_v17 }
 0x98a   : > { %2516 = vmatpush.bf16.xpose.msra.mxu2 %v2803_v3 }
 0x98b   : > { %v2171_v36 = vadd.f32 %v3001_v18, %v2167_v24  ;;  %2530 = vmatpush.bf16.xpose.msrb.mxu3 %v2799_v32 }
 0x98d   : > { %v2205_v37 = vpack.c.bf16 %v2171_v36, %v2171_v36 }
 0x98f   : > { %2788 = vmatmul.msk.bf16.vlgmr.msrb.gmra.mxu0 %vm1271_vm10, %v2205_v37  ;;  %2789 = vmatmul.msk.bf16.vlgmr.msra.gmra.mxu1 %vm1271_vm10, %v2205_v37 }
 0x992   : > { %2517 = vmatpush.bf16.xpose.msra.mxu2 %v2795_v60 }
 0xa0c   : > { %v2351_v51 = vpop.f32.mrf.mxu0  ;;  %v2364_v48 = vpop.f32.mrf.mxu1 }
 0xa0d   : > { %v3976_v8 = vadd.f32 %v2351_v51, %v2207_v39  ;;  %v3978_v56 = vadd.f32 %v2364_v48, %v2208_v52 }
 0xa0f   : > { %v3984_v58 = vmul.f32 0.70710677, %v3976_v8  ;;  %v3987_v27 = vmul.f32 0.70710677, %v3978_v56 }
 0xa11   : > { %v2372_v62 = vmul.f32 %v3984_v58, %v3984_v58  ;;  %v2412_v42 = vmul.f32 %v3987_v27, %v3987_v27 }
 0xa13   : > { %v2373_v57 = vmin.f32 %v2372_v62, 16.0  ;;  %v2413_v28 = vmin.f32 %v2412_v42, 16.0 }
 0xa14   : > { %v2353_v47 = vpop.f32.mrf.mxu0  ;;  %v2366_v63 = vpop.f32.mrf.mxu1 }
 0xa15   : > { %v2374_v45 = vmul.f32 2.1237322e-06, %v2373_v57  ;;  %v2385_v31 = vmul.f32 3.8918573e-05, %v2373_v57  ;;  %v2414_v2 = vmul.f32 2.1237322e-06, %v2413_v28 }
 0xa16   : > { %v2425_v11 = vmul.f32 3.8918573e-05, %v2413_v28 }
 0xa17   : > { %v2375_v43 = vadd.f32 0.00028619796, %v2374_v45  ;;  %v2386_v54 = vadd.f32 0.001143296, %v2385_v31  ;;  %v2415_v7 = vadd.f32 0.00028619796, %v2414_v2 }
 0xa18   : > { %v2426_v12 = vadd.f32 0.001143296, %v2425_v11 }
 0xa19   : > { %v2376_v49 = vmul.f32 %v2375_v43, %v2373_v57  ;;  %v2387_v14 = vmul.f32 %v2386_v54, %v2373_v57  ;;  %v2416_v15 = vmul.f32 %v2415_v7, %v2413_v28 }
 0xa1a   : > { %v2427_v46 = vmul.f32 %v2426_v12, %v2413_v28 }
 0xa1b   : > { %v2377_v16 = vadd.f32 0.0036580483, %v2376_v49  ;;  %v2388_v19 = vadd.f32 0.014752088, %v2387_v14  ;;  %v2417_v30 = vadd.f32 0.0036580483, %v2416_v15 }
 0xa1c   : > { %v2428_v21 = vadd.f32 0.014752088, %v2427_v46 }
 0xa1d   : > { %v2389_v23 = vmul.f32 %v2388_v19, %v2373_v57  ;;  %v2378_v34 = vmul.f32 %v2377_v16, %v2373_v57  ;;  %v2418_v36 = vmul.f32 %v2417_v30, %v2413_v28  ;;  %v2368_v19 = vmul.f32 0.5, %v3976_v8  ;;  %v3002_v8 = vld [vmem:[%s4125_s17] ss:$0 sm:$0xff] }
 0xa1e   : > { %v2429_v9 = vmul.f32 %v2428_v21, %v2413_v28 }
 0xa1f   : > { %v2390_v35 = vadd.f32 0.112945676, %v2389_v23  ;;  %v2379_v38 = vadd.f32 0.05243302, %v2378_v34  ;;  %v2419_v33 = vadd.f32 0.05243302, %v2418_v36 }
 0xa20   : > { %v2430_v18 = vadd.f32 0.112945676, %v2429_v9 }
 0xa21   : > { %v2391_v24 = vmul.f32 %v2390_v35, %v2373_v57  ;;  %v2380_v4 = vmul.f32 %v2379_v38, %v2373_v57  ;;  %v2420_v51 = vmul.f32 %v2419_v33, %v2413_v28 }
 0xa22   : > { %v2431_v37 = vmul.f32 %v2430_v18, %v2413_v28 }
 0xa23   : > { %v2392_v25 = vadd.f32 0.4994258, %v2391_v24  ;;  %v2381_v48 = vadd.f32 0.18741608, %v2380_v4  ;;  %v2421_v55 = vadd.f32 0.18741608, %v2420_v51 }
 0xa24   : > { %v2432_v59 = vadd.f32 0.4994258, %v2431_v37 }
 0xa25   : > { %v2393_v40 = vmul.f32 %v2392_v25, %v2373_v57  ;;  %v2382_v61 = vmul.f32 %v2381_v48, %v2373_v57  ;;  %v2422_v6 = vmul.f32 %v2421_v55, %v2413_v28 }
 0xa26   : > { %v2433_v41 = vmul.f32 %v2432_v59, %v2413_v28 }
 0xa27   : > { %v2394_v39 = vadd.f32 1.0, %v2393_v40  ;;  %v2383_v47 = vadd.f32 1.1283791, %v2382_v61  ;;  %v2423_v31 = vadd.f32 1.1283791, %v2422_v6 }
 0xa28   : > { %v2434_v52 = vadd.f32 1.0, %v2433_v41 }
 0xa29   : > { %3049 = vrcp.f32 %v2394_v39  ;;  %v2406_v63 = vand.u32 2147483648, %v2394_v39  ;;  %v2404_v29 = vand.u32 2147483647, %v2394_v39  ;;  %vm2400_vm11 = vweird.f32 %v2394_v39 }
 0xa2a   : > { %3051 = vrcp.f32 %v2434_v52  ;;  %v2446_v45 = vand.u32 2147483648, %v2434_v52  ;;  %v2444_v3 = vand.u32 2147483647, %v2434_v52  ;;  %vm2440_vm13 = vweird.f32 %v2434_v52 }
 0xa2b   : > { %v2407_v57 = vor.u32 1.1754944e-38, %v2406_v63  ;;  %v2384_v28 = vmul.f32 %v2383_v47, %v3984_v58  ;;  %vm2405_vm14 = vcmp.eq.f32.partialorder %v2404_v29, 8.507059e+37  ;;  %v2424_v10 = vmul.f32 %v2423_v31, %v3987_v27 }
 0xa2c   : > { %v2447_v54 = vor.u32 1.1754944e-38, %v2446_v45  ;;  %vm2445_vm0 = vcmp.eq.f32.partialorder %v2444_v3, 8.507059e+37  ;;  %v2369_v58 = vmul.f32 0.5, %v3978_v56 }
 0xa2f   : > { %v3050_v26 = vpop.eup %3049 }
 0xa30   : > { %v3052_v53 = vpop.eup %3051  ;;  %v2396_v44 = vmul.f32 %v3050_v26, %v2394_v39  ;;  %vm2401_vm8 = vweird.f32 %v3050_v26 }
 0xa31   : > { %v2436_v62 = vmul.f32 %v3052_v53, %v2434_v52  ;;  %vm2441_vm9 = vweird.f32 %v3052_v53  ;;  %vm2402_vm12 = vmor %vm2400_vm11, %vm2401_vm8 }
 0xa32   : > { %v2397_v42 = vsub.f32 1.0, %v2396_v44  ;;  %vm2442_vm15 = vmor %vm2440_vm13, %vm2441_vm9 }
 0xa33   : > { %v2437_v0 = vsub.f32 1.0, %v2436_v62 }
 0xa34   : > { %v2398_v1 = vmul.f32 %v3050_v26, %v2397_v42 }
 0xa35   : > { %v2438_v2 = vmul.f32 %v3052_v53, %v2437_v0 }
 0xa36   : > { %v2399_v11 = vadd.f32 %v3050_v26, %v2398_v1 }
 0xa37   : > { %v2439_v5 = vadd.f32 %v3052_v53, %v2438_v2 }
 0xa38   : > { %v2403_v43 = vsel %vm2402_vm12, %v3050_v26, %v2399_v11 }
 0xa39   : > { %v2408_v7 = vsel %vm2405_vm14, %v2407_v57, %v2403_v43  ;;  %v2443_v12 = vsel %vm2442_vm15, %v3052_v53, %v2439_v5 }
 0xa3a   : > { %v2409_v49 = vmul.f32 %v2408_v7, %v2384_v28  ;;  %v2448_v14 = vsel %vm2445_vm0, %v2447_v54, %v2443_v12 }
 0xa3b   : > { %v2449_v15 = vmul.f32 %v2448_v14, %v2424_v10 }
 0xa3c   : > { %v2790_v46 = vclamps-f32 %v2409_v49, 1.0 }
 0xa3d   : > { %v2791_v16 = vclamps-f32 %v2449_v15, 1.0 }
 0xa3e   : > { %v2452_v21 = vadd.f32 1.0, %v2790_v46 }
 0xa3f   : > { %v2453_v22 = vadd.f32 1.0, %v2791_v16 }
 0xa40   : > { %v2454_v20 = vmul.f32 %v2452_v21, %v2368_v19 }
 0xa41   : > { %v2455_v23 = vmul.f32 %v2453_v22, %v2369_v58 }
 0xa42   : > { %v2465_v30 = vpack.c.bf16 %v2454_v20, %v2454_v20 }
 0xa43   : > { %v2466_v27 = vpack.c.bf16 %v2455_v23, %v2455_v23 }
 0xa44   : > { %2518 = vmatmul.bf16.vlgmr.msra.gmra.mxu2 %v2465_v30 }
 0xa45   : > { %2531 = vmatmul.bf16.vlgmr.msrb.gmra.mxu3 %v2466_v27 }
 0xac7   : > { %v2519_v56 = vpop.f32.mrf.mxu2 }
 0xac8   : > { %v2520_v60 = vadd.f32 %v3002_v8, %v2519_v56  ;;  %v2532_v13 = vpop.f32.mrf.mxu3 }
 0xaca   : > { %v2533_v17 = vadd.f32 %v2532_v13, %v2520_v60 }
 0xacc   : > { %v2536_v9 = vadd.f32 %v2533_v17, %v3872_v50 }
 0xace   : > { %2537 = vst.msk [vmem:[%s4128_s27] sm:$0xff] %vm1271_vm10, %v2536_v9 }
 0xacf   : > { %v2521_v32 = vpop.f32.mrf.mxu2 }
 0xad0   : > { %3080 = shalt.err (!%p3077_p7)
}
 0xad1   : > { %2870 = dma.vmem_to_hbm [thread:$0]  (%p3305_p3), %s2554_s4, 128, %s2556_s5, %s2539_s16   ;;  %v2534_v50 = vpop.f32.mrf.mxu3 }
 0xad2 PF: > { %s4130_s29 = sld [smem:[#allocation7_spill]]  ;;  %p2876_p9 = scmp.ge.s32.totalorder %s3147_s30, 2 }
 0xad4   : > { %p2873_p10 = pnand %p2876_p9, %p3314_p8 }
 0xad6   : > { %p2874_p11 = pneg %p2873_p10 }
 0xad8   : > { %s2567_s19 = sand.u32 1, %s4130_s29  }
 0xad9   : > { %s2568_s27 = scalar_lea.sflag [#allocation5], %s2567_s19 }
 0xada   : > { %3114 = dma.done.wait (%p2874_p11), %s2568_s27, 128  }
 0xadb   : > { %3116 = vsyncadd (%p2874_p11), %s2568_s27, 4294967168  ;;  %s30_s30 = sadd.s32 1, %s3147_s30   ;;  %s4132_s27 = sld [smem:[#allocation8_spill]] }
 0xadc   : > { %p27_p12 = scmp.ge.s32.totalorder %s30_s30, 6   ;;  %s4133_s28 = sld [smem:[#allocation9_spill]] }
 0xadd   : > { %s4134_s29 = sld [smem:[#allocation10_spill]]  ;;  %s4136_s24 = smov %s3123_s25 }
 0xade   : > { %s4135_s0 = sld [smem:[#allocation11_spill]]  ;;  %s4137_s25 = smov %s3127_s26 }
 0xadf   : > { %s4138_s26 = smov %s3323_s1  ;;  %29 = sbr.rel (!%p27_p12) target bundleno = 14 (0xe), region = 128 }
 0xae4   :  { %2574 = vsyncpa [#allocation5], 1 }
 0xae5   :  { %2576 = vsyncpa [#allocation5 + $0x1], 1 }

// kernel: custom_transformer.2
= control target key start
LH: loop header
LB: loop body
LE: loop exit
PB: predicated region body
PF: predicated region fallthrough
CT: control target
= control target key end

     0   :  { %s3163_s24 = smov 0   ;;  %s3165_s25 = smov 0   ;;  %s3911_s0 = inlined_call_operand.vmem [shape: f32[2,16,64], index: 0, kind: input, shape index: {}]   ;;  %s3912_s1 = inlined_call_operand.vmem [shape: f32[1,64], index: 1, kind: input, shape index: {}]   ;;  %s3913_s2 = inlined_call_operand.vmem [shape: f32[1,64], index: 2, kind: input, shape index: {}]   ;;  %s3914_s3 = inlined_call_operand.vmem [shape: bf16[64,64], index: 3, kind: input, shape index: {}]   ;;  %s3915_s4 = inlined_call_operand.vmem [shape: f32[1,64], index: 4, kind: input, shape index: {}]   ;;  %s3916_s5 = inlined_call_operand.vmem [shape: bf16[64,64], index: 5, kind: input, shape index: {}]   ;;  %s3917_s6 = inlined_call_operand.vmem [shape: f32[1,64], index: 6, kind: input, shape index: {}]   ;;  %s3918_s7 = inlined_call_operand.vmem [shape: bf16[64,64], index: 7, kind: input, shape index: {}]   ;;  %s3919_s8 = inlined_call_operand.vmem [shape: f32[1,64], index: 8, kind: input, shape index: {}]   ;;  %s3920_s9 = inlined_call_operand.vmem [shape: bf16[64,64], index: 9, kind: input, shape index: {}]   ;;  %s3921_s10 = inlined_call_operand.vmem [shape: f32[1,64], index: 10, kind: input, shape index: {}]   ;;  %s3922_s11 = inlined_call_operand.vmem [shape: f32[1,64], index: 11, kind: input, shape index: {}]   ;;  %s3923_s12 = inlined_call_operand.vmem [shape: f32[1,64], index: 12, kind: input, shape index: {}]   ;;  %s3924_s13 = inlined_call_operand.vmem [shape: bf16[256,64], index: 13, kind: input, shape index: {}]   ;;  %s3925_s14 = inlined_call_operand.vmem [shape: f32[1,256], index: 14, kind: input, shape index: {}]   ;;  %s3926_s15 = inlined_call_operand.vmem [shape: bf16[64,256], index: 15, kind: input, shape index: {}]   ;;  %s3927_s16 = inlined_call_operand.vmem [shape: f32[1,64], index: 16, kind: input, shape index: {}]   ;;  %s3928_s17 = inlined_call_operand.vmem [shape: f32[2,16,64], index: 17, kind: output, shape index: {}]  }
   0x1   :  { %3931 = sst [smem:[#allocation8_spill]] %s3911_s0  ;;  %s3167_s26 = smov 0  }
   0x2   :  { %3932 = sst [smem:[#allocation9_spill]] %s3912_s1  ;;  %s3169_s27 = smov 0  }
   0x3   :  { %s3171_s28 = smov 0  }
   0x4 LB: > { %3933 = sst [smem:[#allocation4_spill]] %s3048_s26  ;;  %s36_s29 = sadd.s32 1, %s3048_s26  ;;  %s3056_s28 = sphi %s3171_s28, %s27_s28   ;;  %s3052_s27 = sphi %s3169_s27, %s3943_s27   ;;  %s3048_s26 = sphi %s3167_s26, %s3942_s26   ;;  %s3044_s25 = sphi %s3165_s25, %s3941_s25   ;;  %s3040_s24 = sphi %s3163_s24, %s3940_s24  }
   0x5   : > { %3934 = sst [smem:[#allocation5_spill]] %s3052_s27  ;;  %s39_s0 = sadd.s32 1, %s3052_s27 }
   0x6   : > { %p37_p0 = scmp.ge.s32.totalorder %s36_s29, 2  ;;  %p2632_p1 = scmp.ge.s32.totalorder %s3056_s28, 1 }
   0x7   : > { %p501_p2 = scmp.lt.s32.totalorder %s3056_s28, 5 }
   0x8   : > { %s3945_s29 = smov (%p37_p0, %s36_s29), 0  ;;  %s3947_s0 = smov (!%p37_p0, %s39_s0), %s3052_s27 }
   0x9   : > { %3935 = sst [smem:[#allocation6_spill]] %s3945_s29  ;;  %p502_p3 = pnand %p2632_p1, %p501_p2 }
   0xa   : > { %p41_p4 = scmp.ge.s32.totalorder %s3947_s0, 2  ;;  %p556_p5 = scmp.lt.s32.totalorder (!%p502_p3), %s3044_s25, 1 }
   0xb   : > { %505 = sbr.rel (%p502_p3) target bundleno = 2753 (0xac1), region = 88  ;;  %p563_p6 = scmp.lt.s32.totalorder (!%p502_p3), %s3040_s24, 1 }
   0xc   : > { %s3949_s0 = smov (%p41_p4, %s3947_s0), 0  ;;  %s3937_s21 = sld [smem:[#allocation8_spill]] (!%p502_p3) }
   0xd   : > { %3936 = sst [smem:[#allocation7_spill]] %s3949_s0  ;;  %p2637_p7 = scmp.ne.s32.totalorder (!%p502_p3), %s3040_s24, 0 }
  0x10   : > { %s3951_s25 = smov (!%p556_p5, %s3044_s25), 1  ;;  %s3938_s1 = sld [smem:[#allocation9_spill]] (!%p2637_p7) }
  0x11   : > { %s564_s30 = scalar_select %p563_p6, %s3040_s24, 1 }
  0x12   : > { %s2825_s18 = sshll.u32 %s3951_s25, 4  ;;  %s2635_s19 = sshll.u32 %s3951_s25, 1 }
  0x13   : > { %s3200_s22 = scalar_lea.vmem %s3937_s21, %s2825_s18  ;;  %s566_s23 = sadd.s32 %s2635_s19, %s564_s30 }
  0x14   : > { %s2636_s29 = sshll.u32 %s566_s23, 3  ;;  %573 = sbr.rel (%p2637_p7) target bundleno = 622 (0x26e), region = 92 }
  0x15   : > { %s3205_s0 = scalar_lea.vmem %s3928_s17, %s2636_s29  ;;  %s3059_s26 = smov (!%p2637_p7), 80  }
  0x16   : > { %s3060_s27 = smov (!%p2637_p7), 112   ;;  %s3061_s18 = smov (!%p2637_p7), 96  }
  0x19   : > { %v574_v0 = vld [vmem:[%s3200_s22] sm:$0xff]  ;;  %vm578_vm0 = vcmask 523264   ;;  %v575_v2 = vld [vmem:[%s3200_s22 + $0x8] sm:$0xff]  ;;  %v3058_v4 = vmov 64.0   ;;  %v2829_v21 = vld [vmem:[%s3916_s5 + $0x18] sm:$0xff]  ;;  %vm723_vm8 = vcmask 1047556  }
  0x1a   : > { %v579_v1 = vsel %vm578_vm0, %v574_v0, 0.0  ;;  %v582_v3 = vsel %vm578_vm0, %v575_v2, 0.0  ;;  %2955 = vrcp.f32 %v3058_v4  ;;  %v2833_v22 = vld [vmem:[%s3918_s7 + $0x18] sm:$0xff]  ;;  %v686_v23 = vsel %vm578_vm0, %v2829_v21, 0  ;;  %v2828_v25 = vld [vmem:[%s3916_s5 + $0x10] sm:$0xff]  ;;  %v2827_v29 = vld [vmem:[%s3916_s5 + $0x8] sm:$0xff] }
  0x1b   : > { %580 = vadd.xlane.f32.xlu0 %v579_v1  ;;  %v1002_v24 = vsel %vm578_vm0, %v2833_v22, 0  ;;  %692 = vmatpush.bf16.xpose.msra.mxu0 %v686_v23  ;;  %v2832_v26 = vld [vmem:[%s3918_s7 + $0x10] sm:$0xff]  ;;  %v683_v27 = vsel %vm578_vm0, %v2828_v25, 0  ;;  %v2831_v30 = vld [vmem:[%s3918_s7 + $0x8] sm:$0xff]  ;;  %v680_v31 = vsel %vm578_vm0, %v2827_v29, 0  ;;  %v2826_v33 = vld [vmem:[%s3916_s5] sm:$0xff] }
  0x1c   : > { %1008 = vmatpush.bf16.xpose.msra.mxu1 %v1002_v24  ;;  %v999_v28 = vsel %vm578_vm0, %v2832_v26, 0  ;;  %v996_v32 = vsel %vm578_vm0, %v2831_v30, 0  ;;  %v2830_v34 = vld [vmem:[%s3918_s7] sm:$0xff]  ;;  %v677_v35 = vsel %vm578_vm0, %v2826_v33, 0  ;;  %vm951_vm9 = vcmask 125952  }
  0x1d   : > { %v993_v36 = vsel %vm578_vm0, %v2830_v34, 0  ;;  %v2951_v56 = vld [vmem:[%s3938_s1] ss:$0 sm:$0xff] }
  0x1e   : > { %v2952_v61 = vld [vmem:[%s3913_s2] ss:$0 sm:$0xff] }
  0x1f   : > { %v2953_v4 = vld [vmem:[%s3917_s6] ss:$0 sm:$0xff] }
  0x20   : > { %v2956_v5 = vpop.eup %2955 }
  0x21   : > { %v586_v6 = vmul.f32 64.0, %v2956_v5  ;;  %vm590_vm1 = vweird.f32 %v2956_v5 }
  0x23   : > { %583 = vadd.xlane.f32.xlu0 %v582_v3  ;;  %v587_v7 = vsub.f32 1.0, %v586_v6  ;;  %693 = vmatpush.bf16.xpose.msra.mxu0 %v683_v27 }
  0x24   : > { %1009 = vmatpush.bf16.xpose.msra.mxu1 %v999_v28 }
  0x25   : > { %v588_v8 = vmul.f32 %v2956_v5, %v587_v7 }
  0x27   : > { %v589_v9 = vadd.f32 %v2956_v5, %v588_v8 }
  0x29   : > { %v591_v10 = vsel %vm590_vm1, %v2956_v5, %v589_v9 }
  0x2b   : > { %694 = vmatpush.bf16.xpose.msra.mxu0 %v680_v31 }
  0x2c   : > { %1010 = vmatpush.bf16.xpose.msra.mxu1 %v996_v32 }
  0x33   : > { %695 = vmatpush.bf16.xpose.msra.mxu0 %v677_v35 }
  0x34   : > { %1011 = vmatpush.bf16.xpose.msra.mxu1 %v993_v36 }
  0x8e   : > { %v581_v11 = vpop.xlane.xlu0 %580 }
  0x8f   : > { %v592_v12 = vmul.f32 %v591_v10, %v581_v11 }
  0x91   : > { %v594_v13 = vsub.f32 %v574_v0, %v592_v12 }
  0x93   : > { %v596_v14 = vmul.f32 %v594_v13, %v594_v13 }
  0x95   : > { %v598_v15 = vsel %vm578_vm0, %v596_v14, 0.0 }
  0x96   : > { %599 = vadd.xlane.f32.xlu1 %v598_v15  ;;  %v584_v16 = vpop.xlane.xlu0 %583 }
  0x97   : > { %v593_v17 = vmul.f32 %v591_v10, %v584_v16 }
  0x99   : > { %v595_v18 = vsub.f32 %v575_v2, %v593_v17 }
  0x9b   : > { %v597_v19 = vmul.f32 %v595_v18, %v595_v18 }
  0x9d   : > { %v601_v20 = vsel %vm578_vm0, %v597_v19, 0.0 }
  0x9e   : > { %602 = vadd.xlane.f32.xlu1 %v601_v20  ;;  %v3062_v20 = vmov 1983009808  }
  0x9f   : > { %v728_v21 = vunpack.c.l.s4 %v3062_v20 }
  0xa1   : > { %v3260_v28 = vunpack.c.0.s8 %v728_v21 }
 0x109   : > { %v600_v37 = vpop.xlane.xlu1 %599 }
 0x10a   : > { %v604_v38 = vmul.f32 %v600_v37, %v591_v10 }
 0x10c   : > { %v606_v39 = vadd.f32 1e-05, %v604_v38 }
 0x10e   : > { %2957 = vrsqrt.f32 %v606_v39  ;;  %vm614_vm3 = vweird.f32 %v606_v39 }
 0x111   : > { %v603_v40 = vpop.xlane.xlu1 %602 }
 0x112   : > { %v605_v41 = vmul.f32 %v603_v40, %v591_v10  ;;  %v2954_v10 = vld [vmem:[%s3919_s8] ss:$0 sm:$0xff]  ;;  %v3063_v40 = vmov 1934713408  }
 0x114   : > { %v2958_v42 = vpop.eup %2957  ;;  %v607_v43 = vadd.f32 1e-05, %v605_v41  ;;  %v752_v41 = vunpack.c.l.s4 %v3063_v40 }
 0x115   : > { %v609_v44 = vmul.f32 %v2958_v42, %v606_v39  ;;  %vm615_vm2 = vweird.f32 %v2958_v42 }
 0x116   : > { %2959 = vrsqrt.f32 %v607_v43  ;;  %vm616_vm4 = vmor %vm614_vm3, %vm615_vm2  ;;  %vm624_vm6 = vweird.f32 %v607_v43 }
 0x117   : > { %v610_v45 = vmul.f32 %v2958_v42, %v609_v44 }
 0x119   : > { %v611_v46 = vmul.f32 0.5, %v610_v45 }
 0x11b   : > { %v612_v47 = vsub.f32 1.5, %v611_v46 }
 0x11c   : > { %v2960_v48 = vpop.eup %2959 }
 0x11d   : > { %v613_v49 = vmul.f32 %v2958_v42, %v612_v47  ;;  %v619_v50 = vmul.f32 %v2960_v48, %v607_v43  ;;  %vm625_vm5 = vweird.f32 %v2960_v48 }
 0x11e   : > { %vm626_vm7 = vmor %vm624_vm6, %vm625_vm5 }
 0x11f   : > { %v620_v51 = vmul.f32 %v2960_v48, %v619_v50  ;;  %v617_v52 = vsel %vm616_vm4, %v2958_v42, %v613_v49 }
 0x120   : > { %v628_v55 = vmul.f32 %v617_v52, %v594_v13  ;;  %v3288_v52 = vunpack.c.0.s8 %v752_v41 }
 0x121   : > { %v621_v53 = vmul.f32 0.5, %v620_v51 }
 0x122   : > { %v633_v60 = vmul.f32 %v2951_v56, %v628_v55 }
 0x123   : > { %v622_v54 = vsub.f32 1.5, %v621_v53 }
 0x124   : > { %v638_v63 = vadd.f32 %v2952_v61, %v633_v60 }
 0x125   : > { %v623_v57 = vmul.f32 %v2960_v48, %v622_v54 }
 0x127   : > { %v627_v58 = vsel %vm626_vm7, %v2960_v48, %v623_v57 }
 0x128   : > { %v629_v59 = vmul.f32 %v627_v58, %v595_v18 }
 0x12a   : > { %v634_v62 = vmul.f32 %v2951_v56, %v629_v59 }
 0x12c   : > { %v639_v0 = vadd.f32 %v2952_v61, %v634_v62 }
 0x12e   : > { %v649_v1 = vpack.c.bf16 %v639_v0, %v638_v63 }
 0x130   : > { %2654 = vmatmul.msk.bf16.vlgmr.msra.gmra.mxu0 %vm578_vm0, %v649_v1  ;;  %2671 = vmatmul.msk.bf16.vlgmr.msra.gmra.mxu1 %vm578_vm0, %v649_v1 }
 0x1ad   : > { %v697_v2 = vpop.f32.mrf.mxu0  ;;  %v1013_v3 = vpop.f32.mrf.mxu1 }
 0x1ae   : > { %v698_v6 = vadd.f32 %v2953_v4, %v697_v2  ;;  %v1014_v12 = vadd.f32 %v2954_v10, %v1013_v3 }
 0x1b0   : > { %v725_v27 = vrot.slane %v698_v6, 4  ;;  %v1040_v29 = vrot.slane %v1014_v12, 4 }
 0x1b5   : > { %v699_v5 = vpop.f32.mrf.mxu0  ;;  %v1015_v9 = vpop.f32.mrf.mxu1 }
 0x1b6   : > { %v700_v7 = vadd.f32 %v2953_v4, %v699_v5  ;;  %v1016_v11 = vadd.f32 %v2954_v10, %v1015_v9 }
 0x1b8   : > { %v2936_v8 = vpack.i.bf16 %v700_v7, %v698_v6  ;;  %v2926_v13 = vpack.i.bf16 %v1016_v11, %v1014_v12  ;;  %v781_v26 = vrot.slane %v700_v7, 4  ;;  %v1096_v30 = vrot.slane %v1016_v11, 4 }
 0x1ba   : > { %2937 = vrot.lane.b32.xlu1 %v2936_v8, %s3059_s26  ;;  %2932 = vrot.lane.b32.xlu0 %v2936_v8, %s3060_s27 }
 0x1bb   : > { %2922 = vrot.lane.b32.xlu2 %v2936_v8, %s3061_s18 }
 0x1c3   : > { %2927 = vrot.lane.b32.xlu2 %v2926_v13, %s3061_s18 }
 0x1cb   : > { %2942 = vrot.lane.b32.xlu2 %v2926_v13, %s3060_s27 }
 0x1d3   : > { %2947 = vrot.lane.b32.xlu2 %v2926_v13, %s3059_s26 }
 0x215   : > { %v2923_v14 = vpop.permute.xlu2 %2922 }
 0x216   : > { %v2925_v15 = vunpack.i.h.bf16 %v2923_v14  ;;  %v2924_v16 = vunpack.i.l.bf16 %v2923_v14 }
 0x218   : > { %v779_v22 = vrot.slane %v2925_v15, 4  ;;  %v722_v23 = vrot.slane %v2924_v16, 4  ;;  %v782_v32 = vsel %vm723_vm8, %v2925_v15, %v781_v26  ;;  %v726_v34 = vsel %vm723_vm8, %v2924_v16, %v725_v27 }
 0x219   : > { %v3272_v43 = vperm.slane %v782_v32, %v3260_v28  ;;  %v734_v45 = vperm.slane %v726_v34, %v3260_v28 }
 0x21a   : > { %v780_v31 = vsel %vm723_vm8, %v779_v22, %v700_v7  ;;  %v724_v33 = vsel %vm723_vm8, %v722_v23, %v698_v6 }
 0x21b   : > { %v786_v42 = vperm.slane %v780_v31, %v3260_v28  ;;  %v730_v44 = vperm.slane %v724_v33, %v3260_v28  ;;  %v817_v54 = vrot.slane %v3272_v43, 4  ;;  %v761_v56 = vrot.slane %v734_v45, 4 }
 0x21d   : > { %v2928_v17 = vpop.permute.xlu2 %2927  ;;  %v805_v53 = vrot.slane %v786_v42, 4  ;;  %v749_v55 = vrot.slane %v730_v44, 4 }
 0x21e   : > { %v2930_v18 = vunpack.i.h.bf16 %v2928_v17  ;;  %v2929_v19 = vunpack.i.l.bf16 %v2928_v17 }
 0x220   : > { %v1094_v24 = vrot.slane %v2930_v18, 4  ;;  %v1038_v25 = vrot.slane %v2929_v19, 4  ;;  %v1097_v36 = vsel %vm723_vm8, %v2930_v18, %v1096_v30  ;;  %v1041_v38 = vsel %vm723_vm8, %v2929_v19, %v1040_v29 }
 0x221   : > { %v3280_v47 = vperm.slane %v1097_v36, %v3260_v28  ;;  %v3286_v49 = vperm.slane %v1041_v38, %v3260_v28 }
 0x222   : > { %v1095_v35 = vsel %vm723_vm8, %v1094_v24, %v1016_v11  ;;  %v1039_v37 = vsel %vm723_vm8, %v1038_v25, %v1014_v12 }
 0x223   : > { %v3277_v46 = vperm.slane %v1095_v35, %v3260_v28  ;;  %v3283_v48 = vperm.slane %v1039_v37, %v3260_v28  ;;  %v1132_v58 = vrot.slane %v3280_v47, 4  ;;  %v1076_v60 = vrot.slane %v3286_v49, 4 }
 0x225   : > { %v2943_v39 = vpop.permute.xlu2 %2942  ;;  %v1120_v57 = vrot.slane %v3277_v46, 4  ;;  %v1064_v59 = vrot.slane %v3283_v48, 4 }
 0x226   : > { %v2945_v50 = vunpack.i.h.bf16 %v2943_v39  ;;  %v2944_v51 = vunpack.i.l.bf16 %v2943_v39 }
 0x228   : > { %v1108_v4 = vrot.slane %v2945_v50, 4  ;;  %v1052_v5 = vrot.slane %v2944_v51, 4 }
 0x22c   : > { %v2938_v61 = vpop.permute.xlu1 %2937  ;;  %v2933_v62 = vpop.permute.xlu0 %2932 }
 0x22d   : > { %v2940_v63 = vunpack.i.h.bf16 %v2938_v61  ;;  %v2939_v0 = vunpack.i.l.bf16 %v2938_v61  ;;  %v2935_v1 = vunpack.i.h.bf16 %v2933_v62  ;;  %v2934_v2 = vunpack.i.l.bf16 %v2933_v62  ;;  %v2948_v3 = vpop.permute.xlu2 %2947 }
 0x22e   : > { %v2950_v6 = vunpack.i.h.bf16 %v2948_v3  ;;  %v2949_v7 = vunpack.i.l.bf16 %v2948_v3 }
 0x22f   : > { %v791_v8 = vrot.slane %v2940_v63, 4  ;;  %v735_v9 = vrot.slane %v2939_v0, 4  ;;  %v793_v10 = vrot.slane %v2935_v1, 4  ;;  %v737_v11 = vrot.slane %v2934_v2, 4 }
 0x230   : > { %v1106_v12 = vrot.slane %v2950_v6, 4  ;;  %v1050_v13 = vrot.slane %v2949_v7, 4  ;;  %v1053_v14 = vsel %vm723_vm8, %v2949_v7, %v1052_v5  ;;  %v1109_v15 = vsel %vm723_vm8, %v2950_v6, %v1108_v4 }
 0x231   : > { %v792_v16 = vsel %vm723_vm8, %v791_v8, %v2935_v1  ;;  %v794_v17 = vsel %vm723_vm8, %v2940_v63, %v793_v10  ;;  %v736_v18 = vsel %vm723_vm8, %v735_v9, %v2934_v2  ;;  %v738_v19 = vsel %vm723_vm8, %v2939_v0, %v737_v11 }
 0x232   : > { %v798_v20 = vperm.slane %v792_v16, %v3260_v28  ;;  %v802_v21 = vperm.slane %v794_v17, %v3260_v28  ;;  %v742_v22 = vperm.slane %v736_v18, %v3260_v28  ;;  %v746_v23 = vperm.slane %v738_v19, %v3260_v28 }
 0x233   : > { %v3306_v24 = vsel %vm723_vm8, %v1050_v13, %v2944_v51  ;;  %v3309_v25 = vperm.slane %v1053_v14, %v3260_v28  ;;  %v3312_v26 = vsel %vm723_vm8, %v1106_v12, %v2945_v50  ;;  %v3315_v27 = vperm.slane %v1109_v15, %v3260_v28 }
 0x234   : > { %v803_v29 = vrot.slane %v798_v20, 4  ;;  %v815_v30 = vrot.slane %v802_v21, 4  ;;  %v747_v31 = vrot.slane %v742_v22, 4  ;;  %v750_v32 = vsel %vm723_vm8, %v742_v22, %v749_v55 }
 0x235   : > { %v758_v33 = vperm.slane %v750_v32, %v3288_v52  ;;  %v759_v34 = vrot.slane %v746_v23, 4  ;;  %v762_v35 = vsel %vm723_vm8, %v746_v23, %v761_v56  ;;  %v806_v36 = vsel %vm723_vm8, %v798_v20, %v805_v53 }
 0x236   : > { %v748_v37 = vsel %vm723_vm8, %v747_v31, %v730_v44  ;;  %v770_v38 = vperm.slane %v762_v35, %v3288_v52  ;;  %v804_v39 = vsel %vm723_vm8, %v803_v29, %v786_v42  ;;  %v814_v40 = vperm.slane %v806_v36, %v3288_v52 }
 0x237   : > { %v754_v41 = vperm.slane %v748_v37, %v3288_v52  ;;  %v760_v50 = vsel %vm723_vm8, %v759_v34, %v734_v45  ;;  %v773_v51 = vrot.slane %v758_v33, 4  ;;  %v810_v55 = vperm.slane %v804_v39, %v3288_v52 }
 0x238   : > { %v766_v61 = vperm.slane %v760_v50, %v3288_v52  ;;  %v777_v56 = vrot.slane %v770_v38, 4  ;;  %v816_v53 = vsel %vm723_vm8, %v815_v30, %v3272_v43  ;;  %v818_v44 = vsel %vm723_vm8, %v802_v21, %v817_v54 }
 0x239   : > { %v771_v62 = vrot.slane %v754_v41, 4  ;;  %v774_v42 = vsel %vm723_vm8, 0.0, %v773_v51  ;;  %v822_v63 = vperm.slane %v816_v53, %v3288_v52  ;;  %v826_v0 = vperm.slane %v818_v44, %v3288_v52 }
 0x23a   : > { %v775_v1 = vrot.slane %v766_v61, 4  ;;  %v778_v45 = vsel %vm723_vm8, 0.0, %v777_v56  ;;  %v827_v2 = vrot.slane %v810_v55, 4  ;;  %v829_v3 = vrot.slane %v814_v40, 4 }
 0x23b   : > { %v772_v4 = vsel %vm723_vm8, 0.0, %v771_v62  ;;  %v831_v5 = vrot.slane %v822_v63, 4  ;;  %v833_v6 = vrot.slane %v826_v0, 4  ;;  %v835_v43 = vsel %vm723_vm8, %v773_v51, %v754_v41 }
 0x23c   : > { %v776_v54 = vsel %vm723_vm8, 0.0, %v775_v1  ;;  %v828_v7 = vsel %vm723_vm8, 0.0, %v827_v2  ;;  %v830_v8 = vsel %vm723_vm8, 0.0, %v829_v3  ;;  %v839_v9 = vperm.slane %v835_v43, %v3260_v28 }
 0x23d   : > { %v832_v10 = vsel %vm723_vm8, 0.0, %v831_v5  ;;  %v834_v11 = vsel %vm723_vm8, 0.0, %v833_v6  ;;  %v840_v12 = vrot.slane %v774_v42, 4  ;;  %v846_v13 = vsel %vm723_vm8, %v777_v56, %v766_v61 }
 0x23e   : > { %v850_v14 = vperm.slane %v846_v13, %v3260_v28  ;;  %v851_v15 = vrot.slane %v778_v45, 4  ;;  %v859_v16 = vrot.slane %v839_v9, 4  ;;  %v889_v17 = vsel %vm723_vm8, %v829_v3, %v810_v55 }
 0x23f   : > { %v841_v18 = vsel %vm723_vm8, %v840_v12, %v772_v4  ;;  %v893_v19 = vperm.slane %v889_v17, %v3260_v28  ;;  %v894_v20 = vrot.slane %v830_v8, 4  ;;  %v900_v21 = vsel %vm723_vm8, %v833_v6, %v822_v63 }
 0x240   : > { %v845_v22 = vperm.slane %v841_v18, %v3260_v28  ;;  %v852_v23 = vsel %vm723_vm8, %v851_v15, %v776_v54  ;;  %v871_v29 = vrot.slane %v850_v14, 4  ;;  %v904_v30 = vperm.slane %v900_v21, %v3260_v28 }
 0x241   : > { %v856_v31 = vperm.slane %v852_v23, %v3260_v28  ;;  %v895_v32 = vsel %vm723_vm8, %v894_v20, %v828_v7  ;;  %v905_v33 = vrot.slane %v834_v11, 4  ;;  %v913_v34 = vrot.slane %v893_v19, 4 }
 0x242   : > { %v857_v35 = vrot.slane %v845_v22, 4  ;;  %v860_v36 = vsel %vm723_vm8, %v845_v22, %v859_v16  ;;  %v899_v37 = vperm.slane %v895_v32, %v3260_v28  ;;  %v925_v38 = vrot.slane %v904_v30, 4 }
 0x243   : > { %v868_v39 = vperm.slane %v860_v36, %v3288_v52  ;;  %v869_v40 = vrot.slane %v856_v31, 4  ;;  %v872_v41 = vsel %vm723_vm8, %v856_v31, %v871_v29  ;;  %v906_v50 = vsel %vm723_vm8, %v905_v33, %v832_v10 }
 0x244   : > { %v858_v51 = vsel %vm723_vm8, %v857_v35, %v839_v9  ;;  %v880_v55 = vperm.slane %v872_v41, %v3288_v52  ;;  %v910_v61 = vperm.slane %v906_v50, %v3260_v28  ;;  %v911_v56 = vrot.slane %v899_v37, 4 }
 0x245   : > { %v864_v53 = vperm.slane %v858_v51, %v3288_v52  ;;  %v870_v44 = vsel %vm723_vm8, %v869_v40, %v850_v14  ;;  %v887_v62 = vrot.slane %v868_v39, 4  ;;  %v914_v42 = vsel %vm723_vm8, %v899_v37, %v913_v34 }
 0x246   : > { %v876_v63 = vperm.slane %v870_v44, %v3288_v52  ;;  %v885_v0 = vrot.slane %v880_v55, 4  ;;  %v912_v1 = vsel %vm723_vm8, %v911_v56, %v893_v19  ;;  %v922_v45 = vperm.slane %v914_v42, %v3288_v52 }
 0x247   : > { %v883_v2 = vrot.slane %v864_v53, 4  ;;  %v888_v3 = vsel %vm723_vm8, %v880_v55, %v887_v62  ;;  %v918_v4 = vperm.slane %v912_v1, %v3288_v52  ;;  %v923_v5 = vrot.slane %v910_v61, 4 }
 0x248   : > { %v881_v6 = vrot.slane %v876_v63, 4  ;;  %v886_v43 = vsel %vm723_vm8, %v885_v0, %v868_v39  ;;  %v926_v54 = vsel %vm723_vm8, %v910_v61, %v925_v38  ;;  %v941_v7 = vrot.slane %v922_v45, 4 }
 0x249   : > { %v884_v8 = vsel %vm723_vm8, %v876_v63, %v883_v2  ;;  %v924_v9 = vsel %vm723_vm8, %v923_v5, %v904_v30  ;;  %v934_v10 = vperm.slane %v926_v54, %v3288_v52  ;;  %v937_v11 = vrot.slane %v918_v4, 4 }
 0x24a   : > { %v882_v12 = vsel %vm723_vm8, %v881_v6, %v864_v53  ;;  %v930_v13 = vperm.slane %v924_v9, %v3288_v52  ;;  %v945_v14 = vpack.c.bf16 %v884_v8, %v884_v8  ;;  %v947_v15 = vpack.c.bf16 %v886_v43, %v886_v43 }
 0x24b   : > { %v939_v16 = vrot.slane %v934_v10, 4  ;;  %v942_v17 = vsel %vm723_vm8, %v934_v10, %v941_v7  ;;  %v943_v18 = vpack.c.bf16 %v882_v12, %v882_v12  ;;  %v949_v19 = vpack.c.bf16 %v888_v3, %v888_v3 }
 0x24c   : > { %v935_v20 = vrot.slane %v930_v13, 4  ;;  %v938_v21 = vsel %vm723_vm8, %v930_v13, %v937_v11  ;;  %v950_v22 = vpack.c.bf16 %v942_v17, %v942_v17  ;;  %954 = vst.msk [vmem:[#allocation2 + $0x8] sm:$0xf] %vm951_vm9, %v945_v14  ;;  %v1057_v23 = vperm.slane %v3306_v24, %v3260_v28 }
 0x24d   : > { %v940_v29 = vsel %vm723_vm8, %v939_v16, %v922_v45  ;;  %v946_v30 = vpack.c.bf16 %v938_v21, %v938_v21  ;;  %952 = vst.msk [vmem:[#allocation2] sm:$0xf] %vm951_vm9, %v943_v18  ;;  %v1074_v31 = vrot.slane %v3309_v25, 4  ;;  %v1077_v32 = vsel %vm723_vm8, %v3309_v25, %v1076_v60 }
 0x24e   : > { %v936_v33 = vsel %vm723_vm8, %v935_v20, %v918_v4  ;;  %v948_v34 = vpack.c.bf16 %v940_v29, %v940_v29  ;;  %956 = vst.msk [vmem:[#allocation2 + $0x10] sm:$0xf] %vm951_vm9, %v947_v15  ;;  %v1062_v35 = vrot.slane %v1057_v23, 4  ;;  %v1065_v24 = vsel %vm723_vm8, %v1057_v23, %v1064_v59 }
 0x24f   : > { %v944_v36 = vpack.c.bf16 %v936_v33, %v936_v33  ;;  %955 = vst.msk [vmem:[#allocation2 + $0xc] sm:$0xf] %vm951_vm9, %v946_v30  ;;  %v1073_v37 = vperm.slane %v1065_v24, %v3288_v52  ;;  %v1075_v38 = vsel %vm723_vm8, %v1074_v31, %v3286_v49  ;;  %v1085_v60 = vperm.slane %v1077_v32, %v3288_v52 }
 0x250   : > { %957 = vst.msk [vmem:[#allocation2 + $0x14] sm:$0xf] %vm951_vm9, %v948_v34  ;;  %v1063_v25 = vsel %vm723_vm8, %v1062_v35, %v3283_v48  ;;  %v1081_v39 = vperm.slane %v1075_v38, %v3288_v52  ;;  %v1113_v59 = vperm.slane %v3312_v26, %v3260_v28  ;;  %v1130_v40 = vrot.slane %v3315_v27, 4 }
 0x251   : > { %953 = vst.msk [vmem:[#allocation2 + $0x4] sm:$0xf] %vm951_vm9, %v944_v36  ;;  %v1069_v41 = vperm.slane %v1063_v25, %v3288_v52  ;;  %v1088_v50 = vrot.slane %v1073_v37, 4  ;;  %v1092_v49 = vrot.slane %v1085_v60, 4  ;;  %v1133_v51 = vsel %vm723_vm8, %v3315_v27, %v1132_v58 }
 0x252   : > { %958 = vst.msk [vmem:[#allocation2 + $0x18] sm:$0xf] %vm951_vm9, %v949_v19  ;;  %v1090_v48 = vrot.slane %v1081_v39, 4  ;;  %v1118_v55 = vrot.slane %v1113_v59, 4  ;;  %v1121_v26 = vsel %vm723_vm8, %v1113_v59, %v1120_v57  ;;  %v1131_v61 = vsel %vm723_vm8, %v1130_v40, %v3280_v47 }
 0x253   : > { %959 = vst.msk [vmem:[#allocation2 + $0x1c] sm:$0xf] %vm951_vm9, %v950_v22  ;;  %v1086_v56 = vrot.slane %v1069_v41, 4  ;;  %v1089_v53 = vsel %vm723_vm8, 0.0, %v1088_v50  ;;  %v1093_v44 = vsel %vm723_vm8, 0.0, %v1092_v49  ;;  %v1129_v58 = vperm.slane %v1121_v26, %v3288_v52 }
 0x254   : > { %v1091_v27 = vsel %vm723_vm8, 0.0, %v1090_v48  ;;  %v1119_v62 = vsel %vm723_vm8, %v1118_v55, %v3277_v46  ;;  %v1137_v42 = vperm.slane %v1131_v61, %v3288_v52  ;;  %v1141_v57 = vperm.slane %v1133_v51, %v3288_v52 }
 0x255   : > { %v1087_v47 = vsel %vm723_vm8, 0.0, %v1086_v56  ;;  %v1125_v63 = vperm.slane %v1119_v62, %v3288_v52  ;;  %v1144_v0 = vrot.slane %v1129_v58, 4  ;;  %v1150_v1 = vsel %vm723_vm8, %v1088_v50, %v1069_v41 }
 0x256   : > { %v1146_v45 = vrot.slane %v1137_v42, 4  ;;  %v1148_v2 = vrot.slane %v1141_v57, 4  ;;  %v1154_v3 = vperm.slane %v1150_v1, %v3260_v28  ;;  %v1155_v4 = vrot.slane %v1089_v53, 4 }
 0x257   : > { %v1142_v5 = vrot.slane %v1125_v63, 4  ;;  %v1145_v6 = vsel %vm723_vm8, 0.0, %v1144_v0  ;;  %v1161_v46 = vsel %vm723_vm8, %v1092_v49, %v1081_v39  ;;  %v1166_v43 = vrot.slane %v1093_v44, 4 }
 0x258   : > { %v1147_v54 = vsel %vm723_vm8, 0.0, %v1146_v45  ;;  %v1149_v7 = vsel %vm723_vm8, 0.0, %v1148_v2  ;;  %v1156_v8 = vsel %vm723_vm8, %v1155_v4, %v1087_v47  ;;  %v1165_v9 = vperm.slane %v1161_v46, %v3260_v28 }
 0x259   : > { %v1143_v10 = vsel %vm723_vm8, 0.0, %v1142_v5  ;;  %v1160_v11 = vperm.slane %v1156_v8, %v3260_v28  ;;  %v1167_v12 = vsel %vm723_vm8, %v1166_v43, %v1091_v27  ;;  %v1174_v13 = vrot.slane %v1154_v3, 4 }
 0x25a   : > { %v1171_v14 = vperm.slane %v1167_v12, %v3260_v28  ;;  %v1186_v15 = vrot.slane %v1165_v9, 4  ;;  %v1204_v16 = vsel %vm723_vm8, %v1144_v0, %v1125_v63  ;;  %v1209_v17 = vrot.slane %v1145_v6, 4 }
 0x25b   : > { %v1172_v18 = vrot.slane %v1160_v11, 4  ;;  %v1175_v19 = vsel %vm723_vm8, %v1160_v11, %v1174_v13  ;;  %v1208_v20 = vperm.slane %v1204_v16, %v3260_v28  ;;  %v1215_v21 = vsel %vm723_vm8, %v1148_v2, %v1137_v42 }
 0x25c   : > { %v1183_v22 = vperm.slane %v1175_v19, %v3288_v52  ;;  %v1184_v23 = vrot.slane %v1171_v14, 4  ;;  %v1187_v29 = vsel %vm723_vm8, %v1171_v14, %v1186_v15  ;;  %v1210_v30 = vsel %vm723_vm8, %v1209_v17, %v1143_v10 }
 0x25d   : > { %v1173_v31 = vsel %vm723_vm8, %v1172_v18, %v1154_v3  ;;  %v1195_v32 = vperm.slane %v1187_v29, %v3288_v52  ;;  %v1214_v33 = vperm.slane %v1210_v30, %v3260_v28  ;;  %v1219_v34 = vperm.slane %v1215_v21, %v3260_v28 }
 0x25e   : > { %v1179_v35 = vperm.slane %v1173_v31, %v3288_v52  ;;  %v1185_v24 = vsel %vm723_vm8, %v1184_v23, %v1165_v9  ;;  %v1202_v36 = vrot.slane %v1183_v22, 4  ;;  %v1220_v37 = vrot.slane %v1149_v7, 4 }
 0x25f   : > { %v1191_v38 = vperm.slane %v1185_v24, %v3288_v52  ;;  %v1200_v60 = vrot.slane %v1195_v32, 4  ;;  %v1226_v25 = vrot.slane %v1214_v33, 4  ;;  %v1228_v39 = vrot.slane %v1208_v20, 4 }
 0x260   : > { %v1198_v59 = vrot.slane %v1179_v35, 4  ;;  %v1203_v40 = vsel %vm723_vm8, %v1195_v32, %v1202_v36  ;;  %v1221_v41 = vsel %vm723_vm8, %v1220_v37, %v1147_v54  ;;  %v1240_v50 = vrot.slane %v1219_v34, 4 }
 0x261   : > { %v1196_v49 = vrot.slane %v1191_v38, 4  ;;  %v1201_v51 = vsel %vm723_vm8, %v1200_v60, %v1183_v22  ;;  %v1225_v48 = vperm.slane %v1221_v41, %v3260_v28  ;;  %v1227_v55 = vsel %vm723_vm8, %v1226_v25, %v1208_v20 }
 0x262   : > { %v1199_v26 = vsel %vm723_vm8, %v1191_v38, %v1198_v59  ;;  %v1229_v61 = vsel %vm723_vm8, %v1214_v33, %v1228_v39  ;;  %v1233_v56 = vperm.slane %v1227_v55, %v3288_v52  ;;  %v1262_v53 = vpack.c.bf16 %v1201_v51, %v1201_v51 }
 0x263   : > { %v1197_v44 = vsel %vm723_vm8, %v1196_v49, %v1179_v35  ;;  %v1237_v58 = vperm.slane %v1229_v61, %v3288_v52  ;;  %v1238_v27 = vrot.slane %v1225_v48, 4  ;;  %v1241_v62 = vsel %vm723_vm8, %v1225_v48, %v1240_v50 }
 0x264   : > { %v1249_v42 = vperm.slane %v1241_v62, %v3288_v52  ;;  %v1252_v57 = vrot.slane %v1233_v56, 4  ;;  %v1258_v28 = vpack.c.bf16 %v1197_v44, %v1197_v44  ;;  %v1260_v47 = vpack.c.bf16 %v1199_v26, %v1199_v26  ;;  %1270 = vst.msk [vmem:[#allocation3 + $0x10] sm:$0xf] %vm951_vm9, %v1262_v53 }
 0x265   : > { %v1239_v63 = vsel %vm723_vm8, %v1238_v27, %v1219_v34  ;;  %v1256_v0 = vrot.slane %v1237_v58, 4  ;;  %v1264_v1 = vpack.c.bf16 %v1203_v40, %v1203_v40 }
 0x266   : > { %v1245_v45 = vperm.slane %v1239_v63, %v3288_v52  ;;  %v1254_v2 = vrot.slane %v1249_v42, 4  ;;  %1266 = vst.msk [vmem:[#allocation3] sm:$0xf] %vm951_vm9, %v1258_v28 }
 0x267   : > { %v1257_v3 = vsel %vm723_vm8, %v1249_v42, %v1256_v0  ;;  %1268 = vst.msk [vmem:[#allocation3 + $0x8] sm:$0xf] %vm951_vm9, %v1260_v47 }
 0x268   : > { %v1250_v4 = vrot.slane %v1245_v45, 4  ;;  %v1253_v5 = vsel %vm723_vm8, %v1245_v45, %v1252_v57  ;;  %v1255_v6 = vsel %vm723_vm8, %v1254_v2, %v1237_v58  ;;  %v1265_v46 = vpack.c.bf16 %v1257_v3, %v1257_v3  ;;  %1272 = vst.msk [vmem:[#allocation3 + $0x18] sm:$0xf] %vm951_vm9, %v1264_v1 }
 0x269   : > { %v1261_v43 = vpack.c.bf16 %v1253_v5, %v1253_v5  ;;  %v1263_v54 = vpack.c.bf16 %v1255_v6, %v1255_v6 }
 0x26a   : > { %v1251_v7 = vsel %vm723_vm8, %v1250_v4, %v1233_v56  ;;  %1273 = vst.msk [vmem:[#allocation3 + $0x1c] sm:$0xf] %vm951_vm9, %v1265_v46 }
 0x26b   : > { %v1259_v52 = vpack.c.bf16 %v1251_v7, %v1251_v7  ;;  %1269 = vst.msk [vmem:[#allocation3 + $0xc] sm:$0xf] %vm951_vm9, %v1261_v43 }
 0x26c   : > { %1271 = vst.msk [vmem:[#allocation3 + $0x14] sm:$0xf] %vm951_vm9, %v1263_v54 }
 0x26d   : > { %1267 = vst.msk [vmem:[#allocation3 + $0x4] sm:$0xf] %vm951_vm9, %v1259_v52 }
 0x26e PF: > { %s2672_s19 = sshll.u32 %s3040_s24, 3  ;;  %vm1279_vm10 = vcmask 523264   ;;  %v3064_v10 = vmov 64.0   ;;  %v2837_v11 = vld [vmem:[%s3914_s3 + $0x18] sm:$0xff]  ;;  %v2836_v29 = vld [vmem:[%s3914_s3 + $0x10] sm:$0xff]  ;;  %v2835_v31 = vld [vmem:[%s3914_s3 + $0x8] sm:$0xff] }
 0x26f   : > { %s1275_s1 = scalar_lea.vmem %s3200_s22, %s2672_s19  ;;  %2968 = vrcp.f32 %v3064_v10  ;;  %v1363_v12 = vsel %vm1279_vm10, %v2837_v11, 0  ;;  %v1360_v30 = vsel %vm1279_vm10, %v2836_v29, 0  ;;  %v1357_v32 = vsel %vm1279_vm10, %v2835_v31, 0  ;;  %v2834_v33 = vld [vmem:[%s3914_s3] sm:$0xff]  ;;  %s3939_s18 = sld [smem:[#allocation9_spill]] }
 0x270   : > { %v3484_v8 = vld [vmem:[%s1275_s1] sm:$0xff]  ;;  %1369 = vmatpush.bf16.xpose.msra.mxu0 %v1363_v12  ;;  %v1354_v34 = vsel %vm1279_vm10, %v2834_v33, 0  ;;  %s3065_s24 = smov 80   ;;  %s3066_s22 = smov 112   ;;  %v1506_v58 = vld [vmem:[#allocation2 + $0x10] sm:$0xf] }
 0x271   : > { %v1280_v9 = vsel %vm1279_vm10, %v3484_v8, 0.0  ;;  %v2962_v49 = vld [vmem:[%s3913_s2] ss:$0 sm:$0xff]  ;;  %s3067_s23 = smov 96   ;;  %vm1512_vm15 = vcmask 130048   ;;  %vm1390_vm0 = vcmask 1047556  }
 0x272   : > { %1281 = vadd.xlane.f32.xlu0 %v1280_v9  ;;  %v2963_v26 = vld [vmem:[%s3915_s4] ss:$0 sm:$0xff]  ;;  %v1555_v62 = vsel %vm1512_vm15, %v1506_v58, 0  ;;  %v1507_v57 = vld [vmem:[#allocation2 + $0x18] sm:$0xf]  ;;  %vm1589_vm1 = vcmask 64512  }
 0x273   : > { %v1504_v27 = vld [vmem:[#allocation2] sm:$0xf]  ;;  %v1732_v28 = vld [vmem:[#allocation2 + $0xc] sm:$0xf]  ;;  %1564 = vmatpush.bf16.xpose.msra.mxu3 %v1555_v62  ;;  %v1574_v47 = vsel %vm1512_vm15, %v1507_v57, 0  ;;  %vm1653_vm2 = vcmask 1043456  }
 0x274   : > { %v1517_v42 = vsel %vm1512_vm15, %v1504_v27, 0  ;;  %v1756_v63 = vsel %vm1512_vm15, %v1732_v28, 0  ;;  %1583 = vmatpush.bf16.xpose.msra.mxu1 %v1574_v47  ;;  %v3068_v1 = vmov 1983009808   ;;  %v1505_v6 = vld [vmem:[#allocation2 + $0x8] sm:$0xf] }
 0x275   : > { %v2969_v13 = vpop.eup %2968  ;;  %v2961_v40 = vld [vmem:[%s3939_s18] ss:$0 sm:$0xff]  ;;  %1526 = vmatpush.bf16.xpose.msra.mxu2 %v1517_v42  ;;  %v1395_v45 = vunpack.c.l.s4 %v3068_v1  ;;  %v1536_v43 = vsel %vm1512_vm15, %v1505_v6, 0  ;;  %v3069_v7 = vmov 1934713408   ;;  %s3070_s25 = smov 48  }
 0x276   : > { %v1284_v14 = vmul.f32 64.0, %v2969_v13  ;;  %vm1288_vm11 = vweird.f32 %v2969_v13  ;;  %v1419_v52 = vunpack.c.l.s4 %v3069_v7  ;;  %s3071_s26 = smov 32   ;;  %s3072_s27 = smov 16   ;;  %vm2082_vm3 = vcmask 261120  }
 0x277   : > { %v3525_v46 = vunpack.c.0.s8 %v1395_v45  ;;  %vm2084_vm4 = vcmask 392192  }
 0x278   : > { %v1285_v15 = vsub.f32 1.0, %v1284_v14  ;;  %1370 = vmatpush.bf16.xpose.msra.mxu0 %v1360_v30 }
 0x27a   : > { %v1286_v16 = vmul.f32 %v2969_v13, %v1285_v15 }
 0x27c   : > { %v1287_v17 = vadd.f32 %v2969_v13, %v1286_v16 }
 0x27d   : > { %1545 = vmatpush.bf16.xpose.msrb.mxu2 %v1536_v43 }
 0x27e   : > { %v3492_v18 = vsel %vm1288_vm11, %v2969_v13, %v1287_v17  ;;  %v3531_v13 = vunpack.c.0.s8 %v1419_v52 }
 0x280   : > { %1371 = vmatpush.bf16.xpose.msra.mxu0 %v1357_v32 }
 0x288   : > { %1372 = vmatpush.bf16.xpose.msra.mxu0 %v1354_v34 }
 0x290   : > { %1765 = vmatpush.bf16.xpose.msrb.mxu0 %v1756_v63 }
 0x2e5   : > { %v1282_v19 = vpop.xlane.xlu0 %1281 }
 0x2e6   : > { %v1290_v20 = vmul.f32 %v3492_v18, %v1282_v19 }
 0x2e8   : > { %v1291_v21 = vsub.f32 %v3484_v8, %v1290_v20 }
 0x2ea   : > { %v1292_v22 = vmul.f32 %v1291_v21, %v1291_v21 }
 0x2ec   : > { %v1293_v23 = vsel %vm1279_vm10, %v1292_v22, 0.0 }
 0x2ed   : > { %1294 = vadd.xlane.f32.xlu0 %v1293_v23 }
 0x360   : > { %v1295_v35 = vpop.xlane.xlu0 %1294 }
 0x361   : > { %v1296_v24 = vmul.f32 %v1295_v35, %v3492_v18 }
 0x363   : > { %v1297_v36 = vadd.f32 1e-05, %v1296_v24 }
 0x365   : > { %2970 = vrsqrt.f32 %v1297_v36  ;;  %vm1304_vm13 = vweird.f32 %v1297_v36 }
 0x36b   : > { %v2971_v37 = vpop.eup %2970 }
 0x36c   : > { %v1299_v38 = vmul.f32 %v2971_v37, %v1297_v36  ;;  %vm1305_vm12 = vweird.f32 %v2971_v37 }
 0x36d   : > { %vm1306_vm14 = vmor %vm1304_vm13, %vm1305_vm12 }
 0x36e   : > { %v1300_v60 = vmul.f32 %v2971_v37, %v1299_v38 }
 0x370   : > { %v1301_v25 = vmul.f32 0.5, %v1300_v60 }
 0x372   : > { %v1302_v39 = vsub.f32 1.5, %v1301_v25 }
 0x374   : > { %v1303_v59 = vmul.f32 %v2971_v37, %v1302_v39 }
 0x376   : > { %v1307_v41 = vsel %vm1306_vm14, %v2971_v37, %v1303_v59 }
 0x377   : > { %v1308_v50 = vmul.f32 %v1307_v41, %v1291_v21 }
 0x379   : > { %v1312_v51 = vmul.f32 %v2961_v40, %v1308_v50 }
 0x37b   : > { %v1316_v48 = vadd.f32 %v2962_v49, %v1312_v51 }
 0x37d   : > { %v1326_v55 = vpack.c.bf16 %v1316_v48, %v1316_v48 }
 0x37f   : > { %2689 = vmatmul.msk.bf16.vlgmr.msra.gmra.mxu0 %vm1279_vm10, %v1326_v55 }
 0x3fc   : > { %v1374_v61 = vpop.f32.mrf.mxu0 }
 0x3fd   : > { %v1375_v56 = vadd.f32 %v2963_v26, %v1374_v61 }
 0x3ff   : > { %v1378_v53 = vmul.f32 0.25, %v1375_v56 }
 0x401   : > { %1386 = vrot.lane.b32.xlu2 %v1378_v53, %s3065_s24  ;;  %1380 = vrot.lane.b32.xlu1 %v1378_v53, %s3066_s22  ;;  %v1392_v10 = vrot.slane %v1378_v53, 4 }
 0x404   : > { %v1376_v44 = vpop.f32.mrf.mxu0 }
 0x409   : > { %1383 = vrot.lane.b32.xlu1 %v1378_v53, %s3067_s23 }
 0x45b   : > { %v1387_v0 = vpop.permute.xlu2 %1386 }
 0x45c   : > { %v1402_v4 = vrot.slane %v1387_v0, 4 }
 0x473   : > { %v1381_v2 = vpop.permute.xlu1 %1380 }
 0x474   : > { %v1404_v3 = vrot.slane %v1381_v2, 4  ;;  %v1403_v54 = vsel %vm1390_vm0, %v1402_v4, %v1381_v2 }
 0x475   : > { %v1409_v11 = vperm.slane %v1403_v54, %v3525_v46 }
 0x476   : > { %v1405_v5 = vsel %vm1390_vm0, %v1387_v0, %v1404_v3 }
 0x477   : > { %v1413_v9 = vperm.slane %v1405_v5, %v3525_v46  ;;  %v1414_v20 = vrot.slane %v1409_v11, 4 }
 0x479   : > { %v1426_v16 = vrot.slane %v1413_v9, 4 }
 0x47b   : > { %v1384_v12 = vpop.permute.xlu1 %1383 }
 0x47c   : > { %v1389_v14 = vrot.slane %v1384_v12, 4  ;;  %v1393_v15 = vsel %vm1390_vm0, %v1384_v12, %v1392_v10 }
 0x47d   : > { %v1401_v17 = vperm.slane %v1393_v15, %v3525_v46 }
 0x47e   : > { %v1391_v19 = vsel %vm1390_vm0, %v1389_v14, %v1378_v53 }
 0x47f   : > { %v1397_v21 = vperm.slane %v1391_v19, %v3525_v46  ;;  %v1427_v22 = vsel %vm1390_vm0, %v1426_v16, %v1401_v17  ;;  %v1428_v23 = vrot.slane %v1401_v17, 4 }
 0x480   : > { %v1433_v29 = vperm.slane %v1427_v22, %v3531_v13 }
 0x481   : > { %v1415_v30 = vsel %vm1390_vm0, %v1414_v20, %v1397_v21  ;;  %v1416_v31 = vrot.slane %v1397_v21, 4  ;;  %v1429_v32 = vsel %vm1390_vm0, %v1413_v9, %v1428_v23 }
 0x482   : > { %v1421_v33 = vperm.slane %v1415_v30, %v3531_v13  ;;  %v1437_v34 = vperm.slane %v1429_v32, %v3531_v13  ;;  %v1442_v36 = vrot.slane %v1433_v29, 4 }
 0x483   : > { %v1417_v35 = vsel %vm1390_vm0, %v1409_v11, %v1416_v31 }
 0x484   : > { %v1425_v24 = vperm.slane %v1417_v35, %v3531_v13  ;;  %v1444_v37 = vrot.slane %v1437_v34, 4  ;;  %v1438_v38 = vrot.slane %v1421_v33, 4  ;;  %v1443_v50 = vsel %vm1390_vm0, 0.0, %v1442_v36  ;;  %v1508_v34 = vld [vmem:[#allocation3] sm:$0xf] }
 0x485   : > { %v1655_v35 = vsel %vm1653_vm2, %v1508_v34, 0 }
 0x486   : > { %v1440_v60 = vrot.slane %v1425_v24, 4  ;;  %v1445_v25 = vsel %vm1390_vm0, 0.0, %v1444_v37  ;;  %v1457_v39 = vsel %vm1390_vm0, %v1444_v37, %v1433_v29  ;;  %v1439_v61 = vsel %vm1390_vm0, 0.0, %v1438_v38  ;;  %v1509_v24 = vld [vmem:[#allocation3 + $0x8] sm:$0xf] }
 0x487   : > { %v1461_v59 = vperm.slane %v1457_v39, %v3525_v46  ;;  %v1462_v40 = vrot.slane %v1445_v25, 4  ;;  %v1674_v36 = vsel %vm1653_vm2, %v1509_v24, 0  ;;  %v1511_v37 = vld [vmem:[#allocation3 + $0x18] sm:$0xf]  ;;  %v1736_v39 = vld [vmem:[#allocation3 + $0xc] sm:$0xf] }
 0x488   : > { %v1441_v41 = vsel %vm1390_vm0, 0.0, %v1440_v60  ;;  %v1446_v49 = vsel %vm1390_vm0, %v1440_v60, %v1421_v33  ;;  %1683 = vmatpush.bf16.msrb.mxu3 %v1674_v36  ;;  %v1712_v38 = vsel %vm1653_vm2, %v1511_v37, 0 }
 0x489   : > { %v1451_v51 = vrot.slane %v1441_v41, 4  ;;  %v1463_v48 = vsel %vm1390_vm0, %v1462_v40, %v1443_v50  ;;  %v1482_v55 = vrot.slane %v1461_v59, 4  ;;  %v1450_v26 = vperm.slane %v1446_v49, %v3525_v46  ;;  %v1731_v41 = vld [vmem:[#allocation2 + $0x4] sm:$0xf] }
 0x48a   : > { %v1467_v56 = vperm.slane %v1463_v48, %v3525_v46  ;;  %v1894_v40 = vsel %vm1653_vm2, %v1736_v39, 0  ;;  %v1740_v50 = vsel %vm1512_vm15, %v1731_v41, 0  ;;  %v1510_v48 = vld [vmem:[#allocation3 + $0x10] sm:$0xf] }
 0x48b   : > { %v1452_v53 = vsel %vm1390_vm0, %v1451_v51, %v1439_v61  ;;  %v1470_v44 = vrot.slane %v1450_v26, 4  ;;  %1903 = vmatpush.bf16.msra.mxu0 %v1894_v40 }
 0x48c   : > { %v1456_v58 = vperm.slane %v1452_v53, %v3525_v46  ;;  %v1483_v27 = vsel %vm1390_vm0, %v1467_v56, %v1482_v55  ;;  %v1480_v62 = vrot.slane %v1467_v56, 4  ;;  %v1693_v55 = vsel %vm1653_vm2, %v1510_v48, 0  ;;  %v1734_v53 = vld [vmem:[#allocation2 + $0x1c] sm:$0xf] }
 0x48d   : > { %v1491_v42 = vperm.slane %v1483_v27, %v3531_v13  ;;  %1702 = vmatpush.bf16.msrb.mxu1 %v1693_v55 }
 0x48e   : > { %v1471_v57 = vsel %vm1390_vm0, %v1456_v58, %v1470_v44  ;;  %v1468_v28 = vrot.slane %v1456_v58, 4  ;;  %v1481_v47 = vsel %vm1390_vm0, %v1480_v62, %v1461_v59  ;;  %v1788_v62 = vsel %vm1512_vm15, %v1734_v53, 0 }
 0x48f   : > { %v1479_v63 = vperm.slane %v1471_v57, %v3531_v13  ;;  %v1496_v0 = vrot.slane %v1491_v42, 4  ;;  %v1487_v1 = vperm.slane %v1481_v47, %v3531_v13 }
 0x490   : > { %v1469_v45 = vsel %vm1390_vm0, %v1468_v28, %v1450_v26 }
 0x491   : > { %v1497_v2 = vsel %vm1390_vm0, %v1496_v0, %v1479_v63  ;;  %v1475_v3 = vperm.slane %v1469_v45, %v3531_v13  ;;  %v1492_v4 = vrot.slane %v1487_v1, 4  ;;  %v1498_v5 = vrot.slane %v1479_v63, 4 }
 0x492   : > { %v3566_v6 = vpack.c.bf16 %v1497_v2, %v1497_v2 }
 0x493   : > { %v1493_v43 = vsel %vm1390_vm0, %v1492_v4, %v1475_v3  ;;  %v1494_v54 = vrot.slane %v1475_v3, 4  ;;  %v1499_v7 = vsel %vm1390_vm0, %v1491_v42, %v1498_v5  ;;  %v1733_v42 = vld [vmem:[#allocation2 + $0x14] sm:$0xf] }
 0x494   : > { %2692 = vmatmul.msk.bf16.vlgmr.msra.gmra.mxu3 %vm1512_vm15, %v3566_v6  ;;  %v3572_v52 = vpack.c.bf16 %v1493_v43, %v1493_v43  ;;  %v3574_v9 = vpack.c.bf16 %v1499_v7, %v1499_v7  ;;  %v1772_v57 = vsel %vm1512_vm15, %v1733_v42, 0 }
 0x495   : > { %v1495_v10 = vsel %vm1390_vm0, %v1487_v1, %v1494_v54  ;;  %1749 = vmatpush.bf16.xpose.msra.mxu3 %v1740_v50 }
 0x496   : > { %2690 = vmatmul.msk.bf16.vlgmr.msra.gmra.mxu2 %vm1512_vm15, %v3572_v52  ;;  %2693 = vmatmul.msk.bf16.vlgmr.msra.gmra.mxu1 %vm1512_vm15, %v3574_v9  ;;  %v1501_v11 = vpack.c.bf16 %v1495_v10, %v1495_v10 }
 0x497   : > { %1664 = vmatpush.bf16.msra.mxu2 %v1655_v35  ;;  %1781 = vmatpush.bf16.xpose.msra.mxu1 %v1772_v57 }
 0x498   : > { %2699 = vmatmul.msk.bf16.vlgmr.msrb.gmra.mxu0 %vm1512_vm15, %v1501_v11 }
 0x4a6   : > { %2691 = vmatmul.msk.bf16.vlgmr.msrb.gmra.mxu2 %vm1512_vm15, %v1501_v11 }
 0x4a7   : > { %1721 = vmatpush.bf16.msrb.mxu2 %v1712_v38 }
 0x513   : > { %v1585_v12 = vpop.f32.mrf.mxu1 }
 0x514   : > { %v1599_v14 = vsel %vm1589_vm1, %v1585_v12, -inf }
 0x515   : > { %1600 = vmax.xlane.f32.xlu1 %v1599_v14  ;;  %v3584_v15 = vpop.f32.mrf.mxu0 }
 0x516   : > { %v1806_v29 = vsel %vm1589_vm1, %v3584_v15, -inf }
 0x517   : > { %v3586_v16 = vpop.f32.mrf.mxu3 }
 0x518   : > { %v1596_v33 = vsel %vm1589_vm1, %v3586_v16, -inf }
 0x519   : > { %v1528_v17 = vpop.f32.mrf.mxu2 }
 0x51a   : > { %v1590_v19 = vsel %vm1589_vm1, %v1528_v17, -inf }
 0x51b   : > { %v1587_v20 = vpop.f32.mrf.mxu1  ;;  %1591 = vmax.xlane.f32.xlu2 %v1590_v19 }
 0x51d   : > { %v1769_v21 = vpop.f32.mrf.mxu0 }
 0x51f   : > { %v1568_v22 = vpop.f32.mrf.mxu3 }
 0x521   : > { %v1530_v23 = vpop.f32.mrf.mxu2 }
 0x523   : > { %1807 = vmax.xlane.f32.xlu2 %v1806_v29 }
 0x529   : > { %v1547_v30 = vpop.f32.mrf.mxu2 }
 0x52a   : > { %v1593_v31 = vsel %vm1589_vm1, %v1547_v30, -inf }
 0x52b   : > { %1594 = vmax.xlane.f32.xlu0 %v1593_v31 }
 0x531   : > { %v1549_v32 = vpop.f32.mrf.mxu2 }
 0x533   : > { %1597 = vmax.xlane.f32.xlu0 %v1596_v33 }
 0x588   : > { %v3597_v60 = vpop.xlane.xlu1 %1600 }
 0x589   : > { %v1617_v25 = vsub.f32 %v1585_v12, %v3597_v60  ;;  %v1605_v57 = vsub.f32 -inf, %v3597_v60 }
 0x58b   : > { %v1624_v59 = vmul.f32 1.442695, %v1617_v25 }
 0x58d   : > { %2972 = vpow2.f32 %v1624_v59 }
 0x58e   : > { %v3602_v49 = vpop.xlane.xlu2 %1591 }
 0x58f   : > { %v1614_v51 = vsub.f32 %v1528_v17, %v3602_v49 }
 0x591   : > { %v1618_v26 = vmul.f32 1.442695, %v1614_v51 }
 0x593   : > { %v2973_v61 = vpop.eup %2972  ;;  %2974 = vpow2.f32 %v1618_v26  ;;  %v1735_v26 = vld [vmem:[#allocation3 + $0x4] sm:$0xf] }
 0x594   : > { %v1639_v56 = vsel %vm1589_vm1, %v2973_v61, 0.0  ;;  %v1649_v10 = vpack.c.bf16 %v2973_v61, %v2973_v61  ;;  %v1875_v61 = vsel %vm1653_vm2, %v1735_v26, 0 }
 0x595   : > { %1640 = vadd.xlane.f32.xlu1 %v1639_v56  ;;  %v1738_v56 = vld [vmem:[#allocation3 + $0x1c] sm:$0xf] }
 0x596   : > { %v1808_v28 = vpop.xlane.xlu2 %1807  ;;  %v1932_v53 = vsel %vm1653_vm2, %v1738_v56, 0 }
 0x599   : > { %v2975_v44 = vpop.eup %2974 }
 0x59a   : > { %v1630_v58 = vsel %vm1589_vm1, %v2975_v44, 0.0  ;;  %v1646_v27 = vpack.c.bf16 %v2975_v44, %v2975_v44  ;;  %v1737_v44 = vld [vmem:[#allocation3 + $0x14] sm:$0xf] }
 0x59b   : > { %1631 = vadd.xlane.f32.xlu2 %v1630_v58  ;;  %v1913_v58 = vsel %vm1653_vm2, %v1737_v44, 0 }
 0x59c   : > { %2694 = vmatmul.msk.bf16.vlgmr.msra.gmra.mxu2 %vm1589_vm1, %v1646_v27  ;;  %v1602_v27 = vsub.f32 -inf, %v3602_v49 }
 0x59d   : > { %1797 = vmatpush.bf16.xpose.msra.mxu2 %v1788_v62 }
 0x59e   : > { %v1595_v47 = vpop.xlane.xlu0 %1594  ;;  %v1606_v62 = vmul.f32 1.442695, %v1602_v27 }
 0x59f   : > { %v1615_v63 = vsub.f32 %v1547_v30, %v1595_v47  ;;  %v1816_v0 = vmax.f32 %v1595_v47, %v1808_v28 }
 0x5a1   : > { %v1620_v1 = vmul.f32 1.442695, %v1615_v63  ;;  %v1820_v45 = vsub.f32 %v1595_v47, %v1816_v0  ;;  %v1832_v2 = vsub.f32 %v3584_v15, %v1816_v0  ;;  %v1612_v0 = vmul.f32 1.442695, %v1605_v57 }
 0x5a3   : > { %2976 = vpow2.f32 %v1620_v1  ;;  %v1837_v3 = vmul.f32 1.442695, %v1832_v2  ;;  %v1825_v20 = vmul.f32 1.442695, %v1820_v45 }
 0x5a5   : > { %2978 = vpow2.f32 %v1837_v3 }
 0x5a6   : > { %v3612_v4 = vpop.xlane.xlu0 %1597 }
 0x5a7   : > { %v1616_v5 = vsub.f32 %v3586_v16, %v3612_v4  ;;  %v1603_v16 = vsub.f32 -inf, %v1595_v47 }
 0x5a9   : > { %v2977_v43 = vpop.eup %2976  ;;  %v1622_v54 = vmul.f32 1.442695, %v1616_v5  ;;  %v1608_v19 = vmul.f32 1.442695, %v1603_v16  ;;  %v1604_v5 = vsub.f32 -inf, %v3612_v4 }
 0x5aa   : > { %v1647_v7 = vpack.c.bf16 %v2977_v43, %v2977_v43  ;;  %v1633_v55 = vsel %vm1589_vm1, %v2977_v43, 0.0 }
 0x5ab   : > { %2980 = vpow2.f32 %v1622_v54  ;;  %v3616_v11 = vpop.eup %2978 }
 0x5ac   : > { %2695 = vmatmul.msk.bf16.vlgmr.msrb.gmra.mxu3 %vm1589_vm1, %v1647_v7  ;;  %2697 = vmatmul.msk.bf16.vlgmr.msrb.gmra.mxu2 %vm1589_vm1, %v1649_v10  ;;  %v1868_v12 = vpack.c.bf16 %v3616_v11, %v3616_v11  ;;  %2982 = vpow2.f32 %v1608_v19 }
 0x5ad   : > { %2984 = vpow2.f32 %v1825_v20  ;;  %1884 = vmatpush.bf16.msrb.mxu3 %v1875_v61  ;;  %1941 = vmatpush.bf16.msrb.mxu2 %v1932_v53  ;;  %v1850_v53 = vsel %vm1589_vm1, %v3616_v11, 0.0 }
 0x5ae   : > { %2703 = vmatmul.msk.bf16.vlgmr.msra.gmra.mxu0 %vm1589_vm1, %v1868_v12  ;;  %2986 = vpow2.f32 %v1606_v62 }
 0x5b1   : > { %v2981_v14 = vpop.eup %2980 }
 0x5b2   : > { %v1648_v15 = vpack.c.bf16 %v2981_v14, %v2981_v14  ;;  %v2983_v22 = vpop.eup %2982  ;;  %v1636_v48 = vsel %vm1589_vm1, %v2981_v14, 0.0  ;;  %v1610_v14 = vmul.f32 1.442695, %v1604_v5 }
 0x5b3   : > { %v3632_v29 = vmul.f32 0.0, %v2983_v22  ;;  %v3637_v31 = vpop.eup %2984 }
 0x5b4   : > { %2696 = vmatmul.msk.bf16.vlgmr.msrb.gmra.mxu1 %vm1589_vm1, %v1648_v15  ;;  %v2987_v2 = vpop.eup %2986 }
 0x5b5   : > { %1922 = vmatpush.bf16.msrb.mxu1 %v1913_v58  ;;  %v1626_v54 = vmul.f32 0.0, %v2987_v2 }
 0x5bc   : > { %2698 = vmatmul.msk.bf16.vlgmr.msra.gmra.mxu3 %vm1512_vm15, %v3572_v52  ;;  %2701 = vmatmul.msk.bf16.vlgmr.msra.gmra.mxu2 %vm1512_vm15, %v3574_v9 }
 0x5c4   : > { %2700 = vmatmul.msk.bf16.vlgmr.msra.gmra.mxu1 %vm1512_vm15, %v3566_v6 }
 0x608   : > { %v1641_v44 = vpop.xlane.xlu1 %1640 }
 0x61f   : > { %v3630_v17 = vpop.f32.mrf.mxu2 }
 0x620   : > { %v1727_v12 = vadd.f32 %v3630_v17, %v1626_v54 }
 0x627   : > { %v1668_v21 = vpop.f32.mrf.mxu2 }
 0x62b   : > { %v1905_v23 = vpop.f32.mrf.mxu0 }
 0x62f   : > { %v1685_v30 = vpop.f32.mrf.mxu3  ;;  %v3634_v52 = vpop.f32.mrf.mxu2 }
 0x630   : > { %v1728_v9 = vadd.f32 %v1685_v30, %v3632_v29 }
 0x631   : > { %v3639_v6 = vpop.f32.mrf.mxu1 }
 0x632   : > { %v1864_v32 = vmul.f32 %v3637_v31, %v1728_v9 }
 0x633   : > { %v1907_v34 = vpop.f32.mrf.mxu0 }
 0x634   : > { %v3642_v33 = vadd.f32 %v1905_v23, %v1864_v32 }
 0x637   : > { %v1687_v35 = vpop.f32.mrf.mxu3  ;;  %v1725_v24 = vpop.f32.mrf.mxu2 }
 0x639   : > { %v1706_v36 = vpop.f32.mrf.mxu1 }
 0x63f   : > { %v1751_v37 = vpop.f32.mrf.mxu3  ;;  %v1799_v38 = vpop.f32.mrf.mxu2 }
 0x640   : > { %v1803_v25 = vsel %vm1589_vm1, %v1751_v37, -inf  ;;  %v1812_v41 = vsel %vm1589_vm1, %v1799_v38, -inf }
 0x641   : > { %1804 = vmax.xlane.f32.xlu0 %v1803_v25  ;;  %v3645_v39 = vpop.f32.mrf.mxu1 }
 0x642   : > { %v1809_v51 = vsel %vm1589_vm1, %v3645_v39, -inf }
 0x647   : > { %v1753_v59 = vpop.f32.mrf.mxu3  ;;  %v1801_v40 = vpop.f32.mrf.mxu2 }
 0x649   : > { %v1785_v50 = vpop.f32.mrf.mxu1  ;;  %1813 = vmax.xlane.f32.xlu0 %v1812_v41 }
 0x651   : > { %1810 = vmax.xlane.f32.xlu0 %v1809_v51 }
 0x659   : > { %1637 = vadd.xlane.f32.xlu0 %v1636_v48 }
 0x661   : > { %1634 = vadd.xlane.f32.xlu0 %v1633_v55 }
 0x6b4   : > { %v1805_v42 = vpop.xlane.xlu0 %1804 }
 0x6b5   : > { %v1815_v28 = vmax.f32 %v3602_v49, %v1805_v42 }
 0x6b7   : > { %v1819_v47 = vsub.f32 %v3602_v49, %v1815_v28  ;;  %v1831_v63 = vsub.f32 %v1751_v37, %v1815_v28 }
 0x6b9   : > { %v1823_v1 = vmul.f32 1.442695, %v1819_v47  ;;  %v1835_v45 = vmul.f32 1.442695, %v1831_v63 }
 0x6bb   : > { %2988 = vpow2.f32 %v1823_v1 }
 0x6bc   : > { %2990 = vpow2.f32 %v1835_v45  ;;  %v1814_v3 = vpop.xlane.xlu0 %1813 }
 0x6bd   : > { %2992 = vpow2.f32 %v1612_v0  ;;  %v1818_v43 = vmax.f32 %v3597_v60, %v1814_v3 }
 0x6bf   : > { %v1822_v7 = vsub.f32 %v3597_v60, %v1818_v43  ;;  %v1834_v10 = vsub.f32 %v1799_v38, %v1818_v43 }
 0x6c1   : > { %v2989_v49 = vpop.eup %2988  ;;  %v1829_v15 = vmul.f32 1.442695, %v1822_v7  ;;  %v1841_v16 = vmul.f32 1.442695, %v1834_v10 }
 0x6c2   : > { %v2991_v19 = vpop.eup %2990  ;;  %v1863_v20 = vmul.f32 %v2989_v49, %v1727_v12 }
 0x6c3   : > { %v2993_v21 = vpop.eup %2992  ;;  %v1867_v22 = vpack.c.bf16 %v2991_v19, %v2991_v19  ;;  %2994 = vpow2.f32 %v1829_v15  ;;  %v1847_v23 = vsel %vm1589_vm1, %v2991_v19, 0.0 }
 0x6c4   : > { %2996 = vpow2.f32 %v1841_v16  ;;  %1848 = vadd.xlane.f32.xlu1 %v1847_v23  ;;  %v1811_v30 = vpop.xlane.xlu0 %1810  ;;  %v1629_v17 = vmul.f32 0.0, %v2993_v21 }
 0x6c5   : > { %2998 = vpow2.f32 %v1610_v14  ;;  %2702 = vmatmul.msk.bf16.vlgmr.msrb.gmra.mxu3 %vm1589_vm1, %v1867_v22  ;;  %v1817_v60 = vmax.f32 %v3612_v4, %v1811_v30 }
 0x6c6   : > { %v1730_v34 = vadd.f32 %v3634_v52, %v1629_v17  ;;  %v1645_v57 = vadd.f32 %v1641_v44, %v1629_v17 }
 0x6c7   : > { %v1821_v9 = vsub.f32 %v3612_v4, %v1817_v60  ;;  %v1833_v32 = vsub.f32 %v3645_v39, %v1817_v60 }
 0x6c9   : > { %v2995_v35 = vpop.eup %2994  ;;  %v1827_v24 = vmul.f32 1.442695, %v1821_v9  ;;  %v1839_v36 = vmul.f32 1.442695, %v1833_v32 }
 0x6ca   : > { %v2997_v37 = vpop.eup %2996  ;;  %v1866_v38 = vmul.f32 %v2995_v35, %v1730_v34  ;;  %v1846_v63 = vmul.f32 %v2995_v35, %v1645_v57 }
 0x6cb   : > { %v2999_v25 = vpop.eup %2998  ;;  %v1870_v59 = vpack.c.bf16 %v2997_v37, %v2997_v37  ;;  %3000 = vpow2.f32 %v1827_v24  ;;  %v1856_v40 = vsel %vm1589_vm1, %v2997_v37, 0.0 }
 0x6cc   : > { %3002 = vpow2.f32 %v1839_v36  ;;  %1857 = vadd.xlane.f32.xlu0 %v1856_v40  ;;  %v1638_v41 = vpop.xlane.xlu0 %1637  ;;  %v1628_v4 = vmul.f32 0.0, %v2999_v25 }
 0x6cd   : > { %2705 = vmatmul.msk.bf16.vlgmr.msrb.gmra.mxu2 %vm1589_vm1, %v1870_v59 }
 0x6ce   : > { %v1729_v39 = vadd.f32 %v3639_v6, %v1628_v4  ;;  %v1632_v6 = vpop.xlane.xlu2 %1631  ;;  %v1644_v47 = vadd.f32 %v1638_v41, %v1628_v4 }
 0x6cf   : > { %v1642_v58 = vadd.f32 %v1632_v6, %v1626_v54 }
 0x6d1   : > { %v3001_v50 = vpop.eup %3000  ;;  %v1843_v62 = vmul.f32 %v2989_v49, %v1642_v58 }
 0x6d2   : > { %v3003_v52 = vpop.eup %3002  ;;  %v1865_v51 = vmul.f32 %v3001_v50, %v1729_v39 }
 0x6d3   : > { %v1869_v48 = vpack.c.bf16 %v3003_v52, %v3003_v52  ;;  %v1853_v55 = vsel %vm1589_vm1, %v3003_v52, 0.0 }
 0x6d4   : > { %1854 = vadd.xlane.f32.xlu2 %v1853_v55  ;;  %v1635_v26 = vpop.xlane.xlu0 %1634 }
 0x6d5   : > { %2704 = vmatmul.msk.bf16.vlgmr.msrb.gmra.mxu1 %vm1589_vm1, %v1869_v48  ;;  %v1643_v61 = vadd.f32 %v1635_v26, %v3632_v29  ;;  %v1845_v29 = vmul.f32 %v3001_v50, %v1644_v47 }
 0x6d7   : > { %v1844_v56 = vmul.f32 %v3637_v31, %v1643_v61 }
 0x6dc   : > { %1851 = vadd.xlane.f32.xlu2 %v1850_v53 }
 0x737   : > { %v1849_v27 = vpop.xlane.xlu1 %1848 }
 0x738   : > { %v1859_v42 = vadd.f32 %v1849_v27, %v1843_v62 }
 0x73a   : > { %3004 = vrcp.f32 %v1859_v42 }
 0x73f   : > { %v1858_v28 = vpop.xlane.xlu0 %1857 }
 0x740   : > { %v1862_v1 = vadd.f32 %v1858_v28, %v1846_v63  ;;  %v3005_v2 = vpop.eup %3004 }
 0x742   : > { %3006 = vrcp.f32 %v1862_v1 }
 0x747   : > { %v1855_v0 = vpop.xlane.xlu2 %1854 }
 0x748   : > { %v1886_v45 = vpop.f32.mrf.mxu3  ;;  %v1861_v3 = vadd.f32 %v1855_v0, %v1845_v29  ;;  %v3007_v12 = vpop.eup %3006 }
 0x749   : > { %v1947_v31 = vadd.f32 %v1886_v45, %v1863_v20 }
 0x74a   : > { %3008 = vrcp.f32 %v1861_v3 }
 0x74b   : > { %v1955_v11 = vmul.f32 %v3005_v2, %v1947_v31 }
 0x74d   : > { %v1961_v19 = vrot.slane %v1955_v11, 4 }
 0x74f   : > { %v1852_v5 = vpop.xlane.xlu2 %1851 }
 0x750   : > { %v1860_v43 = vadd.f32 %v1852_v5, %v1844_v56  ;;  %v1888_v54 = vpop.f32.mrf.mxu3  ;;  %v1943_v7 = vpop.f32.mrf.mxu2 }
 0x751   : > { %v1950_v10 = vadd.f32 %v1943_v7, %v1866_v38  ;;  %v3009_v16 = vpop.eup %3008 }
 0x752   : > { %3010 = vrcp.f32 %v1860_v43  ;;  %v1924_v49 = vpop.f32.mrf.mxu1 }
 0x753   : > { %v1958_v14 = vmul.f32 %v3007_v12, %v1950_v10  ;;  %v1949_v15 = vadd.f32 %v1924_v49, %v1865_v51 }
 0x755   : > { %v1957_v21 = vmul.f32 %v3009_v16, %v1949_v15  ;;  %v1971_v17 = vrot.slane %v1958_v14, 4 }
 0x757   : > { %v1959_v22 = vrot.slane %v1957_v21, 4  ;;  %v1962_v20 = vsel %vm1390_vm0, %v1957_v21, %v1961_v19 }
 0x758   : > { %v3011_v23 = vpop.eup %3010  ;;  %v1945_v30 = vpop.f32.mrf.mxu2  ;;  %v1970_v34 = vperm.slane %v1962_v20, %v3525_v46 }
 0x759   : > { %v1956_v60 = vmul.f32 %v3011_v23, %v3642_v33  ;;  %v1960_v9 = vsel %vm1390_vm0, %v1959_v22, %v1955_v11 }
 0x75a   : > { %v1966_v32 = vperm.slane %v1960_v9, %v3525_v46  ;;  %v1926_v35 = vpop.f32.mrf.mxu1  ;;  %v1997_v41 = vrot.slane %v1970_v34, 4 }
 0x75b   : > { %v1973_v24 = vrot.slane %v1956_v60, 4  ;;  %v1972_v36 = vsel %vm1390_vm0, %v1971_v17, %v1956_v60  ;;  %v2841_v60 = vld [vmem:[%s3920_s9 + $0x18] sm:$0xff]  ;;  %v2840_v17 = vld [vmem:[%s3920_s9 + $0x10] sm:$0xff]  ;;  %v2838_v35 = vld [vmem:[%s3920_s9] sm:$0xff] }
 0x75c   : > { %v1978_v37 = vperm.slane %v1972_v36, %v3525_v46  ;;  %v1985_v38 = vrot.slane %v1966_v32, 4  ;;  %v2129_v9 = vsel %vm1279_vm10, %v2840_v17, 0 }
 0x75d   : > { %v1974_v25 = vsel %vm1390_vm0, %v1958_v14, %v1973_v24  ;;  %v2123_v24 = vsel %vm1279_vm10, %v2838_v35, 0 }
 0x75e   : > { %v1982_v59 = vperm.slane %v1974_v25, %v3525_v46  ;;  %v1983_v40 = vrot.slane %v1978_v37, 4  ;;  %v1986_v33 = vsel %vm1390_vm0, %v1978_v37, %v1985_v38 }
 0x75f   : > { %v1994_v4 = vperm.slane %v1986_v33, %v3531_v13 }
 0x760   : > { %v1995_v39 = vrot.slane %v1982_v59, 4  ;;  %v1984_v50 = vsel %vm1390_vm0, %v1983_v40, %v1966_v32  ;;  %v1998_v52 = vsel %vm1390_vm0, %v1982_v59, %v1997_v41  ;;  %v2839_v32 = vld [vmem:[%s3920_s9 + $0x8] sm:$0xff]  ;;  %v2964_v41 = vld [vmem:[%s3921_s10] ss:$0 sm:$0xff] }
 0x761   : > { %v1990_v51 = vperm.slane %v1984_v50, %v3531_v13  ;;  %v2006_v48 = vperm.slane %v1998_v52, %v3531_v13  ;;  %v2009_v55 = vrot.slane %v1994_v4, 4 }
 0x762   : > { %v1996_v26 = vsel %vm1390_vm0, %v1995_v39, %v1970_v34  ;;  %v2126_v34 = vsel %vm1279_vm10, %v2839_v32, 0  ;;  %v2965_v32 = vld [vmem:[%s3922_s11] ss:$0 sm:$0xff] }
 0x763   : > { %v2002_v61 = vperm.slane %v1996_v26, %v3531_v13  ;;  %v2007_v56 = vrot.slane %v1990_v51, 4  ;;  %v2013_v53 = vrot.slane %v2006_v48, 4  ;;  %v2010_v44 = vsel %vm1390_vm0, 0.0, %v2009_v55  ;;  %v2849_v48 = vld [vmem:[%s3924_s13 + $0x38] sm:$0xff] }
 0x764   : > { %v2015_v6 = vsel %vm1390_vm0, %v2009_v55, %v1990_v51  ;;  %v2020_v58 = vrot.slane %v2010_v44, 4  ;;  %v2857_v55 = vld [vmem:[%s3924_s13 + $0x78] sm:$0xff]  ;;  %v2324_v26 = vsel %vm1279_vm10, %v2849_v48, 0 }
 0x765   : > { %v2011_v27 = vrot.slane %v2002_v61, 4  ;;  %v2008_v62 = vsel %vm1390_vm0, 0.0, %v2007_v56  ;;  %v2014_v42 = vsel %vm1390_vm0, 0.0, %v2013_v53  ;;  %v2019_v57 = vperm.slane %v2015_v6, %v3525_v46  ;;  %2350 = vmatpush.bf16.xpose.msrb.mxu0 %v2324_v26  ;;  %v2856_v56 = vld [vmem:[%s3924_s13 + $0x70] sm:$0xff]  ;;  %v2847_v6 = vld [vmem:[%s3924_s13 + $0x28] sm:$0xff] }
 0x766   : > { %v2021_v28 = vsel %vm1390_vm0, %v2020_v58, %v2008_v62  ;;  %v2026_v47 = vsel %vm1390_vm0, %v2013_v53, %v2002_v61  ;;  %v2031_v63 = vrot.slane %v2014_v42, 4  ;;  %v2348_v61 = vsel %vm1279_vm10, %v2857_v55, 0  ;;  %v2855_v58 = vld [vmem:[%s3924_s13 + $0x68] sm:$0xff]  ;;  %v2846_v42 = vld [vmem:[%s3924_s13 + $0x20] sm:$0xff] }
 0x767   : > { %v2012_v0 = vsel %vm1390_vm0, 0.0, %v2011_v27  ;;  %v2025_v1 = vperm.slane %v2021_v28, %v3525_v46  ;;  %v2030_v29 = vperm.slane %v2026_v47, %v3525_v46  ;;  %v2039_v45 = vrot.slane %v2019_v57, 4  ;;  %2363 = vmatpush.bf16.xpose.msra.mxu1 %v2348_v61  ;;  %v2809_v55 = vld [vmem:[%s3926_s15 + $0x20] sm:$0xf]  ;;  %v2863_v26 = vld [vmem:[%s3926_s15 + $0x24] sm:$0xf0] }
 0x768   : > { %v2032_v31 = vsel %vm1390_vm0, %v2031_v63, %v2012_v0  ;;  %v2345_v44 = vsel %vm1279_vm10, %v2856_v56, 0  ;;  %v2318_v27 = vsel %vm1279_vm10, %v2847_v6, 0  ;;  %v2342_v62 = vsel %vm1279_vm10, %v2855_v58, 0  ;;  %v2862_v61 = vld [vmem:[%s3926_s15 + $0x24] sm:$0xf] }
 0x769   : > { %v2036_v2 = vperm.slane %v2032_v31, %v3525_v46  ;;  %v2040_v3 = vsel %vm1390_vm0, %v2025_v1, %v2039_v45  ;;  %v2051_v11 = vrot.slane %v2030_v29, 4  ;;  %v2037_v5 = vrot.slane %v2025_v1, 4  ;;  %v2853_v45 = vld [vmem:[%s3924_s13 + $0x58] sm:$0xff] }
 0x76a   : > { %v2048_v43 = vperm.slane %v2040_v3, %v3531_v13  ;;  %v2315_v47 = vsel %vm1279_vm10, %v2846_v42, 0 }
 0x76b   : > { %v2052_v54 = vsel %vm1390_vm0, %v2036_v2, %v2051_v11  ;;  %v2038_v7 = vsel %vm1390_vm0, %v2037_v5, %v2019_v57  ;;  %v2049_v10 = vrot.slane %v2036_v2, 4  ;;  %v2854_v57 = vld [vmem:[%s3924_s13 + $0x60] sm:$0xff]  ;;  %v2336_v11 = vsel %vm1279_vm10, %v2853_v45, 0  ;;  %v2844_v5 = vld [vmem:[%s3924_s13 + $0x10] sm:$0xff] }
 0x76c   : > { %v2060_v12 = vperm.slane %v2052_v54, %v3531_v13  ;;  %v2067_v49 = vrot.slane %v2048_v43, 4  ;;  %v2044_v14 = vperm.slane %v2038_v7, %v3531_v13  ;;  %v2339_v63 = vsel %vm1279_vm10, %v2854_v57, 0 }
 0x76d   : > { %v2050_v15 = vsel %vm1390_vm0, %v2049_v10, %v2030_v29  ;;  %v2845_v29 = vld [vmem:[%s3924_s13 + $0x18] sm:$0xff]  ;;  %v2309_v54 = vsel %vm1279_vm10, %v2844_v5, 0  ;;  %v2843_v10 = vld [vmem:[%s3924_s13 + $0x8] sm:$0xff] }
 0x76e   : > { %v2068_v46 = vsel %vm1390_vm0, %v2060_v12, %v2067_v49  ;;  %v2065_v16 = vrot.slane %v2060_v12, 4  ;;  %v2056_v19 = vperm.slane %v2050_v15, %v3531_v13  ;;  %v2063_v21 = vrot.slane %v2044_v14, 4  ;;  %v2851_v12 = vld [vmem:[%s3924_s13 + $0x48] sm:$0xff]  ;;  %v2842_v15 = vld [vmem:[%s3924_s13] sm:$0xff]  ;;  %v2803_v5 = vld [vmem:[%s3926_s15 + $0x18] sm:$0xf0] }
 0x76f   : > { %2078 = vrot.lane.b32.xlu2 %v2068_v46, %s3070_s25  ;;  %v2132_v13 = vsel %vm1279_vm10, %v2841_v60, 0  ;;  %2364 = vmatpush.bf16.xpose.msra.mxu1 %v2345_v44  ;;  %v2312_v3 = vsel %vm1279_vm10, %v2845_v29, 0  ;;  %v2306_v49 = vsel %vm1279_vm10, %v2843_v10, 0  ;;  %v2850_v46 = vld [vmem:[%s3924_s13 + $0x40] sm:$0xff]  ;;  %v2811_v44 = vld [vmem:[%s3926_s15 + $0x28] sm:$0xf0] }
 0x770   : > { %v2066_v22 = vsel %vm1390_vm0, %v2065_v16, %v2048_v43  ;;  %v2061_v20 = vrot.slane %v2056_v19, 4  ;;  %v2064_v23 = vsel %vm1390_vm0, %v2056_v19, %v2063_v21  ;;  %2138 = vmatpush.bf16.xpose.msra.mxu3 %v2132_v13  ;;  %v2852_v43 = vld [vmem:[%s3924_s13 + $0x50] sm:$0xff]  ;;  %v2303_v16 = vsel %vm1279_vm10, %v2842_v15, 0 }
 0x771   : > { %2074 = vrot.lane.b32.xlu0 %v2066_v22, %s3071_s26  ;;  %2070 = vrot.lane.b32.xlu1 %v2064_v23, %s3072_s27  ;;  %v2333_v7 = vsel %vm1279_vm10, %v2852_v43, 0  ;;  %v2327_v19 = vsel %vm1279_vm10, %v2850_v46, 0  ;;  %v2814_v6 = vor.u32 %v2862_v61, %v2811_v44  ;;  %v2860_v29 = vld [vmem:[%s3926_s15 + $0x14] sm:$0xf] }
 0x772   : > { %v2062_v30 = vsel %vm1390_vm0, %v2061_v20, %v2044_v14  ;;  %v2330_v14 = vsel %vm1279_vm10, %v2851_v12, 0  ;;  %v2806_v10 = vor.u32 %v2860_v29, %v2803_v5 }
 0x777   : > { %2365 = vmatpush.bf16.xpose.msra.mxu1 %v2342_v62 }
 0x778   : > { %2139 = vmatpush.bf16.xpose.msra.mxu3 %v2129_v9 }
 0x77f   : > { %2366 = vmatpush.bf16.xpose.msra.mxu1 %v2339_v63 }
 0x780   : > { %2140 = vmatpush.bf16.xpose.msra.mxu3 %v2126_v34 }
 0x787   : > { %2367 = vmatpush.bf16.xpose.msra.mxu1 %v2336_v11 }
 0x788   : > { %2141 = vmatpush.bf16.xpose.msra.mxu3 %v2123_v24 }
 0x78f   : > { %2368 = vmatpush.bf16.xpose.msra.mxu1 %v2333_v7 }
 0x797   : > { %2369 = vmatpush.bf16.xpose.msra.mxu1 %v2330_v14 }
 0x79f   : > { %2370 = vmatpush.bf16.xpose.msra.mxu1 %v2327_v19 }
 0x7c9   : > { %v2079_v25 = vpop.permute.xlu2 %2078 }
 0x7e3   : > { %v2075_v36 = vpop.permute.xlu0 %2074  ;;  %v2071_v37 = vpop.permute.xlu1 %2070 }
 0x7e4   : > { %v2081_v38 = vsel %vm1512_vm15, %v2062_v30, %v2071_v37 }
 0x7e5   : > { %v2083_v59 = vsel %vm2082_vm3, %v2081_v38, %v2075_v36  ;;  %v2817_v38 = vld [vmem:[%s3926_s15 + $0x30] sm:$0xf] }
 0x7e6   : > { %v2085_v40 = vsel %vm2084_vm4, %v2083_v59, %v2079_v25  ;;  %v2865_v25 = vld [vmem:[%s3926_s15 + $0x34] sm:$0xf0]  ;;  %v2864_v59 = vld [vmem:[%s3926_s15 + $0x34] sm:$0xf] }
 0x7e7   : > { %v2095_v33 = vpack.c.bf16 %v2085_v40, %v2085_v40  ;;  %v2818_v40 = vor.u32 %v2865_v25, %v2817_v38 }
 0x7e9   : > { %2722 = vmatmul.msk.bf16.vlgmr.msra.gmra.mxu3 %vm1279_vm10, %v2095_v33  ;;  %v2819_v33 = vld [vmem:[%s3926_s15 + $0x38] sm:$0xf0]  ;;  %2522 = vmatpush.bf16.xpose.msra.mxu2 %v2818_v40 }
 0x86c   : > { %v2143_v4 = vpop.f32.mrf.mxu3 }
 0x86d   : > { %v2144_v39 = vadd.f32 %v2964_v41, %v2143_v4  ;;  %v2212_v41 = vld [vmem:[%s3925_s14] sm:$0x3]  ;;  %v2822_v4 = vor.u32 %v2864_v59, %v2819_v33 }
 0x86f   : > { %v3741_v50 = vadd.f32 %v2144_v39, %v3484_v8  ;;  %v2848_v8 = vld [vmem:[%s3924_s13 + $0x30] sm:$0xff]  ;;  %2535 = vmatpush.bf16.xpose.msrb.mxu3 %v2822_v4  ;;  %v2215_v39 = vperm.slane %v2212_v41, 0 }
 0x870   : > { %v2321_v53 = vsel %vm1279_vm10, %v2848_v8, 0 }
 0x871   : > { %v2150_v52 = vsel %vm1279_vm10, %v3741_v50, 0.0  ;;  %2351 = vmatpush.bf16.xpose.msrb.mxu0 %v2321_v53  ;;  %v2810_v53 = vor.u32 %v2863_v26, %v2809_v55 }
 0x872   : > { %2151 = vadd.xlane.f32.xlu1 %v2150_v52  ;;  %v2216_v52 = vperm.slane %v2212_v41, 1 }
 0x873   : > { %2523 = vmatpush.bf16.xpose.msra.mxu2 %v2810_v53 }
 0x874   : > { %v2145_v51 = vpop.f32.mrf.mxu3 }
 0x877   : > { %2536 = vmatpush.bf16.xpose.msrb.mxu3 %v2814_v6 }
 0x879   : > { %2352 = vmatpush.bf16.xpose.msrb.mxu0 %v2318_v27 }
 0x87f   : > { %2537 = vmatpush.bf16.xpose.msrb.mxu3 %v2806_v10 }
 0x881   : > { %2353 = vmatpush.bf16.xpose.msrb.mxu0 %v2315_v47 }
 0x889   : > { %2354 = vmatpush.bf16.xpose.msrb.mxu0 %v2312_v3 }
 0x891   : > { %2355 = vmatpush.bf16.xpose.msrb.mxu0 %v2309_v54 }
 0x899   : > { %2356 = vmatpush.bf16.xpose.msrb.mxu0 %v2306_v49 }
 0x8a1   : > { %2357 = vmatpush.bf16.xpose.msrb.mxu0 %v2303_v16 }
 0x8e5   : > { %v2152_v28 = vpop.xlane.xlu1 %2151 }
 0x8e6   : > { %v2153_v0 = vmul.f32 %v2152_v28, %v3492_v18 }
 0x8e8   : > { %v2154_v1 = vsub.f32 %v3741_v50, %v2153_v0  ;;  %v2801_v0 = vld [vmem:[%s3926_s15 + $0x10] sm:$0xf] }
 0x8ea   : > { %v2155_v31 = vmul.f32 %v2154_v1, %v2154_v1 }
 0x8ec   : > { %v2156_v2 = vsel %vm1279_vm10, %v2155_v31, 0.0 }
 0x8ed   : > { %2157 = vadd.xlane.f32.xlu0 %v2156_v2 }
 0x960   : > { %v2158_v21 = vpop.xlane.xlu0 %2157 }
 0x961   : > { %v2159_v22 = vmul.f32 %v2158_v21, %v3492_v18  ;;  %v2966_v18 = vld [vmem:[%s3923_s12] ss:$0 sm:$0xff] }
 0x963   : > { %v2160_v20 = vadd.f32 1e-05, %v2159_v22  ;;  %v2793_v22 = vld [vmem:[%s3926_s15] sm:$0xf] }
 0x965   : > { %3012 = vrsqrt.f32 %v2160_v20  ;;  %vm2167_vm6 = vweird.f32 %v2160_v20 }
 0x96b   : > { %v3013_v23 = vpop.eup %3012 }
 0x96c   : > { %v2162_v30 = vmul.f32 %v3013_v23, %v2160_v20  ;;  %vm2168_vm5 = vweird.f32 %v3013_v23  ;;  %v2859_v20 = vld [vmem:[%s3926_s15 + $0x4] sm:$0xf0] }
 0x96d   : > { %vm2169_vm7 = vmor %vm2167_vm6, %vm2168_vm5 }
 0x96e   : > { %v2163_v60 = vmul.f32 %v3013_v23, %v2162_v30 }
 0x970   : > { %v2164_v13 = vmul.f32 0.5, %v2163_v60  ;;  %v2794_v60 = vor.u32 %v2859_v20, %v2793_v22 }
 0x972   : > { %v2165_v17 = vsub.f32 1.5, %v2164_v13  ;;  %v2858_v13 = vld [vmem:[%s3926_s15 + $0x4] sm:$0xf] }
 0x974   : > { %v2166_v9 = vmul.f32 %v3013_v23, %v2165_v17  ;;  %v2795_v17 = vld [vmem:[%s3926_s15 + $0x8] sm:$0xf0] }
 0x976   : > { %v2170_v34 = vsel %vm2169_vm7, %v3013_v23, %v2166_v9 }
 0x977   : > { %v2171_v35 = vmul.f32 %v2170_v34, %v2154_v1  ;;  %v2861_v1 = vld [vmem:[%s3926_s15 + $0x14] sm:$0xf0] }
 0x978   : > { %v2802_v3 = vor.u32 %v2861_v1, %v2801_v0 }
 0x979   : > { %v2175_v24 = vmul.f32 %v2965_v32, %v2171_v35  ;;  %v2798_v32 = vor.u32 %v2858_v13, %v2795_v17 }
 0x97a   : > { %2524 = vmatpush.bf16.xpose.msra.mxu2 %v2802_v3 }
 0x97b   : > { %v2179_v36 = vadd.f32 %v2966_v18, %v2175_v24  ;;  %2538 = vmatpush.bf16.xpose.msrb.mxu3 %v2798_v32 }
 0x97d   : > { %v2213_v37 = vpack.c.bf16 %v2179_v36, %v2179_v36 }
 0x97f   : > { %2787 = vmatmul.msk.bf16.vlgmr.msrb.gmra.mxu0 %vm1279_vm10, %v2213_v37  ;;  %2788 = vmatmul.msk.bf16.vlgmr.msra.gmra.mxu1 %vm1279_vm10, %v2213_v37 }
 0x982   : > { %2525 = vmatpush.bf16.xpose.msra.mxu2 %v2794_v60 }
 0x9fc   : > { %v2359_v51 = vpop.f32.mrf.mxu0  ;;  %v2372_v48 = vpop.f32.mrf.mxu1 }
 0x9fd   : > { %v3845_v8 = vadd.f32 %v2359_v51, %v2215_v39  ;;  %v3847_v56 = vadd.f32 %v2372_v48, %v2216_v52 }
 0x9ff   : > { %v3853_v58 = vmul.f32 0.70710677, %v3845_v8  ;;  %v3856_v27 = vmul.f32 0.70710677, %v3847_v56 }
 0xa01   : > { %v2380_v62 = vmul.f32 %v3853_v58, %v3853_v58  ;;  %v2420_v42 = vmul.f32 %v3856_v27, %v3856_v27 }
 0xa03   : > { %v2381_v57 = vmin.f32 %v2380_v62, 16.0  ;;  %v2421_v28 = vmin.f32 %v2420_v42, 16.0 }
 0xa04   : > { %v2361_v47 = vpop.f32.mrf.mxu0  ;;  %v2374_v63 = vpop.f32.mrf.mxu1 }
 0xa05   : > { %v2382_v45 = vmul.f32 2.1237322e-06, %v2381_v57  ;;  %v2393_v31 = vmul.f32 3.8918573e-05, %v2381_v57  ;;  %v2422_v2 = vmul.f32 2.1237322e-06, %v2421_v28 }
 0xa06   : > { %v2433_v11 = vmul.f32 3.8918573e-05, %v2421_v28 }
 0xa07   : > { %v2383_v43 = vadd.f32 0.00028619796, %v2382_v45  ;;  %v2394_v54 = vadd.f32 0.001143296, %v2393_v31  ;;  %v2423_v7 = vadd.f32 0.00028619796, %v2422_v2 }
 0xa08   : > { %v2434_v12 = vadd.f32 0.001143296, %v2433_v11 }
 0xa09   : > { %v2384_v49 = vmul.f32 %v2383_v43, %v2381_v57  ;;  %v2395_v14 = vmul.f32 %v2394_v54, %v2381_v57  ;;  %v2424_v15 = vmul.f32 %v2423_v7, %v2421_v28 }
 0xa0a   : > { %v2435_v46 = vmul.f32 %v2434_v12, %v2421_v28 }
 0xa0b   : > { %v2385_v16 = vadd.f32 0.0036580483, %v2384_v49  ;;  %v2396_v19 = vadd.f32 0.014752088, %v2395_v14  ;;  %v2425_v30 = vadd.f32 0.0036580483, %v2424_v15 }
 0xa0c   : > { %v2436_v21 = vadd.f32 0.014752088, %v2435_v46 }
 0xa0d   : > { %v2397_v23 = vmul.f32 %v2396_v19, %v2381_v57  ;;  %v2386_v34 = vmul.f32 %v2385_v16, %v2381_v57  ;;  %v2426_v36 = vmul.f32 %v2425_v30, %v2421_v28  ;;  %v2376_v19 = vmul.f32 0.5, %v3845_v8 }
 0xa0e   : > { %v2437_v9 = vmul.f32 %v2436_v21, %v2421_v28 }
 0xa0f   : > { %v2398_v35 = vadd.f32 0.112945676, %v2397_v23  ;;  %v2387_v38 = vadd.f32 0.05243302, %v2386_v34  ;;  %v2427_v33 = vadd.f32 0.05243302, %v2426_v36 }
 0xa10   : > { %v2438_v18 = vadd.f32 0.112945676, %v2437_v9 }
 0xa11   : > { %v2399_v24 = vmul.f32 %v2398_v35, %v2381_v57  ;;  %v2388_v4 = vmul.f32 %v2387_v38, %v2381_v57  ;;  %v2428_v51 = vmul.f32 %v2427_v33, %v2421_v28 }
 0xa12   : > { %v2439_v37 = vmul.f32 %v2438_v18, %v2421_v28 }
 0xa13   : > { %v2400_v25 = vadd.f32 0.4994258, %v2399_v24  ;;  %v2389_v48 = vadd.f32 0.18741608, %v2388_v4  ;;  %v2429_v55 = vadd.f32 0.18741608, %v2428_v51 }
 0xa14   : > { %v2440_v59 = vadd.f32 0.4994258, %v2439_v37 }
 0xa15   : > { %v2401_v40 = vmul.f32 %v2400_v25, %v2381_v57  ;;  %v2390_v61 = vmul.f32 %v2389_v48, %v2381_v57  ;;  %v2430_v6 = vmul.f32 %v2429_v55, %v2421_v28 }
 0xa16   : > { %v2441_v41 = vmul.f32 %v2440_v59, %v2421_v28 }
 0xa17   : > { %v2402_v39 = vadd.f32 1.0, %v2401_v40  ;;  %v2391_v47 = vadd.f32 1.1283791, %v2390_v61  ;;  %v2431_v31 = vadd.f32 1.1283791, %v2430_v6 }
 0xa18   : > { %v2442_v52 = vadd.f32 1.0, %v2441_v41 }
 0xa19   : > { %3014 = vrcp.f32 %v2402_v39  ;;  %v2414_v63 = vand.u32 2147483648, %v2402_v39  ;;  %v2412_v29 = vand.u32 2147483647, %v2402_v39  ;;  %vm2408_vm11 = vweird.f32 %v2402_v39 }
 0xa1a   : > { %3016 = vrcp.f32 %v2442_v52  ;;  %v2454_v45 = vand.u32 2147483648, %v2442_v52  ;;  %v2452_v3 = vand.u32 2147483647, %v2442_v52  ;;  %vm2448_vm13 = vweird.f32 %v2442_v52 }
 0xa1b   : > { %v2415_v57 = vor.u32 1.1754944e-38, %v2414_v63  ;;  %v2392_v28 = vmul.f32 %v2391_v47, %v3853_v58  ;;  %vm2413_vm14 = vcmp.eq.f32.partialorder %v2412_v29, 8.507059e+37  ;;  %v2432_v10 = vmul.f32 %v2431_v31, %v3856_v27  ;;  %v2967_v27 = vld [vmem:[%s3927_s16] ss:$0 sm:$0xff] }
 0xa1c   : > { %v2455_v54 = vor.u32 1.1754944e-38, %v2454_v45  ;;  %vm2453_vm0 = vcmp.eq.f32.partialorder %v2452_v3, 8.507059e+37  ;;  %v2377_v58 = vmul.f32 0.5, %v3847_v56 }
 0xa1f   : > { %v3015_v26 = vpop.eup %3014 }
 0xa20   : > { %v3017_v53 = vpop.eup %3016  ;;  %v2404_v44 = vmul.f32 %v3015_v26, %v2402_v39  ;;  %vm2409_vm8 = vweird.f32 %v3015_v26 }
 0xa21   : > { %v2444_v62 = vmul.f32 %v3017_v53, %v2442_v52  ;;  %vm2449_vm9 = vweird.f32 %v3017_v53  ;;  %vm2410_vm12 = vmor %vm2408_vm11, %vm2409_vm8 }
 0xa22   : > { %v2405_v42 = vsub.f32 1.0, %v2404_v44  ;;  %vm2450_vm15 = vmor %vm2448_vm13, %vm2449_vm9 }
 0xa23   : > { %v2445_v0 = vsub.f32 1.0, %v2444_v62 }
 0xa24   : > { %v2406_v1 = vmul.f32 %v3015_v26, %v2405_v42 }
 0xa25   : > { %v2446_v2 = vmul.f32 %v3017_v53, %v2445_v0 }
 0xa26   : > { %v2407_v11 = vadd.f32 %v3015_v26, %v2406_v1 }
 0xa27   : > { %v2447_v5 = vadd.f32 %v3017_v53, %v2446_v2 }
 0xa28   : > { %v2411_v43 = vsel %vm2410_vm12, %v3015_v26, %v2407_v11 }
 0xa29   : > { %v2416_v7 = vsel %vm2413_vm14, %v2415_v57, %v2411_v43  ;;  %v2451_v12 = vsel %vm2450_vm15, %v3017_v53, %v2447_v5 }
 0xa2a   : > { %v2417_v49 = vmul.f32 %v2416_v7, %v2392_v28  ;;  %v2456_v14 = vsel %vm2453_vm0, %v2455_v54, %v2451_v12 }
 0xa2b   : > { %v2457_v15 = vmul.f32 %v2456_v14, %v2432_v10 }
 0xa2c   : > { %v2789_v46 = vclamps-f32 %v2417_v49, 1.0 }
 0xa2d   : > { %v2790_v16 = vclamps-f32 %v2457_v15, 1.0 }
 0xa2e   : > { %v2460_v21 = vadd.f32 1.0, %v2789_v46 }
 0xa2f   : > { %v2461_v22 = vadd.f32 1.0, %v2790_v16 }
 0xa30   : > { %v2462_v20 = vmul.f32 %v2460_v21, %v2376_v19 }
 0xa31   : > { %v2463_v23 = vmul.f32 %v2461_v22, %v2377_v58 }
 0xa32   : > { %v2473_v30 = vpack.c.bf16 %v2462_v20, %v2462_v20 }
 0xa33   : > { %v2474_v60 = vpack.c.bf16 %v2463_v23, %v2463_v23 }
 0xa34   : > { %2526 = vmatmul.bf16.vlgmr.msra.gmra.mxu2 %v2473_v30 }
 0xa35   : > { %2539 = vmatmul.bf16.vlgmr.msrb.gmra.mxu3 %v2474_v60 }
 0xab7   : > { %v2527_v13 = vpop.f32.mrf.mxu2 }
 0xab8   : > { %v2528_v17 = vadd.f32 %v2967_v27, %v2527_v13  ;;  %v2540_v9 = vpop.f32.mrf.mxu3 }
 0xaba   : > { %v2541_v32 = vadd.f32 %v2540_v9, %v2528_v17 }
 0xabc   : > { %v2544_v8 = vadd.f32 %v2541_v32, %v3741_v50 }
 0xabe   : > { %2545 = vst.msk [vmem:[%s3205_s0] sm:$0xff] %vm1279_vm10, %v2544_v8 }
 0xabf   : > { %v2529_v56 = vpop.f32.mrf.mxu2 }
 0xac0   : > { %v2542_v34 = vpop.f32.mrf.mxu3 }
 0xac1 PF: > { %s27_s28 = sadd.s32 1, %s3056_s28   ;;  %s3940_s24 = sld [smem:[#allocation4_spill]] }
 0xac2   : > { %p24_p8 = scmp.ge.s32.totalorder %s27_s28, 6   ;;  %s3941_s25 = sld [smem:[#allocation5_spill]] }
 0xac3   : > { %s3942_s26 = sld [smem:[#allocation6_spill]] }
 0xac4   : > { %s3943_s27 = sld [smem:[#allocation7_spill]]  ;;  %26 = sbr.rel (!%p24_p8) target bundleno = 4 (0x4), region = 123 }

</bundles_post_ra>
